<compile_context>
chip_gen: v5e
topology: v5e:2x2
jax: 0.10.0
libtpu: 0.0.40
codegen_flags: <defaults>
</compile_context>

<pallas_src>
import numpy as np
import jax
import jax.numpy as jnp
from jax import lax
from jax.experimental import pallas as pl
from jax.experimental.pallas import tpu as pltpu


def make_posterior_encoder_kernel(BP, T, H, K, dilation_rate, n_layers, N1):
    BT = T * BP

    def kernel(x_ref, pre_w_ref, pre_b_ref, win_ref, bin_ref, wrs_ref, brs_ref,
               fc1_b_ref, fc2_b_ref, fc1_hbm, fc2_hbm, out_ref,
               fc1_vmem, fc2_vmem, dma_sem):
        # --- Kick off the big FC weight DMAs first so they overlap with the
        #     pre-conv + WN-stack compute (hides the dominant HBM transfer). --
        fc1_cp = pltpu.make_async_copy(fc1_hbm, fc1_vmem, dma_sem.at[0])
        fc2_cp = pltpu.make_async_copy(fc2_hbm, fc2_vmem, dma_sem.at[1])
        fc1_cp.start()
        fc2_cp.start()

        # --- pre: Conv1d 1x1 as one MXU matmul (bf16 operands, f32 accum) ----
        h = jnp.dot(x_ref[...], pre_w_ref[...],
                    preferred_element_type=jnp.float32) + pre_b_ref[...]

        # Hoisted constants (JAX does not CSE broadcasts / iotas).
        row_idx = lax.broadcasted_iota(jnp.int32, (BT, H), 0)
        zeros_2h = jnp.zeros((BT, 2 * H), jnp.float32)
        output = jnp.zeros((BT, H), jnp.float32)

        # --- WN stack ---------------------------------------------------------
        for i in range(n_layers):
            d = dilation_rate ** i
            pad = d * (K - 1) // 2
            w_in = win_ref[i]          # (K*H, 2H) bf16
            b_in = bin_ref[i]          # (1, 2H)   f32
            w_rs = wrs_ref[i]          # (H, 2H)   bf16 (last layer zero-padded)
            b_rs = brs_ref[i]          # (1, 2H)   f32

            # Dilated conv = K accumulated MXU matmuls on time-shifted copies
            # of h built with pltpu.roll (XLU) + cheap row masks (VPU).  A time
            # shift of s is a row shift of s*BP and never crosses a batch row.
            xin = zeros_2h
            for k in range(K):
                sb = (k * d - pad) * BP
                if sb >= BT or sb <= -BT:
                    continue                      # entirely zero-padded tap
                if sb == 0:
                    tap = h
                else:
                    rolled = pltpu.roll(h, shift=(-sb) % BT, axis=0)
                    if sb > 0:
                        mask = row_idx < (BT - sb)
                    else:
                        mask = row_idx >= (-sb)
                    tap = jnp.where(mask, rolled, 0.0)
                xin = xin + jnp.dot(tap.astype(jnp.bfloat16),
                                    w_in[k * H:(k + 1) * H, :],
                                    preferred_element_type=jnp.float32)
            xin = xin + b_in
            acts = jnp.tanh(xin[:, :H]) * jax.nn.sigmoid(xin[:, H:])
            # dropout has p=0 -> identity

            # Fused residual + skip matmul (both halves packed along lanes).
            rs = jnp.dot(acts.astype(jnp.bfloat16), w_rs,
                         preferred_element_type=jnp.float32) + b_rs
            if i < n_layers - 1:
                h = h + rs[:, :H]
                output = output + rs[:, H:]
            else:
                output = output + rs[:, :H]       # padded cols of rs are zero

        # --- FC head -----------------------------------------------------------
        fc1_cp.wait()
        fc2_cp.wait()
        # FC1 as an accumulation over time blocks: keeps the reduction on the
        # MXU and avoids any (B, T*H) lane concatenation / relayout.
        y1 = jnp.zeros((BP, N1), jnp.float32)
        for t in range(T):
            y1 = y1 + jnp.dot(
                output[t * BP:(t + 1) * BP, :].astype(jnp.bfloat16),
                fc1_vmem[t * H:(t + 1) * H, :],
                preferred_element_type=jnp.float32)
        y1 = y1 + fc1_b_ref[...]
        mish = y1 * jnp.tanh(jax.nn.softplus(y1))            # nn.Mish
        y2 = jnp.dot(mish.astype(jnp.bfloat16), fc2_vmem[...],
                     preferred_element_type=jnp.float32) + fc2_b_ref[...]
        out_ref[...] = y2                                    # (BP, 128) unmasked vst

    return kernel


def posterior_encoder_forward(x_nct, params, *, kernel_size, dilation_rate, n_layers):
    B, Cin, T = x_nct.shape
    H = params["pre_w"].shape[0]
    K = kernel_size
    N1 = params["fc1_w"].shape[0]                          # 4096
    NOUT = params["fc2_w"].shape[0]                        # 97
    NPAD = ((NOUT + 127) // 128) * 128                     # 128
    BP = ((B + 7) // 8) * 8                                # pad batch to sublane group

    # (B, Cin, T) -> pad batch -> (T, BP, Cin) -> (T*BP, Cin): rows ordered (t, b).
    x_p = jnp.pad(x_nct, ((0, BP - B), (0, 0), (0, 0)))
    x_k = jnp.transpose(x_p, (2, 0, 1)).reshape(T * BP, Cin).astype(jnp.bfloat16)

    pre_w = jnp.transpose(params["pre_w"][:, :, 0]).astype(jnp.bfloat16)   # (Cin, H)
    pre_b = params["pre_b"][None, :]                                       # (1, H)

    # Stack per-layer weights into a handful of arrays (few prologue DMAs).
    win_l, bin_l, wrs_l, brs_l = [], [], [], []
    for i in range(n_layers):
        inW = params["in_w"][i]                            # (2H, H, K)
        win_l.append(jnp.transpose(inW, (2, 1, 0)).reshape(K * H, 2 * H))
        bin_l.append(params["in_b"][i][None, :])           # (1, 2H)
        rsW = jnp.transpose(params["rs_w"][i][:, :, 0])    # (H, R)
        rsb = params["rs_b"][i]                            # (R,)
        R = rsW.shape[1]
        wrs_l.append(jnp.pad(rsW, ((0, 0), (0, 2 * H - R))))
        brs_l.append(jnp.pad(rsb, (0, 2 * H - R))[None, :])
    win_stack = jnp.stack(win_l).astype(jnp.bfloat16)      # (L, K*H, 2H)
    bin_stack = jnp.stack(bin_l)                           # (L, 1, 2H) f32
    wrs_stack = jnp.stack(wrs_l).astype(jnp.bfloat16)      # (L, H, 2H)
    brs_stack = jnp.stack(brs_l)                           # (L, 1, 2H) f32

    W1, b1 = params["fc1_w"], params["fc1_b"]              # (4096, H*T), (4096,)
    W2, b2 = params["fc2_w"], params["fc2_b"]              # (97, 4096), (97,)
    # PyTorch flattens (B, H, T) as h*T + t; the kernel reduces over t with
    # per-t (H, 4096) blocks -> permute W1 to (t, h) row order.
    fc1_k = jnp.transpose(W1.reshape(N1, H, T), (2, 1, 0)).reshape(T * H, N1)
    fc1_k = fc1_k.astype(jnp.bfloat16)
    fc2_k = jnp.pad(jnp.transpose(W2), ((0, 0), (0, NPAD - NOUT))).astype(jnp.bfloat16)
    fc1_bk = b1[None, :]
    fc2_bk = jnp.pad(b2, (0, NPAD - NOUT))[None, :]        # zero-pad invariant!

    vmem_inputs = [x_k, pre_w, pre_b, win_stack, bin_stack, wrs_stack, brs_stack,
                   fc1_bk, fc2_bk]
    hbm_inputs = [fc1_k, fc2_k]     # DMA'd manually inside the kernel

    def full_spec(a):
        nd = a.ndim
        return pl.BlockSpec(a.shape, lambda i, _nd=nd: (0,) * _nd)

    in_specs = ([full_spec(a) for a in vmem_inputs]
                + [pl.BlockSpec(memory_space=pl.ANY) for _ in hbm_inputs])

    kernel = make_posterior_encoder_kernel(BP, T, H, K, dilation_rate, n_layers, N1)
    out = pl.pallas_call(
        kernel,
        out_shape=jax.ShapeDtypeStruct((BP, NPAD), jnp.float32),
        grid=(1,),
        in_specs=in_specs,
        out_specs=pl.BlockSpec((BP, NPAD), lambda i: (0, 0)),
        scratch_shapes=[
            pltpu.VMEM((T * H, N1), jnp.bfloat16),         # fc1 weight buffer
            pltpu.VMEM((N1, NPAD), jnp.bfloat16),          # fc2 weight buffer
            pltpu.SemaphoreType.DMA((2,)),
        ],
        compiler_params=pltpu.CompilerParams(
            dimension_semantics=("arbitrary",),
            vmem_limit_bytes=32 * 1024 * 1024),            # safe on v5e/v6e/v7x
    )(*vmem_inputs, *hbm_inputs)
    return out[:B, :NOUT]


def reference_forward(x_nct, params, *, kernel_size, dilation_rate, n_layers):
    # Pure-JAX (f32) mirror of the PyTorch forward (NCT layout) for validation.
    H = params["pre_w"].shape[0]
    B, _, T = x_nct.shape
    h = jnp.einsum('oc,bct->bot', params["pre_w"][:, :, 0], x_nct,
                   precision=lax.Precision.HIGHEST) + params["pre_b"][None, :, None]
    output = jnp.zeros_like(h)
    for i in range(n_layers):
        d = dilation_rate ** i
        pad = d * (kernel_size - 1) // 2
        xin = lax.conv_general_dilated(
            h, params["in_w"][i], window_strides=(1,), padding=[(pad, pad)],
            rhs_dilation=(d,), dimension_numbers=('NCH', 'OIH', 'NCH'),
            precision=lax.Precision.HIGHEST)
        xin = xin + params["in_b"][i][None, :, None]
        a, b = xin[:, :H], xin[:, H:]
        acts = jnp.tanh(a) * jax.nn.sigmoid(b)
        rs = jnp.einsum('oc,bct->bot', params["rs_w"][i][:, :, 0], acts,
                        precision=lax.Precision.HIGHEST) + params["rs_b"][i][None, :, None]
        if i < n_layers - 1:
            h = h + rs[:, :H]
            output = output + rs[:, H:]
        else:
            output = output + rs
    flat = output.reshape(B, -1)
    y = jnp.dot(flat, params["fc1_w"].T,
                precision=lax.Precision.HIGHEST) + params["fc1_b"]
    y = y * jnp.tanh(jax.nn.softplus(y))
    y = jnp.dot(y, params["fc2_w"].T,
                precision=lax.Precision.HIGHEST) + params["fc2_b"]
    return y


def init_params(key, in_channels, hidden_channels, kernel_size, frame_length, n_layers):
    H = hidden_channels
    keys = iter(jax.random.split(key, 8 + 4 * n_layers))
    p = {
        "pre_w": 0.2 * jax.random.normal(next(keys), (H, in_channels, 1), jnp.float32),
        "pre_b": 0.1 * jax.random.normal(next(keys), (H,), jnp.float32),
        "in_w": [], "in_b": [], "rs_w": [], "rs_b": [],
        "fc1_w": 0.02 * jax.random.normal(next(keys), (4096, H * frame_length), jnp.float32),
        "fc1_b": 0.05 * jax.random.normal(next(keys), (4096,), jnp.float32),
        "fc2_w": 0.02 * jax.random.normal(next(keys), (97, 4096), jnp.float32),
        "fc2_b": 0.05 * jax.random.normal(next(keys), (97,), jnp.float32),
    }
    for i in range(n_layers):
        R = 2 * H if i < n_layers - 1 else H
        p["in_w"].append(0.1 * jax.random.normal(next(keys), (2 * H, H, kernel_size), jnp.float32))
        p["in_b"].append(0.05 * jax.random.normal(next(keys), (2 * H,), jnp.float32))
        p["rs_w"].append(0.1 * jax.random.normal(next(keys), (R, H, 1), jnp.float32))
        p["rs_b"].append(0.05 * jax.random.normal(next(keys), (R,), jnp.float32))
    return p


if __name__ == "__main__":
    B = 2
    in_channels = 4
    hidden_channels = 32
    kernel_size = 3
    dilation_rate = 2
    frame_length = 8      # T
    n_layers = 3

    key = jax.random.PRNGKey(0)
    k_x, k_p = jax.random.split(key)
    x = jax.random.normal(k_x, (B, in_channels, frame_length), jnp.float32)
    params = init_params(k_p, in_channels, hidden_channels, kernel_size,
                         frame_length, n_layers)

    out = posterior_encoder_forward(x, params, kernel_size=kernel_size,
                                    dilation_rate=dilation_rate, n_layers=n_layers)
    out = jax.block_until_ready(out)

    ref = reference_forward(x, params, kernel_size=kernel_size,
                            dilation_rate=dilation_rate, n_layers=n_layers)
    # Tolerance absorbs bf16 matmul operands (f32 accumulation) in the kernel.
    np.testing.assert_allclose(np.asarray(out), np.asarray(ref), rtol=3e-2, atol=3e-2)
    print("KERNEL_OK")
</pallas_src>

<mosaic_0001>
module attributes {stable_mosaic.version = 11 : i64} {
  func.func @kernel(%arg0: i32, %arg1: memref<64x4xbf16, #tpu.memory_space<vmem>>, %arg2: memref<4x32xbf16, #tpu.memory_space<vmem>>, %arg3: memref<1x32xf32, #tpu.memory_space<vmem>>, %arg4: memref<3x96x64xbf16, #tpu.memory_space<vmem>>, %arg5: memref<3x1x64xf32, #tpu.memory_space<vmem>>, %arg6: memref<3x32x64xbf16, #tpu.memory_space<vmem>>, %arg7: memref<3x1x64xf32, #tpu.memory_space<vmem>>, %arg8: memref<1x4096xf32, #tpu.memory_space<vmem>>, %arg9: memref<1x128xf32, #tpu.memory_space<vmem>>, %arg10: memref<256x4096xbf16, #tpu.memory_space<any>>, %arg11: memref<4096x128xbf16, #tpu.memory_space<any>>, %arg12: memref<8x128xf32, #tpu.memory_space<vmem>>, %arg13: memref<256x4096xbf16, #tpu.memory_space<vmem>>, %arg14: memref<4096x128xbf16, #tpu.memory_space<vmem>>, %arg15: memref<2x!tpu.dma_semaphore, #tpu.memory_space<semaphore_mem>>) attributes {dimension_semantics = [#tpu.dimension_semantics<arbitrary>], iteration_bounds = array<i64: 1>, scalar_prefetch = 0 : i64, scratch_operands = 3 : i64, tpu.core_type = #tpu.core_type<tc>, window_params = [{pipeline_mode = #tpu.pipeline_mode<synchronous>, transform_indices = @transform_0, window_bounds = array<i64: 64, 4>}, {pipeline_mode = #tpu.pipeline_mode<synchronous>, transform_indices = @transform_1, window_bounds = array<i64: 4, 32>}, {pipeline_mode = #tpu.pipeline_mode<synchronous>, transform_indices = @transform_2, window_bounds = array<i64: 1, 32>}, {pipeline_mode = #tpu.pipeline_mode<synchronous>, transform_indices = @transform_3, window_bounds = array<i64: 3, 96, 64>}, {pipeline_mode = #tpu.pipeline_mode<synchronous>, transform_indices = @transform_4, window_bounds = array<i64: 3, 1, 64>}, {pipeline_mode = #tpu.pipeline_mode<synchronous>, transform_indices = @transform_5, window_bounds = array<i64: 3, 32, 64>}, {pipeline_mode = #tpu.pipeline_mode<synchronous>, transform_indices = @transform_6, window_bounds = array<i64: 3, 1, 64>}, {pipeline_mode = #tpu.pipeline_mode<synchronous>, transform_indices = @transform_7, window_bounds = array<i64: 1, 4096>}, {pipeline_mode = #tpu.pipeline_mode<synchronous>, transform_indices = @transform_8, window_bounds = array<i64: 1, 128>}, {}, {}, {pipeline_mode = #tpu.pipeline_mode<synchronous>, transform_indices = @transform_11, window_bounds = array<i64: 8, 128>}]} {
    %c0_i32 = arith.constant 0 : i32
    %0 = tpu.memref_slice %arg15[%c0_i32] : memref<2x!tpu.dma_semaphore, #tpu.memory_space<semaphore_mem>> -> memref<1x!tpu.dma_semaphore, #tpu.memory_space<semaphore_mem>>
    %1 = tpu.memref_squeeze %0 : memref<1x!tpu.dma_semaphore, #tpu.memory_space<semaphore_mem>> -> memref<!tpu.dma_semaphore, #tpu.memory_space<semaphore_mem>>
    tpu.enqueue_dma source(%arg10 : memref<256x4096xbf16, #tpu.memory_space<any>>) target(%arg13 : memref<256x4096xbf16, #tpu.memory_space<vmem>>) target_semaphore(%1 : memref<!tpu.dma_semaphore, #tpu.memory_space<semaphore_mem>>)
    %c1_i32 = arith.constant 1 : i32
    %2 = tpu.memref_slice %arg15[%c1_i32] : memref<2x!tpu.dma_semaphore, #tpu.memory_space<semaphore_mem>> -> memref<1x!tpu.dma_semaphore, #tpu.memory_space<semaphore_mem>>
    %3 = tpu.memref_squeeze %2 : memref<1x!tpu.dma_semaphore, #tpu.memory_space<semaphore_mem>> -> memref<!tpu.dma_semaphore, #tpu.memory_space<semaphore_mem>>
    tpu.enqueue_dma source(%arg11 : memref<4096x128xbf16, #tpu.memory_space<any>>) target(%arg14 : memref<4096x128xbf16, #tpu.memory_space<vmem>>) target_semaphore(%3 : memref<!tpu.dma_semaphore, #tpu.memory_space<semaphore_mem>>)
    %c0 = arith.constant 0 : index
    %c0_0 = arith.constant 0 : index
    %4 = vector.load %arg1[%c0, %c0_0] : memref<64x4xbf16, #tpu.memory_space<vmem>>, vector<64x4xbf16>
    %c0_1 = arith.constant 0 : index
    %c0_2 = arith.constant 0 : index
    %5 = vector.load %arg2[%c0_1, %c0_2] : memref<4x32xbf16, #tpu.memory_space<vmem>>, vector<4x32xbf16>
    %cst = arith.constant dense<0.000000e+00> : vector<64x32xf32>
    %6 = tpu.matmul %4, %5, %cst {dimension_numbers = #tpu.dot_dimension_numbers<[1], [0], [0], [1], [0, 0, 1, 1], [], []>} : vector<64x4xbf16>, vector<4x32xbf16>, vector<64x32xf32> -> vector<64x32xf32>
    %c0_3 = arith.constant 0 : index
    %c0_4 = arith.constant 0 : index
    %7 = vector.load %arg3[%c0_3, %c0_4] : memref<1x32xf32, #tpu.memory_space<vmem>>, vector<1x32xf32>
    %8 = vector.broadcast %7 : vector<1x32xf32> to vector<64x32xf32>
    %9 = arith.addf %6, %8 : vector<64x32xf32>
    %10 = tpu.iota {dimensions = array<i32: 0>} : vector<64x32xi32>
    %cst_5 = arith.constant 0.000000e+00 : f32
    %11 = vector.broadcast %cst_5 : f32 to vector<64x64xf32>
    %cst_6 = arith.constant 0.000000e+00 : f32
    %12 = vector.broadcast %cst_6 : f32 to vector<64x32xf32>
    %c0_7 = arith.constant 0 : index
    %c0_8 = arith.constant 0 : index
    %c0_9 = arith.constant 0 : index
    %13 = vector.load %arg4[%c0_7, %c0_8, %c0_9] : memref<3x96x64xbf16, #tpu.memory_space<vmem>>, vector<1x96x64xbf16>
    %14 = vector.shape_cast %13 : vector<1x96x64xbf16> to vector<96x64xbf16>
    %c0_10 = arith.constant 0 : index
    %c0_11 = arith.constant 0 : index
    %c0_12 = arith.constant 0 : index
    %15 = vector.load %arg5[%c0_10, %c0_11, %c0_12] : memref<3x1x64xf32, #tpu.memory_space<vmem>>, vector<1x1x64xf32>
    %16 = vector.shape_cast %15 : vector<1x1x64xf32> to vector<1x64xf32>
    %c0_13 = arith.constant 0 : index
    %c0_14 = arith.constant 0 : index
    %c0_15 = arith.constant 0 : index
    %17 = vector.load %arg6[%c0_13, %c0_14, %c0_15] : memref<3x32x64xbf16, #tpu.memory_space<vmem>>, vector<1x32x64xbf16>
    %18 = vector.shape_cast %17 : vector<1x32x64xbf16> to vector<32x64xbf16>
    %c0_16 = arith.constant 0 : index
    %c0_17 = arith.constant 0 : index
    %c0_18 = arith.constant 0 : index
    %19 = vector.load %arg7[%c0_16, %c0_17, %c0_18] : memref<3x1x64xf32, #tpu.memory_space<vmem>>, vector<1x1x64xf32>
    %20 = vector.shape_cast %19 : vector<1x1x64xf32> to vector<1x64xf32>
    %c8_i32 = arith.constant 8 : i32
    %21 = tpu.dynamic_rotate %9 by %c8_i32 dim 0 : vector<64x32xf32>, i32 -> vector<64x32xf32>
    %c8_i32_19 = arith.constant 8 : i32
    %22 = vector.broadcast %c8_i32_19 : i32 to vector<64x32xi32>
    %23 = arith.cmpi sge, %10, %22 : vector<64x32xi32>
    %cst_20 = arith.constant 0.000000e+00 : f32
    %24 = vector.broadcast %cst_20 : f32 to vector<64x32xf32>
    %25 = arith.select %23, %21, %24 : vector<64x32xi1>, vector<64x32xf32>
    %26 = arith.truncf %25 : vector<64x32xf32> to vector<64x32xbf16>
    %27 = vector.extract_strided_slice %14 {offsets = [0, 0], sizes = [32, 64], strides = [1, 1]} : vector<96x64xbf16> to vector<32x64xbf16>
    %cst_21 = arith.constant dense<0.000000e+00> : vector<64x64xf32>
    %28 = tpu.matmul %26, %27, %cst_21 {dimension_numbers = #tpu.dot_dimension_numbers<[1], [0], [0], [1], [0, 0, 1, 1], [], []>} : vector<64x32xbf16>, vector<32x64xbf16>, vector<64x64xf32> -> vector<64x64xf32>
    %29 = arith.addf %11, %28 : vector<64x64xf32>
    %30 = arith.truncf %9 : vector<64x32xf32> to vector<64x32xbf16>
    %31 = vector.extract_strided_slice %14 {offsets = [32, 0], sizes = [32, 64], strides = [1, 1]} : vector<96x64xbf16> to vector<32x64xbf16>
    %cst_22 = arith.constant dense<0.000000e+00> : vector<64x64xf32>
    %32 = tpu.matmul %30, %31, %cst_22 {dimension_numbers = #tpu.dot_dimension_numbers<[1], [0], [0], [1], [0, 0, 1, 1], [], []>} : vector<64x32xbf16>, vector<32x64xbf16>, vector<64x64xf32> -> vector<64x64xf32>
    %33 = arith.addf %29, %32 : vector<64x64xf32>
    %c56_i32 = arith.constant 56 : i32
    %34 = tpu.dynamic_rotate %9 by %c56_i32 dim 0 : vector<64x32xf32>, i32 -> vector<64x32xf32>
    %c56_i32_23 = arith.constant 56 : i32
    %35 = vector.broadcast %c56_i32_23 : i32 to vector<64x32xi32>
    %36 = arith.cmpi slt, %10, %35 : vector<64x32xi32>
    %cst_24 = arith.constant 0.000000e+00 : f32
    %37 = vector.broadcast %cst_24 : f32 to vector<64x32xf32>
    %38 = arith.select %36, %34, %37 : vector<64x32xi1>, vector<64x32xf32>
    %39 = arith.truncf %38 : vector<64x32xf32> to vector<64x32xbf16>
    %40 = vector.extract_strided_slice %14 {offsets = [64, 0], sizes = [32, 64], strides = [1, 1]} : vector<96x64xbf16> to vector<32x64xbf16>
    %cst_25 = arith.constant dense<0.000000e+00> : vector<64x64xf32>
    %41 = tpu.matmul %39, %40, %cst_25 {dimension_numbers = #tpu.dot_dimension_numbers<[1], [0], [0], [1], [0, 0, 1, 1], [], []>} : vector<64x32xbf16>, vector<32x64xbf16>, vector<64x64xf32> -> vector<64x64xf32>
    %42 = arith.addf %33, %41 : vector<64x64xf32>
    %43 = vector.broadcast %16 : vector<1x64xf32> to vector<64x64xf32>
    %44 = arith.addf %42, %43 : vector<64x64xf32>
    %45 = vector.extract_strided_slice %44 {offsets = [0, 0], sizes = [64, 32], strides = [1, 1]} : vector<64x64xf32> to vector<64x32xf32>
    %46 = math.tanh %45 : vector<64x32xf32>
    %47 = vector.extract_strided_slice %44 {offsets = [0, 32], sizes = [64, 32], strides = [1, 1]} : vector<64x64xf32> to vector<64x32xf32>
    %48 = arith.negf %47 : vector<64x32xf32>
    %49 = math.exp %48 : vector<64x32xf32>
    %cst_26 = arith.constant 1.000000e+00 : f32
    %50 = vector.broadcast %cst_26 : f32 to vector<64x32xf32>
    %51 = arith.addf %50, %49 : vector<64x32xf32>
    %52 = arith.divf %50, %51 : vector<64x32xf32>
    %53 = arith.mulf %46, %52 : vector<64x32xf32>
    %54 = arith.truncf %53 : vector<64x32xf32> to vector<64x32xbf16>
    %cst_27 = arith.constant dense<0.000000e+00> : vector<64x64xf32>
    %55 = tpu.matmul %54, %18, %cst_27 {dimension_numbers = #tpu.dot_dimension_numbers<[1], [0], [0], [1], [0, 0, 1, 1], [], []>} : vector<64x32xbf16>, vector<32x64xbf16>, vector<64x64xf32> -> vector<64x64xf32>
    %56 = vector.broadcast %20 : vector<1x64xf32> to vector<64x64xf32>
    %57 = arith.addf %55, %56 : vector<64x64xf32>
    %58 = vector.extract_strided_slice %57 {offsets = [0, 0], sizes = [64, 32], strides = [1, 1]} : vector<64x64xf32> to vector<64x32xf32>
    %59 = arith.addf %9, %58 : vector<64x32xf32>
    %60 = vector.extract_strided_slice %57 {offsets = [0, 32], sizes = [64, 32], strides = [1, 1]} : vector<64x64xf32> to vector<64x32xf32>
    %61 = arith.addf %12, %60 : vector<64x32xf32>
    %c1 = arith.constant 1 : index
    %c0_28 = arith.constant 0 : index
    %c0_29 = arith.constant 0 : index
    %62 = vector.load %arg4[%c1, %c0_28, %c0_29] : memref<3x96x64xbf16, #tpu.memory_space<vmem>>, vector<1x96x64xbf16>
    %63 = vector.shape_cast %62 : vector<1x96x64xbf16> to vector<96x64xbf16>
    %c1_30 = arith.constant 1 : index
    %c0_31 = arith.constant 0 : index
    %c0_32 = arith.constant 0 : index
    %64 = vector.load %arg5[%c1_30, %c0_31, %c0_32] : memref<3x1x64xf32, #tpu.memory_space<vmem>>, vector<1x1x64xf32>
    %65 = vector.shape_cast %64 : vector<1x1x64xf32> to vector<1x64xf32>
    %c1_33 = arith.constant 1 : index
    %c0_34 = arith.constant 0 : index
    %c0_35 = arith.constant 0 : index
    %66 = vector.load %arg6[%c1_33, %c0_34, %c0_35] : memref<3x32x64xbf16, #tpu.memory_space<vmem>>, vector<1x32x64xbf16>
    %67 = vector.shape_cast %66 : vector<1x32x64xbf16> to vector<32x64xbf16>
    %c1_36 = arith.constant 1 : index
    %c0_37 = arith.constant 0 : index
    %c0_38 = arith.constant 0 : index
    %68 = vector.load %arg7[%c1_36, %c0_37, %c0_38] : memref<3x1x64xf32, #tpu.memory_space<vmem>>, vector<1x1x64xf32>
    %69 = vector.shape_cast %68 : vector<1x1x64xf32> to vector<1x64xf32>
    %c16_i32 = arith.constant 16 : i32
    %70 = tpu.dynamic_rotate %59 by %c16_i32 dim 0 : vector<64x32xf32>, i32 -> vector<64x32xf32>
    %c16_i32_39 = arith.constant 16 : i32
    %71 = vector.broadcast %c16_i32_39 : i32 to vector<64x32xi32>
    %72 = arith.cmpi sge, %10, %71 : vector<64x32xi32>
    %cst_40 = arith.constant 0.000000e+00 : f32
    %73 = vector.broadcast %cst_40 : f32 to vector<64x32xf32>
    %74 = arith.select %72, %70, %73 : vector<64x32xi1>, vector<64x32xf32>
    %75 = arith.truncf %74 : vector<64x32xf32> to vector<64x32xbf16>
    %76 = vector.extract_strided_slice %63 {offsets = [0, 0], sizes = [32, 64], strides = [1, 1]} : vector<96x64xbf16> to vector<32x64xbf16>
    %cst_41 = arith.constant dense<0.000000e+00> : vector<64x64xf32>
    %77 = tpu.matmul %75, %76, %cst_41 {dimension_numbers = #tpu.dot_dimension_numbers<[1], [0], [0], [1], [0, 0, 1, 1], [], []>} : vector<64x32xbf16>, vector<32x64xbf16>, vector<64x64xf32> -> vector<64x64xf32>
    %78 = arith.addf %11, %77 : vector<64x64xf32>
    %79 = arith.truncf %59 : vector<64x32xf32> to vector<64x32xbf16>
    %80 = vector.extract_strided_slice %63 {offsets = [32, 0], sizes = [32, 64], strides = [1, 1]} : vector<96x64xbf16> to vector<32x64xbf16>
    %cst_42 = arith.constant dense<0.000000e+00> : vector<64x64xf32>
    %81 = tpu.matmul %79, %80, %cst_42 {dimension_numbers = #tpu.dot_dimension_numbers<[1], [0], [0], [1], [0, 0, 1, 1], [], []>} : vector<64x32xbf16>, vector<32x64xbf16>, vector<64x64xf32> -> vector<64x64xf32>
    %82 = arith.addf %78, %81 : vector<64x64xf32>
    %c48_i32 = arith.constant 48 : i32
    %83 = tpu.dynamic_rotate %59 by %c48_i32 dim 0 : vector<64x32xf32>, i32 -> vector<64x32xf32>
    %c48_i32_43 = arith.constant 48 : i32
    %84 = vector.broadcast %c48_i32_43 : i32 to vector<64x32xi32>
    %85 = arith.cmpi slt, %10, %84 : vector<64x32xi32>
    %cst_44 = arith.constant 0.000000e+00 : f32
    %86 = vector.broadcast %cst_44 : f32 to vector<64x32xf32>
    %87 = arith.select %85, %83, %86 : vector<64x32xi1>, vector<64x32xf32>
    %88 = arith.truncf %87 : vector<64x32xf32> to vector<64x32xbf16>
    %89 = vector.extract_strided_slice %63 {offsets = [64, 0], sizes = [32, 64], strides = [1, 1]} : vector<96x64xbf16> to vector<32x64xbf16>
    %cst_45 = arith.constant dense<0.000000e+00> : vector<64x64xf32>
    %90 = tpu.matmul %88, %89, %cst_45 {dimension_numbers = #tpu.dot_dimension_numbers<[1], [0], [0], [1], [0, 0, 1, 1], [], []>} : vector<64x32xbf16>, vector<32x64xbf16>, vector<64x64xf32> -> vector<64x64xf32>
    %91 = arith.addf %82, %90 : vector<64x64xf32>
    %92 = vector.broadcast %65 : vector<1x64xf32> to vector<64x64xf32>
    %93 = arith.addf %91, %92 : vector<64x64xf32>
    %94 = vector.extract_strided_slice %93 {offsets = [0, 0], sizes = [64, 32], strides = [1, 1]} : vector<64x64xf32> to vector<64x32xf32>
    %95 = math.tanh %94 : vector<64x32xf32>
    %96 = vector.extract_strided_slice %93 {offsets = [0, 32], sizes = [64, 32], strides = [1, 1]} : vector<64x64xf32> to vector<64x32xf32>
    %97 = arith.negf %96 : vector<64x32xf32>
    %98 = math.exp %97 : vector<64x32xf32>
    %cst_46 = arith.constant 1.000000e+00 : f32
    %99 = vector.broadcast %cst_46 : f32 to vector<64x32xf32>
    %100 = arith.addf %99, %98 : vector<64x32xf32>
    %101 = arith.divf %99, %100 : vector<64x32xf32>
    %102 = arith.mulf %95, %101 : vector<64x32xf32>
    %103 = arith.truncf %102 : vector<64x32xf32> to vector<64x32xbf16>
    %cst_47 = arith.constant dense<0.000000e+00> : vector<64x64xf32>
    %104 = tpu.matmul %103, %67, %cst_47 {dimension_numbers = #tpu.dot_dimension_numbers<[1], [0], [0], [1], [0, 0, 1, 1], [], []>} : vector<64x32xbf16>, vector<32x64xbf16>, vector<64x64xf32> -> vector<64x64xf32>
    %105 = vector.broadcast %69 : vector<1x64xf32> to vector<64x64xf32>
    %106 = arith.addf %104, %105 : vector<64x64xf32>
    %107 = vector.extract_strided_slice %106 {offsets = [0, 0], sizes = [64, 32], strides = [1, 1]} : vector<64x64xf32> to vector<64x32xf32>
    %108 = arith.addf %59, %107 : vector<64x32xf32>
    %109 = vector.extract_strided_slice %106 {offsets = [0, 32], sizes = [64, 32], strides = [1, 1]} : vector<64x64xf32> to vector<64x32xf32>
    %110 = arith.addf %61, %109 : vector<64x32xf32>
    %c2 = arith.constant 2 : index
    %c0_48 = arith.constant 0 : index
    %c0_49 = arith.constant 0 : index
    %111 = vector.load %arg4[%c2, %c0_48, %c0_49] : memref<3x96x64xbf16, #tpu.memory_space<vmem>>, vector<1x96x64xbf16>
    %112 = vector.shape_cast %111 : vector<1x96x64xbf16> to vector<96x64xbf16>
    %c2_50 = arith.constant 2 : index
    %c0_51 = arith.constant 0 : index
    %c0_52 = arith.constant 0 : index
    %113 = vector.load %arg5[%c2_50, %c0_51, %c0_52] : memref<3x1x64xf32, #tpu.memory_space<vmem>>, vector<1x1x64xf32>
    %114 = vector.shape_cast %113 : vector<1x1x64xf32> to vector<1x64xf32>
    %c2_53 = arith.constant 2 : index
    %c0_54 = arith.constant 0 : index
    %c0_55 = arith.constant 0 : index
    %115 = vector.load %arg6[%c2_53, %c0_54, %c0_55] : memref<3x32x64xbf16, #tpu.memory_space<vmem>>, vector<1x32x64xbf16>
    %116 = vector.shape_cast %115 : vector<1x32x64xbf16> to vector<32x64xbf16>
    %c2_56 = arith.constant 2 : index
    %c0_57 = arith.constant 0 : index
    %c0_58 = arith.constant 0 : index
    %117 = vector.load %arg7[%c2_56, %c0_57, %c0_58] : memref<3x1x64xf32, #tpu.memory_space<vmem>>, vector<1x1x64xf32>
    %118 = vector.shape_cast %117 : vector<1x1x64xf32> to vector<1x64xf32>
    %c32_i32 = arith.constant 32 : i32
    %119 = tpu.dynamic_rotate %108 by %c32_i32 dim 0 : vector<64x32xf32>, i32 -> vector<64x32xf32>
    %c32_i32_59 = arith.constant 32 : i32
    %120 = vector.broadcast %c32_i32_59 : i32 to vector<64x32xi32>
    %121 = arith.cmpi sge, %10, %120 : vector<64x32xi32>
    %cst_60 = arith.constant 0.000000e+00 : f32
    %122 = vector.broadcast %cst_60 : f32 to vector<64x32xf32>
    %123 = arith.select %121, %119, %122 : vector<64x32xi1>, vector<64x32xf32>
    %124 = arith.truncf %123 : vector<64x32xf32> to vector<64x32xbf16>
    %125 = vector.extract_strided_slice %112 {offsets = [0, 0], sizes = [32, 64], strides = [1, 1]} : vector<96x64xbf16> to vector<32x64xbf16>
    %cst_61 = arith.constant dense<0.000000e+00> : vector<64x64xf32>
    %126 = tpu.matmul %124, %125, %cst_61 {dimension_numbers = #tpu.dot_dimension_numbers<[1], [0], [0], [1], [0, 0, 1, 1], [], []>} : vector<64x32xbf16>, vector<32x64xbf16>, vector<64x64xf32> -> vector<64x64xf32>
    %127 = arith.addf %11, %126 : vector<64x64xf32>
    %128 = arith.truncf %108 : vector<64x32xf32> to vector<64x32xbf16>
    %129 = vector.extract_strided_slice %112 {offsets = [32, 0], sizes = [32, 64], strides = [1, 1]} : vector<96x64xbf16> to vector<32x64xbf16>
    %cst_62 = arith.constant dense<0.000000e+00> : vector<64x64xf32>
    %130 = tpu.matmul %128, %129, %cst_62 {dimension_numbers = #tpu.dot_dimension_numbers<[1], [0], [0], [1], [0, 0, 1, 1], [], []>} : vector<64x32xbf16>, vector<32x64xbf16>, vector<64x64xf32> -> vector<64x64xf32>
    %131 = arith.addf %127, %130 : vector<64x64xf32>
    %c32_i32_63 = arith.constant 32 : i32
    %132 = tpu.dynamic_rotate %108 by %c32_i32_63 dim 0 : vector<64x32xf32>, i32 -> vector<64x32xf32>
    %c32_i32_64 = arith.constant 32 : i32
    %133 = vector.broadcast %c32_i32_64 : i32 to vector<64x32xi32>
    %134 = arith.cmpi slt, %10, %133 : vector<64x32xi32>
    %cst_65 = arith.constant 0.000000e+00 : f32
    %135 = vector.broadcast %cst_65 : f32 to vector<64x32xf32>
    %136 = arith.select %134, %132, %135 : vector<64x32xi1>, vector<64x32xf32>
    %137 = arith.truncf %136 : vector<64x32xf32> to vector<64x32xbf16>
    %138 = vector.extract_strided_slice %112 {offsets = [64, 0], sizes = [32, 64], strides = [1, 1]} : vector<96x64xbf16> to vector<32x64xbf16>
    %cst_66 = arith.constant dense<0.000000e+00> : vector<64x64xf32>
    %139 = tpu.matmul %137, %138, %cst_66 {dimension_numbers = #tpu.dot_dimension_numbers<[1], [0], [0], [1], [0, 0, 1, 1], [], []>} : vector<64x32xbf16>, vector<32x64xbf16>, vector<64x64xf32> -> vector<64x64xf32>
    %140 = arith.addf %131, %139 : vector<64x64xf32>
    %141 = vector.broadcast %114 : vector<1x64xf32> to vector<64x64xf32>
    %142 = arith.addf %140, %141 : vector<64x64xf32>
    %143 = vector.extract_strided_slice %142 {offsets = [0, 0], sizes = [64, 32], strides = [1, 1]} : vector<64x64xf32> to vector<64x32xf32>
    %144 = math.tanh %143 : vector<64x32xf32>
    %145 = vector.extract_strided_slice %142 {offsets = [0, 32], sizes = [64, 32], strides = [1, 1]} : vector<64x64xf32> to vector<64x32xf32>
    %146 = arith.negf %145 : vector<64x32xf32>
    %147 = math.exp %146 : vector<64x32xf32>
    %cst_67 = arith.constant 1.000000e+00 : f32
    %148 = vector.broadcast %cst_67 : f32 to vector<64x32xf32>
    %149 = arith.addf %148, %147 : vector<64x32xf32>
    %150 = arith.divf %148, %149 : vector<64x32xf32>
    %151 = arith.mulf %144, %150 : vector<64x32xf32>
    %152 = arith.truncf %151 : vector<64x32xf32> to vector<64x32xbf16>
    %cst_68 = arith.constant dense<0.000000e+00> : vector<64x64xf32>
    %153 = tpu.matmul %152, %116, %cst_68 {dimension_numbers = #tpu.dot_dimension_numbers<[1], [0], [0], [1], [0, 0, 1, 1], [], []>} : vector<64x32xbf16>, vector<32x64xbf16>, vector<64x64xf32> -> vector<64x64xf32>
    %154 = vector.broadcast %118 : vector<1x64xf32> to vector<64x64xf32>
    %155 = arith.addf %153, %154 : vector<64x64xf32>
    %156 = vector.extract_strided_slice %155 {offsets = [0, 0], sizes = [64, 32], strides = [1, 1]} : vector<64x64xf32> to vector<64x32xf32>
    %157 = arith.addf %110, %156 : vector<64x32xf32>
    %c0_i32_69 = arith.constant 0 : i32
    %158 = tpu.memref_slice %arg15[%c0_i32_69] : memref<2x!tpu.dma_semaphore, #tpu.memory_space<semaphore_mem>> -> memref<1x!tpu.dma_semaphore, #tpu.memory_space<semaphore_mem>>
    %159 = tpu.memref_squeeze %158 : memref<1x!tpu.dma_semaphore, #tpu.memory_space<semaphore_mem>> -> memref<!tpu.dma_semaphore, #tpu.memory_space<semaphore_mem>>
    tpu.wait_dma2 semaphore(%159 : memref<!tpu.dma_semaphore, #tpu.memory_space<semaphore_mem>>) src(%arg10 : memref<256x4096xbf16, #tpu.memory_space<any>>) dst(%arg13 : memref<256x4096xbf16, #tpu.memory_space<vmem>>)
    %c1_i32_70 = arith.constant 1 : i32
    %160 = tpu.memref_slice %arg15[%c1_i32_70] : memref<2x!tpu.dma_semaphore, #tpu.memory_space<semaphore_mem>> -> memref<1x!tpu.dma_semaphore, #tpu.memory_space<semaphore_mem>>
    %161 = tpu.memref_squeeze %160 : memref<1x!tpu.dma_semaphore, #tpu.memory_space<semaphore_mem>> -> memref<!tpu.dma_semaphore, #tpu.memory_space<semaphore_mem>>
    tpu.wait_dma2 semaphore(%161 : memref<!tpu.dma_semaphore, #tpu.memory_space<semaphore_mem>>) src(%arg11 : memref<4096x128xbf16, #tpu.memory_space<any>>) dst(%arg14 : memref<4096x128xbf16, #tpu.memory_space<vmem>>)
    %cst_71 = arith.constant 0.000000e+00 : f32
    %162 = vector.broadcast %cst_71 : f32 to vector<8x4096xf32>
    %163 = vector.extract_strided_slice %157 {offsets = [0, 0], sizes = [8, 32], strides = [1, 1]} : vector<64x32xf32> to vector<8x32xf32>
    %164 = arith.truncf %163 : vector<8x32xf32> to vector<8x32xbf16>
    %c0_72 = arith.constant 0 : index
    %c0_73 = arith.constant 0 : index
    %165 = vector.load %arg13[%c0_72, %c0_73] : memref<256x4096xbf16, #tpu.memory_space<vmem>>, vector<32x4096xbf16>
    %cst_74 = arith.constant dense<0.000000e+00> : vector<8x4096xf32>
    %166 = tpu.matmul %164, %165, %cst_74 {dimension_numbers = #tpu.dot_dimension_numbers<[1], [0], [0], [1], [0, 0, 1, 1], [], []>} : vector<8x32xbf16>, vector<32x4096xbf16>, vector<8x4096xf32> -> vector<8x4096xf32>
    %167 = arith.addf %162, %166 : vector<8x4096xf32>
    %168 = vector.extract_strided_slice %157 {offsets = [8, 0], sizes = [8, 32], strides = [1, 1]} : vector<64x32xf32> to vector<8x32xf32>
    %169 = arith.truncf %168 : vector<8x32xf32> to vector<8x32xbf16>
    %c32 = arith.constant 32 : index
    %c0_75 = arith.constant 0 : index
    %170 = vector.load %arg13[%c32, %c0_75] : memref<256x4096xbf16, #tpu.memory_space<vmem>>, vector<32x4096xbf16>
    %cst_76 = arith.constant dense<0.000000e+00> : vector<8x4096xf32>
    %171 = tpu.matmul %169, %170, %cst_76 {dimension_numbers = #tpu.dot_dimension_numbers<[1], [0], [0], [1], [0, 0, 1, 1], [], []>} : vector<8x32xbf16>, vector<32x4096xbf16>, vector<8x4096xf32> -> vector<8x4096xf32>
    %172 = arith.addf %167, %171 : vector<8x4096xf32>
    %173 = vector.extract_strided_slice %157 {offsets = [16, 0], sizes = [8, 32], strides = [1, 1]} : vector<64x32xf32> to vector<8x32xf32>
    %174 = arith.truncf %173 : vector<8x32xf32> to vector<8x32xbf16>
    %c64 = arith.constant 64 : index
    %c0_77 = arith.constant 0 : index
    %175 = vector.load %arg13[%c64, %c0_77] : memref<256x4096xbf16, #tpu.memory_space<vmem>>, vector<32x4096xbf16>
    %cst_78 = arith.constant dense<0.000000e+00> : vector<8x4096xf32>
    %176 = tpu.matmul %174, %175, %cst_78 {dimension_numbers = #tpu.dot_dimension_numbers<[1], [0], [0], [1], [0, 0, 1, 1], [], []>} : vector<8x32xbf16>, vector<32x4096xbf16>, vector<8x4096xf32> -> vector<8x4096xf32>
    %177 = arith.addf %172, %176 : vector<8x4096xf32>
    %178 = vector.extract_strided_slice %157 {offsets = [24, 0], sizes = [8, 32], strides = [1, 1]} : vector<64x32xf32> to vector<8x32xf32>
    %179 = arith.truncf %178 : vector<8x32xf32> to vector<8x32xbf16>
    %c96 = arith.constant 96 : index
    %c0_79 = arith.constant 0 : index
    %180 = vector.load %arg13[%c96, %c0_79] : memref<256x4096xbf16, #tpu.memory_space<vmem>>, vector<32x4096xbf16>
    %cst_80 = arith.constant dense<0.000000e+00> : vector<8x4096xf32>
    %181 = tpu.matmul %179, %180, %cst_80 {dimension_numbers = #tpu.dot_dimension_numbers<[1], [0], [0], [1], [0, 0, 1, 1], [], []>} : vector<8x32xbf16>, vector<32x4096xbf16>, vector<8x4096xf32> -> vector<8x4096xf32>
    %182 = arith.addf %177, %181 : vector<8x4096xf32>
    %183 = vector.extract_strided_slice %157 {offsets = [32, 0], sizes = [8, 32], strides = [1, 1]} : vector<64x32xf32> to vector<8x32xf32>
    %184 = arith.truncf %183 : vector<8x32xf32> to vector<8x32xbf16>
    %c128 = arith.constant 128 : index
    %c0_81 = arith.constant 0 : index
    %185 = vector.load %arg13[%c128, %c0_81] : memref<256x4096xbf16, #tpu.memory_space<vmem>>, vector<32x4096xbf16>
    %cst_82 = arith.constant dense<0.000000e+00> : vector<8x4096xf32>
    %186 = tpu.matmul %184, %185, %cst_82 {dimension_numbers = #tpu.dot_dimension_numbers<[1], [0], [0], [1], [0, 0, 1, 1], [], []>} : vector<8x32xbf16>, vector<32x4096xbf16>, vector<8x4096xf32> -> vector<8x4096xf32>
    %187 = arith.addf %182, %186 : vector<8x4096xf32>
    %188 = vector.extract_strided_slice %157 {offsets = [40, 0], sizes = [8, 32], strides = [1, 1]} : vector<64x32xf32> to vector<8x32xf32>
    %189 = arith.truncf %188 : vector<8x32xf32> to vector<8x32xbf16>
    %c160 = arith.constant 160 : index
    %c0_83 = arith.constant 0 : index
    %190 = vector.load %arg13[%c160, %c0_83] : memref<256x4096xbf16, #tpu.memory_space<vmem>>, vector<32x4096xbf16>
    %cst_84 = arith.constant dense<0.000000e+00> : vector<8x4096xf32>
    %191 = tpu.matmul %189, %190, %cst_84 {dimension_numbers = #tpu.dot_dimension_numbers<[1], [0], [0], [1], [0, 0, 1, 1], [], []>} : vector<8x32xbf16>, vector<32x4096xbf16>, vector<8x4096xf32> -> vector<8x4096xf32>
    %192 = arith.addf %187, %191 : vector<8x4096xf32>
    %193 = vector.extract_strided_slice %157 {offsets = [48, 0], sizes = [8, 32], strides = [1, 1]} : vector<64x32xf32> to vector<8x32xf32>
    %194 = arith.truncf %193 : vector<8x32xf32> to vector<8x32xbf16>
    %c192 = arith.constant 192 : index
    %c0_85 = arith.constant 0 : index
    %195 = vector.load %arg13[%c192, %c0_85] : memref<256x4096xbf16, #tpu.memory_space<vmem>>, vector<32x4096xbf16>
    %cst_86 = arith.constant dense<0.000000e+00> : vector<8x4096xf32>
    %196 = tpu.matmul %194, %195, %cst_86 {dimension_numbers = #tpu.dot_dimension_numbers<[1], [0], [0], [1], [0, 0, 1, 1], [], []>} : vector<8x32xbf16>, vector<32x4096xbf16>, vector<8x4096xf32> -> vector<8x4096xf32>
    %197 = arith.addf %192, %196 : vector<8x4096xf32>
    %198 = vector.extract_strided_slice %157 {offsets = [56, 0], sizes = [8, 32], strides = [1, 1]} : vector<64x32xf32> to vector<8x32xf32>
    %199 = arith.truncf %198 : vector<8x32xf32> to vector<8x32xbf16>
    %c224 = arith.constant 224 : index
    %c0_87 = arith.constant 0 : index
    %200 = vector.load %arg13[%c224, %c0_87] : memref<256x4096xbf16, #tpu.memory_space<vmem>>, vector<32x4096xbf16>
    %cst_88 = arith.constant dense<0.000000e+00> : vector<8x4096xf32>
    %201 = tpu.matmul %199, %200, %cst_88 {dimension_numbers = #tpu.dot_dimension_numbers<[1], [0], [0], [1], [0, 0, 1, 1], [], []>} : vector<8x32xbf16>, vector<32x4096xbf16>, vector<8x4096xf32> -> vector<8x4096xf32>
    %202 = arith.addf %197, %201 : vector<8x4096xf32>
    %c0_89 = arith.constant 0 : index
    %c0_90 = arith.constant 0 : index
    %203 = vector.load %arg8[%c0_89, %c0_90] : memref<1x4096xf32, #tpu.memory_space<vmem>>, vector<1x4096xf32>
    %204 = vector.broadcast %203 : vector<1x4096xf32> to vector<8x4096xf32>
    %205 = arith.addf %202, %204 : vector<8x4096xf32>
    %cst_91 = arith.constant 0.000000e+00 : f32
    %206 = vector.broadcast %cst_91 : f32 to vector<8x4096xf32>
    %207 = arith.maximumf %205, %206 : vector<8x4096xf32>
    %208 = vector.broadcast %cst_91 : f32 to vector<8x4096xf32>
    %209 = arith.subf %205, %208 : vector<8x4096xf32>
    %210 = arith.cmpf one, %209, %209 : vector<8x4096xf32>
    %211 = vector.broadcast %cst_91 : f32 to vector<8x4096xf32>
    %212 = arith.addf %205, %211 : vector<8x4096xf32>
    %213 = math.absf %209 : vector<8x4096xf32>
    %cst_92 = arith.constant 0.000000e+00 : f32
    %214 = vector.broadcast %cst_92 : f32 to vector<8x4096xf32>
    %215 = arith.subf %214, %213 : vector<8x4096xf32>
    %216 = math.exp %215 : vector<8x4096xf32>
    %217 = math.log1p %216 : vector<8x4096xf32>
    %218 = arith.addf %207, %217 : vector<8x4096xf32>
    %219 = arith.select %210, %212, %218 : vector<8x4096xi1>, vector<8x4096xf32>
    %220 = math.tanh %219 : vector<8x4096xf32>
    %221 = arith.mulf %205, %220 : vector<8x4096xf32>
    %222 = arith.truncf %221 : vector<8x4096xf32> to vector<8x4096xbf16>
    %c0_93 = arith.constant 0 : index
    %c0_94 = arith.constant 0 : index
    %223 = vector.load %arg14[%c0_93, %c0_94] : memref<4096x128xbf16, #tpu.memory_space<vmem>>, vector<4096x128xbf16>
    %cst_95 = arith.constant dense<0.000000e+00> : vector<8x128xf32>
    %224 = tpu.matmul %222, %223, %cst_95 {dimension_numbers = #tpu.dot_dimension_numbers<[1], [0], [0], [1], [0, 0, 1, 1], [], []>} : vector<8x4096xbf16>, vector<4096x128xbf16>, vector<8x128xf32> -> vector<8x128xf32>
    %c0_96 = arith.constant 0 : index
    %c0_97 = arith.constant 0 : index
    %225 = vector.load %arg9[%c0_96, %c0_97] : memref<1x128xf32, #tpu.memory_space<vmem>>, vector<1x128xf32>
    %226 = vector.broadcast %225 : vector<1x128xf32> to vector<8x128xf32>
    %227 = arith.addf %224, %226 : vector<8x128xf32>
    %c0_98 = arith.constant 0 : index
    %c0_99 = arith.constant 0 : index
    %228 = vector.load %arg12[%c0_98, %c0_99] : memref<8x128xf32, #tpu.memory_space<vmem>>, vector<8x128xf32>
    tpu.vector_store %arg12[%c0_98, %c0_99], %227 {strides = array<i32>} : memref<8x128xf32, #tpu.memory_space<vmem>>, vector<8x128xf32>,
    return
  }
  func.func @transform_0(%arg0: i32) -> (i32, i32) {
    %c0_i32 = arith.constant 0 : i32
    %c0_i32_0 = arith.constant 0 : i32
    %c0_i32_1 = arith.constant 0 : i32
    return %c0_i32, %c0_i32_0 : i32, i32
  }
  func.func @transform_1(%arg0: i32) -> (i32, i32) {
    %c0_i32 = arith.constant 0 : i32
    %c0_i32_0 = arith.constant 0 : i32
    %c0_i32_1 = arith.constant 0 : i32
    return %c0_i32, %c0_i32_0 : i32, i32
  }
  func.func @transform_2(%arg0: i32) -> (i32, i32) {
    %c0_i32 = arith.constant 0 : i32
    %c0_i32_0 = arith.constant 0 : i32
    %c0_i32_1 = arith.constant 0 : i32
    return %c0_i32, %c0_i32_0 : i32, i32
  }
  func.func @transform_3(%arg0: i32) -> (i32, i32, i32) {
    %c0_i32 = arith.constant 0 : i32
    %c0_i32_0 = arith.constant 0 : i32
    %c0_i32_1 = arith.constant 0 : i32
    %c0_i32_2 = arith.constant 0 : i32
    return %c0_i32, %c0_i32_0, %c0_i32_1 : i32, i32, i32
  }
  func.func @transform_4(%arg0: i32) -> (i32, i32, i32) {
    %c0_i32 = arith.constant 0 : i32
    %c0_i32_0 = arith.constant 0 : i32
    %c0_i32_1 = arith.constant 0 : i32
    %c0_i32_2 = arith.constant 0 : i32
    return %c0_i32, %c0_i32_0, %c0_i32_1 : i32, i32, i32
  }
  func.func @transform_5(%arg0: i32) -> (i32, i32, i32) {
    %c0_i32 = arith.constant 0 : i32
    %c0_i32_0 = arith.constant 0 : i32
    %c0_i32_1 = arith.constant 0 : i32
    %c0_i32_2 = arith.constant 0 : i32
    return %c0_i32, %c0_i32_0, %c0_i32_1 : i32, i32, i32
  }
  func.func @transform_6(%arg0: i32) -> (i32, i32, i32) {
    %c0_i32 = arith.constant 0 : i32
    %c0_i32_0 = arith.constant 0 : i32
    %c0_i32_1 = arith.constant 0 : i32
    %c0_i32_2 = arith.constant 0 : i32
    return %c0_i32, %c0_i32_0, %c0_i32_1 : i32, i32, i32
  }
  func.func @transform_7(%arg0: i32) -> (i32, i32) {
    %c0_i32 = arith.constant 0 : i32
    %c0_i32_0 = arith.constant 0 : i32
    %c0_i32_1 = arith.constant 0 : i32
    return %c0_i32, %c0_i32_0 : i32, i32
  }
  func.func @transform_8(%arg0: i32) -> (i32, i32) {
    %c0_i32 = arith.constant 0 : i32
    %c0_i32_0 = arith.constant 0 : i32
    %c0_i32_1 = arith.constant 0 : i32
    return %c0_i32, %c0_i32_0 : i32, i32
  }
  func.func @transform_11(%arg0: i32) -> (i32, i32) {
    %c0_i32 = arith.constant 0 : i32
    %c0_i32_0 = arith.constant 0 : i32
    %c0_i32_1 = arith.constant 0 : i32
    return %c0_i32, %c0_i32_0 : i32, i32
  }
}

</mosaic_0001>

<bundles_post_ra>
// kernel: tpu_custom_call.1
= control target key start
LH: loop header
LB: loop body
LE: loop exit
PB: predicated region body
PF: predicated region fallthrough
CT: control target
= control target key end

     0   :  { %16 = vsyncpa [#allocation6], 0  ;;  %s19197_s0 = inlined_call_operand.vmem [shape: bf16[64,4], index: 0, kind: input, shape index: {}]   ;;  %s19198_s1 = inlined_call_operand.hbm [shape: bf16[4,32], index: 1, kind: input, shape index: {}]   ;;  %s19199_s2 = inlined_call_operand.hbm [shape: f32[1,32], index: 2, kind: input, shape index: {}]   ;;  %s19200_s3 = inlined_call_operand.vmem [shape: bf16[3,96,64], index: 3, kind: input, shape index: {}]   ;;  %s19201_s4 = inlined_call_operand.hbm [shape: f32[3,1,64], index: 4, kind: input, shape index: {}]   ;;  %s19202_s5 = inlined_call_operand.hbm [shape: bf16[3,32,64], index: 5, kind: input, shape index: {}]   ;;  %s19203_s6 = inlined_call_operand.hbm [shape: f32[3,1,64], index: 6, kind: input, shape index: {}]   ;;  %s19204_s7 = inlined_call_operand.hbm [shape: f32[1,4096], index: 7, kind: input, shape index: {}]   ;;  %s19205_s8 = inlined_call_operand.hbm [shape: f32[1,128], index: 8, kind: input, shape index: {}]   ;;  %s19206_s9 = inlined_call_operand.hbm [shape: bf16[256,4096], index: 9, kind: input, shape index: {}]   ;;  %s19207_s10 = inlined_call_operand.hbm [shape: bf16[4096,128], index: 10, kind: input, shape index: {}]   ;;  %s19208_s11 = inlined_call_operand.hbm [shape: f32[8,128], index: 11, kind: output, shape index: {}]  }
   0x1   :  { %17 = vsyncpa [#allocation9], 0 }
   0x2   :  { %18 = vsyncpa [#allocation12], 0 }
   0x3   :  { %19 = vsyncpa [#allocation15], 0  ;;  %s39_s19 = sshll.u32 %s19199_s2, 4  ;;  %s40_s19 = int_to_ptr.hbm [resolvable:$true] %s39_s19 }
   0x4   :  { %20 = vsyncpa [#allocation7], 0  ;;  %s16718_s20 = smov [#allocation8]   ;;  %s64_s24 = sshll.u32 %s19202_s5, 4  ;;  %s65_s24 = int_to_ptr.hbm [resolvable:$true] %s64_s24 }
   0x5   :  { %s41_s21 = sshll.u32 %s16718_s20, 4  ;;  %s16719_s25 = smov [#allocation11]   ;;  %s42_s21 = int_to_ptr.vmem [resolvable:$true] %s41_s21 }
   0x6   :  { %44 = dma.hbm_to_vmem [thread:$0]  %s40_s19, 16, %s42_s21, [#allocation9]  }
   0x7   :  { %s66_s26 = sshll.u32 %s16719_s25, 4  ;;  %s16720_s27 = smov 64   ;;  %s67_s26 = int_to_ptr.vmem [resolvable:$true] %s66_s26 }
   0x8   :  { %s16721_s28 = smov 4   ;;  %s91_s2 = sshll.u32 %s19204_s7, 4  ;;  %s92_s2 = int_to_ptr.hbm [resolvable:$true] %s91_s2 }
   0x9   :  { %72 = dma.hbm_to_vmem [thread:$0]  %s65_s24, 768, %s67_s26, [#allocation12], %s16720_s27, %s16720_s27, %s16721_s28  }
   0xa   :  { %s16722_s12 = smov [#allocation14]   ;;  %s28_s5 = sshll.u32 %s19198_s1, 4  ;;  %s29_s5 = int_to_ptr.hbm [resolvable:$true] %s28_s5 }
   0xb   :  { %s93_s13 = sshll.u32 %s16722_s12, 4  ;;  %s16723_s16 = smov [#allocation5]   ;;  %s94_s13 = int_to_ptr.vmem [resolvable:$true] %s93_s13 }
   0xc   :  { %96 = dma.hbm_to_vmem [thread:$0]  %s92_s2, 512, %s94_s13, [#allocation15]  }
   0xd   :  { %s30_s17 = sshll.u32 %s16723_s16, 4  ;;  %s51_s20 = sshll.u32 %s19201_s4, 4  ;;  %s31_s17 = int_to_ptr.vmem [resolvable:$true] %s30_s17  ;;  %s52_s20 = int_to_ptr.hbm [resolvable:$true] %s51_s20 }
   0xe   :  { %33 = dma.hbm_to_vmem [thread:$0]  %s29_s5, 32, %s31_s17, [#allocation6]  }
   0xf   :  { %s16724_s7 = smov [#allocation10]   ;;  %s77_s24 = sshll.u32 %s19203_s6, 4  ;;  %s78_s24 = int_to_ptr.hbm [resolvable:$true] %s77_s24 }
  0x10   :  { %s53_s21 = sshll.u32 %s16724_s7, 4  ;;  %s16725_s25 = smov 16   ;;  %s54_s21 = int_to_ptr.vmem [resolvable:$true] %s53_s21 }
  0x11   :  { %s16726_s1 = smov 1   ;;  %s16727_s26 = smov [#allocation13]  }
  0x12   :  { %59 = dma.hbm_to_vmem [thread:$0]  %s52_s20, 48, %s54_s21, [#allocation9], %s16725_s25, %s16725_s25, %s16726_s1  }
  0x13   :  { %s79_s27 = sshll.u32 %s16727_s26, 4  ;;  %s102_s4 = sshll.u32 %s19205_s8, 4  ;;  %s80_s27 = int_to_ptr.vmem [resolvable:$true] %s79_s27  ;;  %s103_s4 = int_to_ptr.hbm [resolvable:$true] %s102_s4 }
  0x14   :  { %85 = dma.hbm_to_vmem [thread:$0]  %s78_s24, 48, %s80_s27, [#allocation12], %s16725_s25, %s16725_s25, %s16726_s1  }
  0x15   :  { %s16728_s30 = smov [#allocation16]  }
  0x16   :  { %s104_s2 = sshll.u32 %s16728_s30, 4  ;;  %s105_s2 = int_to_ptr.vmem [resolvable:$true] %s104_s2 }
  0x17   :  { %107 = dma.hbm_to_vmem [thread:$0]  %s103_s4, 16, %s105_s2, [#allocation15]  }
  0x18   :  { %16704 = dma.done.wait [#allocation6], 32  }
  0x19   :  { %16705 = vsyncadd [#allocation6], 4294967264 }
  0x1a   :  { %16706 = dma.done.wait [#allocation9], 64  }
  0x1b   :  { %16707 = vsyncadd [#allocation9], 4294967232 }
  0x1c   :  { %16708 = dma.done.wait [#allocation12], 816  }
  0x1d   :  { %16709 = vsyncadd [#allocation12], 4294966480 }
  0x1e   :  { %16710 = dma.done.wait [#allocation15], 528  }
  0x1f   :  { %16711 = vsyncadd [#allocation15], 4294966768  ;;  %vm210_vm0 = vcmask 1041408   ;;  %v172_v0 = vld [vmem:[#allocation5] sm:$0x3]  ;;  %vm197_vm1 = vcmask 31744  }
  0x20   :  { %v212_v1 = vsel %vm210_vm0, %v172_v0, 0  ;;  %v15303_v2 = vld [vmem:[%s19197_s0] sm:$0xff]  ;;  %v15304_v3 = vld [vmem:[%s19197_s0 + $0x8] sm:$0xff]  ;;  %v15305_v5 = vld [vmem:[%s19197_s0 + $0x10] sm:$0xff]  ;;  %vm306_vm2 = vcmask 261120   ;;  %v16729_v15 = vmov 0.0  }
  0x21   :  { %221 = vmatpush.bf16.msra.mxu0 %v212_v1  ;;  %v15308_v4 = vld [vmem:[%s19200_s3 + $0x8] sm:$0xff]  ;;  %v15306_v6 = vld [vmem:[%s19197_s0 + $0x18] sm:$0xff]  ;;  %v15307_v7 = vld [vmem:[%s19200_s3] sm:$0xff]  ;;  %s16730_s26 = smov 96   ;;  %s144_s27 = sshll.u32 %s19206_s9, 4  ;;  %s145_s27 = int_to_ptr.hbm [resolvable:$true] %s144_s27 }
  0x22   :  { %378 = vmatpush.bf16.msra.mxu2 %v15308_v4  ;;  %v15310_v8 = vld [vmem:[%s19200_s3 + $0x18] sm:$0xff]  ;;  %v15309_v9 = vld [vmem:[%s19200_s3 + $0x10] sm:$0xff]  ;;  %v15312_v10 = vld [vmem:[%s19200_s3 + $0x28] sm:$0xff]  ;;  %s16733_s28 = smov [#allocation2]   ;;  %s158_s2 = sshll.u32 %s19207_s10, 4  ;;  %s159_s2 = int_to_ptr.hbm [resolvable:$true] %s158_s2 }
  0x23   :  { %325 = vmatpush.bf16.msra.mxu1 %v15310_v8  ;;  %451 = vmatpush.bf16.msra.mxu3 %v15312_v10  ;;  %v15311_v11 = vld [vmem:[%s19200_s3 + $0x20] sm:$0xff]  ;;  %s146_s29 = sshll.u32 %s16733_s28, 4  ;;  %s16734_s6 = smov [#allocation3]   ;;  %s147_s29 = int_to_ptr.vmem [resolvable:$true] %s146_s29 }
  0x24   :  { %11783 = vmatmul.msk.bf16.vlgmr.msra.gmra.mxu0 %vm197_vm1, %v15303_v2  ;;  %v16117_v12 = vld [vmem:[#allocation8] ss:$0 sm:$0xff]  ;;  %v16891_v44 = vld [vmem:[#allocation10] ss:$0 sm:$0xff]  ;;  %149 = dma.hbm_to_vmem [thread:$0]  %s145_s27, 65536, %s147_s29, [#allocation4] }
  0x25   :  { %s160_s8 = sshll.u32 %s16734_s6, 4  ;;  %s161_s8 = int_to_ptr.vmem [resolvable:$true] %s160_s8 }
  0x26   :  { %379 = vmatpush.bf16.msra.mxu2 %v15307_v7  ;;  %163 = dma.hbm_to_vmem [thread:$0]  %s159_s2, 32768, %s161_s8, [#allocation4 + $0x1] }
  0x27   :  { %326 = vmatpush.bf16.msra.mxu1 %v15309_v9  ;;  %452 = vmatpush.bf16.msra.mxu3 %v15311_v11 }
  0x34   :  { %11784 = vmatmul.msk.bf16.gmra.mxu0 %vm197_vm1, %v15304_v3 }
  0x44   :  { %11785 = vmatmul.msk.bf16.gmra.mxu0 %vm197_vm1, %v15305_v5 }
  0x54   :  { %11786 = vmatmul.msk.bf16.gmra.mxu0 %vm197_vm1, %v15306_v6 }
  0xa1   :  { %v223_v13 = vpop.f32.mrf.mxu0 }
  0xa2   :  { %v16847_v14 = vadd.f32 %v16117_v12, %v223_v13 }
  0xa4   :  { %v286_v16 = vpack.c.bf16 %v16847_v14, %v16729_v15 }
  0xa6   :  { %11807 = vmatmul.msk.bf16.vlgmr.msra.gmra.mxu2 %vm306_vm2, %v286_v16 }
  0xa9   :  { %v225_v17 = vpop.f32.mrf.mxu0 }
  0xaa   :  { %v16851_v18 = vadd.f32 %v16117_v12, %v225_v17 }
  0xac   :  { %v290_v19 = vpack.c.bf16 %v16851_v18, %v16847_v14 }
  0xae   :  { %11795 = vmatmul.msk.bf16.vlgmr.msra.gmra.mxu1 %vm306_vm2, %v290_v19 }
  0xb1   :  { %v228_v20 = vpop.f32.mrf.mxu0 }
  0xb2   :  { %v16856_v21 = vadd.f32 %v16117_v12, %v228_v20 }
  0xb4   :  { %v287_v22 = vpack.c.bf16 %v16856_v21, %v16851_v18 }
  0xb6   :  { %11808 = vmatmul.msk.bf16.gmra.mxu2 %vm306_vm2, %v287_v22  ;;  %11819 = vmatmul.msk.bf16.vlgmr.msra.gmra.mxu3 %vm306_vm2, %v287_v22 }
  0xb9   :  { %v230_v23 = vpop.f32.mrf.mxu0 }
  0xba   :  { %v16862_v24 = vadd.f32 %v16117_v12, %v230_v23 }
  0xbc   :  { %v291_v25 = vpack.c.bf16 %v16862_v24, %v16856_v21 }
  0xbe   :  { %11796 = vmatmul.msk.bf16.gmra.mxu1 %vm306_vm2, %v291_v25 }
  0xc1   :  { %v233_v26 = vpop.f32.mrf.mxu0 }
  0xc2   :  { %v16867_v27 = vadd.f32 %v16117_v12, %v233_v26 }
  0xc4   :  { %v288_v28 = vpack.c.bf16 %v16867_v27, %v16862_v24 }
  0xc6   :  { %11809 = vmatmul.msk.bf16.gmra.mxu2 %vm306_vm2, %v288_v28  ;;  %11820 = vmatmul.msk.bf16.gmra.mxu3 %vm306_vm2, %v288_v28 }
  0xc9   :  { %v235_v29 = vpop.f32.mrf.mxu0 }
  0xca   :  { %v16873_v30 = vadd.f32 %v16117_v12, %v235_v29 }
  0xcc   :  { %v292_v31 = vpack.c.bf16 %v16873_v30, %v16867_v27 }
  0xce   :  { %11797 = vmatmul.msk.bf16.gmra.mxu1 %vm306_vm2, %v292_v31 }
  0xd1   :  { %v238_v32 = vpop.f32.mrf.mxu0 }
  0xd2   :  { %v16878_v33 = vadd.f32 %v16117_v12, %v238_v32 }
  0xd4   :  { %v289_v34 = vpack.c.bf16 %v16878_v33, %v16873_v30 }
  0xd6   :  { %11810 = vmatmul.msk.bf16.gmra.mxu2 %vm306_vm2, %v289_v34  ;;  %11821 = vmatmul.msk.bf16.gmra.mxu3 %vm306_vm2, %v289_v34 }
  0xd9   :  { %v240_v35 = vpop.f32.mrf.mxu0 }
  0xda   :  { %v16884_v36 = vadd.f32 %v16117_v12, %v240_v35 }
  0xdc   :  { %v293_v37 = vpack.c.bf16 %v16884_v36, %v16878_v33  ;;  %v420_v38 = vpack.c.bf16 0.0, %v16884_v36 }
  0xde   :  { %11798 = vmatmul.msk.bf16.gmra.mxu1 %vm306_vm2, %v293_v37 }
  0xe6   :  { %11822 = vmatmul.msk.bf16.gmra.mxu3 %vm306_vm2, %v420_v38 }
 0x129   :  { %v381_v39 = vpop.f32.mrf.mxu2 }
 0x12b   :  { %v328_v40 = vpop.f32.mrf.mxu1 }
 0x12c   :  { %v382_v43 = vadd.f32 %v381_v39, %v328_v40 }
 0x131   :  { %v383_v41 = vpop.f32.mrf.mxu2 }
 0x133   :  { %v330_v42 = vpop.f32.mrf.mxu1 }
 0x134   :  { %v384_v51 = vadd.f32 %v383_v41, %v330_v42 }
 0x139   :  { %v454_v45 = vpop.f32.mrf.mxu3  ;;  %v386_v49 = vpop.f32.mrf.mxu2 }
 0x13a   :  { %v474_v46 = vadd.f32 %v454_v45, %v382_v43 }
 0x13b   :  { %v333_v47 = vpop.f32.mrf.mxu1 }
 0x13c   :  { %v16894_v48 = vadd.f32 %v16891_v44, %v474_v46  ;;  %v387_v60 = vadd.f32 %v386_v49, %v333_v47 }
 0x13e   :  { %v11823_v50 = vmul.f32 -1.442695, %v16894_v48 }
 0x140   :  { %16124 = vpow2.f32 %v11823_v50 }
 0x141   :  { %v456_v52 = vpop.f32.mrf.mxu3  ;;  %v388_v59 = vpop.f32.mrf.mxu2 }
 0x142   :  { %v475_v53 = vadd.f32 %v456_v52, %v384_v51 }
 0x143   :  { %v335_v55 = vpop.f32.mrf.mxu1 }
 0x144   :  { %v16898_v54 = vadd.f32 %v16891_v44, %v475_v53  ;;  %v389_v5 = vadd.f32 %v388_v59, %v335_v55 }
 0x146   :  { %v16125_v56 = vpop.eup %16124  ;;  %v11824_v57 = vmul.f32 -1.442695, %v16898_v54 }
 0x147   :  { %v525_v58 = vadd.f32 1.0, %v16125_v56 }
 0x148   :  { %16126 = vpow2.f32 %v11824_v57 }
 0x149   :  { %16128 = vrcp.f32 %v525_v58  ;;  %v459_v61 = vpop.f32.mrf.mxu3  ;;  %v391_v7 = vpop.f32.mrf.mxu2  ;;  %v542_v11 = vand.u32 2147483647, %v525_v58  ;;  %v544_v12 = vand.u32 2147483648, %v525_v58  ;;  %vm538_vm4 = vweird.f32 %v525_v58 }
 0x14a   :  { %v476_v62 = vadd.f32 %v459_v61, %v387_v60 }
 0x14b   :  { %v338_v4 = vpop.f32.mrf.mxu1  ;;  %vm543_vm6 = vcmp.eq.f32.partialorder %v542_v11, 8.507059e+37  ;;  %v545_v23 = vor.u32 1.1754944e-38, %v544_v12 }
 0x14c   :  { %v16902_v63 = vadd.f32 %v16891_v44, %v476_v62  ;;  %v392_v25 = vadd.f32 %v391_v7, %v338_v4 }
 0x14e   :  { %v16127_v0 = vpop.eup %16126  ;;  %v11825_v1 = vmul.f32 -1.442695, %v16902_v63 }
 0x14f   :  { %v16129_v2 = vpop.eup %16128  ;;  %v526_v3 = vadd.f32 1.0, %v16127_v0 }
 0x150   :  { %16130 = vpow2.f32 %v11825_v1  ;;  %v534_v6 = vmul.f32 %v16129_v2, %v525_v58  ;;  %vm539_vm3 = vweird.f32 %v16129_v2 }
 0x151   :  { %16132 = vrcp.f32 %v526_v3  ;;  %v461_v8 = vpop.f32.mrf.mxu3  ;;  %vm540_vm5 = vmor %vm538_vm4, %vm539_vm3  ;;  %v393_v37 = vpop.f32.mrf.mxu2  ;;  %v557_v38 = vand.u32 2147483647, %v526_v3  ;;  %v559_v39 = vand.u32 2147483648, %v526_v3  ;;  %vm553_vm8 = vweird.f32 %v526_v3 }
 0x152   :  { %v477_v9 = vadd.f32 %v461_v8, %v389_v5  ;;  %v535_v10 = vsub.f32 1.0, %v534_v6 }
 0x153   :  { %v340_v29 = vpop.f32.mrf.mxu1  ;;  %vm558_vm10 = vcmp.eq.f32.partialorder %v557_v38, 8.507059e+37  ;;  %v560_v49 = vor.u32 1.1754944e-38, %v559_v39 }
 0x154   :  { %v16906_v13 = vadd.f32 %v16891_v44, %v477_v9  ;;  %v536_v15 = vmul.f32 %v16129_v2, %v535_v10  ;;  %v394_v50 = vadd.f32 %v393_v37, %v340_v29 }
 0x156   :  { %v16131_v16 = vpop.eup %16130  ;;  %v11826_v17 = vmul.f32 -1.442695, %v16906_v13  ;;  %v537_v19 = vadd.f32 %v16129_v2, %v536_v15 }
 0x157   :  { %v16133_v20 = vpop.eup %16132  ;;  %v527_v22 = vadd.f32 1.0, %v16131_v16 }
 0x158   :  { %16134 = vpow2.f32 %v11826_v17  ;;  %v541_v26 = vsel %vm540_vm5, %v16129_v2, %v537_v19  ;;  %v549_v28 = vmul.f32 %v16133_v20, %v526_v3  ;;  %vm554_vm7 = vweird.f32 %v16133_v20 }
 0x159   :  { %16136 = vrcp.f32 %v527_v22  ;;  %v464_v31 = vpop.f32.mrf.mxu3  ;;  %v546_v32 = vsel %vm543_vm6, %v545_v23, %v541_v26  ;;  %vm555_vm9 = vmor %vm553_vm8, %vm554_vm7  ;;  %v572_v59 = vand.u32 2147483647, %v527_v22  ;;  %v574_v60 = vand.u32 2147483648, %v527_v22  ;;  %v396_v0 = vpop.f32.mrf.mxu2 }
 0x15a   :  { %v478_v34 = vadd.f32 %v464_v31, %v392_v25  ;;  %661 = vrot.lane.b32.xlu0 %v546_v32, %s16730_s26  ;;  %v550_v35 = vsub.f32 1.0, %v549_v28  ;;  %vm568_vm12 = vweird.f32 %v527_v22 }
 0x15b   :  { %v343_v58 = vpop.f32.mrf.mxu1  ;;  %vm573_vm14 = vcmp.eq.f32.partialorder %v572_v59, 8.507059e+37  ;;  %v575_v6 = vor.u32 1.1754944e-38, %v574_v60 }
 0x15c   :  { %v16911_v40 = vadd.f32 %v16891_v44, %v478_v34  ;;  %v551_v41 = vmul.f32 %v16133_v20, %v550_v35  ;;  %v397_v7 = vadd.f32 %v396_v0, %v343_v58 }
 0x15e   :  { %v16135_v42 = vpop.eup %16134  ;;  %v11827_v43 = vmul.f32 -1.442695, %v16911_v40  ;;  %v552_v45 = vadd.f32 %v16133_v20, %v551_v41 }
 0x15f   :  { %v16137_v46 = vpop.eup %16136  ;;  %v528_v47 = vadd.f32 1.0, %v16135_v42 }
 0x160   :  { %16138 = vpow2.f32 %v11827_v43  ;;  %v556_v51 = vsel %vm555_vm9, %v16133_v20, %v552_v45  ;;  %v564_v52 = vmul.f32 %v16137_v46, %v527_v22  ;;  %vm569_vm11 = vweird.f32 %v16137_v46  ;;  %v15314_v43 = vld [vmem:[#allocation11 + $0x8] sm:$0xff] }
 0x161   :  { %16140 = vrcp.f32 %v528_v47  ;;  %v466_v53 = vpop.f32.mrf.mxu3  ;;  %v561_v55 = vsel %vm558_vm10, %v560_v49, %v556_v51  ;;  %vm570_vm13 = vmor %vm568_vm12, %vm569_vm11  ;;  %v587_v16 = vand.u32 2147483647, %v528_v47  ;;  %v589_v17 = vand.u32 2147483648, %v528_v47  ;;  %v398_v29 = vpop.f32.mrf.mxu2  ;;  %730 = vmatpush.bf16.msrb.mxu0 %v15314_v43 }
 0x162   :  { %v479_v56 = vadd.f32 %v466_v53, %v394_v50  ;;  %663 = vrot.lane.b32.xlu0 %v561_v55, %s16730_s26  ;;  %v565_v57 = vsub.f32 1.0, %v564_v52  ;;  %vm583_vm0 = vweird.f32 %v528_v47  ;;  %v15313_v50 = vld [vmem:[#allocation11] sm:$0xff] }
 0x163   :  { %v345_v22 = vpop.f32.mrf.mxu1  ;;  %vm588_vm3 = vcmp.eq.f32.partialorder %v587_v16, 8.507059e+37  ;;  %v590_v32 = vor.u32 1.1754944e-38, %v589_v17 }
 0x164   :  { %v16916_v61 = vadd.f32 %v16891_v44, %v479_v56  ;;  %v566_v62 = vmul.f32 %v16137_v46, %v565_v57  ;;  %v399_v34 = vadd.f32 %v398_v29, %v345_v22 }
 0x165   :  { %731 = vmatpush.bf16.msrb.mxu0 %v15313_v50 }
 0x166   :  { %v16139_v1 = vpop.eup %16138  ;;  %v11828_v2 = vmul.f32 -1.442695, %v16916_v61  ;;  %v567_v3 = vadd.f32 %v16137_v46, %v566_v62 }
 0x167   :  { %v16141_v4 = vpop.eup %16140  ;;  %v529_v5 = vadd.f32 1.0, %v16139_v1 }
 0x168   :  { %16142 = vpow2.f32 %v11828_v2  ;;  %v571_v8 = vsel %vm570_vm13, %v16137_v46, %v567_v3  ;;  %v579_v9 = vmul.f32 %v16141_v4, %v528_v47  ;;  %vm584_vm15 = vweird.f32 %v16141_v4 }
 0x169   :  { %16144 = vrcp.f32 %v529_v5  ;;  %v469_v10 = vpop.f32.mrf.mxu3  ;;  %v576_v11 = vsel %vm573_vm14, %v575_v6, %v571_v8  ;;  %vm585_vm1 = vmor %vm583_vm0, %vm584_vm15  ;;  %v604_v45 = vand.u32 2147483648, %v529_v5  ;;  %v602_v49 = vand.u32 2147483647, %v529_v5 }
 0x16a   :  { %v480_v12 = vadd.f32 %v469_v10, %v397_v7  ;;  %665 = vrot.lane.b32.xlu1 %v576_v11, %s16730_s26  ;;  %v580_v15 = vsub.f32 1.0, %v579_v9  ;;  %vm598_vm5 = vweird.f32 %v529_v5 }
 0x16b   :  { %v605_v57 = vor.u32 1.1754944e-38, %v604_v45  ;;  %vm603_vm7 = vcmp.eq.f32.partialorder %v602_v49, 8.507059e+37 }
 0x16c   :  { %v16921_v19 = vadd.f32 %v16891_v44, %v480_v12  ;;  %v581_v20 = vmul.f32 %v16141_v4, %v580_v15 }
 0x16e   :  { %v16143_v23 = vpop.eup %16142  ;;  %v11829_v25 = vmul.f32 -1.442695, %v16921_v19  ;;  %v582_v26 = vadd.f32 %v16141_v4, %v581_v20 }
 0x16f   :  { %v16145_v28 = vpop.eup %16144  ;;  %v530_v31 = vadd.f32 1.0, %v16143_v23 }
 0x170   :  { %16146 = vpow2.f32 %v11829_v25  ;;  %v586_v35 = vsel %vm585_vm1, %v16141_v4, %v582_v26  ;;  %v594_v37 = vmul.f32 %v16145_v28, %v529_v5  ;;  %vm599_vm4 = vweird.f32 %v16145_v28 }
 0x171   :  { %16148 = vrcp.f32 %v530_v31  ;;  %v471_v38 = vpop.f32.mrf.mxu3  ;;  %v591_v39 = vsel %vm588_vm3, %v590_v32, %v586_v35  ;;  %vm600_vm6 = vmor %vm598_vm5, %vm599_vm4  ;;  %v619_v62 = vand.u32 2147483648, %v530_v31  ;;  %v617_v1 = vand.u32 2147483647, %v530_v31 }
 0x172   :  { %v481_v41 = vadd.f32 %v471_v38, %v399_v34  ;;  %667 = vrot.lane.b32.xlu1 %v591_v39, %s16730_s26  ;;  %v595_v42 = vsub.f32 1.0, %v594_v37  ;;  %vm613_vm9 = vweird.f32 %v530_v31 }
 0x173   :  { %v620_v6 = vor.u32 1.1754944e-38, %v619_v62  ;;  %vm618_vm11 = vcmp.eq.f32.partialorder %v617_v1, 8.507059e+37  ;;  %v15319_v62 = vld [vmem:[%s19200_s3 + $0x50] sm:$0xff] }
 0x174   :  { %v16926_v46 = vadd.f32 %v16891_v44, %v481_v41  ;;  %v596_v47 = vmul.f32 %v16145_v28, %v595_v42 }
 0x176   :  { %v16147_v51 = vpop.eup %16146  ;;  %v11830_v52 = vmul.f32 -1.442695, %v16926_v46  ;;  %v597_v53 = vadd.f32 %v16145_v28, %v596_v47 }
 0x177   :  { %v16149_v55 = vpop.eup %16148  ;;  %v531_v56 = vadd.f32 1.0, %v16147_v51 }
 0x178   :  { %16150 = vpow2.f32 %v11830_v52  ;;  %v601_v58 = vsel %vm600_vm6, %v16145_v28, %v597_v53  ;;  %v609_v59 = vmul.f32 %v16149_v55, %v530_v31  ;;  %vm614_vm8 = vweird.f32 %v16149_v55 }
 0x179   :  { %16152 = vrcp.f32 %v531_v56  ;;  %v606_v44 = vsel %vm603_vm7, %v605_v57, %v601_v58  ;;  %vm615_vm10 = vmor %vm613_vm9, %vm614_vm8  ;;  %v634_v11 = vand.u32 2147483648, %v531_v56  ;;  %v632_v15 = vand.u32 2147483647, %v531_v56 }
 0x17a   :  { %669 = vrot.lane.b32.xlu2 %v606_v44, %s16730_s26  ;;  %v610_v60 = vsub.f32 1.0, %v609_v59  ;;  %vm628_vm13 = vweird.f32 %v531_v56  ;;  %v15316_v44 = vld [vmem:[%s19200_s3 + $0x38] sm:$0xff] }
 0x17b   :  { %v635_v20 = vor.u32 1.1754944e-38, %v634_v11  ;;  %vm633_vm15 = vcmp.eq.f32.partialorder %v632_v15, 8.507059e+37  ;;  %898 = vmatpush.bf16.msrb.mxu2 %v15316_v44 }
 0x17c   :  { %v611_v0 = vmul.f32 %v16149_v55, %v610_v60  ;;  %v15315_v60 = vld [vmem:[%s19200_s3 + $0x30] sm:$0xff] }
 0x17e   :  { %v16151_v2 = vpop.eup %16150  ;;  %v612_v3 = vadd.f32 %v16149_v55, %v611_v0  ;;  %v16731_v0 = vmov 0.0|0.0  }
 0x17f   :  { %v16153_v4 = vpop.eup %16152  ;;  %v532_v5 = vadd.f32 1.0, %v16151_v2  ;;  %899 = vmatpush.bf16.msrb.mxu2 %v15315_v60 }
 0x180   :  { %v616_v7 = vsel %vm615_vm10, %v16149_v55, %v612_v3  ;;  %v624_v8 = vmul.f32 %v16153_v4, %v531_v56  ;;  %vm629_vm12 = vweird.f32 %v16153_v4 }
 0x181   :  { %16154 = vrcp.f32 %v532_v5  ;;  %v621_v9 = vsel %vm618_vm11, %v620_v6, %v616_v7  ;;  %vm630_vm14 = vmor %vm628_vm13, %vm629_vm12  ;;  %v649_v28 = vand.u32 2147483648, %v532_v5  ;;  %v647_v31 = vand.u32 2147483647, %v532_v5 }
 0x182   :  { %671 = vrot.lane.b32.xlu2 %v621_v9, %s16730_s26  ;;  %v625_v10 = vsub.f32 1.0, %v624_v8  ;;  %vm643_vm1 = vweird.f32 %v532_v5  ;;  %16156 = vtanh.f32 %v16894_v48  ;;  %900 = vmatmul.bf16.vlgmr.msrb.gmra.mxu2 %v16731_v0  ;;  %v15317_v8 = vld [vmem:[%s19200_s3 + $0x40] sm:$0xff] }
 0x183   :  { %v650_v34 = vor.u32 1.1754944e-38, %v649_v28  ;;  %vm648_vm4 = vcmp.eq.f32.partialorder %v647_v31, 8.507059e+37  ;;  %16158 = vtanh.f32 %v16898_v54 }
 0x184   :  { %v626_v12 = vmul.f32 %v16153_v4, %v625_v10  ;;  %16160 = vtanh.f32 %v16911_v40  ;;  %v16119_v10 = vld [vmem:[#allocation13] ss:$0 sm:$0xff] }
 0x185   :  { %16162 = vtanh.f32 %v16916_v61 }
 0x186   :  { %v627_v16 = vadd.f32 %v16153_v4, %v626_v12  ;;  %16164 = vtanh.f32 %v16902_v63  ;;  %v15320_v63 = vld [vmem:[%s19200_s3 + $0x58] sm:$0xff] }
 0x187   :  { %v16155_v17 = vpop.eup %16154  ;;  %16166 = vtanh.f32 %v16906_v13  ;;  %v15318_v13 = vld [vmem:[%s19200_s3 + $0x48] sm:$0xff]  ;;  %971 = vmatpush.bf16.msrb.mxu3 %v15320_v63 }
 0x188   :  { %v631_v22 = vsel %vm630_vm14, %v16153_v4, %v627_v16  ;;  %v639_v23 = vmul.f32 %v16155_v17, %v532_v5  ;;  %vm644_vm0 = vweird.f32 %v16155_v17  ;;  %v16157_v39 = vpop.eup %16156  ;;  %845 = vmatpush.bf16.msrb.mxu1 %v15318_v13  ;;  %16168 = vtanh.f32 %v16921_v19 }
 0x189   :  { %v636_v25 = vsel %vm633_vm15, %v635_v20, %v631_v22  ;;  %vm645_vm3 = vmor %vm643_vm1, %vm644_vm0  ;;  %v16159_v41 = vpop.eup %16158  ;;  %16170 = vtanh.f32 %v16926_v46 }
 0x18a   :  { %673 = vrot.lane.b32.xlu0 %v636_v25, %s16730_s26  ;;  %v640_v26 = vsub.f32 1.0, %v639_v23  ;;  %v16161_v50 = vpop.eup %16160 }
 0x18b   :  { %v16163_v51 = vpop.eup %16162  ;;  %972 = vmatpush.bf16.msrb.mxu3 %v15319_v62 }
 0x18c   :  { %v641_v29 = vmul.f32 %v16155_v17, %v640_v26  ;;  %v16165_v56 = vpop.eup %16164  ;;  %846 = vmatpush.bf16.msrb.mxu1 %v15317_v8 }
 0x18d   :  { %v16167_v40 = vpop.eup %16166 }
 0x18e   :  { %v642_v32 = vadd.f32 %v16155_v17, %v641_v29  ;;  %v16169_v2 = vpop.eup %16168 }
 0x18f   :  { %v16171_v3 = vpop.eup %16170 }
 0x190   :  { %v646_v35 = vsel %vm645_vm3, %v16155_v17, %v642_v32 }
 0x191   :  { %v651_v37 = vsel %vm648_vm4, %v650_v34, %v646_v35 }
 0x192   :  { %675 = vrot.lane.b32.xlu1 %v651_v37, %s16730_s26 }
 0x1cc   :  { %v662_v38 = vpop.permute.xlu0 %661 }
 0x1cd   :  { %v685_v45 = vmul.f32 %v16157_v39, %v662_v38 }
 0x1d4   :  { %v670_v42 = vpop.permute.xlu2 %669  ;;  %v664_v43 = vpop.permute.xlu0 %663 }
 0x1d5   :  { %v686_v47 = vmul.f32 %v16159_v41, %v664_v43  ;;  %v689_v48 = vmul.f32 %v16161_v50, %v670_v42 }
 0x1d7   :  { %v693_v49 = vpack.c.bf16 %v686_v47, %v685_v45 }
 0x1d9   :  { %11839 = vmatmul.msk.bf16.vlgmr.msrb.gmra.mxu0 %vm306_vm2, %v693_v49 }
 0x1dc   :  { %v672_v52 = vpop.permute.xlu2 %671  ;;  %v666_v53 = vpop.permute.xlu1 %665 }
 0x1dd   :  { %v690_v54 = vmul.f32 %v16163_v51, %v672_v52  ;;  %v687_v58 = vmul.f32 %v16165_v56, %v666_v53 }
 0x1df   :  { %v695_v55 = vpack.c.bf16 %v690_v54, %v689_v48 }
 0x1e4   :  { %v668_v57 = vpop.permute.xlu1 %667 }
 0x1e5   :  { %v688_v59 = vmul.f32 %v16167_v40, %v668_v57 }
 0x1e7   :  { %v694_v61 = vpack.c.bf16 %v688_v59, %v687_v58 }
 0x1e9   :  { %11840 = vmatmul.msk.bf16.gmra.mxu0 %vm306_vm2, %v694_v61 }
 0x1f9   :  { %11841 = vmatmul.msk.bf16.gmra.mxu0 %vm306_vm2, %v695_v55 }
 0x1fc   :  { %v674_v1 = vpop.permute.xlu0 %673 }
 0x1fd   :  { %v691_v5 = vmul.f32 %v16169_v2, %v674_v1 }
 0x204   :  { %v676_v4 = vpop.permute.xlu1 %675 }
 0x205   :  { %v692_v6 = vmul.f32 %v16171_v3, %v676_v4  ;;  %v901_v42 = vpop.f32.mrf.mxu2 }
 0x207   :  { %v696_v7 = vpack.c.bf16 %v692_v6, %v691_v5 }
 0x209   :  { %11842 = vmatmul.msk.bf16.gmra.mxu0 %vm306_vm2, %v696_v7 }
 0x20d   :  { %v903_v45 = vpop.f32.mrf.mxu2 }
 0x256   :  { %v733_v9 = vpop.f32.mrf.mxu0 }
 0x257   :  { %v16964_v11 = vadd.f32 %v16119_v10, %v733_v9 }
 0x259   :  { %v16970_v12 = vadd.f32 %v16964_v11, %v16847_v14 }
 0x25e   :  { %v735_v19 = vpop.f32.mrf.mxu0 }
 0x25f   :  { %v16966_v46 = vadd.f32 %v16119_v10, %v735_v19 }
 0x261   :  { %v16974_v15 = vadd.f32 %v16966_v46, %v16851_v18 }
 0x263   :  { %v808_v16 = vpack.c.bf16 %v16974_v15, %v16970_v12 }
 0x265   :  { %11863 = vmatmul.msk.bf16.vlgmr.msrb.gmra.mxu1 %vm306_vm2, %v808_v16  ;;  %11875 = vmatmul.msk.bf16.gmra.mxu2 %vm306_vm2, %v808_v16 }
 0x266   :  { %v738_v17 = vpop.f32.mrf.mxu0 }
 0x267   :  { %v16980_v20 = vadd.f32 %v16119_v10, %v738_v17 }
 0x269   :  { %v16986_v14 = vadd.f32 %v16980_v20, %v16856_v21 }
 0x26e   :  { %v740_v22 = vpop.f32.mrf.mxu0 }
 0x26f   :  { %v16982_v23 = vadd.f32 %v16119_v10, %v740_v22 }
 0x271   :  { %v16990_v18 = vadd.f32 %v16982_v23, %v16862_v24 }
 0x273   :  { %v809_v25 = vpack.c.bf16 %v16990_v18, %v16986_v14 }
 0x275   :  { %11864 = vmatmul.msk.bf16.gmra.mxu1 %vm306_vm2, %v809_v25  ;;  %11876 = vmatmul.msk.bf16.gmra.mxu2 %vm306_vm2, %v809_v25 }
 0x276   :  { %11886 = vmatmul.msk.bf16.vlgmr.msrb.gmra.mxu3 %vm306_vm2, %v809_v25  ;;  %v743_v26 = vpop.f32.mrf.mxu0 }
 0x277   :  { %v16997_v28 = vadd.f32 %v16119_v10, %v743_v26 }
 0x279   :  { %v17003_v21 = vadd.f32 %v16997_v28, %v16867_v27 }
 0x27e   :  { %v745_v29 = vpop.f32.mrf.mxu0 }
 0x27f   :  { %v16999_v31 = vadd.f32 %v16119_v10, %v745_v29 }
 0x281   :  { %v17007_v24 = vadd.f32 %v16999_v31, %v16873_v30 }
 0x283   :  { %v810_v32 = vpack.c.bf16 %v17007_v24, %v17003_v21 }
 0x285   :  { %11865 = vmatmul.msk.bf16.gmra.mxu1 %vm306_vm2, %v810_v32  ;;  %11877 = vmatmul.msk.bf16.gmra.mxu2 %vm306_vm2, %v810_v32 }
 0x286   :  { %11887 = vmatmul.msk.bf16.gmra.mxu3 %vm306_vm2, %v810_v32  ;;  %v748_v34 = vpop.f32.mrf.mxu0 }
 0x287   :  { %v17014_v35 = vadd.f32 %v16119_v10, %v748_v34 }
 0x289   :  { %v17020_v27 = vadd.f32 %v17014_v35, %v16878_v33  ;;  %v17031_v33 = vld [vmem:[#allocation10 + $0x1] ss:$0 sm:$0xff] }
 0x28e   :  { %v750_v37 = vpop.f32.mrf.mxu0 }
 0x28f   :  { %v17016_v38 = vadd.f32 %v16119_v10, %v750_v37 }
 0x291   :  { %v17024_v30 = vadd.f32 %v17016_v38, %v16884_v36 }
 0x293   :  { %v814_v39 = vpack.c.bf16 %v17024_v30, %v17020_v27 }
 0x295   :  { %11866 = vmatmul.msk.bf16.gmra.mxu1 %vm306_vm2, %v814_v39 }
 0x296   :  { %11888 = vmatmul.msk.bf16.gmra.mxu3 %vm306_vm2, %v814_v39 }
 0x2a6   :  { %988 = vmatmul.bf16.gmra.mxu3 %v16731_v0 }
 0x2e2   :  { %v848_v41 = vpop.f32.mrf.mxu1 }
 0x2e3   :  { %v902_v47 = vadd.f32 %v901_v42, %v848_v41 }
 0x2e8   :  { %v906_v51 = vpop.f32.mrf.mxu2 }
 0x2ea   :  { %v850_v43 = vpop.f32.mrf.mxu1 }
 0x2eb   :  { %v904_v48 = vadd.f32 %v903_v45, %v850_v43 }
 0x2f0   :  { %v908_v58 = vpop.f32.mrf.mxu2 }
 0x2f2   :  { %v853_v50 = vpop.f32.mrf.mxu1 }
 0x2f3   :  { %v907_v44 = vadd.f32 %v906_v51, %v853_v50 }
 0x2f8   :  { %v911_v5 = vpop.f32.mrf.mxu2 }
 0x2f9   :  { %v974_v49 = vpop.f32.mrf.mxu3 }
 0x2fa   :  { %v994_v36 = vadd.f32 %v974_v49, %v902_v47  ;;  %v855_v56 = vpop.f32.mrf.mxu1 }
 0x2fb   :  { %v909_v6 = vadd.f32 %v908_v58, %v855_v56 }
 0x2fc   :  { %v17034_v52 = vadd.f32 %v17031_v33, %v994_v36 }
 0x2fe   :  { %v11889_v53 = vmul.f32 -1.442695, %v17034_v52 }
 0x300   :  { %16172 = vpow2.f32 %v11889_v53  ;;  %v913_v49 = vpop.f32.mrf.mxu2 }
 0x301   :  { %v976_v54 = vpop.f32.mrf.mxu3 }
 0x302   :  { %v995_v55 = vadd.f32 %v976_v54, %v904_v48  ;;  %v858_v1 = vpop.f32.mrf.mxu1 }
 0x303   :  { %v912_v34 = vadd.f32 %v911_v5, %v858_v1 }
 0x304   :  { %v17038_v40 = vadd.f32 %v17031_v33, %v995_v55 }
 0x306   :  { %v16173_v57 = vpop.eup %16172  ;;  %v11890_v59 = vmul.f32 -1.442695, %v17038_v40 }
 0x307   :  { %v1045_v61 = vadd.f32 1.0, %v16173_v57 }
 0x308   :  { %16174 = vpow2.f32 %v11890_v59 }
 0x309   :  { %16176 = vrcp.f32 %v1045_v61  ;;  %v979_v63 = vpop.f32.mrf.mxu3  ;;  %v1064_v19 = vand.u32 2147483648, %v1045_v61  ;;  %v1062_v22 = vand.u32 2147483647, %v1045_v61  ;;  %vm1058_vm6 = vweird.f32 %v1045_v61 }
 0x30a   :  { %v996_v13 = vadd.f32 %v979_v63, %v907_v44  ;;  %v860_v41 = vpop.f32.mrf.mxu1 }
 0x30b   :  { %v1065_v39 = vor.u32 1.1754944e-38, %v1064_v19  ;;  %vm1063_vm8 = vcmp.eq.f32.partialorder %v1062_v22, 8.507059e+37  ;;  %v914_v59 = vadd.f32 %v913_v49, %v860_v41 }
 0x30c   :  { %v17042_v60 = vadd.f32 %v17031_v33, %v996_v13 }
 0x30e   :  { %v16175_v62 = vpop.eup %16174  ;;  %v11891_v2 = vmul.f32 -1.442695, %v17042_v60 }
 0x30f   :  { %v16177_v3 = vpop.eup %16176  ;;  %v1046_v4 = vadd.f32 1.0, %v16175_v62 }
 0x310   :  { %16178 = vpow2.f32 %v11891_v2  ;;  %v1054_v7 = vmul.f32 %v16177_v3, %v1045_v61  ;;  %vm1059_vm5 = vweird.f32 %v16177_v3 }
 0x311   :  { %16180 = vrcp.f32 %v1046_v4  ;;  %v981_v8 = vpop.f32.mrf.mxu3  ;;  %vm1060_vm7 = vmor %vm1058_vm6, %vm1059_vm5  ;;  %v1079_v51 = vand.u32 2147483648, %v1046_v4  ;;  %v1077_v54 = vand.u32 2147483647, %v1046_v4  ;;  %vm1073_vm10 = vweird.f32 %v1046_v4 }
 0x312   :  { %v997_v9 = vadd.f32 %v981_v8, %v909_v6  ;;  %v1055_v10 = vsub.f32 1.0, %v1054_v7  ;;  %v863_v2 = vpop.f32.mrf.mxu1  ;;  %v916_v7 = vpop.f32.mrf.mxu2 }
 0x313   :  { %v1080_v44 = vor.u32 1.1754944e-38, %v1079_v51  ;;  %vm1078_vm12 = vcmp.eq.f32.partialorder %v1077_v54, 8.507059e+37 }
 0x314   :  { %v17046_v16 = vadd.f32 %v17031_v33, %v997_v9  ;;  %v1056_v17 = vmul.f32 %v16177_v3, %v1055_v10 }
 0x316   :  { %v16179_v25 = vpop.eup %16178  ;;  %v11892_v26 = vmul.f32 -1.442695, %v17046_v16  ;;  %v1057_v29 = vadd.f32 %v16177_v3, %v1056_v17 }
 0x317   :  { %v16181_v32 = vpop.eup %16180  ;;  %v1047_v37 = vadd.f32 1.0, %v16179_v25  ;;  %v917_v25 = vadd.f32 %v916_v7, %v863_v2  ;;  %v15322_v2 = vld [vmem:[#allocation11 + $0x18] sm:$0xff] }
 0x318   :  { %16182 = vpow2.f32 %v11892_v26  ;;  %v1061_v42 = vsel %vm1060_vm7, %v16177_v3, %v1057_v29  ;;  %v1069_v43 = vmul.f32 %v16181_v32, %v1046_v4  ;;  %vm1074_vm9 = vweird.f32 %v16181_v32  ;;  %1250 = vmatpush.bf16.msra.mxu0 %v15322_v2 }
 0x319   :  { %16184 = vrcp.f32 %v1047_v37  ;;  %v984_v45 = vpop.f32.mrf.mxu3  ;;  %v1066_v47 = vsel %vm1063_vm8, %v1065_v39, %v1061_v42  ;;  %vm1075_vm11 = vmor %vm1073_vm10, %vm1074_vm9  ;;  %v1094_v6 = vand.u32 2147483648, %v1047_v37  ;;  %v1092_v9 = vand.u32 2147483647, %v1047_v37 }
 0x31a   :  { %v998_v50 = vadd.f32 %v984_v45, %v912_v34  ;;  %1181 = vrot.lane.b32.xlu2 %v1066_v47, %s16730_s26  ;;  %v1070_v36 = vsub.f32 1.0, %v1069_v43  ;;  %vm1088_vm14 = vweird.f32 %v1047_v37  ;;  %v865_v47 = vpop.f32.mrf.mxu1  ;;  %v918_v51 = vpop.f32.mrf.mxu2 }
 0x31b   :  { %v1095_v29 = vor.u32 1.1754944e-38, %v1094_v6  ;;  %vm1093_vm0 = vcmp.eq.f32.partialorder %v1092_v9, 8.507059e+37 }
 0x31c   :  { %v17051_v53 = vadd.f32 %v17031_v33, %v998_v50  ;;  %v1071_v48 = vmul.f32 %v16181_v32, %v1070_v36 }
 0x31e   :  { %v16183_v55 = vpop.eup %16182  ;;  %v11893_v56 = vmul.f32 -1.442695, %v17051_v53  ;;  %v1072_v57 = vadd.f32 %v16181_v32, %v1071_v48 }
 0x31f   :  { %v16185_v58 = vpop.eup %16184  ;;  %v1048_v61 = vadd.f32 1.0, %v16183_v55 }
 0x320   :  { %16186 = vpow2.f32 %v11893_v56  ;;  %v1076_v63 = vsel %vm1075_vm11, %v16181_v32, %v1072_v57  ;;  %v1084_v13 = vmul.f32 %v16185_v58, %v1047_v37  ;;  %vm1089_vm13 = vweird.f32 %v16185_v58 }
 0x321   :  { %16188 = vrcp.f32 %v1048_v61  ;;  %v986_v62 = vpop.f32.mrf.mxu3  ;;  %v1081_v1 = vsel %vm1078_vm12, %v1080_v44, %v1076_v63  ;;  %vm1090_vm15 = vmor %vm1088_vm14, %vm1089_vm13  ;;  %v1109_v45 = vand.u32 2147483648, %v1048_v61  ;;  %v1107_v50 = vand.u32 2147483647, %v1048_v61 }
 0x322   :  { %v999_v3 = vadd.f32 %v986_v62, %v914_v59  ;;  %1183 = vrot.lane.b32.xlu0 %v1081_v1, %s16730_s26  ;;  %v1085_v5 = vsub.f32 1.0, %v1084_v13  ;;  %vm1103_vm3 = vweird.f32 %v1048_v61  ;;  %v919_v56 = vadd.f32 %v918_v51, %v865_v47 }
 0x323   :  { %vm1108_vm5 = vcmp.eq.f32.partialorder %v1107_v50, 8.507059e+37 }
 0x324   :  { %v17056_v4 = vadd.f32 %v17031_v33, %v999_v3  ;;  %v1086_v8 = vmul.f32 %v16185_v58, %v1085_v5 }
 0x326   :  { %v16187_v10 = vpop.eup %16186  ;;  %v11894_v19 = vmul.f32 -1.442695, %v17056_v4  ;;  %v1087_v17 = vadd.f32 %v16185_v58, %v1086_v8 }
 0x327   :  { %v16189_v22 = vpop.eup %16188  ;;  %v1049_v26 = vadd.f32 1.0, %v16187_v10 }
 0x328   :  { %16190 = vpow2.f32 %v11894_v19  ;;  %v1091_v32 = vsel %vm1090_vm15, %v16185_v58, %v1087_v17  ;;  %v1099_v34 = vmul.f32 %v16189_v22, %v1048_v61  ;;  %vm1104_vm1 = vweird.f32 %v16189_v22 }
 0x329   :  { %16192 = vrcp.f32 %v1049_v26  ;;  %v989_v39 = vpop.f32.mrf.mxu3  ;;  %v1096_v41 = vsel %vm1093_vm0, %v1095_v29, %v1091_v32  ;;  %vm1105_vm4 = vmor %vm1103_vm3, %vm1104_vm1  ;;  %v1110_v58 = vor.u32 1.1754944e-38, %v1109_v45  ;;  %v1124_v3 = vand.u32 2147483648, %v1049_v26 }
 0x32a   :  { %v1000_v42 = vadd.f32 %v989_v39, %v917_v25  ;;  %1185 = vrot.lane.b32.xlu1 %v1096_v41, %s16730_s26  ;;  %v1100_v43 = vsub.f32 1.0, %v1099_v34  ;;  %v1122_v6 = vand.u32 2147483647, %v1049_v26  ;;  %vm1118_vm7 = vweird.f32 %v1049_v26 }
 0x32b   :  { %v1125_v17 = vor.u32 1.1754944e-38, %v1124_v3 }
 0x32c   :  { %v17061_v37 = vadd.f32 %v17031_v33, %v1000_v42  ;;  %v1101_v49 = vmul.f32 %v16189_v22, %v1100_v43  ;;  %vm1123_vm9 = vcmp.eq.f32.partialorder %v1122_v6, 8.507059e+37 }
 0x32e   :  { %v16191_v36 = vpop.eup %16190  ;;  %v11895_v48 = vmul.f32 -1.442695, %v17061_v37  ;;  %v1102_v54 = vadd.f32 %v16189_v22, %v1101_v49 }
 0x32f   :  { %v16193_v55 = vpop.eup %16192  ;;  %v1050_v57 = vadd.f32 1.0, %v16191_v36 }
 0x330   :  { %16194 = vpow2.f32 %v11895_v48  ;;  %v1106_v59 = vsel %vm1105_vm4, %v16189_v22, %v1102_v54  ;;  %v1114_v44 = vmul.f32 %v16193_v55, %v1049_v26  ;;  %vm1119_vm6 = vweird.f32 %v16193_v55 }
 0x331   :  { %16196 = vrcp.f32 %v1050_v57  ;;  %v991_v63 = vpop.f32.mrf.mxu3  ;;  %v1111_v13 = vsel %vm1108_vm5, %v1110_v58, %v1106_v59  ;;  %vm1120_vm8 = vmor %vm1118_vm7, %vm1119_vm6  ;;  %v1139_v32 = vand.u32 2147483648, %v1050_v57  ;;  %v1137_v39 = vand.u32 2147483647, %v1050_v57 }
 0x332   :  { %v1001_v62 = vadd.f32 %v991_v63, %v919_v56  ;;  %1187 = vrot.lane.b32.xlu2 %v1111_v13, %s16730_s26  ;;  %v1115_v1 = vsub.f32 1.0, %v1114_v44  ;;  %vm1133_vm11 = vweird.f32 %v1050_v57 }
 0x333   :  { %v1140_v45 = vor.u32 1.1754944e-38, %v1139_v32  ;;  %vm1138_vm13 = vcmp.eq.f32.partialorder %v1137_v39, 8.507059e+37 }
 0x334   :  { %v17066_v61 = vadd.f32 %v17031_v33, %v1001_v62  ;;  %v1116_v5 = vmul.f32 %v16193_v55, %v1115_v1 }
 0x336   :  { %v16195_v7 = vpop.eup %16194  ;;  %v11896_v8 = vmul.f32 -1.442695, %v17066_v61  ;;  %v1117_v9 = vadd.f32 %v16193_v55, %v1116_v5 }
 0x337   :  { %v16197_v10 = vpop.eup %16196  ;;  %v1051_v19 = vadd.f32 1.0, %v16195_v7  ;;  %v15321_v7 = vld [vmem:[#allocation11 + $0x10] sm:$0xff] }
 0x338   :  { %16198 = vpow2.f32 %v11896_v8  ;;  %v1121_v22 = vsel %vm1120_vm8, %v16193_v55, %v1117_v9  ;;  %v1129_v25 = vmul.f32 %v16197_v10, %v1050_v57  ;;  %vm1134_vm10 = vweird.f32 %v16197_v10  ;;  %1251 = vmatpush.bf16.msra.mxu0 %v15321_v7 }
 0x339   :  { %16200 = vrcp.f32 %v1051_v19  ;;  %v1126_v33 = vsel %vm1123_vm9, %v1125_v17, %v1121_v22  ;;  %vm1135_vm12 = vmor %vm1133_vm11, %vm1134_vm10  ;;  %v1154_v51 = vand.u32 2147483648, %v1051_v19  ;;  %v1152_v54 = vand.u32 2147483647, %v1051_v19 }
 0x33a   :  { %1189 = vrot.lane.b32.xlu0 %v1126_v33, %s16730_s26  ;;  %v1130_v29 = vsub.f32 1.0, %v1129_v25  ;;  %vm1148_vm15 = vweird.f32 %v1051_v19 }
 0x33b   :  { %v1155_v57 = vor.u32 1.1754944e-38, %v1154_v51  ;;  %vm1153_vm1 = vcmp.eq.f32.partialorder %v1152_v54, 8.507059e+37 }
 0x33c   :  { %v1131_v34 = vmul.f32 %v16197_v10, %v1130_v29 }
 0x33e   :  { %v16199_v41 = vpop.eup %16198  ;;  %v1132_v42 = vadd.f32 %v16197_v10, %v1131_v34 }
 0x33f   :  { %v16201_v26 = vpop.eup %16200  ;;  %v1052_v43 = vadd.f32 1.0, %v16199_v41  ;;  %v15326_v41 = vld [vmem:[%s19200_s3 + $0x78] sm:$0xff] }
 0x340   :  { %v1136_v47 = vsel %vm1135_vm12, %v16197_v10, %v1132_v42  ;;  %v1144_v49 = vmul.f32 %v16201_v26, %v1051_v19  ;;  %vm1149_vm14 = vweird.f32 %v16201_v26  ;;  %v15323_v42 = vld [vmem:[%s19200_s3 + $0x60] sm:$0xff]  ;;  %1365 = vmatpush.bf16.msra.mxu1 %v15326_v41 }
 0x341   :  { %16202 = vrcp.f32 %v1052_v43  ;;  %v1141_v50 = vsel %vm1138_vm13, %v1140_v45, %v1136_v47  ;;  %vm1150_vm0 = vmor %vm1148_vm15, %vm1149_vm14  ;;  %v1169_v13 = vand.u32 2147483648, %v1052_v43  ;;  %v1167_v1 = vand.u32 2147483647, %v1052_v43 }
 0x342   :  { %1191 = vrot.lane.b32.xlu1 %v1141_v50, %s16730_s26  ;;  %v1145_v36 = vsub.f32 1.0, %v1144_v49  ;;  %vm1163_vm4 = vweird.f32 %v1052_v43  ;;  %16204 = vtanh.f32 %v17034_v52 }
 0x343   :  { %v1170_v3 = vor.u32 1.1754944e-38, %v1169_v13  ;;  %vm1168_vm6 = vcmp.eq.f32.partialorder %v1167_v1, 8.507059e+37  ;;  %16206 = vtanh.f32 %v17038_v40 }
 0x344   :  { %v1146_v48 = vmul.f32 %v16201_v26, %v1145_v36  ;;  %16208 = vtanh.f32 %v17042_v60  ;;  %v15324_v60 = vld [vmem:[%s19200_s3 + $0x68] sm:$0xff] }
 0x345   :  { %16210 = vtanh.f32 %v17046_v16  ;;  %v15328_v16 = vld [vmem:[%s19200_s3 + $0x88] sm:$0xff]  ;;  %1418 = vmatpush.bf16.msra.mxu2 %v15324_v60 }
 0x346   :  { %v1147_v55 = vadd.f32 %v16201_v26, %v1146_v48  ;;  %1491 = vmatpush.bf16.msra.mxu3 %v15328_v16  ;;  %16212 = vtanh.f32 %v17051_v53  ;;  %v17147_v16 = vld [vmem:[#allocation10 + $0x2] ss:$0 sm:$0xff] }
 0x347   :  { %v16203_v56 = vpop.eup %16202  ;;  %16214 = vtanh.f32 %v17056_v4 }
 0x348   :  { %v1151_v58 = vsel %vm1150_vm0, %v16201_v26, %v1147_v55  ;;  %v1159_v59 = vmul.f32 %v16203_v56, %v1052_v43  ;;  %vm1164_vm3 = vweird.f32 %v16203_v56  ;;  %v16205_v9 = vpop.eup %16204  ;;  %16216 = vtanh.f32 %v17061_v37  ;;  %v15327_v37 = vld [vmem:[%s19200_s3 + $0x80] sm:$0xff] }
 0x349   :  { %v1156_v44 = vsel %vm1153_vm1, %v1155_v57, %v1151_v58  ;;  %vm1165_vm5 = vmor %vm1163_vm4, %vm1164_vm3  ;;  %v16207_v10 = vpop.eup %16206  ;;  %1419 = vmatpush.bf16.msra.mxu2 %v15323_v42  ;;  %16218 = vtanh.f32 %v17066_v61  ;;  %v15325_v57 = vld [vmem:[%s19200_s3 + $0x70] sm:$0xff]  ;;  %v16121_v58 = vld [vmem:[#allocation13 + $0x1] ss:$0 sm:$0xff]  ;;  %s16732_s3 = smov 32  }
 0x34a   :  { %1193 = vrot.lane.b32.xlu2 %v1156_v44, %s16730_s26  ;;  %v1160_v63 = vsub.f32 1.0, %v1159_v59  ;;  %v16209_v29 = vpop.eup %16208  ;;  %1366 = vmatpush.bf16.msra.mxu1 %v15325_v57 }
 0x34b   :  { %v16211_v32 = vpop.eup %16210  ;;  %1492 = vmatpush.bf16.msra.mxu3 %v15327_v37 }
 0x34c   :  { %v1161_v62 = vmul.f32 %v16203_v56, %v1160_v63  ;;  %1420 = vmatmul.bf16.vlgmr.msra.gmra.mxu2 %v16731_v0  ;;  %v16213_v43 = vpop.eup %16212 }
 0x34d   :  { %v16215_v45 = vpop.eup %16214 }
 0x34e   :  { %v1162_v2 = vadd.f32 %v16203_v56, %v1161_v62  ;;  %v16217_v53 = vpop.eup %16216 }
 0x34f   :  { %v16219_v4 = vpop.eup %16218 }
 0x350   :  { %v1166_v5 = vsel %vm1165_vm5, %v16203_v56, %v1162_v2 }
 0x351   :  { %v1171_v6 = vsel %vm1168_vm6, %v1170_v3, %v1166_v5 }
 0x352   :  { %1195 = vrot.lane.b32.xlu0 %v1171_v6, %s16730_s26 }
 0x35c   :  { %1425 = vmatmul.bf16.gmra.mxu2 %v16731_v0 }
 0x374   :  { %v1182_v8 = vpop.permute.xlu2 %1181 }
 0x375   :  { %v1205_v17 = vmul.f32 %v16205_v9, %v1182_v8 }
 0x38c   :  { %v1188_v33 = vpop.permute.xlu2 %1187 }
 0x38d   :  { %v1208_v52 = vmul.f32 %v16211_v32, %v1188_v33 }
 0x394   :  { %v1184_v19 = vpop.permute.xlu0 %1183 }
 0x395   :  { %v1206_v22 = vmul.f32 %v16207_v10, %v1184_v19 }
 0x397   :  { %v1213_v25 = vpack.c.bf16 %v1206_v22, %v1205_v17 }
 0x399   :  { %11905 = vmatmul.msk.bf16.vlgmr.msra.gmra.mxu0 %vm306_vm2, %v1213_v25 }
 0x39c   :  { %v1186_v34 = vpop.permute.xlu1 %1185 }
 0x39d   :  { %v1207_v39 = vmul.f32 %v16209_v29, %v1186_v34 }
 0x39f   :  { %v1214_v40 = vpack.c.bf16 %v1208_v52, %v1207_v39 }
 0x3a4   :  { %v1194_v51 = vpop.permute.xlu2 %1193 }
 0x3a5   :  { %v1211_v54 = vmul.f32 %v16217_v53, %v1194_v51 }
 0x3a9   :  { %11906 = vmatmul.msk.bf16.gmra.mxu0 %vm306_vm2, %v1214_v40 }
 0x3ac   :  { %v1190_v26 = vpop.permute.xlu0 %1189 }
 0x3ad   :  { %v1209_v49 = vmul.f32 %v16213_v43, %v1190_v26 }
 0x3b4   :  { %v1192_v47 = vpop.permute.xlu1 %1191 }
 0x3b5   :  { %v1210_v50 = vmul.f32 %v16215_v45, %v1192_v47 }
 0x3b7   :  { %v1215_v36 = vpack.c.bf16 %v1210_v50, %v1209_v49 }
 0x3b9   :  { %11907 = vmatmul.msk.bf16.gmra.mxu0 %vm306_vm2, %v1215_v36 }
 0x3c4   :  { %v1196_v48 = vpop.permute.xlu0 %1195 }
 0x3c5   :  { %v1212_v55 = vmul.f32 %v16219_v4, %v1196_v48 }
 0x3c7   :  { %v1216_v56 = vpack.c.bf16 %v1212_v55, %v1211_v54 }
 0x3c9   :  { %11908 = vmatmul.msk.bf16.gmra.mxu0 %vm306_vm2, %v1216_v56 }
 0x3cf   :  { %v1421_v52 = vpop.f32.mrf.mxu2 }
 0x3d7   :  { %v1423_v40 = vpop.f32.mrf.mxu2 }
 0x416   :  { %v1253_v61 = vpop.f32.mrf.mxu0 }
 0x417   :  { %v17105_v59 = vadd.f32 %v16121_v58, %v1253_v61 }
 0x419   :  { %v1273_v13 = vadd.f32 %v17105_v59, %v16970_v12 }
 0x41e   :  { %v1255_v44 = vpop.f32.mrf.mxu0 }
 0x41f   :  { %v17107_v63 = vadd.f32 %v16121_v58, %v1255_v44 }
 0x421   :  { %v1274_v62 = vadd.f32 %v17107_v63, %v16974_v15 }
 0x423   :  { %v1329_v1 = vpack.c.bf16 %v1274_v62, %v1273_v13 }
 0x425   :  { %11929 = vmatmul.msk.bf16.vlgmr.msra.gmra.mxu1 %vm306_vm2, %v1329_v1  ;;  %11941 = vmatmul.msk.bf16.gmra.mxu2 %vm306_vm2, %v1329_v1 }
 0x426   :  { %v1258_v2 = vpop.f32.mrf.mxu0 }
 0x427   :  { %v17115_v3 = vadd.f32 %v16121_v58, %v1258_v2 }
 0x429   :  { %v1275_v7 = vadd.f32 %v17115_v3, %v16986_v14 }
 0x42e   :  { %v1260_v5 = vpop.f32.mrf.mxu0 }
 0x42f   :  { %v17117_v6 = vadd.f32 %v16121_v58, %v1260_v5 }
 0x431   :  { %v1276_v12 = vadd.f32 %v17117_v6, %v16990_v18 }
 0x433   :  { %v1330_v8 = vpack.c.bf16 %v1276_v12, %v1275_v7 }
 0x435   :  { %11930 = vmatmul.msk.bf16.gmra.mxu1 %vm306_vm2, %v1330_v8  ;;  %11942 = vmatmul.msk.bf16.gmra.mxu2 %vm306_vm2, %v1330_v8 }
 0x436   :  { %v1263_v15 = vpop.f32.mrf.mxu0 }
 0x437   :  { %v17125_v9 = vadd.f32 %v16121_v58, %v1263_v15 }
 0x439   :  { %v1277_v17 = vadd.f32 %v17125_v9, %v17003_v21 }
 0x43e   :  { %v1265_v10 = vpop.f32.mrf.mxu0 }
 0x43f   :  { %v17127_v19 = vadd.f32 %v16121_v58, %v1265_v10 }
 0x441   :  { %v1278_v14 = vadd.f32 %v17127_v19, %v17007_v24 }
 0x443   :  { %v1333_v22 = vpack.c.bf16 %v1278_v14, %v1277_v17 }
 0x445   :  { %11931 = vmatmul.msk.bf16.gmra.mxu1 %vm306_vm2, %v1333_v22  ;;  %11951 = vmatmul.msk.bf16.vlgmr.msra.gmra.mxu3 %vm306_vm2, %v1333_v22 }
 0x446   :  { %v1268_v18 = vpop.f32.mrf.mxu0 }
 0x447   :  { %v17135_v25 = vadd.f32 %v16121_v58, %v1268_v18 }
 0x449   :  { %v1279_v32 = vadd.f32 %v17135_v25, %v17020_v27 }
 0x44e   :  { %v1270_v33 = vpop.f32.mrf.mxu0 }
 0x44f   :  { %v17137_v29 = vadd.f32 %v16121_v58, %v1270_v33 }
 0x451   :  { %v1280_v21 = vadd.f32 %v17137_v29, %v17024_v30  ;;  %v1426_v30 = vpop.f32.mrf.mxu2 }
 0x453   :  { %v1334_v34 = vpack.c.bf16 %v1280_v21, %v1279_v32 }
 0x455   :  { %11932 = vmatmul.msk.bf16.gmra.mxu1 %vm306_vm2, %v1334_v34  ;;  %11952 = vmatmul.msk.bf16.gmra.mxu3 %vm306_vm2, %v1334_v34 }
 0x459   :  { %v1428_v51 = vpop.f32.mrf.mxu2 }
 0x465   :  { %1503 = vmatmul.bf16.gmra.mxu3 %v16731_v0 }
 0x475   :  { %1508 = vmatmul.bf16.gmra.mxu3 %v16731_v0 }
 0x4a2   :  { %v1368_v24 = vpop.f32.mrf.mxu1 }
 0x4a3   :  { %v1422_v60 = vadd.f32 %v1421_v52, %v1368_v24 }
 0x4a8   :  { %v1431_v13 = vpop.f32.mrf.mxu2 }
 0x4aa   :  { %v1370_v39 = vpop.f32.mrf.mxu1 }
 0x4ab   :  { %v1424_v45 = vadd.f32 %v1423_v40, %v1370_v39 }
 0x4b2   :  { %v1373_v41 = vpop.f32.mrf.mxu1 }
 0x4b3   :  { %v1427_v48 = vadd.f32 %v1426_v30, %v1373_v41 }
 0x4ba   :  { %v1375_v49 = vpop.f32.mrf.mxu1 }
 0x4bb   :  { %v1429_v62 = vadd.f32 %v1428_v51, %v1375_v49 }
 0x4c2   :  { %v1378_v37 = vpop.f32.mrf.mxu1 }
 0x4c3   :  { %v1432_v33 = vadd.f32 %v1431_v13, %v1378_v37 }
 0x4c8   :  { %v1494_v27 = vpop.f32.mrf.mxu3 }
 0x4c9   :  { %v1514_v42 = vadd.f32 %v1494_v27, %v1422_v60  ;;  %v1433_v60 = vpop.f32.mrf.mxu2 }
 0x4ca   :  { %v1380_v34 = vpop.f32.mrf.mxu1 }
 0x4cb   :  { %v17150_v26 = vadd.f32 %v17147_v16, %v1514_v42  ;;  %v1434_v51 = vadd.f32 %v1433_v60, %v1380_v34 }
 0x4cd   :  { %v11953_v43 = vmul.f32 -1.442695, %v17150_v26 }
 0x4cf   :  { %16220 = vpow2.f32 %v11953_v43 }
 0x4d0   :  { %v1496_v47 = vpop.f32.mrf.mxu3 }
 0x4d1   :  { %v1515_v0 = vadd.f32 %v1496_v47, %v1424_v45 }
 0x4d2   :  { %v1383_v37 = vpop.f32.mrf.mxu1 }
 0x4d3   :  { %v17154_v50 = vadd.f32 %v17147_v16, %v1515_v0 }
 0x4d5   :  { %v16221_v36 = vpop.eup %16220  ;;  %v11954_v53 = vmul.f32 -1.442695, %v17154_v50 }
 0x4d6   :  { %v1565_v4 = vadd.f32 1.0, %v16221_v36 }
 0x4d7   :  { %16222 = vpow2.f32 %v11954_v53 }
 0x4d8   :  { %16224 = vrcp.f32 %v1565_v4  ;;  %v1499_v54 = vpop.f32.mrf.mxu3  ;;  %v1584_v12 = vand.u32 2147483648, %v1565_v4  ;;  %v1582_v10 = vand.u32 2147483647, %v1565_v4  ;;  %vm1578_vm8 = vweird.f32 %v1565_v4 }
 0x4d9   :  { %v1516_v55 = vadd.f32 %v1499_v54, %v1427_v48 }
 0x4da   :  { %v1585_v21 = vor.u32 1.1754944e-38, %v1584_v12  ;;  %vm1583_vm10 = vcmp.eq.f32.partialorder %v1582_v10, 8.507059e+37 }
 0x4db   :  { %v17158_v56 = vadd.f32 %v17147_v16, %v1516_v55 }
 0x4dd   :  { %v16223_v57 = vpop.eup %16222  ;;  %v11955_v61 = vmul.f32 -1.442695, %v17158_v56 }
 0x4de   :  { %v16225_v58 = vpop.eup %16224  ;;  %v1566_v44 = vadd.f32 1.0, %v16223_v57 }
 0x4df   :  { %16226 = vpow2.f32 %v11955_v61  ;;  %v1574_v1 = vmul.f32 %v16225_v58, %v1565_v4  ;;  %vm1579_vm7 = vweird.f32 %v16225_v58 }
 0x4e0   :  { %16228 = vrcp.f32 %v1566_v44  ;;  %v1501_v2 = vpop.f32.mrf.mxu3  ;;  %vm1580_vm9 = vmor %vm1578_vm8, %vm1579_vm7  ;;  %v1599_v42 = vand.u32 2147483648, %v1566_v44  ;;  %v1597_v45 = vand.u32 2147483647, %v1566_v44  ;;  %vm1593_vm12 = vweird.f32 %v1566_v44 }
 0x4e1   :  { %v1517_v5 = vadd.f32 %v1501_v2, %v1429_v62  ;;  %v1575_v7 = vsub.f32 1.0, %v1574_v1  ;;  %v1436_v62 = vpop.f32.mrf.mxu2 }
 0x4e2   :  { %v1600_v4 = vor.u32 1.1754944e-38, %v1599_v42  ;;  %vm1598_vm14 = vcmp.eq.f32.partialorder %v1597_v45, 8.507059e+37  ;;  %v1437_v10 = vadd.f32 %v1436_v62, %v1383_v37 }
 0x4e3   :  { %v17162_v8 = vadd.f32 %v17147_v16, %v1517_v5  ;;  %v1576_v15 = vmul.f32 %v16225_v58, %v1575_v7 }
 0x4e5   :  { %v16227_v17 = vpop.eup %16226  ;;  %v11956_v14 = vmul.f32 -1.442695, %v17162_v8  ;;  %v1577_v22 = vadd.f32 %v16225_v58, %v1576_v15 }
 0x4e6   :  { %v16229_v18 = vpop.eup %16228  ;;  %v1567_v32 = vadd.f32 1.0, %v16227_v17 }
 0x4e7   :  { %16230 = vpow2.f32 %v11956_v14  ;;  %v1581_v24 = vsel %vm1580_vm9, %v16225_v58, %v1577_v22  ;;  %v1589_v52 = vmul.f32 %v16229_v18, %v1566_v44  ;;  %vm1594_vm11 = vweird.f32 %v16229_v18 }
 0x4e8   :  { %16232 = vrcp.f32 %v1567_v32  ;;  %v1504_v39 = vpop.f32.mrf.mxu3  ;;  %v1586_v40 = vsel %vm1583_vm10, %v1585_v21, %v1581_v24  ;;  %vm1595_vm13 = vmor %vm1593_vm12, %vm1594_vm11  ;;  %v1614_v13 = vand.u32 2147483648, %v1567_v32  ;;  %v1612_v2 = vand.u32 2147483647, %v1567_v32 }
 0x4e9   :  { %v1518_v27 = vadd.f32 %v1504_v39, %v1432_v33  ;;  %1701 = vrot.lane.b32.xlu1 %v1586_v40, %s16730_s26  ;;  %v1590_v41 = vsub.f32 1.0, %v1589_v52  ;;  %vm1608_vm0 = vweird.f32 %v1567_v32  ;;  %v1385_v39 = vpop.f32.mrf.mxu1 }
 0x4ea   :  { %v1615_v14 = vor.u32 1.1754944e-38, %v1614_v13  ;;  %vm1613_vm3 = vcmp.eq.f32.partialorder %v1612_v2, 8.507059e+37  ;;  %v15329_v13 = vld [vmem:[#allocation11 + $0x20] sm:$0xff] }
 0x4eb   :  { %v17167_v30 = vadd.f32 %v17147_v16, %v1518_v27  ;;  %v1591_v43 = vmul.f32 %v16229_v18, %v1590_v41  ;;  %v1438_v41 = vpop.f32.mrf.mxu2 }
 0x4ed   :  { %v16231_v47 = vpop.eup %16230  ;;  %v11957_v0 = vmul.f32 -1.442695, %v17167_v30  ;;  %v1592_v49 = vadd.f32 %v16229_v18, %v1591_v43 }
 0x4ee   :  { %v16233_v36 = vpop.eup %16232  ;;  %v1568_v53 = vadd.f32 1.0, %v16231_v47  ;;  %v1439_v47 = vadd.f32 %v1438_v41, %v1385_v39 }
 0x4ef   :  { %16234 = vpow2.f32 %v11957_v0  ;;  %v1596_v48 = vsel %vm1595_vm13, %v16229_v18, %v1592_v49  ;;  %v1604_v54 = vmul.f32 %v16233_v36, %v1567_v32  ;;  %vm1609_vm15 = vweird.f32 %v16233_v36 }
 0x4f0   :  { %16236 = vrcp.f32 %v1568_v53  ;;  %v1506_v55 = vpop.f32.mrf.mxu3  ;;  %v1601_v57 = vsel %vm1598_vm14, %v1600_v4, %v1596_v48  ;;  %vm1610_vm1 = vmor %vm1608_vm0, %vm1609_vm15  ;;  %v1629_v52 = vand.u32 2147483648, %v1568_v53  ;;  %v1627_v60 = vand.u32 2147483647, %v1568_v53 }
 0x4f1   :  { %v1519_v61 = vadd.f32 %v1506_v55, %v1434_v51  ;;  %1703 = vrot.lane.b32.xlu2 %v1601_v57, %s16730_s26  ;;  %v1605_v58 = vsub.f32 1.0, %v1604_v54  ;;  %vm1623_vm5 = vweird.f32 %v1568_v53  ;;  %v15330_v57 = vld [vmem:[#allocation11 + $0x28] sm:$0xff] }
 0x4f2   :  { %v1630_v49 = vor.u32 1.1754944e-38, %v1629_v52  ;;  %vm1628_vm7 = vcmp.eq.f32.partialorder %v1627_v60, 8.507059e+37  ;;  %1770 = vmatpush.bf16.msrb.mxu0 %v15330_v57 }
 0x4f3   :  { %v17172_v44 = vadd.f32 %v17147_v16, %v1519_v61  ;;  %v1606_v1 = vmul.f32 %v16233_v36, %v1605_v58 }
 0x4f5   :  { %v16235_v5 = vpop.eup %16234  ;;  %v11958_v7 = vmul.f32 -1.442695, %v17172_v44  ;;  %v1607_v12 = vadd.f32 %v16233_v36, %v1606_v1 }
 0x4f6   :  { %v16237_v15 = vpop.eup %16236  ;;  %v1569_v17 = vadd.f32 1.0, %v16235_v5  ;;  %1771 = vmatpush.bf16.msrb.mxu0 %v15329_v13 }
 0x4f7   :  { %16238 = vpow2.f32 %v11958_v7  ;;  %v1611_v22 = vsel %vm1610_vm1, %v16233_v36, %v1607_v12  ;;  %v1619_v18 = vmul.f32 %v16237_v15, %v1568_v53  ;;  %vm1624_vm4 = vweird.f32 %v16237_v15 }
 0x4f8   :  { %16240 = vrcp.f32 %v1569_v17  ;;  %v1509_v33 = vpop.f32.mrf.mxu3  ;;  %v1616_v21 = vsel %vm1613_vm3, %v1615_v14, %v1611_v22  ;;  %vm1625_vm6 = vmor %vm1623_vm5, %vm1624_vm4  ;;  %v1644_v37 = vand.u32 2147483648, %v1569_v17  ;;  %v1642_v58 = vand.u32 2147483647, %v1569_v17 }
 0x4f9   :  { %v1520_v34 = vadd.f32 %v1509_v33, %v1437_v10  ;;  %1705 = vrot.lane.b32.xlu0 %v1616_v21, %s16730_s26  ;;  %v1620_v24 = vsub.f32 1.0, %v1619_v18  ;;  %vm1638_vm9 = vweird.f32 %v1569_v17 }
 0x4fa   :  { %v1645_v12 = vor.u32 1.1754944e-38, %v1644_v37  ;;  %vm1643_vm11 = vcmp.eq.f32.partialorder %v1642_v58, 8.507059e+37 }
 0x4fb   :  { %v17177_v32 = vadd.f32 %v17147_v16, %v1520_v34  ;;  %v1621_v40 = vmul.f32 %v16237_v15, %v1620_v24 }
 0x4fd   :  { %v16239_v27 = vpop.eup %16238  ;;  %v11959_v42 = vmul.f32 -1.442695, %v17177_v32  ;;  %v1622_v43 = vadd.f32 %v16237_v15, %v1621_v40 }
 0x4fe   :  { %v16241_v45 = vpop.eup %16240  ;;  %v1570_v0 = vadd.f32 1.0, %v16239_v27 }
 0x4ff   :  { %16242 = vpow2.f32 %v11959_v42  ;;  %v1626_v36 = vsel %vm1625_vm6, %v16237_v15, %v1622_v43  ;;  %v1634_v51 = vmul.f32 %v16241_v45, %v1569_v17  ;;  %vm1639_vm8 = vweird.f32 %v16241_v45 }
 0x500   :  { %16244 = vrcp.f32 %v1570_v0  ;;  %v1511_v4 = vpop.f32.mrf.mxu3  ;;  %v1631_v48 = vsel %vm1628_vm7, %v1630_v49, %v1626_v36  ;;  %vm1640_vm10 = vmor %vm1638_vm9, %vm1639_vm8  ;;  %v1659_v22 = vand.u32 2147483648, %v1570_v0  ;;  %v1657_v33 = vand.u32 2147483647, %v1570_v0 }
 0x501   :  { %v1521_v54 = vadd.f32 %v1511_v4, %v1439_v47  ;;  %1707 = vrot.lane.b32.xlu1 %v1631_v48, %s16730_s26  ;;  %v1635_v55 = vsub.f32 1.0, %v1634_v51  ;;  %vm1653_vm13 = vweird.f32 %v1570_v0 }
 0x502   :  { %v1660_v52 = vor.u32 1.1754944e-38, %v1659_v22  ;;  %vm1658_vm15 = vcmp.eq.f32.partialorder %v1657_v33, 8.507059e+37 }
 0x503   :  { %v17182_v53 = vadd.f32 %v17147_v16, %v1521_v54  ;;  %v1636_v61 = vmul.f32 %v16241_v45, %v1635_v55 }
 0x505   :  { %v16243_v62 = vpop.eup %16242  ;;  %v11960_v1 = vmul.f32 -1.442695, %v17182_v53  ;;  %v1637_v2 = vadd.f32 %v16241_v45, %v1636_v61 }
 0x506   :  { %v16245_v5 = vpop.eup %16244  ;;  %v1571_v7 = vadd.f32 1.0, %v16243_v62 }
 0x507   :  { %16246 = vpow2.f32 %v11960_v1  ;;  %v1641_v15 = vsel %vm1640_vm10, %v16241_v45, %v1637_v2  ;;  %v1649_v10 = vmul.f32 %v16245_v5, %v1570_v0  ;;  %vm1654_vm12 = vweird.f32 %v16245_v5 }
 0x508   :  { %16248 = vrcp.f32 %v1571_v7  ;;  %v1646_v16 = vsel %vm1643_vm11, %v1645_v12, %v1641_v15  ;;  %vm1655_vm14 = vmor %vm1653_vm13, %vm1654_vm12  ;;  %v1674_v41 = vand.u32 2147483648, %v1571_v7  ;;  %v1672_v43 = vand.u32 2147483647, %v1571_v7 }
 0x509   :  { %1709 = vrot.lane.b32.xlu2 %v1646_v16, %s16730_s26  ;;  %v1650_v14 = vsub.f32 1.0, %v1649_v10  ;;  %vm1668_vm1 = vweird.f32 %v1571_v7 }
 0x50a   :  { %v1675_v0 = vor.u32 1.1754944e-38, %v1674_v41  ;;  %vm1673_vm4 = vcmp.eq.f32.partialorder %v1672_v43, 8.507059e+37 }
 0x50b   :  { %v1651_v18 = vmul.f32 %v16245_v5, %v1650_v14 }
 0x50d   :  { %v16247_v21 = vpop.eup %16246  ;;  %v1652_v17 = vadd.f32 %v16245_v5, %v1651_v18 }
 0x50e   :  { %v16249_v34 = vpop.eup %16248  ;;  %v1572_v24 = vadd.f32 1.0, %v16247_v21 }
 0x50f   :  { %v1656_v39 = vsel %vm1655_vm14, %v16245_v5, %v1652_v17  ;;  %v1664_v40 = vmul.f32 %v16249_v34, %v1571_v7  ;;  %vm1669_vm0 = vweird.f32 %v16249_v34 }
 0x510   :  { %16250 = vrcp.f32 %v1572_v24  ;;  %v1661_v60 = vsel %vm1658_vm15, %v1660_v52, %v1656_v39  ;;  %vm1670_vm3 = vmor %vm1668_vm1, %vm1669_vm0  ;;  %v1689_v48 = vand.u32 2147483648, %v1572_v24  ;;  %v1687_v55 = vand.u32 2147483647, %v1572_v24 }
 0x511   :  { %1711 = vrot.lane.b32.xlu0 %v1661_v60, %s16730_s26  ;;  %v1665_v27 = vsub.f32 1.0, %v1664_v40  ;;  %vm1683_vm6 = vweird.f32 %v1572_v24  ;;  %16252 = vtanh.f32 %v17150_v26 }
 0x512   :  { %v1690_v37 = vor.u32 1.1754944e-38, %v1689_v48  ;;  %vm1688_vm8 = vcmp.eq.f32.partialorder %v1687_v55, 8.507059e+37  ;;  %16254 = vtanh.f32 %v17154_v50 }
 0x513   :  { %v1666_v42 = vmul.f32 %v16249_v34, %v1665_v27  ;;  %16256 = vtanh.f32 %v17158_v56  ;;  %v16123_v27 = vld [vmem:[#allocation13 + $0x2] ss:$0 sm:$0xff] }
 0x514   :  { %16258 = vtanh.f32 %v17162_v8 }
 0x515   :  { %v1667_v45 = vadd.f32 %v16249_v34, %v1666_v42  ;;  %16260 = vtanh.f32 %v17167_v30 }
 0x516   :  { %v16251_v47 = vpop.eup %16250  ;;  %16262 = vtanh.f32 %v17172_v44 }
 0x517   :  { %v1671_v49 = vsel %vm1670_vm3, %v16249_v34, %v1667_v45  ;;  %v1679_v36 = vmul.f32 %v16251_v47, %v1572_v24  ;;  %vm1684_vm5 = vweird.f32 %v16251_v47  ;;  %v16253_v62 = vpop.eup %16252  ;;  %16264 = vtanh.f32 %v17177_v32 }
 0x518   :  { %v1676_v51 = vsel %vm1673_vm4, %v1675_v0, %v1671_v49  ;;  %vm1685_vm7 = vmor %vm1683_vm6, %vm1684_vm5  ;;  %v16255_v1 = vpop.eup %16254  ;;  %16266 = vtanh.f32 %v17182_v53 }
 0x519   :  { %1713 = vrot.lane.b32.xlu1 %v1676_v51, %s16730_s26  ;;  %v1680_v4 = vsub.f32 1.0, %v1679_v36  ;;  %v16257_v10 = vpop.eup %16256 }
 0x51a   :  { %v16259_v16 = vpop.eup %16258 }
 0x51b   :  { %v1681_v54 = vmul.f32 %v16251_v47, %v1680_v4  ;;  %v16261_v33 = vpop.eup %16260 }
 0x51c   :  { %v16263_v21 = vpop.eup %16262 }
 0x51d   :  { %v1682_v57 = vadd.f32 %v16251_v47, %v1681_v54  ;;  %v16265_v52 = vpop.eup %16264 }
 0x51e   :  { %v16267_v39 = vpop.eup %16266 }
 0x51f   :  { %v1686_v61 = vsel %vm1685_vm7, %v16251_v47, %v1682_v57 }
 0x520   :  { %v1691_v58 = vsel %vm1688_vm8, %v1690_v37, %v1686_v61  ;;  %v1281_v37 = vadd.f32 %v17105_v59, %v16964_v11  ;;  %v1283_v61 = vadd.f32 %v17115_v3, %v16980_v20  ;;  %v1284_v11 = vadd.f32 %v17117_v6, %v16982_v23 }
 0x521   :  { %1715 = vrot.lane.b32.xlu2 %v1691_v58, %s16730_s26  ;;  %v1285_v3 = vadd.f32 %v17125_v9, %v16997_v28 }
 0x54b   :  { %v1704_v13 = vpop.permute.xlu2 %1703 }
 0x54c   :  { %v1726_v5 = vmul.f32 %v16255_v1, %v1704_v13 }
 0x55b   :  { %v1702_v2 = vpop.permute.xlu1 %1701 }
 0x55c   :  { %v1725_v7 = vmul.f32 %v16253_v62, %v1702_v2  ;;  %v1282_v2 = vadd.f32 %v17107_v63, %v16966_v46  ;;  %v1287_v46 = vadd.f32 %v17135_v25, %v17014_v35 }
 0x55e   :  { %v1733_v12 = vpack.c.bf16 %v1726_v5, %v1725_v7 }
 0x560   :  { %11969 = vmatmul.msk.bf16.vlgmr.msrb.gmra.mxu0 %vm306_vm2, %v1733_v12  ;;  %v1286_v12 = vadd.f32 %v17127_v19, %v16999_v31  ;;  %v1288_v19 = vadd.f32 %v17137_v29, %v17016_v38 }
 0x563   :  { %v1710_v18 = vpop.permute.xlu2 %1709 }
 0x564   :  { %v1729_v56 = vmul.f32 %v16261_v33, %v1710_v18 }
 0x56b   :  { %v1706_v15 = vpop.permute.xlu0 %1705 }
 0x56c   :  { %v1727_v26 = vmul.f32 %v16257_v10, %v1706_v15 }
 0x573   :  { %v1708_v14 = vpop.permute.xlu1 %1707 }
 0x574   :  { %v1728_v22 = vmul.f32 %v16259_v16, %v1708_v14 }
 0x576   :  { %v1734_v50 = vpack.c.bf16 %v1728_v22, %v1727_v26 }
 0x578   :  { %11970 = vmatmul.msk.bf16.gmra.mxu0 %vm306_vm2, %v1734_v50 }
 0x57b   :  { %v1716_v24 = vpop.permute.xlu2 %1715 }
 0x57c   :  { %v1732_v30 = vmul.f32 %v16267_v39, %v1716_v24 }
 0x583   :  { %v1712_v17 = vpop.permute.xlu0 %1711 }
 0x584   :  { %v1730_v8 = vmul.f32 %v16263_v21, %v1712_v17 }
 0x586   :  { %v1735_v34 = vpack.c.bf16 %v1730_v8, %v1729_v56 }
 0x588   :  { %11971 = vmatmul.msk.bf16.gmra.mxu0 %vm306_vm2, %v1735_v34 }
 0x58b   :  { %v1714_v40 = vpop.permute.xlu1 %1713 }
 0x58c   :  { %v1731_v60 = vmul.f32 %v16265_v52, %v1714_v40 }
 0x58e   :  { %v1736_v44 = vpack.c.bf16 %v1732_v30, %v1731_v60 }
 0x598   :  { %11972 = vmatmul.msk.bf16.gmra.mxu0 %vm306_vm2, %v1736_v44 }
 0x5dd   :  { %v1773_v41 = vpop.f32.mrf.mxu0 }
 0x5de   :  { %v1774_v42 = vadd.f32 %v16123_v27, %v1773_v41 }
 0x5e0   :  { %1801 = vrot.lane.b32.xlu0 %v1774_v42, %s16732_s3 }
 0x5e5   :  { %v1775_v32 = vpop.f32.mrf.mxu0 }
 0x5e6   :  { %v1776_v53 = vadd.f32 %v16123_v27, %v1775_v32 }
 0x5e8   :  { %1803 = vrot.lane.b32.xlu1 %v1776_v53, %s16732_s3 }
 0x5f5   :  { %v1778_v43 = vpop.f32.mrf.mxu0 }
 0x5f6   :  { %v1779_v45 = vadd.f32 %v16123_v27, %v1778_v43 }
 0x5f8   :  { %1805 = vrot.lane.b32.xlu2 %v1779_v45, %s16732_s3 }
 0x5fd   :  { %v1780_v47 = vpop.f32.mrf.mxu0 }
 0x5fe   :  { %v1781_v0 = vadd.f32 %v16123_v27, %v1780_v47 }
 0x600   :  { %1807 = vrot.lane.b32.xlu0 %v1781_v0, %s16732_s3 }
 0x605   :  { %v1783_v49 = vpop.f32.mrf.mxu0 }
 0x606   :  { %v1784_v36 = vadd.f32 %v16123_v27, %v1783_v49 }
 0x608   :  { %1809 = vrot.lane.b32.xlu1 %v1784_v36, %s16732_s3 }
 0x60d   :  { %v1785_v51 = vpop.f32.mrf.mxu0 }
 0x60e   :  { %v1786_v4 = vadd.f32 %v16123_v27, %v1785_v51 }
 0x610   :  { %1811 = vrot.lane.b32.xlu2 %v1786_v4, %s16732_s3 }
 0x615   :  { %v1788_v48 = vpop.f32.mrf.mxu0 }
 0x616   :  { %v1789_v54 = vadd.f32 %v16123_v27, %v1788_v48 }
 0x618   :  { %1813 = vrot.lane.b32.xlu0 %v1789_v54, %s16732_s3 }
 0x61d   :  { %v1790_v55 = vpop.f32.mrf.mxu0 }
 0x61e   :  { %v1791_v57 = vadd.f32 %v16123_v27, %v1790_v55 }
 0x620   :  { %1815 = vrot.lane.b32.xlu1 %v1791_v57, %s16732_s3 }
 0x652   :  { %v1802_v58 = vpop.permute.xlu0 %1801  ;;  %v1806_v13 = vpop.permute.xlu2 %1805 }
 0x653   :  { %v1825_v62 = vadd.f32 %v1802_v58, %v1281_v37  ;;  %v17219_v1 = vadd.f32 %v1806_v13, %v1283_v61 }
 0x65a   :  { %v1804_v5 = vpop.permute.xlu1 %1803 }
 0x65b   :  { %v1826_v7 = vadd.f32 %v1804_v5, %v1282_v2 }
 0x66a   :  { %v1812_v15 = vpop.permute.xlu2 %1811 }
 0x66b   :  { %v17225_v10 = vadd.f32 %v1812_v15, %v1286_v12 }
 0x66d   :  { %19209 = vst [vmem:[#allocation31_spill] sm:$0xff] %v17225_v10 }
 0x672   :  { %v1808_v20 = vpop.permute.xlu0 %1807 }
 0x673   :  { %v17229_v59 = vadd.f32 %v1808_v20, %v1284_v11 }
 0x67a   :  { %v1810_v16 = vpop.permute.xlu1 %1809 }
 0x67b   :  { %v17233_v14 = vadd.f32 %v1810_v16, %v1285_v3 }
 0x68a   :  { %v1814_v63 = vpop.permute.xlu0 %1813 }
 0x68b   :  { %v17237_v31 = vadd.f32 %v1814_v63, %v1287_v46 }
 0x68d   :  { %19210 = vst [vmem:[#allocation32_spill] sm:$0xff] %v17237_v31 }
 0x692   :  { %v1816_v26 = vpop.permute.xlu1 %1815 }
 0x693   :  { %v17241_v23 = vadd.f32 %v1816_v26, %v1288_v19 }
 0x695   :  { %19211 = vst [vmem:[#allocation33_spill] sm:$0xff] %v17241_v23 }
 0x696   :  { %16712 = dma.done.wait [#allocation4], 65536 }
 0x697   :  { %16713 = vsyncadd [#allocation4], 4294901760  ;;  %v1906_v6 = vpack.c.bf16 %v1826_v7, %v1826_v7 }
 0x698   :  { %16714 = dma.done.wait [#allocation4 + $0x1], 32768 }
 0x699   :  { %16715 = vsyncadd [#allocation4 + $0x1], 4294934528  ;;  %1972 = vrot.lane.b32.xlu0 %v1906_v6, %s16730_s26  ;;  %v1841_v28 = vpack.c.bf16 %v1825_v62, %v1825_v62  ;;  %v12103_v9 = vld [vmem:[#allocation2 + $0x300] sm:$0xf]  ;;  %v15427_v35 = vld [vmem:[#allocation2 + $0x304] sm:$0xf] }
 0x69a   :  { %v15443_v22 = vld [vmem:[#allocation2 + $0x37c] sm:$0xf0]  ;;  %v12105_v50 = vld [vmem:[#allocation2 + $0x380] sm:$0xf0]  ;;  %v12111_v18 = vld [vmem:[#allocation2 + $0x308] sm:$0xf] }
 0x69b   :  { %v12104_v25 = vor.u32 %v15443_v22, %v12103_v9  ;;  %v15444_v33 = vld [vmem:[#allocation2 + $0x384] sm:$0xf0]  ;;  %v12108_v21 = vor.u32 %v15427_v35, %v12105_v50  ;;  %v12151_v29 = vld [vmem:[#allocation2 + $0x330] sm:$0xf]  ;;  %v11975_v56 = vld [vmem:[#allocation2 + $0x200] sm:$0xf] }
 0x69c   :  { %v12112_v38 = vor.u32 %v15444_v33, %v12111_v18  ;;  %v15449_v17 = vld [vmem:[#allocation2 + $0x3ac] sm:$0xf0]  ;;  %v15411_v34 = vld [vmem:[#allocation2 + $0x27c] sm:$0xf0]  ;;  %v15395_v24 = vld [vmem:[#allocation2 + $0x204] sm:$0xf] }
 0x69d   :  { %2303 = vmatpush.bf16.msrb.mxu1 %v12104_v25  ;;  %v12152_v8 = vor.u32 %v15449_v17, %v12151_v29  ;;  %v11977_v52 = vld [vmem:[#allocation2 + $0x280] sm:$0xf0]  ;;  %2316 = vmatpush.bf16.msrb.mxu2 %v12108_v21  ;;  %v11976_v39 = vor.u32 %v15411_v34, %v11975_v56  ;;  %v11983_v30 = vld [vmem:[#allocation2 + $0x208] sm:$0xf]  ;;  %v12023_v44 = vld [vmem:[#allocation2 + $0x230] sm:$0xf] }
 0x69e   :  { %2329 = vmatpush.bf16.msrb.mxu3 %v12112_v38  ;;  %v11980_v40 = vor.u32 %v15395_v24, %v11977_v52  ;;  %v15412_v60 = vld [vmem:[#allocation2 + $0x284] sm:$0xf0]  ;;  %v15417_v41 = vld [vmem:[#allocation2 + $0x2ac] sm:$0xf0]  ;;  %v15428_v32 = vld [vmem:[#allocation2 + $0x30c] sm:$0xf] }
 0x69f   :  { %2459 = vmatpush.bf16.msra.mxu0 %v12152_v8  ;;  %v11984_v27 = vor.u32 %v15412_v60, %v11983_v30  ;;  %v12024_v42 = vor.u32 %v15417_v41, %v12023_v44  ;;  %v12113_v53 = vld [vmem:[#allocation2 + $0x388] sm:$0xf0]  ;;  %v12119_v43 = vld [vmem:[#allocation2 + $0x310] sm:$0xf]  ;;  %v15429_v0 = vld [vmem:[#allocation2 + $0x314] sm:$0xf] }
 0x6a0   :  { %v12116_v45 = vor.u32 %v15428_v32, %v12113_v53  ;;  %v15445_v47 = vld [vmem:[#allocation2 + $0x38c] sm:$0xf0]  ;;  %v12121_v49 = vld [vmem:[#allocation2 + $0x390] sm:$0xf0]  ;;  %v12167_v4 = vld [vmem:[#allocation2 + $0x340] sm:$0xf] }
 0x6a1   :  { %2714 = vrot.lane.b32.xlu0 %v1841_v28, %s16730_s26  ;;  %2304 = vmatpush.bf16.msrb.mxu1 %v11976_v39  ;;  %v12120_v36 = vor.u32 %v15445_v47, %v12119_v43  ;;  %v12124_v51 = vor.u32 %v15429_v0, %v12121_v49  ;;  %v15451_v48 = vld [vmem:[#allocation2 + $0x3bc] sm:$0xf0]  ;;  %v15396_v54 = vld [vmem:[#allocation2 + $0x20c] sm:$0xf]  ;;  %v11991_v37 = vld [vmem:[#allocation2 + $0x210] sm:$0xf] }
 0x6a2   :  { %2317 = vmatpush.bf16.msrb.mxu2 %v11980_v40  ;;  %2330 = vmatpush.bf16.msrb.mxu3 %v11984_v27  ;;  %v12168_v55 = vor.u32 %v15451_v48, %v12167_v4  ;;  %v11985_v57 = vld [vmem:[#allocation2 + $0x288] sm:$0xf0]  ;;  %v15413_v61 = vld [vmem:[#allocation2 + $0x28c] sm:$0xf0]  ;;  %v15397_v62 = vld [vmem:[#allocation2 + $0x214] sm:$0xf] }
 0x6a3   :  { %2460 = vmatpush.bf16.msra.mxu0 %v12024_v42  ;;  %v11988_v58 = vor.u32 %v15396_v54, %v11985_v57  ;;  %v11992_v13 = vor.u32 %v15413_v61, %v11991_v37  ;;  %v11993_v2 = vld [vmem:[#allocation2 + $0x290] sm:$0xf0]  ;;  %v12039_v5 = vld [vmem:[#allocation2 + $0x240] sm:$0xf]  ;;  %v12127_v11 = vld [vmem:[#allocation2 + $0x318] sm:$0xf] }
 0x6a4   :  { %v11996_v7 = vor.u32 %v15397_v62, %v11993_v2  ;;  %v15419_v12 = vld [vmem:[#allocation2 + $0x2bc] sm:$0xf0]  ;;  %v15446_v20 = vld [vmem:[#allocation2 + $0x394] sm:$0xf0]  ;;  %v15430_v3 = vld [vmem:[#allocation2 + $0x31c] sm:$0xf] }
 0x6a5   :  { %2342 = vmatpush.bf16.msra.mxu1 %v12116_v45  ;;  %v12040_v15 = vor.u32 %v15419_v12, %v12039_v5  ;;  %v12129_v16 = vld [vmem:[#allocation2 + $0x398] sm:$0xf0]  ;;  %v12135_v46 = vld [vmem:[#allocation2 + $0x320] sm:$0xf]  ;;  %v12183_v19 = vld [vmem:[#allocation2 + $0x350] sm:$0xf]  ;;  %v12128_v6 = vor.u32 %v15446_v20, %v12127_v11 }
 0x6a6   :  { %2355 = vmatpush.bf16.msra.mxu2 %v12120_v36  ;;  %2368 = vmatpush.bf16.msra.mxu3 %v12124_v51  ;;  %v15447_v63 = vld [vmem:[#allocation2 + $0x39c] sm:$0xf0]  ;;  %v15453_v26 = vld [vmem:[#allocation2 + $0x3cc] sm:$0xf0]  ;;  %v12132_v28 = vor.u32 %v15430_v3, %v12129_v16  ;;  %v11999_v9 = vld [vmem:[#allocation2 + $0x218] sm:$0xf] }
 0x6a7   :  { %2511 = vmatpush.bf16.msrb.mxu0 %v12168_v55  ;;  %v15414_v22 = vld [vmem:[#allocation2 + $0x294] sm:$0xf0]  ;;  %v12136_v25 = vor.u32 %v15447_v63, %v12135_v46  ;;  %v12184_v50 = vor.u32 %v15453_v26, %v12183_v19  ;;  %v15398_v18 = vld [vmem:[#allocation2 + $0x21c] sm:$0xf]  ;;  %v12007_v21 = vld [vmem:[#allocation2 + $0x220] sm:$0xf] }
 0x6a8   :  { %v12001_v33 = vld [vmem:[#allocation2 + $0x298] sm:$0xf0]  ;;  %v15415_v38 = vld [vmem:[#allocation2 + $0x29c] sm:$0xf0]  ;;  %v12055_v29 = vld [vmem:[#allocation2 + $0x250] sm:$0xf]  ;;  %v12000_v56 = vor.u32 %v15414_v22, %v11999_v9 }
 0x6a9   :  { %2343 = vmatpush.bf16.msra.mxu1 %v11988_v58  ;;  %v15421_v17 = vld [vmem:[#allocation2 + $0x2cc] sm:$0xf0]  ;;  %v12004_v8 = vor.u32 %v15398_v18, %v12001_v33  ;;  %v12008_v34 = vor.u32 %v15415_v38, %v12007_v21  ;;  %v15431_v52 = vld [vmem:[#allocation2 + $0x324] sm:$0xf]  ;;  %v12143_v40 = vld [vmem:[#allocation2 + $0x328] sm:$0xf] }
 0x6aa   :  { %2356 = vmatpush.bf16.msra.mxu2 %v11992_v13  ;;  %2369 = vmatpush.bf16.msra.mxu3 %v11996_v7  ;;  %v12056_v24 = vor.u32 %v15421_v17, %v12055_v29  ;;  %v12137_v39 = vld [vmem:[#allocation2 + $0x3a0] sm:$0xf0]  ;;  %v15448_v30 = vld [vmem:[#allocation2 + $0x3a4] sm:$0xf0]  ;;  %v15432_v60 = vld [vmem:[#allocation2 + $0x32c] sm:$0xf] }
 0x6ab   :  { %2512 = vmatpush.bf16.msrb.mxu0 %v12040_v15  ;;  %v12145_v44 = vld [vmem:[#allocation2 + $0x3a8] sm:$0xf0]  ;;  %v12199_v27 = vld [vmem:[#allocation2 + $0x360] sm:$0xf]  ;;  %v12140_v42 = vor.u32 %v15431_v52, %v12137_v39  ;;  %v12144_v32 = vor.u32 %v15448_v30, %v12143_v40  ;;  %v15399_v53 = vld [vmem:[#allocation2 + $0x224] sm:$0xf] }
 0x6ac   :  { %v15455_v41 = vld [vmem:[#allocation2 + $0x3dc] sm:$0xf0]  ;;  %v12009_v43 = vld [vmem:[#allocation2 + $0x2a0] sm:$0xf0]  ;;  %v12148_v45 = vor.u32 %v15432_v60, %v12145_v44  ;;  %v12015_v0 = vld [vmem:[#allocation2 + $0x228] sm:$0xf] }
 0x6ad   :  { %v12200_v47 = vor.u32 %v15455_v41, %v12199_v27  ;;  %v15416_v49 = vld [vmem:[#allocation2 + $0x2a4] sm:$0xf0]  ;;  %v15400_v36 = vld [vmem:[#allocation2 + $0x22c] sm:$0xf]  ;;  %v12071_v4 = vld [vmem:[#allocation2 + $0x260] sm:$0xf]  ;;  %v12012_v54 = vor.u32 %v15399_v53, %v12009_v43  ;;  %v3455_v43 = vpack.c.bf16 %v17219_v1, %v17219_v1 }
 0x6ae   :  { %v12017_v51 = vld [vmem:[#allocation2 + $0x2a8] sm:$0xf0]  ;;  %v15423_v48 = vld [vmem:[#allocation2 + $0x2dc] sm:$0xf0]  ;;  %v12016_v55 = vor.u32 %v15416_v49, %v12015_v0  ;;  %v15433_v61 = vld [vmem:[#allocation2 + $0x334] sm:$0xf] }
 0x6af   :  { %v12020_v57 = vor.u32 %v15400_v36, %v12017_v51  ;;  %v12072_v37 = vor.u32 %v15423_v48, %v12071_v4  ;;  %v12153_v58 = vld [vmem:[#allocation2 + $0x3b0] sm:$0xf0]  ;;  %v12159_v13 = vld [vmem:[#allocation2 + $0x338] sm:$0xf]  ;;  %v15434_v2 = vld [vmem:[#allocation2 + $0x33c] sm:$0xf]  ;;  %3521 = vrot.lane.b32.xlu1 %v3455_v43, %s16730_s26 }
 0x6b0   :  { %v15450_v62 = vld [vmem:[#allocation2 + $0x3b4] sm:$0xf0]  ;;  %v12161_v5 = vld [vmem:[#allocation2 + $0x3b8] sm:$0xf0]  ;;  %v12215_v7 = vld [vmem:[#allocation2 + $0x370] sm:$0xf]  ;;  %v12156_v15 = vor.u32 %v15433_v61, %v12153_v58 }
 0x6b1   :  { %v15457_v12 = vld [vmem:[#allocation2 + $0x3ec] sm:$0xf0]  ;;  %v12160_v11 = vor.u32 %v15450_v62, %v12159_v13  ;;  %v15401_v20 = vld [vmem:[#allocation2 + $0x234] sm:$0xf]  ;;  %v12164_v16 = vor.u32 %v15434_v2, %v12161_v5  ;;  %v12031_v63 = vld [vmem:[#allocation2 + $0x238] sm:$0xf] }
 0x6b2   :  { %v12025_v3 = vld [vmem:[#allocation2 + $0x2b0] sm:$0xf0]  ;;  %v12216_v46 = vor.u32 %v15457_v12, %v12215_v7  ;;  %v15418_v19 = vld [vmem:[#allocation2 + $0x2b4] sm:$0xf0]  ;;  %v15402_v26 = vld [vmem:[#allocation2 + $0x23c] sm:$0xf] }
 0x6b3   :  { %v15425_v9 = vld [vmem:[#allocation2 + $0x2ec] sm:$0xf0]  ;;  %v12028_v22 = vor.u32 %v15401_v20, %v12025_v3  ;;  %v15435_v33 = vld [vmem:[#allocation2 + $0x344] sm:$0xf]  ;;  %v12175_v38 = vld [vmem:[#allocation2 + $0x348] sm:$0xf] }
 0x6b4   :  { %v12169_v21 = vld [vmem:[#allocation2 + $0x3c0] sm:$0xf0]  ;;  %v15452_v29 = vld [vmem:[#allocation2 + $0x3c4] sm:$0xf0]  ;;  %v15436_v17 = vld [vmem:[#allocation2 + $0x34c] sm:$0xf] }
 0x6b5   :  { %v12176_v52 = vor.u32 %v15452_v29, %v12175_v38  ;;  %v15403_v39 = vld [vmem:[#allocation2 + $0x244] sm:$0xf]  ;;  %v12047_v44 = vld [vmem:[#allocation2 + $0x248] sm:$0xf]  ;;  %v15404_v41 = vld [vmem:[#allocation2 + $0x24c] sm:$0xf] }
 0x6b6   :  { %v12041_v40 = vld [vmem:[#allocation2 + $0x2c0] sm:$0xf0]  ;;  %v15420_v27 = vld [vmem:[#allocation2 + $0x2c4] sm:$0xf0]  ;;  %v15347_v53 = vld [vmem:[#allocation2 + $0x7c] sm:$0xf0] }
 0x6b7   :  { %v15437_v36 = vld [vmem:[#allocation2 + $0x354] sm:$0xf]  ;;  %v12191_v4 = vld [vmem:[#allocation2 + $0x358] sm:$0xf]  ;;  %v12193_v1 = vld [vmem:[#allocation2 + $0x3d8] sm:$0xf0] }
 0x6b8   :  { %v12185_v51 = vld [vmem:[#allocation2 + $0x3d0] sm:$0xf0]  ;;  %v15454_v48 = vld [vmem:[#allocation2 + $0x3d4] sm:$0xf0]  ;;  %v15406_v12 = vld [vmem:[#allocation2 + $0x25c] sm:$0xf] }
 0x6b9   :  { %v12192_v61 = vor.u32 %v15454_v48, %v12191_v4  ;;  %v15405_v58 = vld [vmem:[#allocation2 + $0x254] sm:$0xf]  ;;  %v12063_v5 = vld [vmem:[#allocation2 + $0x258] sm:$0xf]  ;;  %v15349_v20 = vld [vmem:[#allocation2 + $0x8c] sm:$0xf0] }
 0x6ba   :  { %v12057_v13 = vld [vmem:[#allocation2 + $0x2d0] sm:$0xf0]  ;;  %v15422_v7 = vld [vmem:[#allocation2 + $0x2d4] sm:$0xf0]  ;;  %v15407_v38 = vld [vmem:[#allocation2 + $0x264] sm:$0xf] }
 0x6bb   :  { %v12060_v3 = vor.u32 %v15405_v58, %v12057_v13  ;;  %v12073_v29 = vld [vmem:[#allocation2 + $0x2e0] sm:$0xf0]  ;;  %v15442_v43 = vld [vmem:[#allocation2 + $0x37c] sm:$0xf]  ;;  %v12089_v4 = vld [vmem:[#allocation2 + $0x2f0] sm:$0xf0] }
 0x6bc   :  { %v15353_v58 = vld [vmem:[#allocation2 + $0xac] sm:$0xf0]  ;;  %v12729_v23 = vld [vmem:[#allocation2 + $0x5b0] sm:$0xf0]  ;;  %v15503_v10 = vld [vmem:[#allocation2 + $0x564] sm:$0xf] }
 0x6bd   :  { %v12663_v31 = vld [vmem:[#allocation2 + $0x470] sm:$0xf]  ;;  %s16735_s9 = smov [#allocation17]   ;;  %s11741_s13 = sshll.u32 %s19208_s11, 4  ;;  %s11742_s13 = int_to_ptr.hbm [resolvable:$true] %s11741_s13 }
 0x6be   :  { %s11739_s10 = sshll.u32 %s16735_s9, 4  ;;  %s11740_s10 = int_to_ptr.vmem [resolvable:$true] %s11739_s10 }
 0x70b   :  { %v17245_v35 = vpop.permute.xlu0 %1972 }
 0x70c   :  { %12229 = vmatmul.msk.bf16.vlgmr.msrb.gmra.mxu1 %vm306_vm2, %v17245_v35  ;;  %12230 = vmatmul.msk.bf16.vlgmr.msrb.gmra.mxu2 %vm306_vm2, %v17245_v35 }
 0x70d   :  { %12231 = vmatmul.msk.bf16.vlgmr.msrb.gmra.mxu3 %vm306_vm2, %v17245_v35  ;;  %12241 = vmatmul.msk.bf16.vlgmr.msra.gmra.mxu0 %vm306_vm2, %v17245_v35 }
 0x70e   :  { %2381 = vmatpush.bf16.msrb.mxu1 %v12128_v6  ;;  %2394 = vmatpush.bf16.msrb.mxu2 %v12132_v28  ;;  %v12033_v6 = vld [vmem:[#allocation2 + $0x2b8] sm:$0xf0]  ;;  %v12087_v28 = vld [vmem:[#allocation2 + $0x270] sm:$0xf] }
 0x70f   :  { %2407 = vmatpush.bf16.msrb.mxu3 %v12136_v25  ;;  %2563 = vmatpush.bf16.msra.mxu0 %v12184_v50  ;;  %v12032_v25 = vor.u32 %v15418_v19, %v12031_v63  ;;  %v12036_v50 = vor.u32 %v15402_v26, %v12033_v6  ;;  %v12088_v18 = vor.u32 %v15425_v9, %v12087_v28  ;;  %v15439_v19 = vld [vmem:[#allocation2 + $0x364] sm:$0xf]  ;;  %v12207_v6 = vld [vmem:[#allocation2 + $0x368] sm:$0xf]  ;;  %v15440_v9 = vld [vmem:[#allocation2 + $0x36c] sm:$0xf] }
 0x710   :  { %v12201_v26 = vld [vmem:[#allocation2 + $0x3e0] sm:$0xf0]  ;;  %v15456_v28 = vld [vmem:[#allocation2 + $0x3e4] sm:$0xf0] }
 0x712   :  { %2382 = vmatpush.bf16.msrb.mxu1 %v12000_v56  ;;  %2395 = vmatpush.bf16.msrb.mxu2 %v12004_v8  ;;  %v12177_v56 = vld [vmem:[#allocation2 + $0x3c8] sm:$0xf0]  ;;  %v12391_v8 = vld [vmem:[#allocation2 + $0x100] sm:$0xf] }
 0x713   :  { %2408 = vmatpush.bf16.msrb.mxu3 %v12008_v34  ;;  %2564 = vmatpush.bf16.msra.mxu0 %v12056_v24  ;;  %v15379_v34 = vld [vmem:[#allocation2 + $0x17c] sm:$0xf0]  ;;  %v12172_v24 = vor.u32 %v15435_v33, %v12169_v21  ;;  %v12180_v30 = vor.u32 %v15436_v17, %v12177_v56  ;;  %v12204_v33 = vor.u32 %v15439_v19, %v12201_v26  ;;  %v15331_v26 = vld [vmem:[#allocation2 + $0x4] sm:$0xf] }
 0x714   :  { %v12392_v60 = vor.u32 %v15379_v34, %v12391_v8  ;;  %v12208_v21 = vor.u32 %v15456_v28, %v12207_v6  ;;  %v12079_v8 = vld [vmem:[#allocation2 + $0x268] sm:$0xf]  ;;  %v12265_v6 = vld [vmem:[#allocation2 + $0x80] sm:$0xf0] }
 0x715   :  { %v15424_v34 = vld [vmem:[#allocation2 + $0x2e4] sm:$0xf0] }
 0x71c   :  { %12232 = vmatmul.msk.bf16.vlgmr.msra.gmra.mxu1 %vm306_vm2, %v17245_v35  ;;  %12233 = vmatmul.msk.bf16.vlgmr.msra.gmra.mxu2 %vm306_vm2, %v17245_v35 }
 0x71d   :  { %12234 = vmatmul.msk.bf16.vlgmr.msra.gmra.mxu3 %vm306_vm2, %v17245_v35  ;;  %12245 = vmatmul.msk.bf16.vlgmr.msrb.gmra.mxu0 %vm306_vm2, %v17245_v35 }
 0x71e   :  { %2420 = vmatpush.bf16.msra.mxu1 %v12140_v42  ;;  %2433 = vmatpush.bf16.msra.mxu2 %v12144_v32  ;;  %v12049_v42 = vld [vmem:[#allocation2 + $0x2c8] sm:$0xf0]  ;;  %v12263_v32 = vld [vmem:[#allocation2] sm:$0xf] }
 0x71f   :  { %2446 = vmatpush.bf16.msra.mxu3 %v12148_v45  ;;  %2615 = vmatpush.bf16.msrb.mxu0 %v12200_v47  ;;  %v12044_v45 = vor.u32 %v15403_v39, %v12041_v40  ;;  %v12048_v47 = vor.u32 %v15420_v27, %v12047_v44  ;;  %v12052_v0 = vor.u32 %v15404_v41, %v12049_v42  ;;  %v12295_v39 = vld [vmem:[#allocation2 + $0x20] sm:$0xf]  ;;  %v15441_v41 = vld [vmem:[#allocation2 + $0x374] sm:$0xf] }
 0x720   :  { %v12264_v49 = vor.u32 %v15347_v53, %v12263_v32  ;;  %v15351_v40 = vld [vmem:[#allocation2 + $0x9c] sm:$0xf0]  ;;  %v12217_v42 = vld [vmem:[#allocation2 + $0x3f0] sm:$0xf0]  ;;  %v12223_v32 = vld [vmem:[#allocation2 + $0x378] sm:$0xf] }
 0x721   :  { %v12296_v27 = vor.u32 %v15351_v40, %v12295_v39  ;;  %v15458_v53 = vld [vmem:[#allocation2 + $0x3f4] sm:$0xf0]  ;;  %v15366_v40 = vld [vmem:[#allocation2 + $0x11c] sm:$0xf] }
 0x722   :  { %2421 = vmatpush.bf16.msra.mxu1 %v12012_v54  ;;  %2434 = vmatpush.bf16.msra.mxu2 %v12016_v55  ;;  %v15438_v54 = vld [vmem:[#allocation2 + $0x35c] sm:$0xf]  ;;  %v12407_v55 = vld [vmem:[#allocation2 + $0x110] sm:$0xf]  ;;  %v15382_v39 = vld [vmem:[#allocation2 + $0x194] sm:$0xf0] }
 0x723   :  { %2447 = vmatpush.bf16.msra.mxu3 %v12020_v57  ;;  %2616 = vmatpush.bf16.msrb.mxu0 %v12072_v37  ;;  %v15381_v57 = vld [vmem:[#allocation2 + $0x18c] sm:$0xf0]  ;;  %v12188_v37 = vor.u32 %v15437_v36, %v12185_v51  ;;  %v12196_v62 = vor.u32 %v15438_v54, %v12193_v1  ;;  %v12224_v36 = vor.u32 %v15458_v53, %v12223_v32  ;;  %v15409_v51 = vld [vmem:[#allocation2 + $0x274] sm:$0xf]  ;;  %v12095_v1 = vld [vmem:[#allocation2 + $0x278] sm:$0xf] }
 0x724   :  { %v12408_v2 = vor.u32 %v15381_v57, %v12407_v55  ;;  %v15426_v55 = vld [vmem:[#allocation2 + $0x2f4] sm:$0xf0]  ;;  %v15410_v57 = vld [vmem:[#allocation2 + $0x27c] sm:$0xf]  ;;  %v12092_v13 = vor.u32 %v15409_v51, %v12089_v4  ;;  %v15333_v53 = vld [vmem:[#allocation2 + $0x14] sm:$0xf] }
 0x725   :  { %v12289_v51 = vld [vmem:[#allocation2 + $0x98] sm:$0xf0]  ;;  %v12343_v4 = vld [vmem:[#allocation2 + $0x50] sm:$0xf] }
 0x72c   :  { %12235 = vmatmul.msk.bf16.vlgmr.msrb.gmra.mxu1 %vm306_vm2, %v17245_v35  ;;  %12236 = vmatmul.msk.bf16.vlgmr.msrb.gmra.mxu2 %vm306_vm2, %v17245_v35 }
 0x72d   :  { %12237 = vmatmul.msk.bf16.vlgmr.msrb.gmra.mxu3 %vm306_vm2, %v17245_v35  ;;  %12249 = vmatmul.msk.bf16.vlgmr.msra.gmra.mxu0 %vm306_vm2, %v17245_v35 }
 0x72e   :  { %2472 = vmatpush.bf16.msrb.mxu1 %v12156_v15  ;;  %2485 = vmatpush.bf16.msrb.mxu2 %v12160_v11  ;;  %v12065_v15 = vld [vmem:[#allocation2 + $0x2d8] sm:$0xf0]  ;;  %v12279_v11 = vld [vmem:[#allocation2 + $0x10] sm:$0xf] }
 0x72f   :  { %2498 = vmatpush.bf16.msrb.mxu3 %v12164_v16  ;;  %2667 = vmatpush.bf16.msra.mxu0 %v12216_v46  ;;  %v12064_v16 = vor.u32 %v15422_v7, %v12063_v5  ;;  %v12068_v46 = vor.u32 %v15406_v12, %v12065_v15  ;;  %v12280_v63 = vor.u32 %v15349_v20, %v12279_v11  ;;  %v15363_v7 = vld [vmem:[#allocation2 + $0x104] sm:$0xf]  ;;  %v12399_v15 = vld [vmem:[#allocation2 + $0x108] sm:$0xf]  ;;  %v15364_v20 = vld [vmem:[#allocation2 + $0x10c] sm:$0xf] }
 0x730   :  { %v12393_v12 = vld [vmem:[#allocation2 + $0x180] sm:$0xf0]  ;;  %v15380_v11 = vld [vmem:[#allocation2 + $0x184] sm:$0xf0] }
 0x731   :  { %v12400_v19 = vor.u32 %v15380_v11, %v12399_v15  ;;  %v12433_v11 = vld [vmem:[#allocation2 + $0x1a8] sm:$0xf0] }
 0x732   :  { %2473 = vmatpush.bf16.msrb.mxu1 %v12028_v22  ;;  %2486 = vmatpush.bf16.msrb.mxu2 %v12032_v25  ;;  %v12209_v22 = vld [vmem:[#allocation2 + $0x3e8] sm:$0xf0]  ;;  %v12423_v25 = vld [vmem:[#allocation2 + $0x120] sm:$0xf] }
 0x733   :  { %2499 = vmatpush.bf16.msrb.mxu3 %v12036_v50  ;;  %2668 = vmatpush.bf16.msra.mxu0 %v12088_v18  ;;  %v15383_v50 = vld [vmem:[#allocation2 + $0x19c] sm:$0xf0]  ;;  %v17290_v18 = vpop.permute.xlu0 %2714  ;;  %v12212_v17 = vor.u32 %v15440_v9, %v12209_v22  ;;  %v12271_v22 = vld [vmem:[#allocation2 + $0x8] sm:$0xf] }
 0x734   :  { %v12424_v56 = vor.u32 %v15383_v50, %v12423_v25  ;;  %v15348_v25 = vld [vmem:[#allocation2 + $0x84] sm:$0xf0]  ;;  %v15332_v50 = vld [vmem:[#allocation2 + $0xc] sm:$0xf] }
 0x73c   :  { %12238 = vmatmul.msk.bf16.vlgmr.msra.gmra.mxu1 %vm306_vm2, %v17245_v35  ;;  %12239 = vmatmul.msk.bf16.vlgmr.msra.gmra.mxu2 %vm306_vm2, %v17245_v35 }
 0x73d   :  { %12240 = vmatmul.msk.bf16.vlgmr.msra.gmra.mxu3 %vm306_vm2, %v17245_v35  ;;  %12253 = vmatmul.msk.bf16.vlgmr.msrb.gmra.mxu0 %vm306_vm2, %v17245_v35 }
 0x73e   :  { %2524 = vmatpush.bf16.msra.mxu1 %v12172_v24  ;;  %2537 = vmatpush.bf16.msra.mxu2 %v12176_v52  ;;  %v15408_v24 = vld [vmem:[#allocation2 + $0x26c] sm:$0xf] }
 0x73f   :  { %2550 = vmatpush.bf16.msra.mxu3 %v12180_v30  ;;  %3045 = vmatpush.bf16.msrb.mxu0 %v12392_v60  ;;  %v12081_v52 = vld [vmem:[#allocation2 + $0x2e8] sm:$0xf0]  ;;  %v12076_v30 = vor.u32 %v15407_v38, %v12073_v29  ;;  %v12080_v60 = vor.u32 %v15424_v34, %v12079_v8  ;;  %v15355_v38 = vld [vmem:[#allocation2 + $0xbc] sm:$0xf0]  ;;  %v12268_v29 = vor.u32 %v15331_v26, %v12265_v6  ;;  %v15365_v34 = vld [vmem:[#allocation2 + $0x114] sm:$0xf] }
 0x740   :  { %v12084_v44 = vor.u32 %v15408_v24, %v12081_v52  ;;  %v12409_v24 = vld [vmem:[#allocation2 + $0x190] sm:$0xf0]  ;;  %v12415_v52 = vld [vmem:[#allocation2 + $0x118] sm:$0xf]  ;;  %v15335_v26 = vld [vmem:[#allocation2 + $0x24] sm:$0xf] }
 0x741   :  { %v12416_v32 = vor.u32 %v15382_v39, %v12415_v52  ;;  %v12297_v6 = vld [vmem:[#allocation2 + $0xa0] sm:$0xf0] }
 0x742   :  { %2525 = vmatpush.bf16.msra.mxu1 %v12044_v45  ;;  %2538 = vmatpush.bf16.msra.mxu2 %v12048_v47  ;;  %v12225_v45 = vld [vmem:[#allocation2 + $0x3f8] sm:$0xf0]  ;;  %v12439_v47 = vld [vmem:[#allocation2 + $0x130] sm:$0xf] }
 0x743   :  { %2551 = vmatpush.bf16.msra.mxu3 %v12052_v0  ;;  %3046 = vmatpush.bf16.msrb.mxu0 %v12264_v49  ;;  %v15385_v0 = vld [vmem:[#allocation2 + $0x1ac] sm:$0xf0]  ;;  %v12220_v49 = vor.u32 %v15441_v41, %v12217_v42  ;;  %v12228_v48 = vor.u32 %v15442_v43, %v12225_v45  ;;  %v12412_v42 = vor.u32 %v15365_v34, %v12409_v24  ;;  %v12281_v43 = vld [vmem:[#allocation2 + $0x90] sm:$0xf0] }
 0x744   :  { %v12440_v54 = vor.u32 %v15385_v0, %v12439_v47  ;;  %v12287_v0 = vld [vmem:[#allocation2 + $0x18] sm:$0xf] }
 0x74c   :  { %12242 = vmatmul.msk.bf16.vlgmr.msrb.gmra.mxu1 %vm306_vm2, %v17245_v35  ;;  %12243 = vmatmul.msk.bf16.vlgmr.msrb.gmra.mxu2 %vm306_vm2, %v17245_v35 }
 0x74d   :  { %12244 = vmatmul.msk.bf16.vlgmr.msrb.gmra.mxu3 %vm306_vm2, %v17245_v35  ;;  %12257 = vmatmul.msk.bf16.vlgmr.msra.gmra.mxu0 %vm306_vm2, %v17245_v35 }
 0x74e   :  { %2576 = vmatpush.bf16.msrb.mxu1 %v12188_v37  ;;  %2589 = vmatpush.bf16.msrb.mxu2 %v12192_v61  ;;  %v12097_v37 = vld [vmem:[#allocation2 + $0x2f8] sm:$0xf0]  ;;  %v12311_v61 = vld [vmem:[#allocation2 + $0x30] sm:$0xf] }
 0x74f   :  { %2602 = vmatpush.bf16.msrb.mxu3 %v12196_v62  ;;  %3097 = vmatpush.bf16.msra.mxu0 %v12408_v2  ;;  %v12096_v62 = vor.u32 %v15426_v55, %v12095_v1  ;;  %v12100_v2 = vor.u32 %v15410_v57, %v12097_v37  ;;  %v12312_v5 = vor.u32 %v15353_v58, %v12311_v61 }
 0x752   :  { %2577 = vmatpush.bf16.msrb.mxu1 %v12060_v3  ;;  %2590 = vmatpush.bf16.msrb.mxu2 %v12064_v16  ;;  %v12401_v3 = vld [vmem:[#allocation2 + $0x188] sm:$0xf0]  ;;  %v12455_v16 = vld [vmem:[#allocation2 + $0x140] sm:$0xf] }
 0x753   :  { %2603 = vmatpush.bf16.msrb.mxu3 %v12068_v46  ;;  %3098 = vmatpush.bf16.msra.mxu0 %v12280_v63  ;;  %v15387_v46 = vld [vmem:[#allocation2 + $0x1bc] sm:$0xf0]  ;;  %v12396_v63 = vor.u32 %v15363_v7, %v12393_v12  ;;  %v12404_v28 = vor.u32 %v15364_v20, %v12401_v3  ;;  %v15384_v7 = vld [vmem:[#allocation2 + $0x1a4] sm:$0xf0]  ;;  %v15368_v12 = vld [vmem:[#allocation2 + $0x12c] sm:$0xf] }
 0x754   :  { %v12456_v9 = vor.u32 %v15387_v46, %v12455_v16  ;;  %v12487_v20 = vld [vmem:[#allocation2 + $0x160] sm:$0xf] }
 0x755   :  { %v15391_v3 = vld [vmem:[#allocation2 + $0x1dc] sm:$0xf0] }
 0x75c   :  { %12246 = vmatmul.msk.bf16.vlgmr.msra.gmra.mxu1 %vm306_vm2, %v17245_v35  ;;  %12247 = vmatmul.msk.bf16.vlgmr.msra.gmra.mxu2 %vm306_vm2, %v17245_v35 }
 0x75d   :  { %12248 = vmatmul.msk.bf16.vlgmr.msra.gmra.mxu3 %vm306_vm2, %v17245_v35  ;;  %12517 = vmatmul.msk.bf16.vlgmr.msrb.gmra.mxu0 %vm306_vm2, %v17290_v18 }
 0x75e   :  { %2628 = vmatpush.bf16.msra.mxu1 %v12204_v33  ;;  %2641 = vmatpush.bf16.msra.mxu2 %v12208_v21  ;;  %v12273_v33 = vld [vmem:[#allocation2 + $0x88] sm:$0xf0]  ;;  %v12327_v21 = vld [vmem:[#allocation2 + $0x40] sm:$0xf] }
 0x75f   :  { %2654 = vmatpush.bf16.msra.mxu3 %v12212_v17  ;;  %3149 = vmatpush.bf16.msrb.mxu0 %v12424_v56  ;;  %v12272_v17 = vor.u32 %v15348_v25, %v12271_v22  ;;  %v12276_v56 = vor.u32 %v15332_v50, %v12273_v33  ;;  %v12328_v8 = vor.u32 %v15355_v38, %v12327_v21  ;;  %v12303_v22 = vld [vmem:[#allocation2 + $0x28] sm:$0xf]  ;;  %v15336_v50 = vld [vmem:[#allocation2 + $0x2c] sm:$0xf]  ;;  %v12359_v21 = vld [vmem:[#allocation2 + $0x60] sm:$0xf] }
 0x760   :  { %v15352_v25 = vld [vmem:[#allocation2 + $0xa4] sm:$0xf0]  ;;  %v12305_v33 = vld [vmem:[#allocation2 + $0xa8] sm:$0xf0]  ;;  %v15359_v38 = vld [vmem:[#allocation2 + $0xdc] sm:$0xf0] }
 0x761   :  { %v12360_v34 = vor.u32 %v15359_v38, %v12359_v21 }
 0x762   :  { %2629 = vmatpush.bf16.msra.mxu1 %v12076_v30  ;;  %2642 = vmatpush.bf16.msra.mxu2 %v12080_v60  ;;  %v12417_v30 = vld [vmem:[#allocation2 + $0x198] sm:$0xf0]  ;;  %v12471_v60 = vld [vmem:[#allocation2 + $0x150] sm:$0xf] }
 0x763   :  { %2655 = vmatpush.bf16.msra.mxu3 %v12084_v44  ;;  %3150 = vmatpush.bf16.msrb.mxu0 %v12296_v27  ;;  %v15389_v44 = vld [vmem:[#allocation2 + $0x1cc] sm:$0xf0]  ;;  %v12420_v45 = vor.u32 %v15366_v40, %v12417_v30  ;;  %v15369_v40 = vld [vmem:[#allocation2 + $0x134] sm:$0xf] }
 0x764   :  { %v12472_v47 = vor.u32 %v15389_v44, %v12471_v60  ;;  %v12441_v30 = vld [vmem:[#allocation2 + $0x1b0] sm:$0xf0]  ;;  %v12447_v44 = vld [vmem:[#allocation2 + $0x138] sm:$0xf] }
 0x76c   :  { %12250 = vmatmul.msk.bf16.vlgmr.msrb.gmra.mxu1 %vm306_vm2, %v17245_v35  ;;  %12251 = vmatmul.msk.bf16.vlgmr.msrb.gmra.mxu2 %vm306_vm2, %v17245_v35 }
 0x76d   :  { %12252 = vmatmul.msk.bf16.vlgmr.msrb.gmra.mxu3 %vm306_vm2, %v17245_v35  ;;  %12521 = vmatmul.msk.bf16.vlgmr.msra.gmra.mxu0 %vm306_vm2, %v17290_v18 }
 0x76e   :  { %2680 = vmatpush.bf16.msrb.mxu1 %v12220_v49  ;;  %2693 = vmatpush.bf16.msrb.mxu2 %v12224_v36  ;;  %v15350_v49 = vld [vmem:[#allocation2 + $0x94] sm:$0xf0]  ;;  %v15334_v36 = vld [vmem:[#allocation2 + $0x1c] sm:$0xf] }
 0x76f   :  { %2706 = vmatpush.bf16.msrb.mxu3 %v12228_v48  ;;  %3201 = vmatpush.bf16.msra.mxu0 %v12440_v54  ;;  %v15357_v48 = vld [vmem:[#allocation2 + $0xcc] sm:$0xf0]  ;;  %v12284_v54 = vor.u32 %v15333_v53, %v12281_v43  ;;  %v12288_v1 = vor.u32 %v15350_v49, %v12287_v0  ;;  %v12292_v57 = vor.u32 %v15334_v36, %v12289_v51  ;;  %v12449_v43 = vld [vmem:[#allocation2 + $0x1b8] sm:$0xf0] }
 0x770   :  { %v12344_v37 = vor.u32 %v15357_v48, %v12343_v4  ;;  %v12444_v36 = vor.u32 %v15369_v40, %v12441_v30  ;;  %v15337_v4 = vld [vmem:[#allocation2 + $0x34] sm:$0xf]  ;;  %v12335_v40 = vld [vmem:[#allocation2 + $0x48] sm:$0xf] }
 0x771   :  { %v12313_v48 = vld [vmem:[#allocation2 + $0xb0] sm:$0xf0]  ;;  %v15356_v30 = vld [vmem:[#allocation2 + $0xc4] sm:$0xf0] }
 0x772   :  { %2681 = vmatpush.bf16.msrb.mxu1 %v12092_v13  ;;  %2694 = vmatpush.bf16.msrb.mxu2 %v12096_v62  ;;  %v12425_v62 = vld [vmem:[#allocation2 + $0x1a0] sm:$0xf0] }
 0x773   :  { %2707 = vmatpush.bf16.msrb.mxu3 %v12100_v2  ;;  %3202 = vmatpush.bf16.msra.mxu0 %v12312_v5  ;;  %v12431_v5 = vld [vmem:[#allocation2 + $0x128] sm:$0xf] }
 0x77c   :  { %12254 = vmatmul.msk.bf16.vlgmr.msra.gmra.mxu1 %vm306_vm2, %v17245_v35  ;;  %12255 = vmatmul.msk.bf16.vlgmr.msra.gmra.mxu2 %vm306_vm2, %v17245_v35 }
 0x77d   :  { %12256 = vmatmul.msk.bf16.vlgmr.msra.gmra.mxu3 %vm306_vm2, %v17245_v35  ;;  %12525 = vmatmul.msk.bf16.vlgmr.msrb.gmra.mxu0 %vm306_vm2, %v17290_v18 }
 0x77e   :  { %3058 = vmatpush.bf16.msra.mxu1 %v12396_v63  ;;  %3071 = vmatpush.bf16.msra.mxu2 %v12400_v19  ;;  %v12432_v19 = vor.u32 %v15384_v7, %v12431_v5 }
 0x77f   :  { %3084 = vmatpush.bf16.msra.mxu3 %v12404_v28  ;;  %3253 = vmatpush.bf16.msrb.mxu0 %v12456_v9  ;;  %v12436_v28 = vor.u32 %v15368_v12, %v12433_v11  ;;  %v12488_v9 = vor.u32 %v15391_v3, %v12487_v20 }
 0x782   :  { %3059 = vmatpush.bf16.msra.mxu1 %v12268_v29  ;;  %3072 = vmatpush.bf16.msra.mxu2 %v12272_v17  ;;  %v12300_v29 = vor.u32 %v15335_v26, %v12297_v6  ;;  %v12304_v17 = vor.u32 %v15352_v25, %v12303_v22  ;;  %v12463_v6 = vld [vmem:[#allocation2 + $0x148] sm:$0xf]  ;;  %v12465_v25 = vld [vmem:[#allocation2 + $0x1c8] sm:$0xf0] }
 0x783   :  { %3085 = vmatpush.bf16.msra.mxu3 %v12276_v56  ;;  %3254 = vmatpush.bf16.msrb.mxu0 %v12328_v8  ;;  %v12308_v8 = vor.u32 %v15336_v50, %v12305_v33  ;;  %v12679_v50 = vld [vmem:[#allocation2 + $0x500] sm:$0xf] }
 0x784   :  { %v15507_v33 = vld [vmem:[#allocation2 + $0x57c] sm:$0xf0] }
 0x789   :  { %v17316_v27 = vpop.f32.mrf.mxu1 }
 0x78a   :  { %v17318_v41 = vpop.f32.mrf.mxu0 }
 0x78c   :  { %12258 = vmatmul.msk.bf16.vlgmr.msrb.gmra.mxu1 %vm306_vm2, %v17245_v35  ;;  %12259 = vmatmul.msk.bf16.vlgmr.msrb.gmra.mxu2 %vm306_vm2, %v17245_v35 }
 0x78d   :  { %12260 = vmatmul.msk.bf16.vlgmr.msrb.gmra.mxu3 %vm306_vm2, %v17245_v35  ;;  %12529 = vmatmul.msk.bf16.vlgmr.msra.gmra.mxu0 %vm306_vm2, %v17290_v18  ;;  %v15367_v35 = vld [vmem:[#allocation2 + $0x124] sm:$0xf] }
 0x78e   :  { %3110 = vmatpush.bf16.msrb.mxu1 %v12412_v42  ;;  %3123 = vmatpush.bf16.msrb.mxu2 %v12416_v32  ;;  %v12428_v63 = vor.u32 %v15367_v35, %v12425_v62  ;;  %v15386_v42 = vld [vmem:[#allocation2 + $0x1b4] sm:$0xf0]  ;;  %v15370_v32 = vld [vmem:[#allocation2 + $0x13c] sm:$0xf]  ;;  %v12375_v35 = vld [vmem:[#allocation2 + $0x70] sm:$0xf] }
 0x78f   :  { %v17328_v55 = vpop.f32.mrf.mxu2  ;;  %3136 = vmatpush.bf16.msrb.mxu3 %v12420_v45  ;;  %3305 = vmatpush.bf16.msra.mxu0 %v12472_v47  ;;  %v12503_v45 = vld [vmem:[#allocation2 + $0x170] sm:$0xf]  ;;  %v12448_v51 = vor.u32 %v15386_v42, %v12447_v44  ;;  %v12337_v44 = vld [vmem:[#allocation2 + $0xc8] sm:$0xf0]  ;;  %v12551_v42 = vld [vmem:[#allocation2 + $0x400] sm:$0xf] }
 0x790   :  { %v17330_v61 = vpop.f32.mrf.mxu3  ;;  %v15393_v47 = vld [vmem:[#allocation2 + $0x1ec] sm:$0xf0] }
 0x791   :  { %v2308_v58 = vpop.f32.mrf.mxu1  ;;  %v15361_v62 = vld [vmem:[#allocation2 + $0xec] sm:$0xf0] }
 0x792   :  { %v2464_v13 = vpop.f32.mrf.mxu0  ;;  %3111 = vmatpush.bf16.msrb.mxu1 %v12284_v54  ;;  %3124 = vmatpush.bf16.msrb.mxu2 %v12288_v1  ;;  %v12452_v54 = vor.u32 %v15370_v32, %v12449_v43  ;;  %v12504_v1 = vor.u32 %v15393_v47, %v12503_v45  ;;  %v15338_v58 = vld [vmem:[#allocation2 + $0x3c] sm:$0xf]  ;;  %v15475_v32 = vld [vmem:[#allocation2 + $0x47c] sm:$0xf0]  ;;  %v12336_v43 = vor.u32 %v15356_v30, %v12335_v40 }
 0x793   :  { %3137 = vmatpush.bf16.msrb.mxu3 %v12292_v57  ;;  %3306 = vmatpush.bf16.msra.mxu0 %v12344_v37  ;;  %v12319_v57 = vld [vmem:[#allocation2 + $0x38] sm:$0xf]  ;;  %v12321_v13 = vld [vmem:[#allocation2 + $0xb8] sm:$0xf0] }
 0x794   :  { %v15354_v37 = vld [vmem:[#allocation2 + $0xb4] sm:$0xf0]  ;;  %v12324_v12 = vor.u32 %v15338_v58, %v12321_v13  ;;  %v15374_v13 = vld [vmem:[#allocation2 + $0x15c] sm:$0xf] }
 0x795   :  { %v12320_v5 = vor.u32 %v15354_v37, %v12319_v57  ;;  %v12479_v37 = vld [vmem:[#allocation2 + $0x158] sm:$0xf] }
 0x796   :  { %v15390_v58 = vld [vmem:[#allocation2 + $0x1d4] sm:$0xf0] }
 0x797   :  { %v2321_v2 = vpop.f32.mrf.mxu2 }
 0x798   :  { %v2334_v15 = vpop.f32.mrf.mxu3  ;;  %v12316_v2 = vor.u32 %v15337_v4, %v12313_v48 }
 0x799   :  { %v17332_v16 = vpop.f32.mrf.mxu1  ;;  %v12376_v15 = vor.u32 %v15361_v62, %v12375_v35  ;;  %v12481_v62 = vld [vmem:[#allocation2 + $0x1d8] sm:$0xf0] }
 0x79a   :  { %v17334_v46 = vpop.f32.mrf.mxu0 }
 0x79c   :  { %12518 = vmatmul.msk.bf16.vlgmr.msra.gmra.mxu1 %vm306_vm2, %v17290_v18  ;;  %12519 = vmatmul.msk.bf16.vlgmr.msra.gmra.mxu2 %vm306_vm2, %v17290_v18 }
 0x79d   :  { %12520 = vmatmul.msk.bf16.vlgmr.msra.gmra.mxu3 %vm306_vm2, %v17290_v18  ;;  %12533 = vmatmul.msk.bf16.vlgmr.msrb.gmra.mxu0 %vm306_vm2, %v17290_v18 }
 0x79e   :  { %3162 = vmatpush.bf16.msra.mxu1 %v12428_v63  ;;  %3175 = vmatpush.bf16.msra.mxu2 %v12432_v19  ;;  %v15371_v63 = vld [vmem:[#allocation2 + $0x144] sm:$0xf] }
 0x79f   :  { %v17344_v56 = vpop.f32.mrf.mxu2  ;;  %3188 = vmatpush.bf16.msra.mxu3 %v12436_v28  ;;  %3357 = vmatpush.bf16.msrb.mxu0 %v12488_v9  ;;  %v12457_v19 = vld [vmem:[#allocation2 + $0x1c0] sm:$0xf0]  ;;  %v15388_v28 = vld [vmem:[#allocation2 + $0x1c4] sm:$0xf0]  ;;  %v15372_v9 = vld [vmem:[#allocation2 + $0x14c] sm:$0xf] }
 0x7a0   :  { %v17346_v24 = vpop.f32.mrf.mxu3 }
 0x7a1   :  { %v2347_v52 = vpop.f32.mrf.mxu1 }
 0x7a2   :  { %v2516_v39 = vpop.f32.mrf.mxu0  ;;  %3163 = vmatpush.bf16.msra.mxu1 %v12300_v29  ;;  %3176 = vmatpush.bf16.msra.mxu2 %v12304_v17  ;;  %v12460_v29 = vor.u32 %v15371_v63, %v12457_v19  ;;  %v12464_v17 = vor.u32 %v15388_v28, %v12463_v6  ;;  %v12468_v52 = vor.u32 %v15372_v9, %v12465_v25  ;;  %v15341_v19 = vld [vmem:[#allocation2 + $0x54] sm:$0xf]  ;;  %v12351_v9 = vld [vmem:[#allocation2 + $0x58] sm:$0xf]  ;;  %v15342_v25 = vld [vmem:[#allocation2 + $0x5c] sm:$0xf] }
 0x7a3   :  { %3189 = vmatpush.bf16.msra.mxu3 %v12308_v8  ;;  %3358 = vmatpush.bf16.msrb.mxu0 %v12360_v34  ;;  %v15339_v8 = vld [vmem:[#allocation2 + $0x44] sm:$0xf]  ;;  %v12680_v39 = vor.u32 %v15507_v33, %v12679_v50  ;;  %v12480_v63 = vor.u32 %v15390_v58, %v12479_v37  ;;  %v12484_v6 = vor.u32 %v15374_v13, %v12481_v62  ;;  %v12567_v50 = vld [vmem:[#allocation2 + $0x410] sm:$0xf] }
 0x7a4   :  { %v12329_v34 = vld [vmem:[#allocation2 + $0xc0] sm:$0xf0]  ;;  %v15477_v33 = vld [vmem:[#allocation2 + $0x48c] sm:$0xf0] }
 0x7a5   :  { %v15343_v13 = vld [vmem:[#allocation2 + $0x64] sm:$0xf] }
 0x7a7   :  { %v2360_v60 = vpop.f32.mrf.mxu2 }
 0x7a8   :  { %v2373_v53 = vpop.f32.mrf.mxu3  ;;  %v15340_v60 = vld [vmem:[#allocation2 + $0x4c] sm:$0xf] }
 0x7a9   :  { %v17348_v0 = vpop.f32.mrf.mxu1  ;;  %v12332_v53 = vor.u32 %v15339_v8, %v12329_v34  ;;  %v12340_v47 = vor.u32 %v15340_v60, %v12337_v44  ;;  %v15375_v60 = vld [vmem:[#allocation2 + $0x164] sm:$0xf] }
 0x7aa   :  { %v17350_v49 = vpop.f32.mrf.mxu0  ;;  %v12489_v44 = vld [vmem:[#allocation2 + $0x1e0] sm:$0xf0] }
 0x7ab   :  { %v12492_v37 = vor.u32 %v15375_v60, %v12489_v44  ;;  %v12513_v44 = vld [vmem:[#allocation2 + $0x1f8] sm:$0xf0] }
 0x7ac   :  { %12522 = vmatmul.msk.bf16.vlgmr.msrb.gmra.mxu1 %vm306_vm2, %v17290_v18  ;;  %12523 = vmatmul.msk.bf16.vlgmr.msrb.gmra.mxu2 %vm306_vm2, %v17290_v18 }
 0x7ad   :  { %12524 = vmatmul.msk.bf16.vlgmr.msrb.gmra.mxu3 %vm306_vm2, %v17290_v18  ;;  %12537 = vmatmul.msk.bf16.vlgmr.msra.gmra.mxu0 %vm306_vm2, %v17290_v18 }
 0x7ae   :  { %3214 = vmatpush.bf16.msrb.mxu1 %v12444_v36  ;;  %3227 = vmatpush.bf16.msrb.mxu2 %v12448_v51  ;;  %v12552_v36 = vor.u32 %v15475_v32, %v12551_v42  ;;  %v12495_v32 = vld [vmem:[#allocation2 + $0x168] sm:$0xf] }
 0x7af   :  { %v17360_v7 = vpop.f32.mrf.mxu2  ;;  %3240 = vmatpush.bf16.msrb.mxu3 %v12452_v54  ;;  %3409 = vmatpush.bf16.msra.mxu0 %v12504_v1  ;;  %v15373_v54 = vld [vmem:[#allocation2 + $0x154] sm:$0xf] }
 0x7b0   :  { %v17362_v11 = vpop.f32.mrf.mxu3  ;;  %v12473_v1 = vld [vmem:[#allocation2 + $0x1d0] sm:$0xf0] }
 0x7b1   :  { %v2386_v20 = vpop.f32.mrf.mxu1 }
 0x7b2   :  { %v2568_v3 = vpop.f32.mrf.mxu0  ;;  %3215 = vmatpush.bf16.msrb.mxu1 %v12316_v2  ;;  %3228 = vmatpush.bf16.msrb.mxu2 %v12320_v5  ;;  %v12695_v2 = vld [vmem:[#allocation2 + $0x510] sm:$0xf] }
 0x7b3   :  { %3241 = vmatpush.bf16.msrb.mxu3 %v12324_v12  ;;  %3410 = vmatpush.bf16.msra.mxu0 %v12376_v15  ;;  %v15509_v5 = vld [vmem:[#allocation2 + $0x58c] sm:$0xf0]  ;;  %v4294_v12 = vpack.c.bf16 %v17229_v59, %v17229_v59  ;;  %v12476_v3 = vor.u32 %v15373_v54, %v12473_v1  ;;  %v12353_v59 = vld [vmem:[#allocation2 + $0xd8] sm:$0xf0] }
 0x7b4   :  { %v12696_v28 = vor.u32 %v15509_v5, %v12695_v2  ;;  %v12356_v34 = vor.u32 %v15342_v25, %v12353_v59  ;;  %v12367_v5 = vld [vmem:[#allocation2 + $0x68] sm:$0xf] }
 0x7b5   :  { %4360 = vrot.lane.b32.xlu1 %v4294_v12, %s16730_s26  ;;  %v15360_v12 = vld [vmem:[#allocation2 + $0xe4] sm:$0xf0] }
 0x7b7   :  { %v2399_v26 = vpop.f32.mrf.mxu2 }
 0x7b8   :  { %v2412_v22 = vpop.f32.mrf.mxu3  ;;  %v12345_v26 = vld [vmem:[#allocation2 + $0xd0] sm:$0xf0] }
 0x7b9   :  { %v17364_v21 = vpop.f32.mrf.mxu1  ;;  %v15358_v22 = vld [vmem:[#allocation2 + $0xd4] sm:$0xf0] }
 0x7ba   :  { %v17366_v38 = vpop.f32.mrf.mxu0 }
 0x7bc   :  { %12526 = vmatmul.msk.bf16.vlgmr.msra.gmra.mxu1 %vm306_vm2, %v17290_v18  ;;  %12527 = vmatmul.msk.bf16.vlgmr.msra.gmra.mxu2 %vm306_vm2, %v17290_v18 }
 0x7bd   :  { %12528 = vmatmul.msk.bf16.vlgmr.msra.gmra.mxu3 %vm306_vm2, %v17290_v18  ;;  %12541 = vmatmul.msk.bf16.vlgmr.msrb.gmra.mxu0 %vm306_vm2, %v17290_v18 }
 0x7be   :  { %3266 = vmatpush.bf16.msra.mxu1 %v12460_v29  ;;  %3279 = vmatpush.bf16.msra.mxu2 %v12464_v17  ;;  %v12348_v29 = vor.u32 %v15341_v19, %v12345_v26  ;;  %v12352_v17 = vor.u32 %v15358_v22, %v12351_v9  ;;  %v12583_v19 = vld [vmem:[#allocation2 + $0x420] sm:$0xf] }
 0x7bf   :  { %v17376_v45 = vpop.f32.mrf.mxu2  ;;  %3292 = vmatpush.bf16.msra.mxu3 %v12468_v52  ;;  %3852 = vmatpush.bf16.msrb.mxu0 %v12680_v39  ;;  %v12568_v52 = vor.u32 %v15477_v33, %v12567_v50  ;;  %v15479_v26 = vld [vmem:[#allocation2 + $0x49c] sm:$0xf0] }
 0x7c0   :  { %v17378_v51 = vpop.f32.mrf.mxu3  ;;  %v12584_v25 = vor.u32 %v15479_v26, %v12583_v19 }
 0x7c1   :  { %v2425_v4 = vpop.f32.mrf.mxu1 }
 0x7c2   :  { %v2620_v48 = vpop.f32.mrf.mxu0  ;;  %3267 = vmatpush.bf16.msra.mxu1 %v12332_v53  ;;  %3280 = vmatpush.bf16.msra.mxu2 %v12336_v43  ;;  %v15392_v53 = vld [vmem:[#allocation2 + $0x1e4] sm:$0xf0]  ;;  %v15376_v43 = vld [vmem:[#allocation2 + $0x16c] sm:$0xf]  ;;  %v12711_v4 = vld [vmem:[#allocation2 + $0x520] sm:$0xf] }
 0x7c3   :  { %3293 = vmatpush.bf16.msra.mxu3 %v12340_v47  ;;  %3853 = vmatpush.bf16.msrb.mxu0 %v12552_v36  ;;  %v12497_v36 = vld [vmem:[#allocation2 + $0x1e8] sm:$0xf0]  ;;  %v15511_v48 = vld [vmem:[#allocation2 + $0x59c] sm:$0xf0]  ;;  %v12496_v58 = vor.u32 %v15392_v53, %v12495_v32  ;;  %v15513_v32 = vld [vmem:[#allocation2 + $0x5ac] sm:$0xf0] }
 0x7c4   :  { %v12500_v62 = vor.u32 %v15376_v43, %v12497_v36  ;;  %v12712_v2 = vor.u32 %v15511_v48, %v12711_v4  ;;  %v15345_v4 = vld [vmem:[#allocation2 + $0x74] sm:$0xf] }
 0x7c5   :  { %v12377_v48 = vld [vmem:[#allocation2 + $0xf0] sm:$0xf0] }
 0x7c7   :  { %v2438_v57 = vpop.f32.mrf.mxu2 }
 0x7c8   :  { %v2451_v35 = vpop.f32.mrf.mxu3  ;;  %v17403_v57 = vpop.permute.xlu1 %3521 }
 0x7c9   :  { %v17382_v15 = vpop.f32.mrf.mxu1  ;;  %v12361_v35 = vld [vmem:[#allocation2 + $0xe0] sm:$0xf0] }
 0x7ca   :  { %v17384_v20 = vpop.f32.mrf.mxu0 }
 0x7cc   :  { %12530 = vmatmul.msk.bf16.vlgmr.msrb.gmra.mxu1 %vm306_vm2, %v17290_v18  ;;  %12531 = vmatmul.msk.bf16.vlgmr.msrb.gmra.mxu2 %vm306_vm2, %v17290_v18 }
 0x7cd   :  { %12532 = vmatmul.msk.bf16.vlgmr.msrb.gmra.mxu3 %vm306_vm2, %v17290_v18  ;;  %12545 = vmatmul.msk.bf16.vlgmr.msra.gmra.mxu0 %vm306_vm2, %v17290_v18 }
 0x7ce   :  { %3318 = vmatpush.bf16.msrb.mxu1 %v12476_v3  ;;  %3331 = vmatpush.bf16.msrb.mxu2 %v12480_v63  ;;  %v15344_v3 = vld [vmem:[#allocation2 + $0x6c] sm:$0xf] }
 0x7cf   :  { %v17395_v8 = vpop.f32.mrf.mxu2  ;;  %3344 = vmatpush.bf16.msrb.mxu3 %v12484_v6  ;;  %3904 = vmatpush.bf16.msra.mxu0 %v12696_v28  ;;  %v12369_v63 = vld [vmem:[#allocation2 + $0xe8] sm:$0xf0]  ;;  %v12364_v6 = vor.u32 %v15343_v13, %v12361_v35  ;;  %v12368_v28 = vor.u32 %v15360_v12, %v12367_v5  ;;  %v12383_v13 = vld [vmem:[#allocation2 + $0x78] sm:$0xf]  ;;  %v12599_v5 = vld [vmem:[#allocation2 + $0x430] sm:$0xf] }
 0x7d0   :  { %v17397_v39 = vpop.f32.mrf.mxu3  ;;  %v12372_v22 = vor.u32 %v15344_v3, %v12369_v63  ;;  %v15362_v35 = vld [vmem:[#allocation2 + $0xf4] sm:$0xf0]  ;;  %v15481_v12 = vld [vmem:[#allocation2 + $0x4ac] sm:$0xf0]  ;;  %v12380_v3 = vor.u32 %v15345_v4, %v12377_v48  ;;  %v15459_v4 = vld [vmem:[#allocation2 + $0x404] sm:$0xf] }
 0x7d1   :  { %v2477_v40 = vpop.f32.mrf.mxu1  ;;  %v12384_v63 = vor.u32 %v15362_v35, %v12383_v13  ;;  %v12553_v48 = vld [vmem:[#allocation2 + $0x480] sm:$0xf0]  ;;  %v12559_v13 = vld [vmem:[#allocation2 + $0x408] sm:$0xf] }
 0x7d2   :  { %v2672_v30 = vpop.f32.mrf.mxu0  ;;  %3319 = vmatpush.bf16.msrb.mxu1 %v12348_v29  ;;  %3332 = vmatpush.bf16.msrb.mxu2 %v12352_v17  ;;  %v15377_v29 = vld [vmem:[#allocation2 + $0x174] sm:$0xf]  ;;  %v15394_v40 = vld [vmem:[#allocation2 + $0x1f4] sm:$0xf0]  ;;  %v15476_v35 = vld [vmem:[#allocation2 + $0x484] sm:$0xf0] }
 0x7d3   :  { %3345 = vmatpush.bf16.msrb.mxu3 %v12356_v34  ;;  %3905 = vmatpush.bf16.msra.mxu0 %v12568_v52  ;;  %v12505_v17 = vld [vmem:[#allocation2 + $0x1f0] sm:$0xf0]  ;;  %v12511_v52 = vld [vmem:[#allocation2 + $0x178] sm:$0xf]  ;;  %v15378_v30 = vld [vmem:[#allocation2 + $0x17c] sm:$0xf] }
 0x7d4   :  { %v12512_v36 = vor.u32 %v15394_v40, %v12511_v52  ;;  %v15492_v52 = vld [vmem:[#allocation2 + $0x50c] sm:$0xf] }
 0x7d7   :  { %v2490_v42 = vpop.f32.mrf.mxu2 }
 0x7d8   :  { %v2503_v47 = vpop.f32.mrf.mxu3  ;;  %v12727_v42 = vld [vmem:[#allocation2 + $0x530] sm:$0xf] }
 0x7d9   :  { %v17399_v54 = vpop.f32.mrf.mxu1  ;;  %v12508_v47 = vor.u32 %v15377_v29, %v12505_v17  ;;  %v12687_v17 = vld [vmem:[#allocation2 + $0x508] sm:$0xf] }
 0x7da   :  { %19212 = vst [vmem:[#allocation34_spill] sm:$0xff] %v17399_v54  ;;  %v17401_v1 = vpop.f32.mrf.mxu0  ;;  %v15472_v54 = vld [vmem:[#allocation2 + $0x46c] sm:$0xf] }
 0x7dc   :  { %12534 = vmatmul.msk.bf16.vlgmr.msra.gmra.mxu1 %vm306_vm2, %v17290_v18  ;;  %12535 = vmatmul.msk.bf16.vlgmr.msra.gmra.mxu2 %vm306_vm2, %v17290_v18 }
 0x7dd   :  { %12536 = vmatmul.msk.bf16.vlgmr.msra.gmra.mxu3 %vm306_vm2, %v17290_v18  ;;  %12805 = vmatmul.msk.bf16.vlgmr.msrb.gmra.mxu0 %vm306_vm2, %v17403_v57 }
 0x7de   :  { %3370 = vmatpush.bf16.msra.mxu1 %v12492_v37  ;;  %3383 = vmatpush.bf16.msra.mxu2 %v12496_v58  ;;  %v12516_v37 = vor.u32 %v15378_v30, %v12513_v44  ;;  %v12728_v58 = vor.u32 %v15513_v32, %v12727_v42  ;;  %v12689_v30 = vld [vmem:[#allocation2 + $0x588] sm:$0xf0]  ;;  %v15515_v44 = vld [vmem:[#allocation2 + $0x5bc] sm:$0xf0] }
 0x7df   :  { %v17413_v9 = vpop.f32.mrf.mxu2  ;;  %3396 = vmatpush.bf16.msra.mxu3 %v12500_v62  ;;  %3956 = vmatpush.bf16.msrb.mxu0 %v12712_v2  ;;  %v15346_v62 = vld [vmem:[#allocation2 + $0x7c] sm:$0xf] }
 0x7e0   :  { %19213 = vst [vmem:[#allocation35_spill] sm:$0xff] %v17413_v9  ;;  %v17415_v59 = vpop.f32.mrf.mxu3  ;;  %v12385_v2 = vld [vmem:[#allocation2 + $0xf8] sm:$0xf0]  ;;  %v15488_v9 = vld [vmem:[#allocation2 + $0x4e4] sm:$0xf0] }
 0x7e1   :  { %19214 = vst [vmem:[#allocation36_spill] sm:$0xff] %v17415_v59  ;;  %v2529_v50 = vpop.f32.mrf.mxu1  ;;  %v12388_v26 = vor.u32 %v15346_v62, %v12385_v2  ;;  %v15460_v62 = vld [vmem:[#allocation2 + $0x40c] sm:$0xf]  ;;  %v12777_v59 = vld [vmem:[#allocation2 + $0x5e0] sm:$0xf0] }
 0x7e2   :  { %v3050_v33 = vpop.f32.mrf.mxu0  ;;  %3371 = vmatpush.bf16.msra.mxu1 %v12364_v6  ;;  %3384 = vmatpush.bf16.msra.mxu2 %v12368_v28  ;;  %v12600_v6 = vor.u32 %v15481_v12, %v12599_v5  ;;  %v15491_v50 = vld [vmem:[#allocation2 + $0x504] sm:$0xf]  ;;  %v12561_v2 = vld [vmem:[#allocation2 + $0x488] sm:$0xf0]  ;;  %v12615_v5 = vld [vmem:[#allocation2 + $0x440] sm:$0xf] }
 0x7e3   :  { %3397 = vmatpush.bf16.msra.mxu3 %v12372_v22  ;;  %3957 = vmatpush.bf16.msrb.mxu0 %v12584_v25  ;;  %v12681_v33 = vld [vmem:[#allocation2 + $0x580] sm:$0xf0]  ;;  %v15483_v12 = vld [vmem:[#allocation2 + $0x4bc] sm:$0xf0] }
 0x7e7   :  { %v2542_v34 = vpop.f32.mrf.mxu2 }
 0x7e8   :  { %v2555_v60 = vpop.f32.mrf.mxu3  ;;  %v15508_v34 = vld [vmem:[#allocation2 + $0x584] sm:$0xf0] }
 0x7e9   :  { %v17417_v53 = vpop.f32.mrf.mxu1  ;;  %v12743_v60 = vld [vmem:[#allocation2 + $0x540] sm:$0xf] }
 0x7ea   :  { %19215 = vst [vmem:[#allocation37_spill] sm:$0xff] %v17417_v53  ;;  %v17419_v43 = vpop.f32.mrf.mxu0  ;;  %v15541_v53 = vld [vmem:[#allocation2 + $0x68c] sm:$0xf0] }
 0x7ec   :  { %12538 = vmatmul.msk.bf16.vlgmr.msrb.gmra.mxu1 %vm306_vm2, %v17290_v18  ;;  %12539 = vmatmul.msk.bf16.vlgmr.msrb.gmra.mxu2 %vm306_vm2, %v17290_v18 }
 0x7ed   :  { %12540 = vmatmul.msk.bf16.vlgmr.msrb.gmra.mxu3 %vm306_vm2, %v17290_v18  ;;  %12809 = vmatmul.msk.bf16.vlgmr.msra.gmra.mxu0 %vm306_vm2, %v17403_v57 }
 0x7ee   :  { %3422 = vmatpush.bf16.msrb.mxu1 %v12508_v47  ;;  %3435 = vmatpush.bf16.msrb.mxu2 %v12512_v36  ;;  %v12684_v47 = vor.u32 %v15491_v50, %v12681_v33  ;;  %v12688_v36 = vor.u32 %v15508_v34, %v12687_v17  ;;  %v12697_v17 = vld [vmem:[#allocation2 + $0x590] sm:$0xf0] }
 0x7ef   :  { %v17429_v19 = vpop.f32.mrf.mxu2  ;;  %3448 = vmatpush.bf16.msrb.mxu3 %v12516_v37  ;;  %4008 = vmatpush.bf16.msra.mxu0 %v12728_v58  ;;  %v12692_v37 = vor.u32 %v15492_v52, %v12689_v30  ;;  %v12744_v58 = vor.u32 %v15515_v44, %v12743_v60  ;;  %v12703_v52 = vld [vmem:[#allocation2 + $0x518] sm:$0xf]  ;;  %v15494_v30 = vld [vmem:[#allocation2 + $0x51c] sm:$0xf] }
 0x7f0   :  { %19216 = vst [vmem:[#allocation38_spill] sm:$0xff] %v17429_v19  ;;  %v17431_v28 = vpop.f32.mrf.mxu3  ;;  %v12705_v44 = vld [vmem:[#allocation2 + $0x598] sm:$0xf0]  ;;  %v12855_v19 = vld [vmem:[#allocation2 + $0x610] sm:$0xf] }
 0x7f1   :  { %19217 = vst [vmem:[#allocation39_spill] sm:$0xff] %v17431_v28  ;;  %v2581_v22 = vpop.f32.mrf.mxu1  ;;  %v12761_v28 = vld [vmem:[#allocation2 + $0x5d0] sm:$0xf0] }
 0x7f2   :  { %v3102_v25 = vpop.f32.mrf.mxu0  ;;  %3423 = vmatpush.bf16.msrb.mxu1 %v12380_v3  ;;  %3436 = vmatpush.bf16.msrb.mxu2 %v12384_v63  ;;  %v12556_v3 = vor.u32 %v15459_v4, %v12553_v48  ;;  %v12560_v63 = vor.u32 %v15476_v35, %v12559_v13  ;;  %v12616_v22 = vor.u32 %v15483_v12, %v12615_v5  ;;  %v15461_v13 = vld [vmem:[#allocation2 + $0x414] sm:$0xf]  ;;  %v12575_v5 = vld [vmem:[#allocation2 + $0x418] sm:$0xf] }
 0x7f3   :  { %3449 = vmatpush.bf16.msrb.mxu3 %v12388_v26  ;;  %4009 = vmatpush.bf16.msra.mxu0 %v12600_v6  ;;  %v12564_v6 = vor.u32 %v15460_v62, %v12561_v2  ;;  %v12569_v35 = vld [vmem:[#allocation2 + $0x490] sm:$0xf0]  ;;  %v12708_v62 = vor.u32 %v15494_v30, %v12705_v44  ;;  %v15478_v12 = vld [vmem:[#allocation2 + $0x494] sm:$0xf0] }
 0x7f7   :  { %v2594_v29 = vpop.f32.mrf.mxu2 }
 0x7f8   :  { %v2607_v40 = vpop.f32.mrf.mxu3  ;;  %v15493_v29 = vld [vmem:[#allocation2 + $0x514] sm:$0xf] }
 0x7f9   :  { %v17433_v42 = vpop.f32.mrf.mxu1  ;;  %v15510_v40 = vld [vmem:[#allocation2 + $0x594] sm:$0xf0] }
 0x7fa   :  { %19218 = vst [vmem:[#allocation40_spill] sm:$0xff] %v17433_v42  ;;  %v17435_v32 = vpop.f32.mrf.mxu0  ;;  %v15501_v42 = vld [vmem:[#allocation2 + $0x554] sm:$0xf] }
 0x7fc   :  { %12542 = vmatmul.msk.bf16.vlgmr.msra.gmra.mxu1 %vm306_vm2, %v17290_v18  ;;  %12543 = vmatmul.msk.bf16.vlgmr.msra.gmra.mxu2 %vm306_vm2, %v17290_v18 }
 0x7fd   :  { %12544 = vmatmul.msk.bf16.vlgmr.msra.gmra.mxu3 %vm306_vm2, %v17290_v18  ;;  %12813 = vmatmul.msk.bf16.vlgmr.msrb.gmra.mxu0 %vm306_vm2, %v17403_v57 }
 0x7fe   :  { %3865 = vmatpush.bf16.msra.mxu1 %v12684_v47  ;;  %3878 = vmatpush.bf16.msra.mxu2 %v12688_v36  ;;  %v12759_v47 = vld [vmem:[#allocation2 + $0x550] sm:$0xf] }
 0x7ff   :  { %v17445_v26 = vpop.f32.mrf.mxu2  ;;  %3891 = vmatpush.bf16.msra.mxu3 %v12692_v37  ;;  %4060 = vmatpush.bf16.msrb.mxu0 %v12744_v58  ;;  %v15517_v36 = vld [vmem:[#allocation2 + $0x5cc] sm:$0xf0]  ;;  %v12700_v37 = vor.u32 %v15493_v29, %v12697_v17  ;;  %v12704_v58 = vor.u32 %v15510_v40, %v12703_v52 }
 0x800   :  { %19219 = vst [vmem:[#allocation41_spill] sm:$0xff] %v17445_v26  ;;  %v17447_v25 = vpop.f32.mrf.mxu3  ;;  %v12760_v2 = vor.u32 %v15517_v36, %v12759_v47  ;;  %v12719_v47 = vld [vmem:[#allocation2 + $0x528] sm:$0xf]  ;;  %v15539_v26 = vld [vmem:[#allocation2 + $0x67c] sm:$0xf0] }
 0x801   :  { %19220 = vst [vmem:[#allocation42_spill] sm:$0xff] %v17447_v25  ;;  %v2633_v50 = vpop.f32.mrf.mxu1  ;;  %v15512_v36 = vld [vmem:[#allocation2 + $0x5a4] sm:$0xf0]  ;;  %v12839_v25 = vld [vmem:[#allocation2 + $0x600] sm:$0xf] }
 0x802   :  { %v3154_v33 = vpop.f32.mrf.mxu0  ;;  %3866 = vmatpush.bf16.msra.mxu1 %v12556_v3  ;;  %3879 = vmatpush.bf16.msra.mxu2 %v12560_v63  ;;  %v15462_v3 = vld [vmem:[#allocation2 + $0x41c] sm:$0xf]  ;;  %v12572_v50 = vor.u32 %v15461_v13, %v12569_v35  ;;  %v12721_v13 = vld [vmem:[#allocation2 + $0x5a8] sm:$0xf0]  ;;  %v12775_v35 = vld [vmem:[#allocation2 + $0x560] sm:$0xf] }
 0x803   :  { %3892 = vmatpush.bf16.msra.mxu3 %v12564_v6  ;;  %4061 = vmatpush.bf16.msrb.mxu0 %v12616_v22  ;;  %v12577_v63 = vld [vmem:[#allocation2 + $0x498] sm:$0xf0]  ;;  %v12631_v6 = vld [vmem:[#allocation2 + $0x450] sm:$0xf]  ;;  %v12576_v33 = vor.u32 %v15478_v12, %v12575_v5 }
 0x804   :  { %v15485_v22 = vld [vmem:[#allocation2 + $0x4cc] sm:$0xf0]  ;;  %v12580_v17 = vor.u32 %v15462_v3, %v12577_v63  ;;  %v12720_v3 = vor.u32 %v15512_v36, %v12719_v47  ;;  %v15463_v63 = vld [vmem:[#allocation2 + $0x424] sm:$0xf] }
 0x807   :  { %v2646_v34 = vpop.f32.mrf.mxu2 }
 0x808   :  { %v2659_v60 = vpop.f32.mrf.mxu3  ;;  %v12632_v34 = vor.u32 %v15485_v22, %v12631_v6  ;;  %v12585_v6 = vld [vmem:[#allocation2 + $0x4a0] sm:$0xf0] }
 0x809   :  { %v17449_v4 = vpop.f32.mrf.mxu1  ;;  %v12713_v60 = vld [vmem:[#allocation2 + $0x5a0] sm:$0xf0] }
 0x80a   :  { %19221 = vst [vmem:[#allocation43_spill] sm:$0xff] %v17449_v4  ;;  %v17451_v48 = vpop.f32.mrf.mxu0  ;;  %v12745_v4 = vld [vmem:[#allocation2 + $0x5c0] sm:$0xf0] }
 0x80c   :  { %12546 = vmatmul.msk.bf16.vlgmr.msrb.gmra.mxu1 %vm306_vm2, %v17290_v18  ;;  %12547 = vmatmul.msk.bf16.vlgmr.msrb.gmra.mxu2 %vm306_vm2, %v17290_v18 }
 0x80d   :  { %12548 = vmatmul.msk.bf16.vlgmr.msrb.gmra.mxu3 %vm306_vm2, %v17290_v18  ;;  %12817 = vmatmul.msk.bf16.vlgmr.msra.gmra.mxu0 %vm306_vm2, %v17403_v57  ;;  %v15495_v18 = vld [vmem:[#allocation2 + $0x524] sm:$0xf] }
 0x80e   :  { %3917 = vmatpush.bf16.msrb.mxu1 %v12700_v37  ;;  %3930 = vmatpush.bf16.msrb.mxu2 %v12704_v58  ;;  %v15496_v37 = vld [vmem:[#allocation2 + $0x52c] sm:$0xf]  ;;  %v12716_v12 = vor.u32 %v15495_v18, %v12713_v60  ;;  %v12588_v18 = vor.u32 %v15463_v63, %v12585_v6  ;;  %v15514_v63 = vld [vmem:[#allocation2 + $0x5b4] sm:$0xf0]  ;;  %v15498_v6 = vld [vmem:[#allocation2 + $0x53c] sm:$0xf] }
 0x80f   :  { %v17461_v29 = vpop.f32.mrf.mxu2  ;;  %3943 = vmatpush.bf16.msrb.mxu3 %v12708_v62  ;;  %4112 = vmatpush.bf16.msra.mxu0 %v12760_v2  ;;  %v15519_v62 = vld [vmem:[#allocation2 + $0x5dc] sm:$0xf0]  ;;  %v12724_v22 = vor.u32 %v15496_v37, %v12721_v13 }
 0x810   :  { %19222 = vst [vmem:[#allocation44_spill] sm:$0xff] %v17461_v29  ;;  %v17463_v52 = vpop.f32.mrf.mxu3  ;;  %v15499_v29 = vld [vmem:[#allocation2 + $0x544] sm:$0xf] }
 0x811   :  { %19223 = vst [vmem:[#allocation45_spill] sm:$0xff] %v17463_v52  ;;  %v2685_v40 = vpop.f32.mrf.mxu1  ;;  %v15489_v52 = vld [vmem:[#allocation2 + $0x4ec] sm:$0xf0] }
 0x812   :  { %v3206_v30 = vpop.f32.mrf.mxu0  ;;  %3918 = vmatpush.bf16.msrb.mxu1 %v12572_v50  ;;  %3931 = vmatpush.bf16.msrb.mxu2 %v12576_v33  ;;  %v12776_v50 = vor.u32 %v15519_v62, %v12775_v35  ;;  %v12591_v33 = vld [vmem:[#allocation2 + $0x428] sm:$0xf]  ;;  %v12593_v40 = vld [vmem:[#allocation2 + $0x4a8] sm:$0xf0]  ;;  %v15497_v62 = vld [vmem:[#allocation2 + $0x534] sm:$0xf] }
 0x813   :  { %3944 = vmatpush.bf16.msrb.mxu3 %v12580_v17  ;;  %4113 = vmatpush.bf16.msra.mxu0 %v12632_v34  ;;  %v15480_v17 = vld [vmem:[#allocation2 + $0x4a4] sm:$0xf0]  ;;  %v15464_v34 = vld [vmem:[#allocation2 + $0x42c] sm:$0xf]  ;;  %v12647_v30 = vld [vmem:[#allocation2 + $0x460] sm:$0xf] }
 0x814   :  { %v12592_v60 = vor.u32 %v15480_v17, %v12591_v33  ;;  %v12596_v36 = vor.u32 %v15464_v34, %v12593_v40  ;;  %v12737_v17 = vld [vmem:[#allocation2 + $0x5b8] sm:$0xf0] }
 0x817   :  { %v2698_v44 = vpop.f32.mrf.mxu2 }
 0x818   :  { %v2711_v58 = vpop.f32.mrf.mxu3  ;;  %v15487_v44 = vld [vmem:[#allocation2 + $0x4dc] sm:$0xf0] }
 0x819   :  { %v17465_v2 = vpop.f32.mrf.mxu1  ;;  %v12648_v37 = vor.u32 %v15487_v44, %v12647_v30  ;;  %v12732_v30 = vor.u32 %v15497_v62, %v12729_v23 }
 0x81a   :  { %v17467_v5 = vpop.f32.mrf.mxu0 }
 0x81c   :  { %12806 = vmatmul.msk.bf16.vlgmr.msra.gmra.mxu1 %vm306_vm2, %v17403_v57  ;;  %12807 = vmatmul.msk.bf16.vlgmr.msra.gmra.mxu2 %vm306_vm2, %v17403_v57 }
 0x81d   :  { %12808 = vmatmul.msk.bf16.vlgmr.msra.gmra.mxu3 %vm306_vm2, %v17403_v57  ;;  %12821 = vmatmul.msk.bf16.vlgmr.msrb.gmra.mxu0 %vm306_vm2, %v17403_v57 }
 0x81e   :  { %3969 = vmatpush.bf16.msra.mxu1 %v12716_v12  ;;  %3982 = vmatpush.bf16.msra.mxu2 %v12720_v3  ;;  %v12735_v3 = vld [vmem:[#allocation2 + $0x538] sm:$0xf] }
 0x81f   :  { %v17477_v47 = vpop.f32.mrf.mxu2  ;;  %3995 = vmatpush.bf16.msra.mxu3 %v12724_v22  ;;  %4164 = vmatpush.bf16.msrb.mxu0 %v12776_v50  ;;  %v12791_v22 = vld [vmem:[#allocation2 + $0x570] sm:$0xf]  ;;  %v12736_v44 = vor.u32 %v15514_v63, %v12735_v3 }
 0x820   :  { %v17479_v58 = vpop.f32.mrf.mxu3  ;;  %v15521_v50 = vld [vmem:[#allocation2 + $0x5ec] sm:$0xf0] }
 0x821   :  { %v3063_v13 = vpop.f32.mrf.mxu1 }
 0x822   :  { %v3258_v35 = vpop.f32.mrf.mxu0  ;;  %3970 = vmatpush.bf16.msra.mxu1 %v12588_v18  ;;  %3983 = vmatpush.bf16.msra.mxu2 %v12592_v60  ;;  %v15465_v18 = vld [vmem:[#allocation2 + $0x434] sm:$0xf]  ;;  %v12607_v13 = vld [vmem:[#allocation2 + $0x438] sm:$0xf] }
 0x823   :  { %3996 = vmatpush.bf16.msra.mxu3 %v12596_v36  ;;  %4165 = vmatpush.bf16.msrb.mxu0 %v12648_v37  ;;  %v12601_v60 = vld [vmem:[#allocation2 + $0x4b0] sm:$0xf0]  ;;  %v12740_v36 = vor.u32 %v15498_v6, %v12737_v17  ;;  %v12792_v37 = vor.u32 %v15521_v50, %v12791_v22  ;;  %v15482_v35 = vld [vmem:[#allocation2 + $0x4b4] sm:$0xf0]  ;;  %v12664_v6 = vor.u32 %v15489_v52, %v12663_v31 }
 0x824   :  { %v12604_v23 = vor.u32 %v15465_v18, %v12601_v60  ;;  %v12608_v62 = vor.u32 %v15482_v35, %v12607_v13  ;;  %v15516_v18 = vld [vmem:[#allocation2 + $0x5c4] sm:$0xf0]  ;;  %v15500_v60 = vld [vmem:[#allocation2 + $0x54c] sm:$0xf]  ;;  %v12748_v52 = vor.u32 %v15499_v29, %v12745_v4 }
 0x825   :  { %v12753_v35 = vld [vmem:[#allocation2 + $0x5c8] sm:$0xf0] }
 0x827   :  { %v3076_v12 = vpop.f32.mrf.mxu2 }
 0x828   :  { %v3089_v33 = vpop.f32.mrf.mxu3  ;;  %v15466_v12 = vld [vmem:[#allocation2 + $0x43c] sm:$0xf] }
 0x829   :  { %v17481_v34 = vpop.f32.mrf.mxu1  ;;  %v12609_v33 = vld [vmem:[#allocation2 + $0x4b8] sm:$0xf0] }
 0x82a   :  { %v17483_v40 = vpop.f32.mrf.mxu0  ;;  %v12612_v63 = vor.u32 %v15466_v12, %v12609_v33 }
 0x82c   :  { %12810 = vmatmul.msk.bf16.vlgmr.msrb.gmra.mxu1 %vm306_vm2, %v17403_v57  ;;  %12811 = vmatmul.msk.bf16.vlgmr.msrb.gmra.mxu2 %vm306_vm2, %v17403_v57 }
 0x82d   :  { %12812 = vmatmul.msk.bf16.vlgmr.msrb.gmra.mxu3 %vm306_vm2, %v17403_v57  ;;  %12825 = vmatmul.msk.bf16.vlgmr.msra.gmra.mxu0 %vm306_vm2, %v17403_v57 }
 0x82e   :  { %4021 = vmatpush.bf16.msrb.mxu1 %v12732_v30  ;;  %4034 = vmatpush.bf16.msrb.mxu2 %v12736_v44  ;;  %v12751_v44 = vld [vmem:[#allocation2 + $0x548] sm:$0xf] }
 0x82f   :  { %v17493_v3 = vpop.f32.mrf.mxu2  ;;  %4047 = vmatpush.bf16.msrb.mxu3 %v12740_v36  ;;  %4216 = vmatpush.bf16.msra.mxu0 %v12792_v37  ;;  %v12967_v36 = vld [vmem:[#allocation2 + $0x700] sm:$0xf]  ;;  %v12752_v33 = vor.u32 %v15516_v18, %v12751_v44 }
 0x830   :  { %v17495_v17 = vpop.f32.mrf.mxu3  ;;  %v15571_v37 = vld [vmem:[#allocation2 + $0x77c] sm:$0xf0] }
 0x831   :  { %v3115_v22 = vpop.f32.mrf.mxu1 }
 0x832   :  { %v3310_v50 = vpop.f32.mrf.mxu0  ;;  %4022 = vmatpush.bf16.msrb.mxu1 %v12604_v23  ;;  %4035 = vmatpush.bf16.msrb.mxu2 %v12608_v62  ;;  %v15467_v23 = vld [vmem:[#allocation2 + $0x444] sm:$0xf]  ;;  %v12623_v22 = vld [vmem:[#allocation2 + $0x448] sm:$0xf] }
 0x833   :  { %4048 = vmatpush.bf16.msrb.mxu3 %v12612_v63  ;;  %4217 = vmatpush.bf16.msra.mxu0 %v12664_v6  ;;  %v12617_v62 = vld [vmem:[#allocation2 + $0x4c0] sm:$0xf0]  ;;  %v12756_v63 = vor.u32 %v15500_v60, %v12753_v35  ;;  %v12968_v6 = vor.u32 %v15571_v37, %v12967_v36  ;;  %v15484_v50 = vld [vmem:[#allocation2 + $0x4c4] sm:$0xf0]  ;;  %v12840_v60 = vor.u32 %v15539_v26, %v12839_v25 }
 0x834   :  { %v12620_v4 = vor.u32 %v15467_v23, %v12617_v62  ;;  %v12624_v29 = vor.u32 %v15484_v50, %v12623_v22  ;;  %v15518_v23 = vld [vmem:[#allocation2 + $0x5d4] sm:$0xf0]  ;;  %v15502_v62 = vld [vmem:[#allocation2 + $0x55c] sm:$0xf]  ;;  %v12764_v25 = vor.u32 %v15501_v42, %v12761_v28 }
 0x835   :  { %v12769_v50 = vld [vmem:[#allocation2 + $0x5d8] sm:$0xf0] }
 0x837   :  { %v3128_v30 = vpop.f32.mrf.mxu2 }
 0x838   :  { %v3141_v13 = vpop.f32.mrf.mxu3  ;;  %v15468_v30 = vld [vmem:[#allocation2 + $0x44c] sm:$0xf] }
 0x839   :  { %v17497_v12 = vpop.f32.mrf.mxu1  ;;  %v12625_v13 = vld [vmem:[#allocation2 + $0x4c8] sm:$0xf0] }
 0x83a   :  { %v17499_v31 = vpop.f32.mrf.mxu0  ;;  %v12628_v18 = vor.u32 %v15468_v30, %v12625_v13 }
 0x83c   :  { %12814 = vmatmul.msk.bf16.vlgmr.msra.gmra.mxu1 %vm306_vm2, %v17403_v57  ;;  %12815 = vmatmul.msk.bf16.vlgmr.msra.gmra.mxu2 %vm306_vm2, %v17403_v57 }
 0x83d   :  { %12816 = vmatmul.msk.bf16.vlgmr.msra.gmra.mxu3 %vm306_vm2, %v17403_v57  ;;  %12829 = vmatmul.msk.bf16.vlgmr.msrb.gmra.mxu0 %vm306_vm2, %v17403_v57 }
 0x83e   :  { %4073 = vmatpush.bf16.msra.mxu1 %v12748_v52  ;;  %4086 = vmatpush.bf16.msra.mxu2 %v12752_v33  ;;  %v12767_v33 = vld [vmem:[#allocation2 + $0x558] sm:$0xf] }
 0x83f   :  { %v17509_v44 = vpop.f32.mrf.mxu2  ;;  %4099 = vmatpush.bf16.msra.mxu3 %v12756_v63  ;;  %4691 = vmatpush.bf16.msrb.mxu0 %v12968_v6  ;;  %v12983_v63 = vld [vmem:[#allocation2 + $0x710] sm:$0xf]  ;;  %v12768_v13 = vor.u32 %v15518_v23, %v12767_v33 }
 0x840   :  { %v17511_v35 = vpop.f32.mrf.mxu3  ;;  %v15573_v6 = vld [vmem:[#allocation2 + $0x78c] sm:$0xf0] }
 0x841   :  { %v3167_v36 = vpop.f32.mrf.mxu1 }
 0x842   :  { %v3362_v37 = vpop.f32.mrf.mxu0  ;;  %4074 = vmatpush.bf16.msra.mxu1 %v12620_v4  ;;  %4087 = vmatpush.bf16.msra.mxu2 %v12624_v29  ;;  %v15469_v4 = vld [vmem:[#allocation2 + $0x454] sm:$0xf]  ;;  %v12639_v36 = vld [vmem:[#allocation2 + $0x458] sm:$0xf] }
 0x843   :  { %4100 = vmatpush.bf16.msra.mxu3 %v12628_v18  ;;  %4692 = vmatpush.bf16.msrb.mxu0 %v12840_v60  ;;  %v12633_v29 = vld [vmem:[#allocation2 + $0x4d0] sm:$0xf0]  ;;  %v12772_v18 = vor.u32 %v15502_v62, %v12769_v50  ;;  %v12984_v60 = vor.u32 %v15573_v6, %v12983_v63  ;;  %v15486_v37 = vld [vmem:[#allocation2 + $0x4d4] sm:$0xf0]  ;;  %v12856_v62 = vor.u32 %v15541_v53, %v12855_v19 }
 0x844   :  { %v12636_v28 = vor.u32 %v15469_v4, %v12633_v29  ;;  %v12640_v42 = vor.u32 %v15486_v37, %v12639_v36  ;;  %v15520_v4 = vld [vmem:[#allocation2 + $0x5e4] sm:$0xf0]  ;;  %v15504_v29 = vld [vmem:[#allocation2 + $0x56c] sm:$0xf]  ;;  %v3049_v53 = vadd.f32 %v17401_v1, %v17316_v27  ;;  %v12871_v1 = vld [vmem:[#allocation2 + $0x620] sm:$0xf] }
 0x845   :  { %v12785_v37 = vld [vmem:[#allocation2 + $0x5e8] sm:$0xf0] }
 0x846   :  { %v12657_v27 = vld [vmem:[#allocation2 + $0x4e8] sm:$0xf0] }
 0x847   :  { %v3180_v52 = vpop.f32.mrf.mxu2 }
 0x848   :  { %v3193_v22 = vpop.f32.mrf.mxu3  ;;  %v15470_v52 = vld [vmem:[#allocation2 + $0x45c] sm:$0xf] }
 0x849   :  { %v17513_v30 = vpop.f32.mrf.mxu1  ;;  %v12641_v22 = vld [vmem:[#allocation2 + $0x4d8] sm:$0xf0] }
 0x84a   :  { %v17515_v26 = vpop.f32.mrf.mxu0  ;;  %v12644_v23 = vor.u32 %v15470_v52, %v12641_v22  ;;  %v17533_v22 = vpop.permute.xlu1 %4360 }
 0x84c   :  { %12818 = vmatmul.msk.bf16.vlgmr.msrb.gmra.mxu1 %vm306_vm2, %v17403_v57  ;;  %12819 = vmatmul.msk.bf16.vlgmr.msrb.gmra.mxu2 %vm306_vm2, %v17403_v57 }
 0x84d   :  { %12820 = vmatmul.msk.bf16.vlgmr.msrb.gmra.mxu3 %vm306_vm2, %v17403_v57  ;;  %12833 = vmatmul.msk.bf16.vlgmr.msra.gmra.mxu0 %vm306_vm2, %v17403_v57 }
 0x84e   :  { %4125 = vmatpush.bf16.msrb.mxu1 %v12764_v25  ;;  %4138 = vmatpush.bf16.msrb.mxu2 %v12768_v13  ;;  %v12783_v13 = vld [vmem:[#allocation2 + $0x568] sm:$0xf] }
 0x84f   :  { %v17525_v33 = vpop.f32.mrf.mxu2  ;;  %4151 = vmatpush.bf16.msrb.mxu3 %v12772_v18  ;;  %4743 = vmatpush.bf16.msra.mxu0 %v12984_v60  ;;  %v12999_v18 = vld [vmem:[#allocation2 + $0x720] sm:$0xf] }
 0x850   :  { %v17527_v50 = vpop.f32.mrf.mxu3  ;;  %v15575_v60 = vld [vmem:[#allocation2 + $0x79c] sm:$0xf0] }
 0x851   :  { %v3219_v63 = vpop.f32.mrf.mxu1 }
 0x852   :  { %v3414_v6 = vpop.f32.mrf.mxu0  ;;  %4126 = vmatpush.bf16.msrb.mxu1 %v12636_v28  ;;  %4139 = vmatpush.bf16.msrb.mxu2 %v12640_v42  ;;  %v12780_v28 = vor.u32 %v15503_v10, %v12777_v59  ;;  %v12784_v42 = vor.u32 %v15520_v4, %v12783_v13  ;;  %v12660_v4 = vor.u32 %v15472_v54, %v12657_v27  ;;  %v15506_v54 = vld [vmem:[#allocation2 + $0x57c] sm:$0xf] }
 0x853   :  { %4152 = vmatpush.bf16.msrb.mxu3 %v12644_v23  ;;  %4744 = vmatpush.bf16.msra.mxu0 %v12856_v62  ;;  %v15471_v23 = vld [vmem:[#allocation2 + $0x464] sm:$0xf]  ;;  %v12788_v6 = vor.u32 %v15504_v29, %v12785_v37 }
 0x854   :  { %v12649_v62 = vld [vmem:[#allocation2 + $0x4e0] sm:$0xf0] }
 0x855   :  { %v12652_v10 = vor.u32 %v15471_v23, %v12649_v62  ;;  %v15522_v23 = vld [vmem:[#allocation2 + $0x5f4] sm:$0xf0]  ;;  %v12801_v62 = vld [vmem:[#allocation2 + $0x5f8] sm:$0xf0] }
 0x857   :  { %v3232_v25 = vpop.f32.mrf.mxu2 }
 0x858   :  { %v3245_v36 = vpop.f32.mrf.mxu3  ;;  %v13000_v25 = vor.u32 %v15575_v60, %v12999_v18  ;;  %v5133_v18 = vpack.c.bf16 %v17233_v14, %v17233_v14  ;;  %v3101_v14 = vadd.f32 %v17419_v43, %v17344_v56  ;;  %v12673_v56 = vld [vmem:[#allocation2 + $0x4f8] sm:$0xf0]  ;;  %v12887_v43 = vld [vmem:[#allocation2 + $0x630] sm:$0xf] }
 0x859   :  { %v17531_v19 = vpop.f32.mrf.mxu1  ;;  %v12655_v36 = vld [vmem:[#allocation2 + $0x468] sm:$0xf] }
 0x85a   :  { %19224 = vst [vmem:[#allocation46_spill] sm:$0xff] %v17531_v19  ;;  %v3855_v52 = vpop.f32.mrf.mxu0  ;;  %v15543_v19 = vld [vmem:[#allocation2 + $0x69c] sm:$0xf0]  ;;  %v12656_v59 = vor.u32 %v15488_v9, %v12655_v36  ;;  %5199 = vrot.lane.b32.xlu2 %v5133_v18, %s16730_s26  ;;  %v15505_v9 = vld [vmem:[#allocation2 + $0x574] sm:$0xf]  ;;  %v12804_v18 = vor.u32 %v15506_v54, %v12801_v62 }
 0x85b   :  { %v17535_v63 = vadd.f32 %v3855_v52, %v3049_v53  ;;  %v12872_v29 = vor.u32 %v15543_v19, %v12871_v1  ;;  %v12793_v52 = vld [vmem:[#allocation2 + $0x5f0] sm:$0xf0] }
 0x85c   :  { %12822 = vmatmul.msk.bf16.vlgmr.msra.gmra.mxu1 %vm306_vm2, %v17403_v57  ;;  %12823 = vmatmul.msk.bf16.vlgmr.msra.gmra.mxu2 %vm306_vm2, %v17403_v57  ;;  %v12796_v1 = vor.u32 %v15505_v9, %v12793_v52 }
 0x85d   :  { %12824 = vmatmul.msk.bf16.vlgmr.msra.gmra.mxu3 %vm306_vm2, %v17403_v57  ;;  %13093 = vmatmul.msk.bf16.vlgmr.msrb.gmra.mxu0 %vm306_vm2, %v17533_v22 }
 0x85e   :  { %4177 = vmatpush.bf16.msra.mxu1 %v12780_v28  ;;  %4190 = vmatpush.bf16.msra.mxu2 %v12784_v42  ;;  %v12799_v42 = vld [vmem:[#allocation2 + $0x578] sm:$0xf] }
 0x85f   :  { %v17545_v13 = vpop.f32.mrf.mxu2  ;;  %4203 = vmatpush.bf16.msra.mxu3 %v12788_v6  ;;  %4795 = vmatpush.bf16.msrb.mxu0 %v13000_v25  ;;  %v13015_v6 = vld [vmem:[#allocation2 + $0x730] sm:$0xf] }
 0x860   :  { %v17547_v37 = vpop.f32.mrf.mxu3  ;;  %v15577_v25 = vld [vmem:[#allocation2 + $0x7ac] sm:$0xf0] }
 0x861   :  { %v3271_v60 = vpop.f32.mrf.mxu1 }
 0x862   :  { %v3857_v53 = vpop.f32.mrf.mxu0  ;;  %4178 = vmatpush.bf16.msra.mxu1 %v12652_v10  ;;  %4191 = vmatpush.bf16.msra.mxu2 %v12656_v59  ;;  %v12800_v10 = vor.u32 %v15522_v23, %v12799_v42  ;;  %v15473_v59 = vld [vmem:[#allocation2 + $0x474] sm:$0xf]  ;;  %v13016_v60 = vor.u32 %v15577_v25, %v13015_v6 }
 0x863   :  { %4204 = vmatpush.bf16.msra.mxu3 %v12660_v4  ;;  %4796 = vmatpush.bf16.msrb.mxu0 %v12872_v29  ;;  %v12665_v4 = vld [vmem:[#allocation2 + $0x4f0] sm:$0xf0]  ;;  %v12671_v53 = vld [vmem:[#allocation2 + $0x478] sm:$0xf] }
 0x864   :  { %v12668_v9 = vor.u32 %v15473_v59, %v12665_v4  ;;  %v15572_v59 = vld [vmem:[#allocation2 + $0x784] sm:$0xf0]  ;;  %v15556_v4 = vld [vmem:[#allocation2 + $0x70c] sm:$0xf] }
 0x867   :  { %v3284_v28 = vpop.f32.mrf.mxu2 }
 0x868   :  { %v3297_v19 = vpop.f32.mrf.mxu3  ;;  %v15490_v28 = vld [vmem:[#allocation2 + $0x4f4] sm:$0xf0] }
 0x869   :  { %v17554_v36 = vpop.f32.mrf.mxu1  ;;  %v15474_v19 = vld [vmem:[#allocation2 + $0x47c] sm:$0xf]  ;;  %v12672_v52 = vor.u32 %v15490_v28, %v12671_v53  ;;  %v12977_v28 = vld [vmem:[#allocation2 + $0x788] sm:$0xf0] }
 0x86a   :  { %19225 = vst [vmem:[#allocation47_spill] sm:$0xff] %v17554_v36  ;;  %v3907_v27 = vpop.f32.mrf.mxu0  ;;  %v15545_v36 = vld [vmem:[#allocation2 + $0x6ac] sm:$0xf0]  ;;  %v12676_v23 = vor.u32 %v15474_v19, %v12673_v56 }
 0x86b   :  { %v17556_v29 = vadd.f32 %v3907_v27, %v3101_v14  ;;  %v12888_v54 = vor.u32 %v15545_v36, %v12887_v43  ;;  %v15555_v14 = vld [vmem:[#allocation2 + $0x704] sm:$0xf]  ;;  %v3153_v36 = vadd.f32 %v17435_v32, %v17362_v11  ;;  %v12849_v11 = vld [vmem:[#allocation2 + $0x688] sm:$0xf0]  ;;  %v12903_v32 = vld [vmem:[#allocation2 + $0x640] sm:$0xf] }
 0x86c   :  { %12826 = vmatmul.msk.bf16.vlgmr.msrb.gmra.mxu1 %vm306_vm2, %v17403_v57  ;;  %12827 = vmatmul.msk.bf16.vlgmr.msrb.gmra.mxu2 %vm306_vm2, %v17403_v57  ;;  %v12969_v27 = vld [vmem:[#allocation2 + $0x780] sm:$0xf0] }
 0x86d   :  { %12828 = vmatmul.msk.bf16.vlgmr.msrb.gmra.mxu3 %vm306_vm2, %v17403_v57  ;;  %13097 = vmatmul.msk.bf16.vlgmr.msra.gmra.mxu0 %vm306_vm2, %v17533_v22  ;;  %v12972_v43 = vor.u32 %v15555_v14, %v12969_v27 }
 0x86e   :  { %4229 = vmatpush.bf16.msrb.mxu1 %v12796_v1  ;;  %4242 = vmatpush.bf16.msrb.mxu2 %v12800_v10  ;;  %v12975_v10 = vld [vmem:[#allocation2 + $0x708] sm:$0xf] }
 0x86f   :  { %v17566_v42 = vpop.f32.mrf.mxu2  ;;  %4255 = vmatpush.bf16.msrb.mxu3 %v12804_v18  ;;  %4847 = vmatpush.bf16.msra.mxu0 %v13016_v60  ;;  %v13031_v18 = vld [vmem:[#allocation2 + $0x740] sm:$0xf] }
 0x870   :  { %v17568_v62 = vpop.f32.mrf.mxu3  ;;  %v15579_v60 = vld [vmem:[#allocation2 + $0x7bc] sm:$0xf0] }
 0x871   :  { %19226 = vst [vmem:[#allocation48_spill] sm:$0xff] %v17568_v62  ;;  %v3323_v6 = vpop.f32.mrf.mxu1  ;;  %v15540_v62 = vld [vmem:[#allocation2 + $0x684] sm:$0xf0] }
 0x872   :  { %v3909_v25 = vpop.f32.mrf.mxu0  ;;  %4230 = vmatpush.bf16.msrb.mxu1 %v12668_v9  ;;  %4243 = vmatpush.bf16.msrb.mxu2 %v12672_v52  ;;  %v12976_v9 = vor.u32 %v15572_v59, %v12975_v10  ;;  %v15523_v52 = vld [vmem:[#allocation2 + $0x604] sm:$0xf]  ;;  %v12980_v6 = vor.u32 %v15556_v4, %v12977_v28 }
 0x873   :  { %4256 = vmatpush.bf16.msrb.mxu3 %v12676_v23  ;;  %4848 = vmatpush.bf16.msra.mxu0 %v12888_v54  ;;  %v12841_v23 = vld [vmem:[#allocation2 + $0x680] sm:$0xf0]  ;;  %v13032_v25 = vor.u32 %v15579_v60, %v13031_v18 }
 0x874   :  { %v12844_v14 = vor.u32 %v15523_v52, %v12841_v23  ;;  %v15574_v52 = vld [vmem:[#allocation2 + $0x794] sm:$0xf0] }
 0x877   :  { %v3336_v1 = vpop.f32.mrf.mxu2 }
 0x878   :  { %v3349_v53 = vpop.f32.mrf.mxu3  ;;  %v12847_v1 = vld [vmem:[#allocation2 + $0x608] sm:$0xf] }
 0x879   :  { %v17572_v19 = vpop.f32.mrf.mxu1  ;;  %v15524_v53 = vld [vmem:[#allocation2 + $0x60c] sm:$0xf]  ;;  %v12848_v27 = vor.u32 %v15540_v62, %v12847_v1  ;;  %v15558_v62 = vld [vmem:[#allocation2 + $0x71c] sm:$0xf] }
 0x87a   :  { %19227 = vst [vmem:[#allocation49_spill] sm:$0xff] %v17572_v19  ;;  %v3959_v56 = vpop.f32.mrf.mxu0  ;;  %v15547_v19 = vld [vmem:[#allocation2 + $0x6bc] sm:$0xf0]  ;;  %v12852_v59 = vor.u32 %v15524_v53, %v12849_v11  ;;  %v12993_v1 = vld [vmem:[#allocation2 + $0x798] sm:$0xf0] }
 0x87b   :  { %v17574_v54 = vadd.f32 %v3959_v56, %v3153_v36  ;;  %v12904_v4 = vor.u32 %v15547_v19, %v12903_v32  ;;  %v15557_v36 = vld [vmem:[#allocation2 + $0x714] sm:$0xf]  ;;  %v3205_v19 = vadd.f32 %v17451_v48, %v17318_v41  ;;  %v12865_v41 = vld [vmem:[#allocation2 + $0x698] sm:$0xf0]  ;;  %v12919_v48 = vld [vmem:[#allocation2 + $0x650] sm:$0xf] }
 0x87c   :  { %12830 = vmatmul.msk.bf16.vlgmr.msra.gmra.mxu1 %vm306_vm2, %v17403_v57  ;;  %12831 = vmatmul.msk.bf16.vlgmr.msra.gmra.mxu2 %vm306_vm2, %v17403_v57  ;;  %v12985_v56 = vld [vmem:[#allocation2 + $0x790] sm:$0xf0] }
 0x87d   :  { %12832 = vmatmul.msk.bf16.vlgmr.msra.gmra.mxu3 %vm306_vm2, %v17403_v57  ;;  %13101 = vmatmul.msk.bf16.vlgmr.msrb.gmra.mxu0 %vm306_vm2, %v17533_v22  ;;  %v12988_v32 = vor.u32 %v15557_v36, %v12985_v56 }
 0x87e   :  { %4704 = vmatpush.bf16.msra.mxu1 %v12972_v43  ;;  %4717 = vmatpush.bf16.msra.mxu2 %v12976_v9  ;;  %v12991_v9 = vld [vmem:[#allocation2 + $0x718] sm:$0xf] }
 0x87f   :  { %v17584_v10 = vpop.f32.mrf.mxu2  ;;  %4730 = vmatpush.bf16.msra.mxu3 %v12980_v6  ;;  %4899 = vmatpush.bf16.msrb.mxu0 %v13032_v25  ;;  %v13047_v6 = vld [vmem:[#allocation2 + $0x750] sm:$0xf] }
 0x880   :  { %v17586_v28 = vpop.f32.mrf.mxu3  ;;  %v15581_v25 = vld [vmem:[#allocation2 + $0x7cc] sm:$0xf0] }
 0x881   :  { %19228 = vst [vmem:[#allocation50_spill] sm:$0xff] %v17586_v28  ;;  %v3375_v18 = vpop.f32.mrf.mxu1  ;;  %v15542_v28 = vld [vmem:[#allocation2 + $0x694] sm:$0xf0] }
 0x882   :  { %v3961_v60 = vpop.f32.mrf.mxu0  ;;  %4705 = vmatpush.bf16.msra.mxu1 %v12844_v14  ;;  %4718 = vmatpush.bf16.msra.mxu2 %v12848_v27  ;;  %v12992_v14 = vor.u32 %v15574_v52, %v12991_v9  ;;  %v15525_v27 = vld [vmem:[#allocation2 + $0x614] sm:$0xf]  ;;  %v12996_v18 = vor.u32 %v15558_v62, %v12993_v1 }
 0x883   :  { %4731 = vmatpush.bf16.msra.mxu3 %v12852_v59  ;;  %4900 = vmatpush.bf16.msrb.mxu0 %v12904_v4  ;;  %v12857_v59 = vld [vmem:[#allocation2 + $0x690] sm:$0xf0]  ;;  %v13048_v60 = vor.u32 %v15581_v25, %v13047_v6 }
 0x884   :  { %v12860_v36 = vor.u32 %v15525_v27, %v12857_v59  ;;  %v3062_v27 = vadd.f32 %v17465_v2, %v17328_v55  ;;  %v12879_v55 = vld [vmem:[#allocation2 + $0x628] sm:$0xf] }
 0x885   :  { %v15544_v2 = vld [vmem:[#allocation2 + $0x6a4] sm:$0xf0] }
 0x887   :  { %v3388_v43 = vpop.f32.mrf.mxu2 }
 0x888   :  { %v3401_v23 = vpop.f32.mrf.mxu3  ;;  %v12863_v43 = vld [vmem:[#allocation2 + $0x618] sm:$0xf] }
 0x889   :  { %v17590_v53 = vpop.f32.mrf.mxu1  ;;  %v15526_v23 = vld [vmem:[#allocation2 + $0x61c] sm:$0xf]  ;;  %v12864_v56 = vor.u32 %v15542_v28, %v12863_v43  ;;  %v15560_v28 = vld [vmem:[#allocation2 + $0x72c] sm:$0xf]  ;;  %v3257_v43 = vadd.f32 %v17467_v5, %v17334_v46  ;;  %v12935_v5 = vld [vmem:[#allocation2 + $0x660] sm:$0xf] }
 0x88a   :  { %19229 = vst [vmem:[#allocation51_spill] sm:$0xff] %v17590_v53  ;;  %v4011_v11 = vpop.f32.mrf.mxu0  ;;  %v15549_v53 = vld [vmem:[#allocation2 + $0x6cc] sm:$0xf0]  ;;  %v12868_v52 = vor.u32 %v15526_v23, %v12865_v41  ;;  %v12881_v46 = vld [vmem:[#allocation2 + $0x6a8] sm:$0xf0] }
 0x88b   :  { %v17592_v4 = vadd.f32 %v4011_v11, %v3205_v19  ;;  %v12920_v62 = vor.u32 %v15549_v53, %v12919_v48  ;;  %v13001_v19 = vld [vmem:[#allocation2 + $0x7a0] sm:$0xf0]  ;;  %v13063_v53 = vld [vmem:[#allocation2 + $0x760] sm:$0xf] }
 0x88c   :  { %12834 = vmatmul.msk.bf16.vlgmr.msrb.gmra.mxu1 %vm306_vm2, %v17403_v57  ;;  %12835 = vmatmul.msk.bf16.vlgmr.msrb.gmra.mxu2 %vm306_vm2, %v17403_v57 }
 0x88d   :  { %12836 = vmatmul.msk.bf16.vlgmr.msrb.gmra.mxu3 %vm306_vm2, %v17403_v57  ;;  %13105 = vmatmul.msk.bf16.vlgmr.msra.gmra.mxu0 %vm306_vm2, %v17533_v22  ;;  %v15559_v57 = vld [vmem:[#allocation2 + $0x724] sm:$0xf] }
 0x88e   :  { %4756 = vmatpush.bf16.msrb.mxu1 %v12988_v32  ;;  %4769 = vmatpush.bf16.msrb.mxu2 %v12992_v14  ;;  %v13007_v32 = vld [vmem:[#allocation2 + $0x728] sm:$0xf] }
 0x88f   :  { %v17602_v9 = vpop.f32.mrf.mxu2  ;;  %4782 = vmatpush.bf16.msrb.mxu3 %v12996_v18  ;;  %4951 = vmatpush.bf16.msra.mxu0 %v13048_v60  ;;  %v15576_v14 = vld [vmem:[#allocation2 + $0x7a4] sm:$0xf0]  ;;  %v13009_v18 = vld [vmem:[#allocation2 + $0x7a8] sm:$0xf0]  ;;  %v15583_v60 = vld [vmem:[#allocation2 + $0x7dc] sm:$0xf0] }
 0x890   :  { %v17604_v1 = vpop.f32.mrf.mxu3 }
 0x891   :  { %v3427_v6 = vpop.f32.mrf.mxu1 }
 0x892   :  { %v4013_v25 = vpop.f32.mrf.mxu0  ;;  %4757 = vmatpush.bf16.msrb.mxu1 %v12860_v36  ;;  %4770 = vmatpush.bf16.msrb.mxu2 %v12864_v56  ;;  %v13004_v36 = vor.u32 %v15559_v57, %v13001_v19  ;;  %v13008_v56 = vor.u32 %v15576_v14, %v13007_v32  ;;  %v3075_v57 = vadd.f32 %v17477_v47, %v17330_v61  ;;  %v15561_v61 = vld [vmem:[#allocation2 + $0x734] sm:$0xf] }
 0x893   :  { %4783 = vmatpush.bf16.msrb.mxu3 %v12868_v52  ;;  %4952 = vmatpush.bf16.msra.mxu0 %v12920_v62  ;;  %v15527_v52 = vld [vmem:[#allocation2 + $0x624] sm:$0xf]  ;;  %v13012_v25 = vor.u32 %v15560_v28, %v13009_v18  ;;  %v12880_v32 = vor.u32 %v15544_v2, %v12879_v55  ;;  %v3088_v14 = vadd.f32 %v17479_v58, %v17332_v16  ;;  %v13017_v47 = vld [vmem:[#allocation2 + $0x7b0] sm:$0xf0]  ;;  %v13023_v16 = vld [vmem:[#allocation2 + $0x738] sm:$0xf] }
 0x894   :  { %v12873_v62 = vld [vmem:[#allocation2 + $0x6a0] sm:$0xf0]  ;;  %v15578_v58 = vld [vmem:[#allocation2 + $0x7b4] sm:$0xf0]  ;;  %v15585_v55 = vld [vmem:[#allocation2 + $0x7ec] sm:$0xf0] }
 0x895   :  { %v12876_v19 = vor.u32 %v15527_v52, %v12873_v62  ;;  %v3114_v52 = vadd.f32 %v17481_v34, %v17346_v24  ;;  %v12895_v24 = vld [vmem:[#allocation2 + $0x638] sm:$0xf] }
 0x896   :  { %v15546_v34 = vld [vmem:[#allocation2 + $0x6b4] sm:$0xf0] }
 0x897   :  { %v3440_v11 = vpop.f32.mrf.mxu2 }
 0x898   :  { %v3453_v59 = vpop.f32.mrf.mxu3  ;;  %v13064_v11 = vor.u32 %v15583_v60, %v13063_v53 }
 0x899   :  { %v3868_v23 = vpop.f32.mrf.mxu1  ;;  %v15528_v59 = vld [vmem:[#allocation2 + $0x62c] sm:$0xf] }
 0x89a   :  { %v17610_v41 = vadd.f32 %v3868_v23, %v3062_v27  ;;  %v4063_v48 = vpop.f32.mrf.mxu0  ;;  %v15551_v27 = vld [vmem:[#allocation2 + $0x6dc] sm:$0xf0]  ;;  %v12884_v18 = vor.u32 %v15528_v59, %v12881_v46 }
 0x89b   :  { %v17612_v6 = vadd.f32 %v4063_v48, %v3257_v43  ;;  %v12936_v53 = vor.u32 %v15551_v27, %v12935_v5  ;;  %v13020_v5 = vor.u32 %v15561_v61, %v13017_v47  ;;  %v13024_v27 = vor.u32 %v15578_v58, %v13023_v16 }
 0x89c   :  { %13094 = vmatmul.msk.bf16.vlgmr.msra.gmra.mxu1 %vm306_vm2, %v17533_v22  ;;  %13095 = vmatmul.msk.bf16.vlgmr.msra.gmra.mxu2 %vm306_vm2, %v17533_v22  ;;  %v12896_v61 = vor.u32 %v15546_v34, %v12895_v24  ;;  %v3140_v47 = vadd.f32 %v17495_v17, %v17360_v7  ;;  %v13039_v7 = vld [vmem:[#allocation2 + $0x748] sm:$0xf] }
 0x89d   :  { %19230 = vst [vmem:[#allocation52_spill] sm:$0xff] %v17612_v6  ;;  %13096 = vmatmul.msk.bf16.vlgmr.msra.gmra.mxu3 %vm306_vm2, %v17533_v22  ;;  %13109 = vmatmul.msk.bf16.vlgmr.msrb.gmra.mxu0 %vm306_vm2, %v17533_v22  ;;  %v15580_v17 = vld [vmem:[#allocation2 + $0x7c4] sm:$0xf0] }
 0x89e   :  { %4808 = vmatpush.bf16.msra.mxu1 %v13004_v36  ;;  %4821 = vmatpush.bf16.msra.mxu2 %v13008_v56  ;;  %v15562_v56 = vld [vmem:[#allocation2 + $0x73c] sm:$0xf] }
 0x89f   :  { %v3881_v28 = vpop.f32.mrf.mxu2  ;;  %4834 = vmatpush.bf16.msra.mxu3 %v13012_v25  ;;  %5003 = vmatpush.bf16.msrb.mxu0 %v13064_v11  ;;  %v13025_v25 = vld [vmem:[#allocation2 + $0x7b8] sm:$0xf0]  ;;  %v13079_v11 = vld [vmem:[#allocation2 + $0x770] sm:$0xf] }
 0x8a0   :  { %v17626_v60 = vadd.f32 %v3881_v28, %v3075_v57  ;;  %v3894_v43 = vpop.f32.mrf.mxu3  ;;  %v15529_v57 = vld [vmem:[#allocation2 + $0x634] sm:$0xf]  ;;  %v13080_v28 = vor.u32 %v15585_v55, %v13079_v11 }
 0x8a1   :  { %v17628_v23 = vadd.f32 %v3894_v43, %v3088_v14  ;;  %v3870_v48 = vpop.f32.mrf.mxu1  ;;  %v13028_v14 = vor.u32 %v15562_v56, %v13025_v25  ;;  %v3127_v43 = vadd.f32 %v17493_v3, %v17348_v0  ;;  %v15563_v0 = vld [vmem:[#allocation2 + $0x744] sm:$0xf] }
 0x8a2   :  { %v4065_v6 = vpop.f32.mrf.mxu0  ;;  %4809 = vmatpush.bf16.msra.mxu1 %v12876_v19  ;;  %4822 = vmatpush.bf16.msra.mxu2 %v12880_v32  ;;  %v12889_v19 = vld [vmem:[#allocation2 + $0x6b0] sm:$0xf0]  ;;  %v13033_v3 = vld [vmem:[#allocation2 + $0x7c0] sm:$0xf0] }
 0x8a3   :  { %4835 = vmatpush.bf16.msra.mxu3 %v12884_v18  ;;  %5004 = vmatpush.bf16.msrb.mxu0 %v12936_v53  ;;  %v3309_v6 = vadd.f32 %v17483_v40, %v17350_v49  ;;  %v15530_v18 = vld [vmem:[#allocation2 + $0x63c] sm:$0xf]  ;;  %v12951_v40 = vld [vmem:[#allocation2 + $0x670] sm:$0xf]  ;;  %v12892_v48 = vor.u32 %v15529_v57, %v12889_v19  ;;  %v15635_v57 = vld [vmem:[#allocation2 + $0x97c] sm:$0xf0]  ;;  %v3361_v19 = vadd.f32 %v17499_v31, %v17366_v38 }
 0x8a4   :  { %v12897_v49 = vld [vmem:[#allocation2 + $0x6b8] sm:$0xf0]  ;;  %v15553_v53 = vld [vmem:[#allocation2 + $0x6ec] sm:$0xf0]  ;;  %v13036_v34 = vor.u32 %v15563_v0, %v13033_v3  ;;  %v12913_v38 = vld [vmem:[#allocation2 + $0x6c8] sm:$0xf0] }
 0x8a5   :  { %v12900_v16 = vor.u32 %v15530_v18, %v12897_v49  ;;  %v12952_v58 = vor.u32 %v15553_v53, %v12951_v40  ;;  %v13040_v18 = vor.u32 %v15580_v17, %v13039_v7  ;;  %v15531_v49 = vld [vmem:[#allocation2 + $0x644] sm:$0xf]  ;;  %v13127_v31 = vld [vmem:[#allocation2 + $0x800] sm:$0xf] }
 0x8a6   :  { %v12905_v40 = vld [vmem:[#allocation2 + $0x6c0] sm:$0xf0] }
 0x8a7   :  { %v3883_v36 = vpop.f32.mrf.mxu2 }
 0x8a8   :  { %v3896_v62 = vpop.f32.mrf.mxu3 }
 0x8a9   :  { %v3920_v2 = vpop.f32.mrf.mxu1 }
 0x8aa   :  { %v17634_v59 = vadd.f32 %v3920_v2, %v3114_v52  ;;  %v4115_v46 = vpop.f32.mrf.mxu0  ;;  %v3166_v2 = vadd.f32 %v17497_v12, %v17364_v21  ;;  %v12911_v21 = vld [vmem:[#allocation2 + $0x648] sm:$0xf] }
 0x8ab   :  { %v17636_v32 = vadd.f32 %v4115_v46, %v3309_v6  ;;  %v15564_v6 = vld [vmem:[#allocation2 + $0x74c] sm:$0xf]  ;;  %v15548_v12 = vld [vmem:[#allocation2 + $0x6c4] sm:$0xf0] }
 0x8ac   :  { %13098 = vmatmul.msk.bf16.vlgmr.msrb.gmra.mxu1 %vm306_vm2, %v17533_v22  ;;  %13099 = vmatmul.msk.bf16.vlgmr.msrb.gmra.mxu2 %vm306_vm2, %v17533_v22 }
 0x8ad   :  { %13100 = vmatmul.msk.bf16.vlgmr.msrb.gmra.mxu3 %vm306_vm2, %v17533_v22  ;;  %13113 = vmatmul.msk.bf16.vlgmr.msra.gmra.mxu0 %vm306_vm2, %v17533_v22 }
 0x8ae   :  { %4860 = vmatpush.bf16.msrb.mxu1 %v13020_v5  ;;  %4873 = vmatpush.bf16.msrb.mxu2 %v13024_v27  ;;  %v13041_v5 = vld [vmem:[#allocation2 + $0x7c8] sm:$0xf0]  ;;  %v13255_v27 = vld [vmem:[#allocation2 + $0x900] sm:$0xf] }
 0x8af   :  { %v3933_v36 = vpop.f32.mrf.mxu2  ;;  %4886 = vmatpush.bf16.msrb.mxu3 %v13028_v14  ;;  %5055 = vmatpush.bf16.msra.mxu0 %v13080_v28 }
 0x8b0   :  { %v17650_v56 = vadd.f32 %v3933_v36, %v3127_v43  ;;  %v3946_v52 = vpop.f32.mrf.mxu3  ;;  %v13044_v43 = vor.u32 %v15564_v6, %v13041_v5  ;;  %v3179_v36 = vadd.f32 %v17509_v44, %v17376_v45  ;;  %v15565_v45 = vld [vmem:[#allocation2 + $0x754] sm:$0xf]  ;;  %v3218_v5 = vadd.f32 %v17513_v30, %v17382_v15  ;;  %v12927_v15 = vld [vmem:[#allocation2 + $0x658] sm:$0xf] }
 0x8b1   :  { %v17652_v62 = vadd.f32 %v3946_v52, %v3140_v47  ;;  %v3922_v25 = vpop.f32.mrf.mxu1  ;;  %v15603_v47 = vld [vmem:[#allocation2 + $0x87c] sm:$0xf0]  ;;  %v3192_v52 = vadd.f32 %v17511_v35, %v17378_v51  ;;  %v13049_v44 = vld [vmem:[#allocation2 + $0x7d0] sm:$0xf0]  ;;  %v13055_v51 = vld [vmem:[#allocation2 + $0x758] sm:$0xf] }
 0x8b2   :  { %v4117_v11 = vpop.f32.mrf.mxu0  ;;  %4861 = vmatpush.bf16.msrb.mxu1 %v12892_v48  ;;  %4874 = vmatpush.bf16.msrb.mxu2 %v12896_v61  ;;  %v13256_v48 = vor.u32 %v15635_v57, %v13255_v27  ;;  %v15532_v61 = vld [vmem:[#allocation2 + $0x64c] sm:$0xf]  ;;  %v13128_v0 = vor.u32 %v15603_v47, %v13127_v31  ;;  %v15582_v35 = vld [vmem:[#allocation2 + $0x7d4] sm:$0xf0]  ;;  %v13057_v57 = vld [vmem:[#allocation2 + $0x7d8] sm:$0xf0] }
 0x8b3   :  { %4887 = vmatpush.bf16.msrb.mxu3 %v12900_v16  ;;  %5056 = vmatpush.bf16.msra.mxu0 %v12952_v58  ;;  %v12908_v16 = vor.u32 %v15531_v49, %v12905_v40  ;;  %v12912_v58 = vor.u32 %v15548_v12, %v12911_v21  ;;  %v12916_v11 = vor.u32 %v15532_v61, %v12913_v38  ;;  %v12921_v21 = vld [vmem:[#allocation2 + $0x6d0] sm:$0xf0]  ;;  %v15550_v30 = vld [vmem:[#allocation2 + $0x6d4] sm:$0xf0]  ;;  %v15534_v31 = vld [vmem:[#allocation2 + $0x65c] sm:$0xf] }
 0x8b4   :  { %v13052_v40 = vor.u32 %v15565_v45, %v13049_v44  ;;  %v15605_v47 = vld [vmem:[#allocation2 + $0x88c] sm:$0xf0] }
 0x8b7   :  { %v3935_v55 = vpop.f32.mrf.mxu2 }
 0x8b8   :  { %v3948_v46 = vpop.f32.mrf.mxu3 }
 0x8b9   :  { %v3972_v14 = vpop.f32.mrf.mxu1  ;;  %v15566_v46 = vld [vmem:[#allocation2 + $0x75c] sm:$0xf] }
 0x8ba   :  { %v17658_v28 = vadd.f32 %v3972_v14, %v3166_v2  ;;  %v4167_v24 = vpop.f32.mrf.mxu0  ;;  %v15637_v14 = vld [vmem:[#allocation2 + $0x98c] sm:$0xf0]  ;;  %v13060_v61 = vor.u32 %v15566_v46, %v13057_v57  ;;  %v19232_v46 = vld [vmem:[#allocation46_spill] sm:$0xff]  ;;  %v13073_v57 = vld [vmem:[#allocation2 + $0x7e8] sm:$0xf0] }
 0x8bb   :  { %v17660_v53 = vadd.f32 %v4167_v24, %v3361_v19  ;;  %v13271_v19 = vld [vmem:[#allocation2 + $0x910] sm:$0xf]  ;;  %v3413_v24 = vadd.f32 %v17515_v26, %v17384_v20  ;;  %v12929_v20 = vld [vmem:[#allocation2 + $0x6d8] sm:$0xf0] }
 0x8bc   :  { %13102 = vmatmul.msk.bf16.vlgmr.msra.gmra.mxu1 %vm306_vm2, %v17533_v22  ;;  %13103 = vmatmul.msk.bf16.vlgmr.msra.gmra.mxu2 %vm306_vm2, %v17533_v22  ;;  %v13272_v38 = vor.u32 %v15637_v14, %v13271_v19  ;;  %v13143_v26 = vld [vmem:[#allocation2 + $0x810] sm:$0xf]  ;;  %v13287_v19 = vld [vmem:[#allocation2 + $0x920] sm:$0xf] }
 0x8bd   :  { %13104 = vmatmul.msk.bf16.vlgmr.msra.gmra.mxu3 %vm306_vm2, %v17533_v22  ;;  %13117 = vmatmul.msk.bf16.vlgmr.msrb.gmra.mxu0 %vm306_vm2, %v17533_v22  ;;  %v15639_v14 = vld [vmem:[#allocation2 + $0x99c] sm:$0xf0] }
 0x8be   :  { %4912 = vmatpush.bf16.msra.mxu1 %v13036_v34  ;;  %4925 = vmatpush.bf16.msra.mxu2 %v13040_v18 }
 0x8bf   :  { %v3985_v25 = vpop.f32.mrf.mxu2  ;;  %4938 = vmatpush.bf16.msra.mxu3 %v13044_v43  ;;  %5530 = vmatpush.bf16.msrb.mxu0 %v13256_v48  ;;  %v13056_v43 = vor.u32 %v15582_v35, %v13055_v51  ;;  %v15533_v48 = vld [vmem:[#allocation2 + $0x654] sm:$0xf]  ;;  %v15568_v51 = vld [vmem:[#allocation2 + $0x76c] sm:$0xf]  ;;  %v19231_v35 = vld [vmem:[#allocation34_spill] sm:$0xff] }
 0x8c0   :  { %v17674_v3 = vadd.f32 %v3985_v25, %v3179_v36  ;;  %v3998_v55 = vpop.f32.mrf.mxu3  ;;  %v3231_v36 = vadd.f32 %v17525_v33, %v17395_v8  ;;  %v15567_v8 = vld [vmem:[#allocation2 + $0x764] sm:$0xf] }
 0x8c1   :  { %v17676_v7 = vadd.f32 %v3998_v55, %v3192_v52  ;;  %v3974_v17 = vpop.f32.mrf.mxu1  ;;  %v3244_v52 = vadd.f32 %v17527_v50, %v17397_v39  ;;  %v13065_v33 = vld [vmem:[#allocation2 + $0x7e0] sm:$0xf0]  ;;  %v13071_v39 = vld [vmem:[#allocation2 + $0x768] sm:$0xf] }
 0x8c2   :  { %v4169_v6 = vpop.f32.mrf.mxu0  ;;  %4913 = vmatpush.bf16.msra.mxu1 %v12908_v16  ;;  %4926 = vmatpush.bf16.msra.mxu2 %v12912_v58  ;;  %v12924_v16 = vor.u32 %v15533_v48, %v12921_v21  ;;  %v12928_v58 = vor.u32 %v15550_v30, %v12927_v15  ;;  %v15584_v50 = vld [vmem:[#allocation2 + $0x7e4] sm:$0xf0]  ;;  %v15535_v21 = vld [vmem:[#allocation2 + $0x664] sm:$0xf]  ;;  %v13076_v15 = vor.u32 %v15568_v51, %v13073_v57  ;;  %v15570_v57 = vld [vmem:[#allocation2 + $0x77c] sm:$0xf] }
 0x8c3   :  { %4939 = vmatpush.bf16.msra.mxu3 %v12916_v11  ;;  %5531 = vmatpush.bf16.msrb.mxu0 %v13128_v0  ;;  %v12932_v11 = vor.u32 %v15534_v31, %v12929_v20  ;;  %v13144_v0 = vor.u32 %v15605_v47, %v13143_v26  ;;  %v13072_v48 = vor.u32 %v15584_v50, %v13071_v39  ;;  %v12943_v31 = vld [vmem:[#allocation2 + $0x668] sm:$0xf]  ;;  %v15536_v26 = vld [vmem:[#allocation2 + $0x66c] sm:$0xf] }
 0x8c4   :  { %v13288_v30 = vor.u32 %v15639_v14, %v13287_v19  ;;  %v15552_v20 = vld [vmem:[#allocation2 + $0x6e4] sm:$0xf0]  ;;  %v12945_v47 = vld [vmem:[#allocation2 + $0x6e8] sm:$0xf0]  ;;  %v19236_v19 = vld [vmem:[#allocation37_spill] sm:$0xff] }
 0x8c5   :  { %v19237_v14 = vld [vmem:[#allocation47_spill] sm:$0xff] }
 0x8c7   :  { %v3987_v2 = vpop.f32.mrf.mxu2 }
 0x8c8   :  { %v4000_v27 = vpop.f32.mrf.mxu3 }
 0x8c9   :  { %v4024_v34 = vpop.f32.mrf.mxu1 }
 0x8ca   :  { %v17682_v18 = vadd.f32 %v4024_v34, %v3218_v5  ;;  %v4219_v49 = vpop.f32.mrf.mxu0  ;;  %v3270_v5 = vadd.f32 %v19232_v46, %v19231_v35  ;;  %v13081_v35 = vld [vmem:[#allocation2 + $0x7f0] sm:$0xf0] }
 0x8cb   :  { %v17684_v12 = vadd.f32 %v4219_v49, %v3413_v24 }
 0x8cc   :  { %13106 = vmatmul.msk.bf16.vlgmr.msrb.gmra.mxu1 %vm306_vm2, %v17533_v22  ;;  %13107 = vmatmul.msk.bf16.vlgmr.msrb.gmra.mxu2 %vm306_vm2, %v17533_v22 }
 0x8cd   :  { %13108 = vmatmul.msk.bf16.vlgmr.msrb.gmra.mxu3 %vm306_vm2, %v17533_v22  ;;  %13121 = vmatmul.msk.bf16.vlgmr.msra.gmra.mxu0 %vm306_vm2, %v17533_v22 }
 0x8ce   :  { %4964 = vmatpush.bf16.msrb.mxu1 %v13052_v40  ;;  %4977 = vmatpush.bf16.msrb.mxu2 %v13056_v43  ;;  %v17706_v40 = vpop.permute.xlu2 %5199  ;;  %v13068_v43 = vor.u32 %v15567_v8, %v13065_v33 }
 0x8cf   :  { %v4037_v25 = vpop.f32.mrf.mxu2  ;;  %4990 = vmatpush.bf16.msrb.mxu3 %v13060_v61  ;;  %5582 = vmatpush.bf16.msra.mxu0 %v13272_v38  ;;  %v12937_v61 = vld [vmem:[#allocation2 + $0x6e0] sm:$0xf0] }
 0x8d0   :  { %v17698_v55 = vadd.f32 %v4037_v25, %v3231_v36  ;;  %v4050_v17 = vpop.f32.mrf.mxu3  ;;  %v13159_v36 = vld [vmem:[#allocation2 + $0x820] sm:$0xf]  ;;  %v12944_v25 = vor.u32 %v15552_v20, %v12943_v31 }
 0x8d1   :  { %v17700_v6 = vadd.f32 %v4050_v17, %v3244_v52  ;;  %v4026_v45 = vpop.f32.mrf.mxu1  ;;  %v12940_v52 = vor.u32 %v15535_v21, %v12937_v61  ;;  %v15641_v21 = vld [vmem:[#allocation2 + $0x9ac] sm:$0xf0] }
 0x8d2   :  { %v4221_v44 = vpop.f32.mrf.mxu0  ;;  %4965 = vmatpush.bf16.msrb.mxu1 %v12924_v16  ;;  %4978 = vmatpush.bf16.msrb.mxu2 %v12928_v58  ;;  %v15607_v16 = vld [vmem:[#allocation2 + $0x89c] sm:$0xf0]  ;;  %v12948_v45 = vor.u32 %v15536_v26, %v12945_v47  ;;  %v15537_v26 = vld [vmem:[#allocation2 + $0x674] sm:$0xf] }
 0x8d3   :  { %4991 = vmatpush.bf16.msrb.mxu3 %v12932_v11  ;;  %5583 = vmatpush.bf16.msra.mxu0 %v13144_v0  ;;  %v19234_v11 = vld [vmem:[#allocation36_spill] sm:$0xff]  ;;  %v13160_v44 = vor.u32 %v15607_v16, %v13159_v36 }
 0x8d4   :  { %v3296_v0 = vadd.f32 %v17547_v37, %v19234_v11  ;;  %v15569_v37 = vld [vmem:[#allocation2 + $0x774] sm:$0xf]  ;;  %v12961_v11 = vld [vmem:[#allocation2 + $0x6f8] sm:$0xf0] }
 0x8d5   :  { %v13084_v31 = vor.u32 %v15569_v37, %v13081_v35  ;;  %v12953_v47 = vld [vmem:[#allocation2 + $0x6f0] sm:$0xf0] }
 0x8d7   :  { %v4039_v2 = vpop.f32.mrf.mxu2 }
 0x8d8   :  { %v4052_v27 = vpop.f32.mrf.mxu3  ;;  %v19235_v2 = vld [vmem:[#allocation31_spill] sm:$0xff] }
 0x8d9   :  { %v4076_v24 = vpop.f32.mrf.mxu1  ;;  %v5972_v39 = vpack.c.bf16 %v19235_v2, %v19235_v2  ;;  %v15586_v27 = vld [vmem:[#allocation2 + $0x7f4] sm:$0xf0]  ;;  %v19239_v2 = vld [vmem:[#allocation39_spill] sm:$0xff] }
 0x8da   :  { %v17704_v34 = vadd.f32 %v4076_v24, %v3270_v5  ;;  %v4694_v49 = vpop.f32.mrf.mxu0  ;;  %v13087_v5 = vld [vmem:[#allocation2 + $0x778] sm:$0xf]  ;;  %v3322_v24 = vadd.f32 %v19237_v14, %v19236_v19  ;;  %v13257_v14 = vld [vmem:[#allocation2 + $0x980] sm:$0xf0] }
 0x8db   :  { %v17709_v38 = vadd.f32 %v4694_v49, %v17535_v63  ;;  %v19233_v63 = vld [vmem:[#allocation35_spill] sm:$0xff]  ;;  %6038 = vrot.lane.b32.xlu2 %v5972_v39, %s16730_s26  ;;  %v13088_v20 = vor.u32 %v15586_v27, %v13087_v5  ;;  %v19240_v39 = vld [vmem:[#allocation48_spill] sm:$0xff] }
 0x8dc   :  { %13110 = vmatmul.msk.bf16.vlgmr.msra.gmra.mxu1 %vm306_vm2, %v17533_v22  ;;  %13111 = vmatmul.msk.bf16.vlgmr.msra.gmra.mxu2 %vm306_vm2, %v17533_v22  ;;  %v3283_v58 = vadd.f32 %v17545_v13, %v19233_v63 }
 0x8dd   :  { %13112 = vmatmul.msk.bf16.vlgmr.msra.gmra.mxu3 %vm306_vm2, %v17533_v22  ;;  %13381 = vmatmul.msk.bf16.vlgmr.msrb.gmra.mxu0 %vm306_vm2, %v17706_v40 }
 0x8de   :  { %5016 = vmatpush.bf16.msra.mxu1 %v13068_v43  ;;  %5029 = vmatpush.bf16.msra.mxu2 %v13072_v48  ;;  %v13089_v43 = vld [vmem:[#allocation2 + $0x7f8] sm:$0xf0]  ;;  %v13303_v48 = vld [vmem:[#allocation2 + $0x930] sm:$0xf] }
 0x8df   :  { %v4089_v17 = vpop.f32.mrf.mxu2  ;;  %5042 = vmatpush.bf16.msra.mxu3 %v13076_v15  ;;  %5634 = vmatpush.bf16.msrb.mxu0 %v13288_v30  ;;  %v13092_v16 = vor.u32 %v15570_v57, %v13089_v43  ;;  %v13304_v63 = vor.u32 %v15641_v21, %v13303_v48  ;;  %v15636_v43 = vld [vmem:[#allocation2 + $0x984] sm:$0xf0]  ;;  %v15620_v48 = vld [vmem:[#allocation2 + $0x90c] sm:$0xf] }
 0x8e0   :  { %v17723_v8 = vadd.f32 %v4089_v17, %v3283_v58  ;;  %v4102_v33 = vpop.f32.mrf.mxu3  ;;  %v12959_v58 = vld [vmem:[#allocation2 + $0x678] sm:$0xf]  ;;  %v15609_v17 = vld [vmem:[#allocation2 + $0x8ac] sm:$0xf0] }
 0x8e1   :  { %v17727_v50 = vadd.f32 %v4102_v33, %v3296_v0  ;;  %v4078_v13 = vpop.f32.mrf.mxu1  ;;  %v13175_v0 = vld [vmem:[#allocation2 + $0x830] sm:$0xf] }
 0x8e2   :  { %v4696_v51 = vpop.f32.mrf.mxu0  ;;  %5017 = vmatpush.bf16.msra.mxu1 %v12940_v52  ;;  %5030 = vmatpush.bf16.msra.mxu2 %v12944_v25  ;;  %v15554_v52 = vld [vmem:[#allocation2 + $0x6f4] sm:$0xf0]  ;;  %v15538_v25 = vld [vmem:[#allocation2 + $0x67c] sm:$0xf]  ;;  %v3348_v13 = vadd.f32 %v19240_v39, %v19239_v2  ;;  %v13176_v35 = vor.u32 %v15609_v17, %v13175_v0  ;;  %v19241_v21 = vld [vmem:[#allocation40_spill] sm:$0xff] }
 0x8e3   :  { %5043 = vmatpush.bf16.msra.mxu3 %v12948_v45  ;;  %5635 = vmatpush.bf16.msrb.mxu0 %v13160_v44  ;;  %v12956_v44 = vor.u32 %v15537_v26, %v12953_v47  ;;  %v12960_v33 = vor.u32 %v15554_v52, %v12959_v58  ;;  %v12964_v37 = vor.u32 %v15538_v25, %v12961_v11  ;;  %v13319_v26 = vld [vmem:[#allocation2 + $0x940] sm:$0xf]  ;;  %v15587_v11 = vld [vmem:[#allocation2 + $0x804] sm:$0xf]  ;;  %v15588_v2 = vld [vmem:[#allocation2 + $0x80c] sm:$0xf] }
 0x8e4   :  { %v15643_v47 = vld [vmem:[#allocation2 + $0x9bc] sm:$0xf0]  ;;  %v13129_v0 = vld [vmem:[#allocation2 + $0x880] sm:$0xf0]  ;;  %v13137_v39 = vld [vmem:[#allocation2 + $0x888] sm:$0xf0] }
 0x8e7   :  { %v4091_v46 = vpop.f32.mrf.mxu2 }
 0x8e8   :  { %v4104_v49 = vpop.f32.mrf.mxu3 }
 0x8e9   :  { %v4128_v61 = vpop.f32.mrf.mxu1  ;;  %v13263_v49 = vld [vmem:[#allocation2 + $0x908] sm:$0xf] }
 0x8ea   :  { %v17732_v15 = vadd.f32 %v4128_v61, %v3322_v24  ;;  %v4746_v30 = vpop.f32.mrf.mxu0  ;;  %v19242_v61 = vld [vmem:[#allocation49_spill] sm:$0xff]  ;;  %v13264_v25 = vor.u32 %v15636_v43, %v13263_v49 }
 0x8eb   :  { %v17735_v36 = vadd.f32 %v4746_v30, %v17556_v29  ;;  %v19238_v29 = vld [vmem:[#allocation38_spill] sm:$0xff]  ;;  %v3374_v30 = vadd.f32 %v19242_v61, %v19241_v21 }
 0x8ec   :  { %13114 = vmatmul.msk.bf16.vlgmr.msrb.gmra.mxu1 %vm306_vm2, %v17533_v22  ;;  %13115 = vmatmul.msk.bf16.vlgmr.msrb.gmra.mxu2 %vm306_vm2, %v17533_v22  ;;  %v3335_v45 = vadd.f32 %v17566_v42, %v19238_v29  ;;  %v15619_v42 = vld [vmem:[#allocation2 + $0x904] sm:$0xf] }
 0x8ed   :  { %13116 = vmatmul.msk.bf16.vlgmr.msrb.gmra.mxu3 %vm306_vm2, %v17533_v22  ;;  %13385 = vmatmul.msk.bf16.vlgmr.msra.gmra.mxu0 %vm306_vm2, %v17706_v40  ;;  %v13260_v52 = vor.u32 %v15619_v42, %v13257_v14 }
 0x8ee   :  { %5068 = vmatpush.bf16.msrb.mxu1 %v13084_v31  ;;  %5081 = vmatpush.bf16.msrb.mxu2 %v13088_v20  ;;  %v13265_v20 = vld [vmem:[#allocation2 + $0x988] sm:$0xf0] }
 0x8ef   :  { %v4141_v51 = vpop.f32.mrf.mxu2  ;;  %5094 = vmatpush.bf16.msrb.mxu3 %v13092_v16  ;;  %5686 = vmatpush.bf16.msra.mxu0 %v13304_v63  ;;  %v13268_v29 = vor.u32 %v15620_v48, %v13265_v20 }
 0x8f0   :  { %v17749_v46 = vadd.f32 %v4141_v51, %v3335_v45  ;;  %v4154_v5 = vpop.f32.mrf.mxu3  ;;  %v13320_v45 = vor.u32 %v15643_v47, %v13319_v26  ;;  %v15611_v51 = vld [vmem:[#allocation2 + $0x8bc] sm:$0xf0]  ;;  %v13279_v26 = vld [vmem:[#allocation2 + $0x918] sm:$0xf] }
 0x8f1   :  { %v17751_v27 = vadd.f32 %v4154_v5, %v3348_v13  ;;  %v4130_v57 = vpop.f32.mrf.mxu1  ;;  %v13191_v13 = vld [vmem:[#allocation2 + $0x840] sm:$0xf]  ;;  %v15638_v47 = vld [vmem:[#allocation2 + $0x994] sm:$0xf0] }
 0x8f2   :  { %v4748_v19 = vpop.f32.mrf.mxu0  ;;  %5069 = vmatpush.bf16.msrb.mxu1 %v12956_v44  ;;  %5082 = vmatpush.bf16.msrb.mxu2 %v12960_v33  ;;  %v13135_v44 = vld [vmem:[#allocation2 + $0x808] sm:$0xf]  ;;  %v19244_v57 = vld [vmem:[#allocation42_spill] sm:$0xff]  ;;  %v13192_v49 = vor.u32 %v15611_v51, %v13191_v13  ;;  %v13280_v13 = vor.u32 %v15638_v47, %v13279_v26  ;;  %v15589_v51 = vld [vmem:[#allocation2 + $0x814] sm:$0xf] }
 0x8f3   :  { %5095 = vmatpush.bf16.msrb.mxu3 %v12964_v37  ;;  %5687 = vmatpush.bf16.msra.mxu0 %v13176_v35  ;;  %v15604_v33 = vld [vmem:[#allocation2 + $0x884] sm:$0xf0]  ;;  %v13132_v35 = vor.u32 %v15587_v11, %v13129_v0  ;;  %v19245_v19 = vld [vmem:[#allocation50_spill] sm:$0xff] }
 0x8f4   :  { %v13136_v5 = vor.u32 %v15604_v33, %v13135_v44  ;;  %v3400_v42 = vadd.f32 %v19245_v19, %v19244_v57  ;;  %v13281_v0 = vld [vmem:[#allocation2 + $0x998] sm:$0xf0]  ;;  %v13151_v57 = vld [vmem:[#allocation2 + $0x818] sm:$0xf] }
 0x8f5   :  { %v15606_v19 = vld [vmem:[#allocation2 + $0x894] sm:$0xf0] }
 0x8f7   :  { %v4143_v24 = vpop.f32.mrf.mxu2 }
 0x8f8   :  { %v4156_v31 = vpop.f32.mrf.mxu3  ;;  %v13140_v24 = vor.u32 %v15588_v2, %v13137_v39 }
 0x8f9   :  { %v4180_v16 = vpop.f32.mrf.mxu1  ;;  %v13273_v31 = vld [vmem:[#allocation2 + $0x990] sm:$0xf0] }
 0x8fa   :  { %v17755_v63 = vadd.f32 %v4180_v16, %v3374_v30  ;;  %v4798_v58 = vpop.f32.mrf.mxu0  ;;  %v15622_v16 = vld [vmem:[#allocation2 + $0x91c] sm:$0xf] }
 0x8fb   :  { %v17758_v17 = vadd.f32 %v4798_v58, %v17574_v54  ;;  %v19243_v54 = vld [vmem:[#allocation41_spill] sm:$0xff]  ;;  %v19246_v58 = vld [vmem:[#allocation43_spill] sm:$0xff] }
 0x8fc   :  { %13118 = vmatmul.msk.bf16.vlgmr.msra.gmra.mxu1 %vm306_vm2, %v17533_v22  ;;  %13119 = vmatmul.msk.bf16.vlgmr.msra.gmra.mxu2 %vm306_vm2, %v17533_v22  ;;  %v3387_v37 = vadd.f32 %v17584_v10, %v19243_v54  ;;  %v15621_v10 = vld [vmem:[#allocation2 + $0x914] sm:$0xf] }
 0x8fd   :  { %13120 = vmatmul.msk.bf16.vlgmr.msra.gmra.mxu3 %vm306_vm2, %v17533_v22  ;;  %13389 = vmatmul.msk.bf16.vlgmr.msrb.gmra.mxu0 %vm306_vm2, %v17706_v40  ;;  %v13276_v39 = vor.u32 %v15621_v10, %v13273_v31  ;;  %v13145_v54 = vld [vmem:[#allocation2 + $0x890] sm:$0xf0] }
 0x8fe   :  { %5543 = vmatpush.bf16.msra.mxu1 %v13260_v52  ;;  %5556 = vmatpush.bf16.msra.mxu2 %v13264_v25  ;;  %v19247_v52 = vld [vmem:[#allocation51_spill] sm:$0xff]  ;;  %v19249_v10 = vld [vmem:[#allocation45_spill] sm:$0xff] }
 0x8ff   :  { %v4193_v14 = vpop.f32.mrf.mxu2  ;;  %5569 = vmatpush.bf16.msra.mxu3 %v13268_v29  ;;  %5738 = vmatpush.bf16.msrb.mxu0 %v13320_v45  ;;  %v3426_v25 = vadd.f32 %v19247_v52, %v19246_v58  ;;  %v13335_v29 = vld [vmem:[#allocation2 + $0x950] sm:$0xf]  ;;  %v3452_v31 = vadd.f32 %v17604_v1, %v19249_v10  ;;  %v13295_v1 = vld [vmem:[#allocation2 + $0x928] sm:$0xf]  ;;  %v13223_v10 = vld [vmem:[#allocation2 + $0x860] sm:$0xf] }
 0x900   :  { %v17772_v43 = vadd.f32 %v4193_v14, %v3387_v37  ;;  %v4206_v48 = vpop.f32.mrf.mxu3  ;;  %v15645_v45 = vld [vmem:[#allocation2 + $0x9cc] sm:$0xf0]  ;;  %v13153_v14 = vld [vmem:[#allocation2 + $0x898] sm:$0xf0] }
 0x901   :  { %v17774_v21 = vadd.f32 %v4206_v48, %v3400_v42  ;;  %v4182_v61 = vpop.f32.mrf.mxu1  ;;  %v15590_v42 = vld [vmem:[#allocation2 + $0x81c] sm:$0xf] }
 0x902   :  { %v4800_v30 = vpop.f32.mrf.mxu0  ;;  %5544 = vmatpush.bf16.msra.mxu1 %v13132_v35  ;;  %5557 = vmatpush.bf16.msra.mxu2 %v13136_v5  ;;  %v13284_v35 = vor.u32 %v15622_v16, %v13281_v0  ;;  %v13336_v5 = vor.u32 %v15645_v45, %v13335_v29  ;;  %v13148_v61 = vor.u32 %v15589_v51, %v13145_v54  ;;  %v15640_v29 = vld [vmem:[#allocation2 + $0x9a4] sm:$0xf0]  ;;  %v15624_v45 = vld [vmem:[#allocation2 + $0x92c] sm:$0xf] }
 0x903   :  { %5570 = vmatpush.bf16.msra.mxu3 %v13140_v24  ;;  %5739 = vmatpush.bf16.msrb.mxu0 %v13192_v49  ;;  %v13207_v24 = vld [vmem:[#allocation2 + $0x850] sm:$0xf]  ;;  %v13152_v30 = vor.u32 %v15606_v19, %v13151_v57  ;;  %v13156_v26 = vor.u32 %v15590_v42, %v13153_v14  ;;  %v13296_v57 = vor.u32 %v15640_v29, %v13295_v1  ;;  %v15591_v19 = vld [vmem:[#allocation2 + $0x824] sm:$0xf]  ;;  %v15625_v29 = vld [vmem:[#allocation2 + $0x934] sm:$0xf] }
 0x904   :  { %v15613_v49 = vld [vmem:[#allocation2 + $0x8cc] sm:$0xf0]  ;;  %v13161_v42 = vld [vmem:[#allocation2 + $0x8a0] sm:$0xf0] }
 0x905   :  { %v13208_v47 = vor.u32 %v15613_v49, %v13207_v24  ;;  %v19250_v14 = vld [vmem:[#allocation52_spill] sm:$0xff] }
 0x907   :  { %v4195_v20 = vpop.f32.mrf.mxu2 }
 0x908   :  { %v4208_v11 = vpop.f32.mrf.mxu3 }
 0x909   :  { %v4232_v44 = vpop.f32.mrf.mxu1  ;;  %v13289_v11 = vld [vmem:[#allocation2 + $0x9a0] sm:$0xf0] }
 0x90a   :  { %v17778_v33 = vadd.f32 %v4232_v44, %v3426_v25  ;;  %v4850_v2 = vpop.f32.mrf.mxu0 }
 0x90b   :  { %v17781_v37 = vadd.f32 %v4850_v2, %v17592_v4  ;;  %v19248_v4 = vld [vmem:[#allocation44_spill] sm:$0xff] }
 0x90c   :  { %13122 = vmatmul.msk.bf16.vlgmr.msrb.gmra.mxu1 %vm306_vm2, %v17533_v22  ;;  %13123 = vmatmul.msk.bf16.vlgmr.msrb.gmra.mxu2 %vm306_vm2, %v17533_v22  ;;  %v3439_v48 = vadd.f32 %v17602_v9, %v19248_v4  ;;  %v15623_v9 = vld [vmem:[#allocation2 + $0x924] sm:$0xf]  ;;  %v13297_v2 = vld [vmem:[#allocation2 + $0x9a8] sm:$0xf0] }
 0x90d   :  { %13124 = vmatmul.msk.bf16.vlgmr.msrb.gmra.mxu3 %vm306_vm2, %v17533_v22  ;;  %13393 = vmatmul.msk.bf16.vlgmr.msra.gmra.mxu0 %vm306_vm2, %v17706_v40  ;;  %v13300_v49 = vor.u32 %v15624_v45, %v13297_v2  ;;  %v13305_v45 = vld [vmem:[#allocation2 + $0x9b0] sm:$0xf0]  ;;  %v13311_v2 = vld [vmem:[#allocation2 + $0x938] sm:$0xf] }
 0x90e   :  { %5595 = vmatpush.bf16.msrb.mxu1 %v13276_v39  ;;  %5608 = vmatpush.bf16.msrb.mxu2 %v13280_v13  ;;  %v13351_v39 = vld [vmem:[#allocation2 + $0x960] sm:$0xf] }
 0x90f   :  { %v4245_v20 = vpop.f32.mrf.mxu2  ;;  %5621 = vmatpush.bf16.msrb.mxu3 %v13284_v35  ;;  %5790 = vmatpush.bf16.msra.mxu0 %v13336_v5  ;;  %v15647_v13 = vld [vmem:[#allocation2 + $0x9dc] sm:$0xf0]  ;;  %v13292_v5 = vor.u32 %v15623_v9, %v13289_v11 }
 0x910   :  { %v17795_v16 = vadd.f32 %v4245_v20, %v3439_v48  ;;  %v4258_v22 = vpop.f32.mrf.mxu3  ;;  %v13352_v4 = vor.u32 %v15647_v13, %v13351_v39  ;;  %v13167_v48 = vld [vmem:[#allocation2 + $0x828] sm:$0xf]  ;;  %v13164_v20 = vor.u32 %v15591_v19, %v13161_v42  ;;  %v15642_v39 = vld [vmem:[#allocation2 + $0x9b4] sm:$0xf0]  ;;  %v15626_v13 = vld [vmem:[#allocation2 + $0x93c] sm:$0xf]  ;;  %v13308_v42 = vor.u32 %v15625_v29, %v13305_v45 }
 0x911   :  { %v17797_v58 = vadd.f32 %v4258_v22, %v3452_v31  ;;  %v4234_v52 = vpop.f32.mrf.mxu1  ;;  %v15615_v31 = vld [vmem:[#allocation2 + $0x8dc] sm:$0xf0] }
 0x912   :  { %v4852_v25 = vpop.f32.mrf.mxu0  ;;  %5596 = vmatpush.bf16.msrb.mxu1 %v13148_v61  ;;  %5609 = vmatpush.bf16.msrb.mxu2 %v13152_v30  ;;  %v15608_v61 = vld [vmem:[#allocation2 + $0x8a4] sm:$0xf0]  ;;  %v15592_v30 = vld [vmem:[#allocation2 + $0x82c] sm:$0xf]  ;;  %v13224_v52 = vor.u32 %v15615_v31, %v13223_v10  ;;  %v15610_v10 = vld [vmem:[#allocation2 + $0x8b4] sm:$0xf0] }
 0x913   :  { %5622 = vmatpush.bf16.msrb.mxu3 %v13156_v26  ;;  %5791 = vmatpush.bf16.msra.mxu0 %v13208_v47  ;;  %v13168_v26 = vor.u32 %v15608_v61, %v13167_v48  ;;  %v15594_v31 = vld [vmem:[#allocation2 + $0x83c] sm:$0xf] }
 0x917   :  { %v4247_v0 = vpop.f32.mrf.mxu2 }
 0x918   :  { %v4260_v44 = vpop.f32.mrf.mxu3 }
 0x919   :  { %v4707_v51 = vpop.f32.mrf.mxu1 }
 0x91a   :  { %v17800_v54 = vadd.f32 %v4707_v51, %v17610_v41  ;;  %v4902_v35 = vpop.f32.mrf.mxu0  ;;  %v13169_v41 = vld [vmem:[#allocation2 + $0x8a8] sm:$0xf0] }
 0x91b   :  { %v17803_v24 = vadd.f32 %v4902_v35, %v19250_v14  ;;  %v13172_v22 = vor.u32 %v15592_v30, %v13169_v41  ;;  %v13313_v35 = vld [vmem:[#allocation2 + $0x9b8] sm:$0xf0]  ;;  %v13312_v14 = vor.u32 %v15642_v39, %v13311_v2  ;;  %v13183_v41 = vld [vmem:[#allocation2 + $0x838] sm:$0xf]  ;;  %v15627_v2 = vld [vmem:[#allocation2 + $0x944] sm:$0xf] }
 0x91c   :  { %13382 = vmatmul.msk.bf16.vlgmr.msra.gmra.mxu1 %vm306_vm2, %v17706_v40  ;;  %13383 = vmatmul.msk.bf16.vlgmr.msra.gmra.mxu2 %vm306_vm2, %v17706_v40  ;;  %v13316_v61 = vor.u32 %v15626_v13, %v13313_v35  ;;  %v13321_v39 = vld [vmem:[#allocation2 + $0x9c0] sm:$0xf0]  ;;  %v15644_v35 = vld [vmem:[#allocation2 + $0x9c4] sm:$0xf0] }
 0x91d   :  { %13384 = vmatmul.msk.bf16.vlgmr.msra.gmra.mxu3 %vm306_vm2, %v17706_v40  ;;  %13397 = vmatmul.msk.bf16.vlgmr.msrb.gmra.mxu0 %vm306_vm2, %v17706_v40 }
 0x91e   :  { %5647 = vmatpush.bf16.msra.mxu1 %v13292_v5  ;;  %5660 = vmatpush.bf16.msra.mxu2 %v13296_v57  ;;  %v15649_v5 = vld [vmem:[#allocation2 + $0x9ec] sm:$0xf0] }
 0x91f   :  { %v4720_v47 = vpop.f32.mrf.mxu2  ;;  %5673 = vmatpush.bf16.msra.mxu3 %v13300_v49  ;;  %5842 = vmatpush.bf16.msrb.mxu0 %v13352_v4  ;;  %v15593_v49 = vld [vmem:[#allocation2 + $0x834] sm:$0xf] }
 0x920   :  { %v17814_v25 = vadd.f32 %v4720_v47, %v17626_v60  ;;  %v4733_v9 = vpop.f32.mrf.mxu3  ;;  %v13367_v60 = vld [vmem:[#allocation2 + $0x970] sm:$0xf]  ;;  %v13177_v4 = vld [vmem:[#allocation2 + $0x8b0] sm:$0xf0]  ;;  %v13184_v47 = vor.u32 %v15610_v10, %v13183_v41 }
 0x921   :  { %v17817_v11 = vadd.f32 %v4733_v9, %v17628_v23  ;;  %v4709_v0 = vpop.f32.mrf.mxu1  ;;  %v13368_v30 = vor.u32 %v15649_v5, %v13367_v60  ;;  %v15628_v60 = vld [vmem:[#allocation2 + $0x94c] sm:$0xf] }
 0x922   :  { %v4904_v1 = vpop.f32.mrf.mxu0  ;;  %5648 = vmatpush.bf16.msra.mxu1 %v13164_v20  ;;  %5661 = vmatpush.bf16.msra.mxu2 %v13168_v26  ;;  %v13239_v20 = vld [vmem:[#allocation2 + $0x870] sm:$0xf] }
 0x923   :  { %5674 = vmatpush.bf16.msra.mxu3 %v13172_v22  ;;  %5843 = vmatpush.bf16.msrb.mxu0 %v13224_v52  ;;  %v15617_v26 = vld [vmem:[#allocation2 + $0x8ec] sm:$0xf0] }
 0x924   :  { %v13240_v9 = vor.u32 %v15617_v26, %v13239_v20  ;;  %v15612_v20 = vld [vmem:[#allocation2 + $0x8c4] sm:$0xf0]  ;;  %v15596_v26 = vld [vmem:[#allocation2 + $0x84c] sm:$0xf] }
 0x927   :  { %v4722_v44 = vpop.f32.mrf.mxu2 }
 0x928   :  { %v4735_v51 = vpop.f32.mrf.mxu3 }
 0x929   :  { %v4759_v57 = vpop.f32.mrf.mxu1  ;;  %v13327_v51 = vld [vmem:[#allocation2 + $0x948] sm:$0xf] }
 0x92a   :  { %v17820_v23 = vadd.f32 %v4759_v57, %v17634_v59  ;;  %v4954_v19 = vpop.f32.mrf.mxu0  ;;  %v13185_v59 = vld [vmem:[#allocation2 + $0x8b8] sm:$0xf0]  ;;  %v13329_v57 = vld [vmem:[#allocation2 + $0x9c8] sm:$0xf0] }
 0x92b   :  { %v17823_v48 = vadd.f32 %v4954_v19, %v17636_v32  ;;  %v13180_v32 = vor.u32 %v15593_v49, %v13177_v4  ;;  %v13188_v52 = vor.u32 %v15594_v31, %v13185_v59  ;;  %v15699_v19 = vld [vmem:[#allocation2 + $0xb7c] sm:$0xf0]  ;;  %v13324_v49 = vor.u32 %v15627_v2, %v13321_v39  ;;  %v13199_v59 = vld [vmem:[#allocation2 + $0x848] sm:$0xf] }
 0x92c   :  { %13386 = vmatmul.msk.bf16.vlgmr.msrb.gmra.mxu1 %vm306_vm2, %v17706_v40  ;;  %13387 = vmatmul.msk.bf16.vlgmr.msrb.gmra.mxu2 %vm306_vm2, %v17706_v40  ;;  %v13328_v4 = vor.u32 %v15644_v35, %v13327_v51  ;;  %v13332_v10 = vor.u32 %v15628_v60, %v13329_v57  ;;  %v15629_v51 = vld [vmem:[#allocation2 + $0x954] sm:$0xf]  ;;  %v15646_v57 = vld [vmem:[#allocation2 + $0x9d4] sm:$0xf0] }
 0x92d   :  { %13388 = vmatmul.msk.bf16.vlgmr.msrb.gmra.mxu3 %vm306_vm2, %v17706_v40  ;;  %13401 = vmatmul.msk.bf16.vlgmr.msra.gmra.mxu0 %vm306_vm2, %v17706_v40  ;;  %v13337_v35 = vld [vmem:[#allocation2 + $0x9d0] sm:$0xf0] }
 0x92e   :  { %5699 = vmatpush.bf16.msrb.mxu1 %v13308_v42  ;;  %5712 = vmatpush.bf16.msrb.mxu2 %v13312_v14 }
 0x92f   :  { %v4772_v22 = vpop.f32.mrf.mxu2  ;;  %5725 = vmatpush.bf16.msrb.mxu3 %v13316_v61  ;;  %5894 = vmatpush.bf16.msra.mxu0 %v13368_v30  ;;  %v15595_v61 = vld [vmem:[#allocation2 + $0x844] sm:$0xf] }
 0x930   :  { %v17834_v0 = vadd.f32 %v4772_v22, %v17650_v56  ;;  %v4785_v1 = vpop.f32.mrf.mxu3  ;;  %v13543_v56 = vld [vmem:[#allocation2 + $0xb00] sm:$0xf]  ;;  %v13193_v30 = vld [vmem:[#allocation2 + $0x8c0] sm:$0xf0]  ;;  %v13200_v22 = vor.u32 %v15612_v20, %v13199_v59  ;;  %v15597_v59 = vld [vmem:[#allocation2 + $0x854] sm:$0xf] }
 0x931   :  { %v17837_v29 = vadd.f32 %v4785_v1, %v17652_v62  ;;  %v4761_v45 = vpop.f32.mrf.mxu1  ;;  %v13544_v31 = vor.u32 %v15699_v19, %v13543_v56  ;;  %v15630_v56 = vld [vmem:[#allocation2 + $0x95c] sm:$0xf]  ;;  %v13209_v20 = vld [vmem:[#allocation2 + $0x8d0] sm:$0xf0] }
 0x932   :  { %v4956_v44 = vpop.f32.mrf.mxu0  ;;  %5700 = vmatpush.bf16.msrb.mxu1 %v13180_v32  ;;  %5713 = vmatpush.bf16.msrb.mxu2 %v13184_v47  ;;  %v13415_v32 = vld [vmem:[#allocation2 + $0xa00] sm:$0xf] }
 0x933   :  { %5726 = vmatpush.bf16.msrb.mxu3 %v13188_v52  ;;  %5895 = vmatpush.bf16.msra.mxu0 %v13240_v9  ;;  %v15667_v47 = vld [vmem:[#allocation2 + $0xa7c] sm:$0xf0] }
 0x934   :  { %v13416_v1 = vor.u32 %v15667_v47, %v13415_v32  ;;  %v13215_v47 = vld [vmem:[#allocation2 + $0x858] sm:$0xf] }
 0x937   :  { %v4774_v13 = vpop.f32.mrf.mxu2 }
 0x938   :  { %v4787_v5 = vpop.f32.mrf.mxu3 }
 0x939   :  { %v4811_v42 = vpop.f32.mrf.mxu1  ;;  %v13343_v5 = vld [vmem:[#allocation2 + $0x958] sm:$0xf] }
 0x93a   :  { %v17840_v62 = vadd.f32 %v4811_v42, %v17658_v28  ;;  %v5006_v14 = vpop.f32.mrf.mxu0  ;;  %v13201_v28 = vld [vmem:[#allocation2 + $0x8c8] sm:$0xf0]  ;;  %v13345_v42 = vld [vmem:[#allocation2 + $0x9d8] sm:$0xf0] }
 0x93b   :  { %v17843_v41 = vadd.f32 %v5006_v14, %v17660_v53  ;;  %v13196_v53 = vor.u32 %v15595_v61, %v13193_v30  ;;  %v13204_v9 = vor.u32 %v15596_v26, %v13201_v28  ;;  %v15701_v14 = vld [vmem:[#allocation2 + $0xb8c] sm:$0xf0]  ;;  %v13348_v28 = vor.u32 %v15630_v56, %v13345_v42  ;;  %v15631_v56 = vld [vmem:[#allocation2 + $0x964] sm:$0xf] }
 0x93c   :  { %13390 = vmatmul.msk.bf16.vlgmr.msra.gmra.mxu1 %vm306_vm2, %v17706_v40  ;;  %13391 = vmatmul.msk.bf16.vlgmr.msra.gmra.mxu2 %vm306_vm2, %v17706_v40 }
 0x93d   :  { %13392 = vmatmul.msk.bf16.vlgmr.msra.gmra.mxu3 %vm306_vm2, %v17706_v40  ;;  %13405 = vmatmul.msk.bf16.vlgmr.msrb.gmra.mxu0 %vm306_vm2, %v17706_v40 }
 0x93e   :  { %5751 = vmatpush.bf16.msra.mxu1 %v13324_v49  ;;  %5764 = vmatpush.bf16.msra.mxu2 %v13328_v4  ;;  %v19251_v49 = vld [vmem:[#allocation32_spill] sm:$0xff] }
 0x93f   :  { %v4824_v52 = vpop.f32.mrf.mxu2  ;;  %5777 = vmatpush.bf16.msra.mxu3 %v13332_v10  ;;  %6369 = vmatpush.bf16.msrb.mxu0 %v13544_v31  ;;  %v13340_v10 = vor.u32 %v15629_v51, %v13337_v35  ;;  %v13344_v31 = vor.u32 %v15646_v57, %v13343_v5 }
 0x940   :  { %v17854_v45 = vadd.f32 %v4824_v52, %v17674_v3  ;;  %v4837_v44 = vpop.f32.mrf.mxu3  ;;  %v13559_v3 = vld [vmem:[#allocation2 + $0xb10] sm:$0xf] }
 0x941   :  { %v17857_v2 = vadd.f32 %v4837_v44, %v17676_v7  ;;  %v4813_v39 = vpop.f32.mrf.mxu1  ;;  %v6811_v7 = vpack.c.bf16 %v19251_v49, %v19251_v49  ;;  %v13560_v32 = vor.u32 %v15701_v14, %v13559_v3  ;;  %v13431_v52 = vld [vmem:[#allocation2 + $0xa10] sm:$0xf]  ;;  %v13359_v3 = vld [vmem:[#allocation2 + $0x968] sm:$0xf]  ;;  %v15632_v49 = vld [vmem:[#allocation2 + $0x96c] sm:$0xf] }
 0x942   :  { %v5008_v13 = vpop.f32.mrf.mxu0  ;;  %5752 = vmatpush.bf16.msra.mxu1 %v13196_v53  ;;  %5765 = vmatpush.bf16.msra.mxu2 %v13200_v22  ;;  %v15614_v53 = vld [vmem:[#allocation2 + $0x8d4] sm:$0xf0]  ;;  %v15598_v22 = vld [vmem:[#allocation2 + $0x85c] sm:$0xf]  ;;  %v15648_v14 = vld [vmem:[#allocation2 + $0x9e4] sm:$0xf0] }
 0x943   :  { %5778 = vmatpush.bf16.msra.mxu3 %v13204_v9  ;;  %6370 = vmatpush.bf16.msrb.mxu0 %v13416_v1  ;;  %v15669_v9 = vld [vmem:[#allocation2 + $0xa8c] sm:$0xf0]  ;;  %v13216_v1 = vor.u32 %v15614_v53, %v13215_v47  ;;  %v13225_v47 = vld [vmem:[#allocation2 + $0x8e0] sm:$0xf0] }
 0x944   :  { %6877 = vrot.lane.b32.xlu0 %v6811_v7, %s16730_s26  ;;  %v13432_v13 = vor.u32 %v15669_v9, %v13431_v52  ;;  %v13231_v52 = vld [vmem:[#allocation2 + $0x868] sm:$0xf] }
 0x945   :  { %v15616_v9 = vld [vmem:[#allocation2 + $0x8e4] sm:$0xf0] }
 0x947   :  { %v4826_v60 = vpop.f32.mrf.mxu2 }
 0x948   :  { %v4839_v19 = vpop.f32.mrf.mxu3 }
 0x949   :  { %v4863_v4 = vpop.f32.mrf.mxu1  ;;  %v13353_v19 = vld [vmem:[#allocation2 + $0x9e0] sm:$0xf0] }
 0x94a   :  { %v17862_v61 = vadd.f32 %v4863_v4, %v17682_v18  ;;  %v5058_v30 = vpop.f32.mrf.mxu0  ;;  %v13217_v18 = vld [vmem:[#allocation2 + $0x8d8] sm:$0xf0]  ;;  %v13361_v4 = vld [vmem:[#allocation2 + $0x9e8] sm:$0xf0] }
 0x94b   :  { %v17866_v26 = vadd.f32 %v5058_v30, %v17684_v12  ;;  %v13212_v12 = vor.u32 %v15597_v59, %v13209_v20  ;;  %v13220_v39 = vor.u32 %v15598_v22, %v13217_v18  ;;  %v15703_v30 = vld [vmem:[#allocation2 + $0xb9c] sm:$0xf0]  ;;  %v17885_v59 = vpop.permute.xlu2 %6038  ;;  %v13356_v20 = vor.u32 %v15631_v56, %v13353_v19 }
 0x94c   :  { %13394 = vmatmul.msk.bf16.vlgmr.msrb.gmra.mxu1 %vm306_vm2, %v17706_v40  ;;  %13395 = vmatmul.msk.bf16.vlgmr.msrb.gmra.mxu2 %vm306_vm2, %v17706_v40  ;;  %v13364_v22 = vor.u32 %v15632_v49, %v13361_v4  ;;  %v13369_v49 = vld [vmem:[#allocation2 + $0x9f0] sm:$0xf0]  ;;  %v13375_v4 = vld [vmem:[#allocation2 + $0x978] sm:$0xf] }
 0x94d   :  { %13396 = vmatmul.msk.bf16.vlgmr.msrb.gmra.mxu3 %vm306_vm2, %v17706_v40  ;;  %13409 = vmatmul.msk.bf16.vlgmr.msra.gmra.mxu0 %vm306_vm2, %v17706_v40 }
 0x94e   :  { %5803 = vmatpush.bf16.msrb.mxu1 %v13340_v10  ;;  %5816 = vmatpush.bf16.msrb.mxu2 %v13344_v31 }
 0x94f   :  { %v4876_v44 = vpop.f32.mrf.mxu2  ;;  %5829 = vmatpush.bf16.msrb.mxu3 %v13348_v28  ;;  %6421 = vmatpush.bf16.msra.mxu0 %v13560_v32  ;;  %v13360_v28 = vor.u32 %v15648_v14, %v13359_v3  ;;  %v15599_v32 = vld [vmem:[#allocation2 + $0x864] sm:$0xf]  ;;  %v15633_v14 = vld [vmem:[#allocation2 + $0x974] sm:$0xf] }
 0x950   :  { %v17877_v51 = vadd.f32 %v4876_v44, %v17698_v55  ;;  %v4889_v35 = vpop.f32.mrf.mxu3  ;;  %v13575_v55 = vld [vmem:[#allocation2 + $0xb20] sm:$0xf] }
 0x951   :  { %v17880_v60 = vadd.f32 %v4889_v35, %v17700_v6  ;;  %v4865_v5 = vpop.f32.mrf.mxu1  ;;  %v13576_v18 = vor.u32 %v15703_v30, %v13575_v55  ;;  %v15671_v44 = vld [vmem:[#allocation2 + $0xa9c] sm:$0xf0]  ;;  %v15650_v55 = vld [vmem:[#allocation2 + $0x9f4] sm:$0xf0]  ;;  %v15634_v30 = vld [vmem:[#allocation2 + $0x97c] sm:$0xf] }
 0x952   :  { %v5060_v57 = vpop.f32.mrf.mxu0  ;;  %5804 = vmatpush.bf16.msrb.mxu1 %v13212_v12  ;;  %5817 = vmatpush.bf16.msrb.mxu2 %v13216_v1  ;;  %v15600_v12 = vld [vmem:[#allocation2 + $0x86c] sm:$0xf]  ;;  %v13447_v1 = vld [vmem:[#allocation2 + $0xa20] sm:$0xf] }
 0x953   :  { %5830 = vmatpush.bf16.msrb.mxu3 %v13220_v39  ;;  %6422 = vmatpush.bf16.msra.mxu0 %v13432_v13  ;;  %v13232_v39 = vor.u32 %v15616_v9, %v13231_v52  ;;  %v13448_v5 = vor.u32 %v15671_v44, %v13447_v1  ;;  %v13241_v52 = vld [vmem:[#allocation2 + $0x8f0] sm:$0xf0]  ;;  %v13247_v1 = vld [vmem:[#allocation2 + $0x878] sm:$0xf] }
 0x954   :  { %v15618_v44 = vld [vmem:[#allocation2 + $0x8f4] sm:$0xf0] }
 0x957   :  { %v4878_v42 = vpop.f32.mrf.mxu2 }
 0x958   :  { %v4891_v7 = vpop.f32.mrf.mxu3 }
 0x959   :  { %v4915_v10 = vpop.f32.mrf.mxu1 }
 0x95a   :  { %v17883_v6 = vadd.f32 %v4915_v10, %v17704_v34  ;;  %v5533_v31 = vpop.f32.mrf.mxu0  ;;  %v13233_v34 = vld [vmem:[#allocation2 + $0x8e8] sm:$0xf0] }
 0x95b   :  { %v17888_v53 = vadd.f32 %v5533_v31, %v17709_v38  ;;  %v13228_v38 = vor.u32 %v15599_v32, %v13225_v47  ;;  %v13236_v35 = vor.u32 %v15600_v12, %v13233_v34  ;;  %v13377_v31 = vld [vmem:[#allocation2 + $0x9f8] sm:$0xf0]  ;;  %v13372_v47 = vor.u32 %v15633_v14, %v13369_v49 }
 0x95c   :  { %13398 = vmatmul.msk.bf16.vlgmr.msra.gmra.mxu1 %vm306_vm2, %v17706_v40  ;;  %13399 = vmatmul.msk.bf16.vlgmr.msra.gmra.mxu2 %vm306_vm2, %v17706_v40  ;;  %v13380_v12 = vor.u32 %v15634_v30, %v13377_v31  ;;  %v13545_v30 = vld [vmem:[#allocation2 + $0xb80] sm:$0xf0]  ;;  %v13551_v31 = vld [vmem:[#allocation2 + $0xb08] sm:$0xf] }
 0x95d   :  { %13400 = vmatmul.msk.bf16.vlgmr.msra.gmra.mxu3 %vm306_vm2, %v17706_v40  ;;  %13669 = vmatmul.msk.bf16.vlgmr.msrb.gmra.mxu0 %vm306_vm2, %v17885_v59 }
 0x95e   :  { %5855 = vmatpush.bf16.msra.mxu1 %v13356_v20  ;;  %5868 = vmatpush.bf16.msra.mxu2 %v13360_v28  ;;  %v15705_v20 = vld [vmem:[#allocation2 + $0xbac] sm:$0xf0] }
 0x95f   :  { %v4928_v13 = vpop.f32.mrf.mxu2  ;;  %5881 = vmatpush.bf16.msra.mxu3 %v13364_v22  ;;  %6473 = vmatpush.bf16.msrb.mxu0 %v13576_v18  ;;  %v13376_v22 = vor.u32 %v15650_v55, %v13375_v4  ;;  %v15601_v18 = vld [vmem:[#allocation2 + $0x874] sm:$0xf]  ;;  %v15683_v55 = vld [vmem:[#allocation2 + $0xb04] sm:$0xf] }
 0x960   :  { %v17899_v57 = vadd.f32 %v4928_v13, %v17723_v8  ;;  %v4941_v56 = vpop.f32.mrf.mxu3  ;;  %v13591_v8 = vld [vmem:[#allocation2 + $0xb30] sm:$0xf] }
 0x961   :  { %v17902_v19 = vadd.f32 %v4941_v56, %v17727_v50  ;;  %v4917_v42 = vpop.f32.mrf.mxu1  ;;  %v13592_v34 = vor.u32 %v15705_v20, %v13591_v8  ;;  %v15673_v13 = vld [vmem:[#allocation2 + $0xaac] sm:$0xf0]  ;;  %v15700_v8 = vld [vmem:[#allocation2 + $0xb84] sm:$0xf0]  ;;  %v15684_v20 = vld [vmem:[#allocation2 + $0xb0c] sm:$0xf] }
 0x962   :  { %v5535_v3 = vpop.f32.mrf.mxu0  ;;  %5856 = vmatpush.bf16.msra.mxu1 %v13228_v38  ;;  %5869 = vmatpush.bf16.msra.mxu2 %v13232_v39  ;;  %v15602_v38 = vld [vmem:[#allocation2 + $0x87c] sm:$0xf]  ;;  %v13463_v39 = vld [vmem:[#allocation2 + $0xa30] sm:$0xf] }
 0x963   :  { %5882 = vmatpush.bf16.msra.mxu3 %v13236_v35  ;;  %6474 = vmatpush.bf16.msrb.mxu0 %v13448_v5  ;;  %v13248_v35 = vor.u32 %v15618_v44, %v13247_v1  ;;  %v13464_v42 = vor.u32 %v15673_v13, %v13463_v39  ;;  %v13417_v1 = vld [vmem:[#allocation2 + $0xa80] sm:$0xf0]  ;;  %v13423_v39 = vld [vmem:[#allocation2 + $0xa08] sm:$0xf] }
 0x964   :  { %v15668_v13 = vld [vmem:[#allocation2 + $0xa84] sm:$0xf0] }
 0x967   :  { %v4930_v7 = vpop.f32.mrf.mxu2 }
 0x968   :  { %v4943_v10 = vpop.f32.mrf.mxu3 }
 0x969   :  { %v4967_v28 = vpop.f32.mrf.mxu1 }
 0x96a   :  { %v17905_v50 = vadd.f32 %v4967_v28, %v17732_v15  ;;  %v5585_v32 = vpop.f32.mrf.mxu0  ;;  %v13249_v15 = vld [vmem:[#allocation2 + $0x8f8] sm:$0xf0] }
 0x96b   :  { %v17908_v9 = vadd.f32 %v5585_v32, %v17735_v36  ;;  %v13244_v36 = vor.u32 %v15601_v18, %v13241_v52  ;;  %v13252_v56 = vor.u32 %v15602_v38, %v13249_v15  ;;  %v13553_v32 = vld [vmem:[#allocation2 + $0xb88] sm:$0xf0]  ;;  %v13548_v52 = vor.u32 %v15683_v55, %v13545_v30 }
 0x96c   :  { %13402 = vmatmul.msk.bf16.vlgmr.msrb.gmra.mxu1 %vm306_vm2, %v17706_v40  ;;  %13403 = vmatmul.msk.bf16.vlgmr.msrb.gmra.mxu2 %vm306_vm2, %v17706_v40  ;;  %v13556_v38 = vor.u32 %v15684_v20, %v13553_v32  ;;  %v13561_v20 = vld [vmem:[#allocation2 + $0xb90] sm:$0xf0]  ;;  %v13567_v32 = vld [vmem:[#allocation2 + $0xb18] sm:$0xf] }
 0x96d   :  { %13404 = vmatmul.msk.bf16.vlgmr.msrb.gmra.mxu3 %vm306_vm2, %v17706_v40  ;;  %13673 = vmatmul.msk.bf16.vlgmr.msra.gmra.mxu0 %vm306_vm2, %v17885_v59 }
 0x96e   :  { %5907 = vmatpush.bf16.msrb.mxu1 %v13372_v47  ;;  %5920 = vmatpush.bf16.msrb.mxu2 %v13376_v22  ;;  %v15707_v47 = vld [vmem:[#allocation2 + $0xbbc] sm:$0xf0] }
 0x96f   :  { %v4980_v5 = vpop.f32.mrf.mxu2  ;;  %5933 = vmatpush.bf16.msrb.mxu3 %v13380_v12  ;;  %6525 = vmatpush.bf16.msra.mxu0 %v13592_v34  ;;  %v13552_v12 = vor.u32 %v15700_v8, %v13551_v31  ;;  %v15651_v34 = vld [vmem:[#allocation2 + $0xa04] sm:$0xf]  ;;  %v15685_v8 = vld [vmem:[#allocation2 + $0xb14] sm:$0xf] }
 0x970   :  { %v17919_v3 = vadd.f32 %v4980_v5, %v17749_v46  ;;  %v4993_v14 = vpop.f32.mrf.mxu3  ;;  %v13607_v46 = vld [vmem:[#allocation2 + $0xb40] sm:$0xf] }
 0x971   :  { %v17922_v49 = vadd.f32 %v4993_v14, %v17751_v27  ;;  %v4969_v7 = vpop.f32.mrf.mxu1  ;;  %v13608_v15 = vor.u32 %v15707_v47, %v13607_v46  ;;  %v15675_v5 = vld [vmem:[#allocation2 + $0xabc] sm:$0xf0]  ;;  %v15702_v46 = vld [vmem:[#allocation2 + $0xb94] sm:$0xf0]  ;;  %v15686_v47 = vld [vmem:[#allocation2 + $0xb1c] sm:$0xf] }
 0x972   :  { %v5587_v4 = vpop.f32.mrf.mxu0  ;;  %5908 = vmatpush.bf16.msrb.mxu1 %v13244_v36  ;;  %5921 = vmatpush.bf16.msrb.mxu2 %v13248_v35  ;;  %v15652_v36 = vld [vmem:[#allocation2 + $0xa0c] sm:$0xf]  ;;  %v13479_v35 = vld [vmem:[#allocation2 + $0xa40] sm:$0xf] }
 0x973   :  { %5934 = vmatpush.bf16.msrb.mxu3 %v13252_v56  ;;  %6526 = vmatpush.bf16.msra.mxu0 %v13464_v42  ;;  %v13424_v56 = vor.u32 %v15668_v13, %v13423_v39  ;;  %v13480_v7 = vor.u32 %v15675_v5, %v13479_v35  ;;  %v13433_v39 = vld [vmem:[#allocation2 + $0xa90] sm:$0xf0]  ;;  %v13439_v35 = vld [vmem:[#allocation2 + $0xa18] sm:$0xf] }
 0x974   :  { %v15670_v5 = vld [vmem:[#allocation2 + $0xa94] sm:$0xf0] }
 0x977   :  { %v4982_v10 = vpop.f32.mrf.mxu2 }
 0x978   :  { %v4995_v28 = vpop.f32.mrf.mxu3 }
 0x979   :  { %v5019_v22 = vpop.f32.mrf.mxu1 }
 0x97a   :  { %v17925_v27 = vadd.f32 %v5019_v22, %v17755_v63  ;;  %v5637_v18 = vpop.f32.mrf.mxu0  ;;  %v13425_v63 = vld [vmem:[#allocation2 + $0xa88] sm:$0xf0] }
 0x97b   :  { %v17928_v44 = vadd.f32 %v5637_v18, %v17758_v17  ;;  %v13420_v17 = vor.u32 %v15651_v34, %v13417_v1  ;;  %v13428_v14 = vor.u32 %v15652_v36, %v13425_v63  ;;  %v13569_v18 = vld [vmem:[#allocation2 + $0xb98] sm:$0xf0]  ;;  %v13564_v1 = vor.u32 %v15685_v8, %v13561_v20 }
 0x97c   :  { %13406 = vmatmul.msk.bf16.vlgmr.msra.gmra.mxu1 %vm306_vm2, %v17706_v40  ;;  %13407 = vmatmul.msk.bf16.vlgmr.msra.gmra.mxu2 %vm306_vm2, %v17706_v40  ;;  %v13572_v36 = vor.u32 %v15686_v47, %v13569_v18  ;;  %v15704_v18 = vld [vmem:[#allocation2 + $0xba4] sm:$0xf0] }
 0x97d   :  { %13408 = vmatmul.msk.bf16.vlgmr.msra.gmra.mxu3 %vm306_vm2, %v17706_v40  ;;  %13677 = vmatmul.msk.bf16.vlgmr.msrb.gmra.mxu0 %vm306_vm2, %v17885_v59 }
 0x97e   :  { %6382 = vmatpush.bf16.msra.mxu1 %v13548_v52  ;;  %6395 = vmatpush.bf16.msra.mxu2 %v13552_v12  ;;  %v15709_v52 = vld [vmem:[#allocation2 + $0xbcc] sm:$0xf0] }
 0x97f   :  { %v5032_v42 = vpop.f32.mrf.mxu2  ;;  %6408 = vmatpush.bf16.msra.mxu3 %v13556_v38  ;;  %6577 = vmatpush.bf16.msrb.mxu0 %v13608_v15  ;;  %v13568_v38 = vor.u32 %v15702_v46, %v13567_v32  ;;  %v15653_v15 = vld [vmem:[#allocation2 + $0xa14] sm:$0xf]  ;;  %v15687_v32 = vld [vmem:[#allocation2 + $0xb24] sm:$0xf] }
 0x980   :  { %v17939_v4 = vadd.f32 %v5032_v42, %v17772_v43  ;;  %v5045_v55 = vpop.f32.mrf.mxu3  ;;  %v13623_v43 = vld [vmem:[#allocation2 + $0xb50] sm:$0xf]  ;;  %v13577_v46 = vld [vmem:[#allocation2 + $0xba0] sm:$0xf0] }
 0x981   :  { %v17942_v30 = vadd.f32 %v5045_v55, %v17774_v21  ;;  %v5021_v10 = vpop.f32.mrf.mxu1  ;;  %v13624_v63 = vor.u32 %v15709_v52, %v13623_v43  ;;  %v15677_v42 = vld [vmem:[#allocation2 + $0xacc] sm:$0xf0]  ;;  %v15688_v43 = vld [vmem:[#allocation2 + $0xb2c] sm:$0xf] }
 0x982   :  { %v5639_v31 = vpop.f32.mrf.mxu0  ;;  %6383 = vmatpush.bf16.msra.mxu1 %v13420_v17  ;;  %6396 = vmatpush.bf16.msra.mxu2 %v13424_v56  ;;  %v15654_v17 = vld [vmem:[#allocation2 + $0xa1c] sm:$0xf]  ;;  %v13495_v56 = vld [vmem:[#allocation2 + $0xa50] sm:$0xf] }
 0x983   :  { %6409 = vmatpush.bf16.msra.mxu3 %v13428_v14  ;;  %6578 = vmatpush.bf16.msrb.mxu0 %v13480_v7  ;;  %v13440_v14 = vor.u32 %v15670_v5, %v13439_v35  ;;  %v13496_v10 = vor.u32 %v15677_v42, %v13495_v56  ;;  %v15672_v56 = vld [vmem:[#allocation2 + $0xaa4] sm:$0xf0]  ;;  %v15656_v42 = vld [vmem:[#allocation2 + $0xa2c] sm:$0xf] }
 0x987   :  { %v5034_v28 = vpop.f32.mrf.mxu2 }
 0x988   :  { %v5047_v22 = vpop.f32.mrf.mxu3 }
 0x989   :  { %v5071_v12 = vpop.f32.mrf.mxu1  ;;  %v13583_v22 = vld [vmem:[#allocation2 + $0xb28] sm:$0xf] }
 0x98a   :  { %v17945_v21 = vadd.f32 %v5071_v12, %v17778_v33  ;;  %v5689_v34 = vpop.f32.mrf.mxu0  ;;  %v13441_v33 = vld [vmem:[#allocation2 + $0xa98] sm:$0xf0]  ;;  %v13585_v12 = vld [vmem:[#allocation2 + $0xba8] sm:$0xf0] }
 0x98b   :  { %v17948_v13 = vadd.f32 %v5689_v34, %v17781_v37  ;;  %v13436_v37 = vor.u32 %v15653_v15, %v13433_v39  ;;  %v13444_v55 = vor.u32 %v15654_v17, %v13441_v33  ;;  %v15711_v34 = vld [vmem:[#allocation2 + $0xbdc] sm:$0xf0]  ;;  %v13580_v15 = vor.u32 %v15687_v32, %v13577_v46  ;;  %v13455_v33 = vld [vmem:[#allocation2 + $0xa28] sm:$0xf] }
 0x98c   :  { %13410 = vmatmul.msk.bf16.vlgmr.msrb.gmra.mxu1 %vm306_vm2, %v17706_v40  ;;  %13411 = vmatmul.msk.bf16.vlgmr.msrb.gmra.mxu2 %vm306_vm2, %v17706_v40  ;;  %v13584_v39 = vor.u32 %v15704_v18, %v13583_v22  ;;  %v13588_v5 = vor.u32 %v15688_v43, %v13585_v12  ;;  %v15689_v22 = vld [vmem:[#allocation2 + $0xb34] sm:$0xf]  ;;  %v15706_v12 = vld [vmem:[#allocation2 + $0xbb4] sm:$0xf0] }
 0x98d   :  { %13412 = vmatmul.msk.bf16.vlgmr.msrb.gmra.mxu3 %vm306_vm2, %v17706_v40  ;;  %13681 = vmatmul.msk.bf16.vlgmr.msra.gmra.mxu0 %vm306_vm2, %v17885_v59  ;;  %v13593_v18 = vld [vmem:[#allocation2 + $0xbb0] sm:$0xf0] }
 0x98e   :  { %6434 = vmatpush.bf16.msrb.mxu1 %v13564_v1  ;;  %6447 = vmatpush.bf16.msrb.mxu2 %v13568_v38 }
 0x98f   :  { %v5084_v7 = vpop.f32.mrf.mxu2  ;;  %6460 = vmatpush.bf16.msrb.mxu3 %v13572_v36  ;;  %6629 = vmatpush.bf16.msra.mxu0 %v13624_v63  ;;  %v15655_v36 = vld [vmem:[#allocation2 + $0xa24] sm:$0xf] }
 0x990   :  { %v17959_v31 = vadd.f32 %v5084_v7, %v17795_v16  ;;  %v5097_v8 = vpop.f32.mrf.mxu3  ;;  %v13639_v16 = vld [vmem:[#allocation2 + $0xb60] sm:$0xf]  ;;  %v13449_v63 = vld [vmem:[#allocation2 + $0xaa0] sm:$0xf0]  ;;  %v13456_v7 = vor.u32 %v15672_v56, %v13455_v33 }
 0x991   :  { %v17962_v20 = vadd.f32 %v5097_v8, %v17797_v58  ;;  %v5073_v40 = vpop.f32.mrf.mxu1  ;;  %v13640_v17 = vor.u32 %v15711_v34, %v13639_v16  ;;  %v15690_v16 = vld [vmem:[#allocation2 + $0xb3c] sm:$0xf] }
 0x992   :  { %v5691_v28 = vpop.f32.mrf.mxu0  ;;  %6435 = vmatpush.bf16.msrb.mxu1 %v13436_v37  ;;  %6448 = vmatpush.bf16.msrb.mxu2 %v13440_v14  ;;  %v13511_v37 = vld [vmem:[#allocation2 + $0xa60] sm:$0xf] }
 0x993   :  { %6461 = vmatpush.bf16.msrb.mxu3 %v13444_v55  ;;  %6630 = vmatpush.bf16.msra.mxu0 %v13496_v10  ;;  %v15679_v14 = vld [vmem:[#allocation2 + $0xadc] sm:$0xf0] }
 0x994   :  { %v13512_v8 = vor.u32 %v15679_v14, %v13511_v37  ;;  %v15674_v37 = vld [vmem:[#allocation2 + $0xab4] sm:$0xf0]  ;;  %v15658_v14 = vld [vmem:[#allocation2 + $0xa3c] sm:$0xf] }
 0x997   :  { %v5086_v47 = vpop.f32.mrf.mxu2 }
 0x998   :  { %v5099_v52 = vpop.f32.mrf.mxu3 }
 0x999   :  { %v5546_v1 = vpop.f32.mrf.mxu1  ;;  %v13599_v52 = vld [vmem:[#allocation2 + $0xb38] sm:$0xf] }
 0x99a   :  { %v17965_v58 = vadd.f32 %v5546_v1, %v17800_v54  ;;  %v5741_v38 = vpop.f32.mrf.mxu0  ;;  %v13457_v54 = vld [vmem:[#allocation2 + $0xaa8] sm:$0xf0]  ;;  %v13601_v1 = vld [vmem:[#allocation2 + $0xbb8] sm:$0xf0] }
 0x99b   :  { %v17968_v35 = vadd.f32 %v5741_v38, %v17803_v24  ;;  %v13452_v24 = vor.u32 %v15655_v36, %v13449_v63  ;;  %v13460_v10 = vor.u32 %v15656_v42, %v13457_v54  ;;  %v15713_v38 = vld [vmem:[#allocation2 + $0xbec] sm:$0xf0]  ;;  %v13596_v36 = vor.u32 %v15689_v22, %v13593_v18  ;;  %v13471_v54 = vld [vmem:[#allocation2 + $0xa38] sm:$0xf] }
 0x99c   :  { %13670 = vmatmul.msk.bf16.vlgmr.msra.gmra.mxu1 %vm306_vm2, %v17885_v59  ;;  %13671 = vmatmul.msk.bf16.vlgmr.msra.gmra.mxu2 %vm306_vm2, %v17885_v59  ;;  %v13600_v63 = vor.u32 %v15706_v12, %v13599_v52  ;;  %v13604_v56 = vor.u32 %v15690_v16, %v13601_v1  ;;  %v15691_v52 = vld [vmem:[#allocation2 + $0xb44] sm:$0xf]  ;;  %v15708_v1 = vld [vmem:[#allocation2 + $0xbc4] sm:$0xf0] }
 0x99d   :  { %13672 = vmatmul.msk.bf16.vlgmr.msra.gmra.mxu3 %vm306_vm2, %v17885_v59  ;;  %13685 = vmatmul.msk.bf16.vlgmr.msrb.gmra.mxu0 %vm306_vm2, %v17885_v59  ;;  %v13609_v12 = vld [vmem:[#allocation2 + $0xbc0] sm:$0xf0] }
 0x99e   :  { %6486 = vmatpush.bf16.msra.mxu1 %v13580_v15  ;;  %6499 = vmatpush.bf16.msra.mxu2 %v13584_v39 }
 0x99f   :  { %v5559_v55 = vpop.f32.mrf.mxu2  ;;  %6512 = vmatpush.bf16.msra.mxu3 %v13588_v5  ;;  %6681 = vmatpush.bf16.msrb.mxu0 %v13640_v17  ;;  %v15657_v5 = vld [vmem:[#allocation2 + $0xa34] sm:$0xf] }
 0x9a0   :  { %v17979_v40 = vadd.f32 %v5559_v55, %v17814_v25  ;;  %v5572_v28 = vpop.f32.mrf.mxu3  ;;  %v13655_v25 = vld [vmem:[#allocation2 + $0xb70] sm:$0xf]  ;;  %v13465_v17 = vld [vmem:[#allocation2 + $0xab0] sm:$0xf0]  ;;  %v13472_v55 = vor.u32 %v15674_v37, %v13471_v54 }
 0x9a1   :  { %v17982_v32 = vadd.f32 %v5572_v28, %v17817_v11  ;;  %v5548_v46 = vpop.f32.mrf.mxu1  ;;  %v13656_v42 = vor.u32 %v15713_v38, %v13655_v25  ;;  %v15692_v25 = vld [vmem:[#allocation2 + $0xb4c] sm:$0xf] }
 0x9a2   :  { %v5743_v47 = vpop.f32.mrf.mxu0  ;;  %6487 = vmatpush.bf16.msra.mxu1 %v13452_v24  ;;  %6500 = vmatpush.bf16.msra.mxu2 %v13456_v7  ;;  %v13527_v24 = vld [vmem:[#allocation2 + $0xa70] sm:$0xf] }
 0x9a3   :  { %6513 = vmatpush.bf16.msra.mxu3 %v13460_v10  ;;  %6682 = vmatpush.bf16.msrb.mxu0 %v13512_v8  ;;  %v15681_v7 = vld [vmem:[#allocation2 + $0xaec] sm:$0xf0] }
 0x9a4   :  { %v13528_v28 = vor.u32 %v15681_v7, %v13527_v24  ;;  %v15676_v24 = vld [vmem:[#allocation2 + $0xac4] sm:$0xf0]  ;;  %v15660_v7 = vld [vmem:[#allocation2 + $0xa4c] sm:$0xf] }
 0x9a7   :  { %v5561_v43 = vpop.f32.mrf.mxu2 }
 0x9a8   :  { %v5574_v34 = vpop.f32.mrf.mxu3 }
 0x9a9   :  { %v5598_v15 = vpop.f32.mrf.mxu1  ;;  %v13615_v34 = vld [vmem:[#allocation2 + $0xb48] sm:$0xf] }
 0x9aa   :  { %v17985_v11 = vadd.f32 %v5598_v15, %v17820_v23  ;;  %v5793_v39 = vpop.f32.mrf.mxu0  ;;  %v13473_v23 = vld [vmem:[#allocation2 + $0xab8] sm:$0xf0]  ;;  %v13617_v15 = vld [vmem:[#allocation2 + $0xbc8] sm:$0xf0] }
 0x9ab   :  { %v17988_v33 = vadd.f32 %v5793_v39, %v17823_v48  ;;  %v13468_v48 = vor.u32 %v15657_v5, %v13465_v17  ;;  %v13476_v8 = vor.u32 %v15658_v14, %v13473_v23  ;;  %v15763_v39 = vld [vmem:[#allocation2 + $0xd7c] sm:$0xf0]  ;;  %v13612_v5 = vor.u32 %v15691_v52, %v13609_v12  ;;  %v13487_v23 = vld [vmem:[#allocation2 + $0xa48] sm:$0xf] }
 0x9ac   :  { %13674 = vmatmul.msk.bf16.vlgmr.msrb.gmra.mxu1 %vm306_vm2, %v17885_v59  ;;  %13675 = vmatmul.msk.bf16.vlgmr.msrb.gmra.mxu2 %vm306_vm2, %v17885_v59  ;;  %v13616_v17 = vor.u32 %v15708_v1, %v13615_v34  ;;  %v13620_v37 = vor.u32 %v15692_v25, %v13617_v15  ;;  %v15693_v34 = vld [vmem:[#allocation2 + $0xb54] sm:$0xf]  ;;  %v15710_v15 = vld [vmem:[#allocation2 + $0xbd4] sm:$0xf0] }
 0x9ad   :  { %13676 = vmatmul.msk.bf16.vlgmr.msrb.gmra.mxu3 %vm306_vm2, %v17885_v59  ;;  %13689 = vmatmul.msk.bf16.vlgmr.msra.gmra.mxu0 %vm306_vm2, %v17885_v59  ;;  %v13625_v1 = vld [vmem:[#allocation2 + $0xbd0] sm:$0xf0] }
 0x9ae   :  { %6538 = vmatpush.bf16.msrb.mxu1 %v13596_v36  ;;  %6551 = vmatpush.bf16.msrb.mxu2 %v13600_v63 }
 0x9af   :  { %v5611_v10 = vpop.f32.mrf.mxu2  ;;  %6564 = vmatpush.bf16.msrb.mxu3 %v13604_v56  ;;  %6733 = vmatpush.bf16.msra.mxu0 %v13656_v42  ;;  %v15659_v56 = vld [vmem:[#allocation2 + $0xa44] sm:$0xf] }
 0x9b0   :  { %v17999_v46 = vadd.f32 %v5611_v10, %v17834_v0  ;;  %v5624_v47 = vpop.f32.mrf.mxu3  ;;  %v13831_v0 = vld [vmem:[#allocation2 + $0xd00] sm:$0xf]  ;;  %v13481_v42 = vld [vmem:[#allocation2 + $0xac0] sm:$0xf0]  ;;  %v13488_v10 = vor.u32 %v15676_v24, %v13487_v23  ;;  %v15661_v23 = vld [vmem:[#allocation2 + $0xa54] sm:$0xf] }
 0x9b1   :  { %v18002_v22 = vadd.f32 %v5624_v47, %v17837_v29  ;;  %v5600_v18 = vpop.f32.mrf.mxu1  ;;  %v13832_v14 = vor.u32 %v15763_v39, %v13831_v0  ;;  %v15694_v0 = vld [vmem:[#allocation2 + $0xb5c] sm:$0xf]  ;;  %v13497_v24 = vld [vmem:[#allocation2 + $0xad0] sm:$0xf0] }
 0x9b2   :  { %v5795_v43 = vpop.f32.mrf.mxu0  ;;  %6539 = vmatpush.bf16.msrb.mxu1 %v13468_v48  ;;  %6552 = vmatpush.bf16.msrb.mxu2 %v13472_v55  ;;  %v13703_v48 = vld [vmem:[#allocation2 + $0xc00] sm:$0xf] }
 0x9b3   :  { %6565 = vmatpush.bf16.msrb.mxu3 %v13476_v8  ;;  %6734 = vmatpush.bf16.msra.mxu0 %v13528_v28  ;;  %v15731_v55 = vld [vmem:[#allocation2 + $0xc7c] sm:$0xf0] }
 0x9b4   :  { %v13704_v47 = vor.u32 %v15731_v55, %v13703_v48  ;;  %v13503_v55 = vld [vmem:[#allocation2 + $0xa58] sm:$0xf] }
 0x9b7   :  { %v5613_v16 = vpop.f32.mrf.mxu2 }
 0x9b8   :  { %v5626_v38 = vpop.f32.mrf.mxu3 }
 0x9b9   :  { %v5650_v36 = vpop.f32.mrf.mxu1  ;;  %v13631_v38 = vld [vmem:[#allocation2 + $0xb58] sm:$0xf] }
 0x9ba   :  { %v18005_v29 = vadd.f32 %v5650_v36, %v17840_v62  ;;  %v5845_v63 = vpop.f32.mrf.mxu0  ;;  %v13489_v62 = vld [vmem:[#allocation2 + $0xac8] sm:$0xf0]  ;;  %v13633_v36 = vld [vmem:[#allocation2 + $0xbd8] sm:$0xf0] }
 0x9bb   :  { %v18008_v54 = vadd.f32 %v5845_v63, %v17843_v41  ;;  %v13484_v41 = vor.u32 %v15659_v56, %v13481_v42  ;;  %v13492_v28 = vor.u32 %v15660_v7, %v13489_v62  ;;  %v15765_v63 = vld [vmem:[#allocation2 + $0xd8c] sm:$0xf0]  ;;  %v13636_v62 = vor.u32 %v15694_v0, %v13633_v36  ;;  %v15695_v0 = vld [vmem:[#allocation2 + $0xb64] sm:$0xf] }
 0x9bc   :  { %13678 = vmatmul.msk.bf16.vlgmr.msra.gmra.mxu1 %vm306_vm2, %v17885_v59  ;;  %13679 = vmatmul.msk.bf16.vlgmr.msra.gmra.mxu2 %vm306_vm2, %v17885_v59 }
 0x9bd   :  { %13680 = vmatmul.msk.bf16.vlgmr.msra.gmra.mxu3 %vm306_vm2, %v17885_v59  ;;  %13693 = vmatmul.msk.bf16.vlgmr.msrb.gmra.mxu0 %vm306_vm2, %v17885_v59 }
 0x9be   :  { %6590 = vmatpush.bf16.msra.mxu1 %v13612_v5  ;;  %6603 = vmatpush.bf16.msra.mxu2 %v13616_v17  ;;  %v19252_v5 = vld [vmem:[#allocation33_spill] sm:$0xff] }
 0x9bf   :  { %v5663_v8 = vpop.f32.mrf.mxu2  ;;  %6616 = vmatpush.bf16.msra.mxu3 %v13620_v37  ;;  %7208 = vmatpush.bf16.msrb.mxu0 %v13832_v14  ;;  %v13628_v37 = vor.u32 %v15693_v34, %v13625_v1  ;;  %v13632_v14 = vor.u32 %v15710_v15, %v13631_v38 }
 0x9c0   :  { %v18019_v18 = vadd.f32 %v5663_v8, %v17854_v45  ;;  %v5676_v43 = vpop.f32.mrf.mxu3  ;;  %v13847_v45 = vld [vmem:[#allocation2 + $0xd10] sm:$0xf] }
 0x9c1   :  { %v18022_v52 = vadd.f32 %v5676_v43, %v17857_v2  ;;  %v5652_v12 = vpop.f32.mrf.mxu1  ;;  %v7650_v2 = vpack.c.bf16 %v19252_v5, %v19252_v5  ;;  %v13848_v48 = vor.u32 %v15765_v63, %v13847_v45  ;;  %v13719_v8 = vld [vmem:[#allocation2 + $0xc10] sm:$0xf]  ;;  %v13647_v45 = vld [vmem:[#allocation2 + $0xb68] sm:$0xf]  ;;  %v15696_v5 = vld [vmem:[#allocation2 + $0xb6c] sm:$0xf] }
 0x9c2   :  { %v5847_v16 = vpop.f32.mrf.mxu0  ;;  %6591 = vmatpush.bf16.msra.mxu1 %v13484_v41  ;;  %6604 = vmatpush.bf16.msra.mxu2 %v13488_v10  ;;  %v15678_v41 = vld [vmem:[#allocation2 + $0xad4] sm:$0xf0]  ;;  %v15662_v10 = vld [vmem:[#allocation2 + $0xa5c] sm:$0xf]  ;;  %v15712_v63 = vld [vmem:[#allocation2 + $0xbe4] sm:$0xf0] }
 0x9c3   :  { %6617 = vmatpush.bf16.msra.mxu3 %v13492_v28  ;;  %7209 = vmatpush.bf16.msrb.mxu0 %v13704_v47  ;;  %v15733_v28 = vld [vmem:[#allocation2 + $0xc8c] sm:$0xf0]  ;;  %v13504_v47 = vor.u32 %v15678_v41, %v13503_v55  ;;  %v13513_v55 = vld [vmem:[#allocation2 + $0xae0] sm:$0xf0] }
 0x9c4   :  { %7716 = vrot.lane.b32.xlu1 %v7650_v2, %s16730_s26  ;;  %v13720_v16 = vor.u32 %v15733_v28, %v13719_v8  ;;  %v13519_v8 = vld [vmem:[#allocation2 + $0xa68] sm:$0xf] }
 0x9c5   :  { %v15680_v28 = vld [vmem:[#allocation2 + $0xae4] sm:$0xf0] }
 0x9c7   :  { %v5665_v25 = vpop.f32.mrf.mxu2 }
 0x9c8   :  { %v5678_v39 = vpop.f32.mrf.mxu3 }
 0x9c9   :  { %v5702_v17 = vpop.f32.mrf.mxu1  ;;  %v13641_v39 = vld [vmem:[#allocation2 + $0xbe0] sm:$0xf0] }
 0x9ca   :  { %v18027_v56 = vadd.f32 %v5702_v17, %v17862_v61  ;;  %v5897_v42 = vpop.f32.mrf.mxu0  ;;  %v13505_v61 = vld [vmem:[#allocation2 + $0xad8] sm:$0xf0]  ;;  %v13649_v17 = vld [vmem:[#allocation2 + $0xbe8] sm:$0xf0] }
 0x9cb   :  { %v18031_v7 = vadd.f32 %v5897_v42, %v17866_v26  ;;  %v13500_v26 = vor.u32 %v15661_v23, %v13497_v24  ;;  %v13508_v12 = vor.u32 %v15662_v10, %v13505_v61  ;;  %v15767_v42 = vld [vmem:[#allocation2 + $0xd9c] sm:$0xf0]  ;;  %v18050_v23 = vpop.permute.xlu0 %6877  ;;  %v13644_v24 = vor.u32 %v15695_v0, %v13641_v39 }
 0x9cc   :  { %13682 = vmatmul.msk.bf16.vlgmr.msrb.gmra.mxu1 %vm306_vm2, %v17885_v59  ;;  %13683 = vmatmul.msk.bf16.vlgmr.msrb.gmra.mxu2 %vm306_vm2, %v17885_v59  ;;  %v13652_v10 = vor.u32 %v15696_v5, %v13649_v17  ;;  %v13657_v5 = vld [vmem:[#allocation2 + $0xbf0] sm:$0xf0]  ;;  %v13663_v17 = vld [vmem:[#allocation2 + $0xb78] sm:$0xf] }
 0x9cd   :  { %13684 = vmatmul.msk.bf16.vlgmr.msrb.gmra.mxu3 %vm306_vm2, %v17885_v59  ;;  %13697 = vmatmul.msk.bf16.vlgmr.msra.gmra.mxu0 %vm306_vm2, %v17885_v59 }
 0x9ce   :  { %6642 = vmatpush.bf16.msrb.mxu1 %v13628_v37  ;;  %6655 = vmatpush.bf16.msrb.mxu2 %v13632_v14 }
 0x9cf   :  { %v5715_v43 = vpop.f32.mrf.mxu2  ;;  %6668 = vmatpush.bf16.msrb.mxu3 %v13636_v62  ;;  %7260 = vmatpush.bf16.msra.mxu0 %v13848_v48  ;;  %v13648_v62 = vor.u32 %v15712_v63, %v13647_v45  ;;  %v15663_v48 = vld [vmem:[#allocation2 + $0xa64] sm:$0xf]  ;;  %v15697_v63 = vld [vmem:[#allocation2 + $0xb74] sm:$0xf] }
 0x9d0   :  { %v18042_v34 = vadd.f32 %v5715_v43, %v17877_v51  ;;  %v5728_v1 = vpop.f32.mrf.mxu3  ;;  %v13863_v51 = vld [vmem:[#allocation2 + $0xd20] sm:$0xf] }
 0x9d1   :  { %v18045_v25 = vadd.f32 %v5728_v1, %v17880_v60  ;;  %v5704_v38 = vpop.f32.mrf.mxu1  ;;  %v13864_v61 = vor.u32 %v15767_v42, %v13863_v51  ;;  %v15735_v43 = vld [vmem:[#allocation2 + $0xc9c] sm:$0xf0]  ;;  %v15714_v51 = vld [vmem:[#allocation2 + $0xbf4] sm:$0xf0]  ;;  %v15698_v42 = vld [vmem:[#allocation2 + $0xb7c] sm:$0xf] }
 0x9d2   :  { %v5899_v15 = vpop.f32.mrf.mxu0  ;;  %6643 = vmatpush.bf16.msrb.mxu1 %v13500_v26  ;;  %6656 = vmatpush.bf16.msrb.mxu2 %v13504_v47  ;;  %v15664_v26 = vld [vmem:[#allocation2 + $0xa6c] sm:$0xf]  ;;  %v13735_v47 = vld [vmem:[#allocation2 + $0xc20] sm:$0xf] }
 0x9d3   :  { %6669 = vmatpush.bf16.msrb.mxu3 %v13508_v12  ;;  %7261 = vmatpush.bf16.msra.mxu0 %v13720_v16  ;;  %v13520_v12 = vor.u32 %v15680_v28, %v13519_v8  ;;  %v13736_v38 = vor.u32 %v15735_v43, %v13735_v47  ;;  %v13529_v8 = vld [vmem:[#allocation2 + $0xaf0] sm:$0xf0]  ;;  %v13535_v47 = vld [vmem:[#allocation2 + $0xa78] sm:$0xf] }
 0x9d4   :  { %v15682_v43 = vld [vmem:[#allocation2 + $0xaf4] sm:$0xf0] }
 0x9d7   :  { %v5717_v36 = vpop.f32.mrf.mxu2 }
 0x9d8   :  { %v5730_v2 = vpop.f32.mrf.mxu3 }
 0x9d9   :  { %v5754_v37 = vpop.f32.mrf.mxu1 }
 0x9da   :  { %v18048_v60 = vadd.f32 %v5754_v37, %v17883_v6  ;;  %v6372_v14 = vpop.f32.mrf.mxu0  ;;  %v13521_v6 = vld [vmem:[#allocation2 + $0xae8] sm:$0xf0] }
 0x9db   :  { %v18053_v41 = vadd.f32 %v6372_v14, %v17888_v53  ;;  %v13516_v53 = vor.u32 %v15663_v48, %v13513_v55  ;;  %v13524_v1 = vor.u32 %v15664_v26, %v13521_v6  ;;  %v13665_v14 = vld [vmem:[#allocation2 + $0xbf8] sm:$0xf0]  ;;  %v13660_v55 = vor.u32 %v15697_v63, %v13657_v5 }
 0x9dc   :  { %13686 = vmatmul.msk.bf16.vlgmr.msra.gmra.mxu1 %vm306_vm2, %v17885_v59  ;;  %13687 = vmatmul.msk.bf16.vlgmr.msra.gmra.mxu2 %vm306_vm2, %v17885_v59  ;;  %v13668_v26 = vor.u32 %v15698_v42, %v13665_v14  ;;  %v13833_v42 = vld [vmem:[#allocation2 + $0xd80] sm:$0xf0]  ;;  %v13839_v14 = vld [vmem:[#allocation2 + $0xd08] sm:$0xf] }
 0x9dd   :  { %13688 = vmatmul.msk.bf16.vlgmr.msra.gmra.mxu3 %vm306_vm2, %v17885_v59  ;;  %13957 = vmatmul.msk.bf16.vlgmr.msrb.gmra.mxu0 %vm306_vm2, %v18050_v23 }
 0x9de   :  { %6694 = vmatpush.bf16.msra.mxu1 %v13644_v24  ;;  %6707 = vmatpush.bf16.msra.mxu2 %v13648_v62  ;;  %v15769_v24 = vld [vmem:[#allocation2 + $0xdac] sm:$0xf0] }
 0x9df   :  { %v5767_v16 = vpop.f32.mrf.mxu2  ;;  %6720 = vmatpush.bf16.msra.mxu3 %v13652_v10  ;;  %7312 = vmatpush.bf16.msrb.mxu0 %v13864_v61  ;;  %v13664_v10 = vor.u32 %v15714_v51, %v13663_v17  ;;  %v15665_v61 = vld [vmem:[#allocation2 + $0xa74] sm:$0xf]  ;;  %v15747_v51 = vld [vmem:[#allocation2 + $0xd04] sm:$0xf] }
 0x9e0   :  { %v18064_v15 = vadd.f32 %v5767_v16, %v17899_v57  ;;  %v5780_v0 = vpop.f32.mrf.mxu3  ;;  %v13879_v57 = vld [vmem:[#allocation2 + $0xd30] sm:$0xf] }
 0x9e1   :  { %v18067_v39 = vadd.f32 %v5780_v0, %v17902_v19  ;;  %v5756_v36 = vpop.f32.mrf.mxu1  ;;  %v13880_v6 = vor.u32 %v15769_v24, %v13879_v57  ;;  %v15737_v16 = vld [vmem:[#allocation2 + $0xcac] sm:$0xf0]  ;;  %v15764_v57 = vld [vmem:[#allocation2 + $0xd84] sm:$0xf0]  ;;  %v15748_v24 = vld [vmem:[#allocation2 + $0xd0c] sm:$0xf] }
 0x9e2   :  { %v6374_v45 = vpop.f32.mrf.mxu0  ;;  %6695 = vmatpush.bf16.msra.mxu1 %v13516_v53  ;;  %6708 = vmatpush.bf16.msra.mxu2 %v13520_v12  ;;  %v15666_v53 = vld [vmem:[#allocation2 + $0xa7c] sm:$0xf]  ;;  %v13751_v12 = vld [vmem:[#allocation2 + $0xc30] sm:$0xf] }
 0x9e3   :  { %6721 = vmatpush.bf16.msra.mxu3 %v13524_v1  ;;  %7313 = vmatpush.bf16.msrb.mxu0 %v13736_v38  ;;  %v13536_v1 = vor.u32 %v15682_v43, %v13535_v47  ;;  %v13752_v36 = vor.u32 %v15737_v16, %v13751_v12  ;;  %v13705_v47 = vld [vmem:[#allocation2 + $0xc80] sm:$0xf0]  ;;  %v13711_v12 = vld [vmem:[#allocation2 + $0xc08] sm:$0xf] }
 0x9e4   :  { %v15732_v16 = vld [vmem:[#allocation2 + $0xc84] sm:$0xf0] }
 0x9e7   :  { %v5769_v2 = vpop.f32.mrf.mxu2 }
 0x9e8   :  { %v5782_v37 = vpop.f32.mrf.mxu3 }
 0x9e9   :  { %v5806_v62 = vpop.f32.mrf.mxu1 }
 0x9ea   :  { %v18070_v19 = vadd.f32 %v5806_v62, %v17905_v50  ;;  %v6424_v48 = vpop.f32.mrf.mxu0  ;;  %v13537_v50 = vld [vmem:[#allocation2 + $0xaf8] sm:$0xf0] }
 0x9eb   :  { %v18073_v28 = vadd.f32 %v6424_v48, %v17908_v9  ;;  %v13532_v9 = vor.u32 %v15665_v61, %v13529_v8  ;;  %v13540_v0 = vor.u32 %v15666_v53, %v13537_v50  ;;  %v13841_v48 = vld [vmem:[#allocation2 + $0xd88] sm:$0xf0]  ;;  %v13836_v8 = vor.u32 %v15747_v51, %v13833_v42 }
 0x9ec   :  { %13690 = vmatmul.msk.bf16.vlgmr.msrb.gmra.mxu1 %vm306_vm2, %v17885_v59  ;;  %13691 = vmatmul.msk.bf16.vlgmr.msrb.gmra.mxu2 %vm306_vm2, %v17885_v59  ;;  %v13844_v53 = vor.u32 %v15748_v24, %v13841_v48  ;;  %v13849_v24 = vld [vmem:[#allocation2 + $0xd90] sm:$0xf0]  ;;  %v13855_v48 = vld [vmem:[#allocation2 + $0xd18] sm:$0xf] }
 0x9ed   :  { %13692 = vmatmul.msk.bf16.vlgmr.msrb.gmra.mxu3 %vm306_vm2, %v17885_v59  ;;  %13961 = vmatmul.msk.bf16.vlgmr.msra.gmra.mxu0 %vm306_vm2, %v18050_v23 }
 0x9ee   :  { %6746 = vmatpush.bf16.msrb.mxu1 %v13660_v55  ;;  %6759 = vmatpush.bf16.msrb.mxu2 %v13664_v10  ;;  %v15771_v55 = vld [vmem:[#allocation2 + $0xdbc] sm:$0xf0] }
 0x9ef   :  { %v5819_v38 = vpop.f32.mrf.mxu2  ;;  %6772 = vmatpush.bf16.msrb.mxu3 %v13668_v26  ;;  %7364 = vmatpush.bf16.msra.mxu0 %v13880_v6  ;;  %v13840_v26 = vor.u32 %v15764_v57, %v13839_v14  ;;  %v15715_v6 = vld [vmem:[#allocation2 + $0xc04] sm:$0xf]  ;;  %v15749_v57 = vld [vmem:[#allocation2 + $0xd14] sm:$0xf] }
 0x9f0   :  { %v18084_v45 = vadd.f32 %v5819_v38, %v17919_v3  ;;  %v5832_v63 = vpop.f32.mrf.mxu3  ;;  %v13895_v3 = vld [vmem:[#allocation2 + $0xd40] sm:$0xf] }
 0x9f1   :  { %v18087_v5 = vadd.f32 %v5832_v63, %v17922_v49  ;;  %v5808_v2 = vpop.f32.mrf.mxu1  ;;  %v13896_v50 = vor.u32 %v15771_v55, %v13895_v3  ;;  %v15739_v38 = vld [vmem:[#allocation2 + $0xcbc] sm:$0xf0]  ;;  %v15766_v3 = vld [vmem:[#allocation2 + $0xd94] sm:$0xf0]  ;;  %v15750_v55 = vld [vmem:[#allocation2 + $0xd1c] sm:$0xf] }
 0x9f2   :  { %v6426_v17 = vpop.f32.mrf.mxu0  ;;  %6747 = vmatpush.bf16.msrb.mxu1 %v13532_v9  ;;  %6760 = vmatpush.bf16.msrb.mxu2 %v13536_v1  ;;  %v15716_v9 = vld [vmem:[#allocation2 + $0xc0c] sm:$0xf]  ;;  %v13767_v1 = vld [vmem:[#allocation2 + $0xc40] sm:$0xf] }
 0x9f3   :  { %6773 = vmatpush.bf16.msrb.mxu3 %v13540_v0  ;;  %7365 = vmatpush.bf16.msra.mxu0 %v13752_v36  ;;  %v13712_v0 = vor.u32 %v15732_v16, %v13711_v12  ;;  %v13768_v2 = vor.u32 %v15739_v38, %v13767_v1  ;;  %v13721_v12 = vld [vmem:[#allocation2 + $0xc90] sm:$0xf0]  ;;  %v13727_v1 = vld [vmem:[#allocation2 + $0xc18] sm:$0xf] }
 0x9f4   :  { %v15734_v38 = vld [vmem:[#allocation2 + $0xc94] sm:$0xf0] }
 0x9f7   :  { %v5821_v37 = vpop.f32.mrf.mxu2 }
 0x9f8   :  { %v5834_v62 = vpop.f32.mrf.mxu3 }
 0x9f9   :  { %v5858_v10 = vpop.f32.mrf.mxu1 }
 0x9fa   :  { %v18090_v49 = vadd.f32 %v5858_v10, %v17925_v27  ;;  %v6476_v61 = vpop.f32.mrf.mxu0  ;;  %v13713_v27 = vld [vmem:[#allocation2 + $0xc88] sm:$0xf0] }
 0x9fb   :  { %v18093_v43 = vadd.f32 %v6476_v61, %v17928_v44  ;;  %v13708_v44 = vor.u32 %v15715_v6, %v13705_v47  ;;  %v13716_v63 = vor.u32 %v15716_v9, %v13713_v27  ;;  %v13857_v61 = vld [vmem:[#allocation2 + $0xd98] sm:$0xf0]  ;;  %v13852_v47 = vor.u32 %v15749_v57, %v13849_v24 }
 0x9fc   :  { %13694 = vmatmul.msk.bf16.vlgmr.msra.gmra.mxu1 %vm306_vm2, %v17885_v59  ;;  %13695 = vmatmul.msk.bf16.vlgmr.msra.gmra.mxu2 %vm306_vm2, %v17885_v59  ;;  %v13860_v9 = vor.u32 %v15750_v55, %v13857_v61  ;;  %v15768_v61 = vld [vmem:[#allocation2 + $0xda4] sm:$0xf0] }
 0x9fd   :  { %13696 = vmatmul.msk.bf16.vlgmr.msra.gmra.mxu3 %vm306_vm2, %v17885_v59  ;;  %13965 = vmatmul.msk.bf16.vlgmr.msrb.gmra.mxu0 %vm306_vm2, %v18050_v23 }
 0x9fe   :  { %7221 = vmatpush.bf16.msra.mxu1 %v13836_v8  ;;  %7234 = vmatpush.bf16.msra.mxu2 %v13840_v26  ;;  %v15773_v8 = vld [vmem:[#allocation2 + $0xdcc] sm:$0xf0] }
 0x9ff   :  { %v5871_v36 = vpop.f32.mrf.mxu2  ;;  %7247 = vmatpush.bf16.msra.mxu3 %v13844_v53  ;;  %7416 = vmatpush.bf16.msrb.mxu0 %v13896_v50  ;;  %v13856_v53 = vor.u32 %v15766_v3, %v13855_v48  ;;  %v15717_v50 = vld [vmem:[#allocation2 + $0xc14] sm:$0xf]  ;;  %v15751_v48 = vld [vmem:[#allocation2 + $0xd24] sm:$0xf] }
 0xa00   :  { %v18104_v17 = vadd.f32 %v5871_v36, %v17939_v4  ;;  %v5884_v51 = vpop.f32.mrf.mxu3  ;;  %v13911_v4 = vld [vmem:[#allocation2 + $0xd50] sm:$0xf]  ;;  %v13865_v3 = vld [vmem:[#allocation2 + $0xda0] sm:$0xf0] }
 0xa01   :  { %v18107_v42 = vadd.f32 %v5884_v51, %v17942_v30  ;;  %v5860_v37 = vpop.f32.mrf.mxu1  ;;  %v13912_v27 = vor.u32 %v15773_v8, %v13911_v4  ;;  %v15741_v36 = vld [vmem:[#allocation2 + $0xccc] sm:$0xf0]  ;;  %v15752_v4 = vld [vmem:[#allocation2 + $0xd2c] sm:$0xf] }
 0xa02   :  { %v6478_v14 = vpop.f32.mrf.mxu0  ;;  %7222 = vmatpush.bf16.msra.mxu1 %v13708_v44  ;;  %7235 = vmatpush.bf16.msra.mxu2 %v13712_v0  ;;  %v15718_v44 = vld [vmem:[#allocation2 + $0xc1c] sm:$0xf]  ;;  %v13783_v0 = vld [vmem:[#allocation2 + $0xc50] sm:$0xf] }
 0xa03   :  { %7248 = vmatpush.bf16.msra.mxu3 %v13716_v63  ;;  %7417 = vmatpush.bf16.msrb.mxu0 %v13768_v2  ;;  %v13728_v63 = vor.u32 %v15734_v38, %v13727_v1  ;;  %v13784_v37 = vor.u32 %v15741_v36, %v13783_v0  ;;  %v15736_v0 = vld [vmem:[#allocation2 + $0xca4] sm:$0xf0]  ;;  %v15720_v36 = vld [vmem:[#allocation2 + $0xc2c] sm:$0xf] }
 0xa07   :  { %v5873_v62 = vpop.f32.mrf.mxu2 }
 0xa08   :  { %v5886_v10 = vpop.f32.mrf.mxu3 }
 0xa09   :  { %v5910_v26 = vpop.f32.mrf.mxu1  ;;  %v13871_v10 = vld [vmem:[#allocation2 + $0xd28] sm:$0xf] }
 0xa0a   :  { %v18110_v30 = vadd.f32 %v5910_v26, %v17945_v21  ;;  %v6528_v6 = vpop.f32.mrf.mxu0  ;;  %v13729_v21 = vld [vmem:[#allocation2 + $0xc98] sm:$0xf0]  ;;  %v13873_v26 = vld [vmem:[#allocation2 + $0xda8] sm:$0xf0] }
 0xa0b   :  { %v18113_v16 = vadd.f32 %v6528_v6, %v17948_v13  ;;  %v13724_v13 = vor.u32 %v15717_v50, %v13721_v12  ;;  %v13732_v51 = vor.u32 %v15718_v44, %v13729_v21  ;;  %v15775_v6 = vld [vmem:[#allocation2 + $0xddc] sm:$0xf0]  ;;  %v13868_v50 = vor.u32 %v15751_v48, %v13865_v3  ;;  %v13743_v21 = vld [vmem:[#allocation2 + $0xc28] sm:$0xf] }
 0xa0c   :  { %13698 = vmatmul.msk.bf16.vlgmr.msrb.gmra.mxu1 %vm306_vm2, %v17885_v59  ;;  %13699 = vmatmul.msk.bf16.vlgmr.msrb.gmra.mxu2 %vm306_vm2, %v17885_v59  ;;  %v13872_v12 = vor.u32 %v15768_v61, %v13871_v10  ;;  %v13876_v38 = vor.u32 %v15752_v4, %v13873_v26  ;;  %v15753_v10 = vld [vmem:[#allocation2 + $0xd34] sm:$0xf]  ;;  %v15770_v26 = vld [vmem:[#allocation2 + $0xdb4] sm:$0xf0] }
 0xa0d   :  { %13700 = vmatmul.msk.bf16.vlgmr.msrb.gmra.mxu3 %vm306_vm2, %v17885_v59  ;;  %13969 = vmatmul.msk.bf16.vlgmr.msra.gmra.mxu0 %vm306_vm2, %v18050_v23  ;;  %v13881_v61 = vld [vmem:[#allocation2 + $0xdb0] sm:$0xf0] }
 0xa0e   :  { %7273 = vmatpush.bf16.msrb.mxu1 %v13852_v47  ;;  %7286 = vmatpush.bf16.msrb.mxu2 %v13856_v53 }
 0xa0f   :  { %v5923_v2 = vpop.f32.mrf.mxu2  ;;  %7299 = vmatpush.bf16.msrb.mxu3 %v13860_v9  ;;  %7468 = vmatpush.bf16.msra.mxu0 %v13912_v27  ;;  %v15719_v9 = vld [vmem:[#allocation2 + $0xc24] sm:$0xf] }
 0xa10   :  { %v18124_v14 = vadd.f32 %v5923_v2, %v17959_v31  ;;  %v5936_v57 = vpop.f32.mrf.mxu3  ;;  %v13927_v31 = vld [vmem:[#allocation2 + $0xd60] sm:$0xf]  ;;  %v13737_v27 = vld [vmem:[#allocation2 + $0xca0] sm:$0xf0]  ;;  %v13744_v2 = vor.u32 %v15736_v0, %v13743_v21 }
 0xa11   :  { %v18127_v24 = vadd.f32 %v5936_v57, %v17962_v20  ;;  %v5912_v59 = vpop.f32.mrf.mxu1  ;;  %v13928_v44 = vor.u32 %v15775_v6, %v13927_v31  ;;  %v15754_v31 = vld [vmem:[#allocation2 + $0xd3c] sm:$0xf] }
 0xa12   :  { %v6530_v62 = vpop.f32.mrf.mxu0  ;;  %7274 = vmatpush.bf16.msrb.mxu1 %v13724_v13  ;;  %7287 = vmatpush.bf16.msrb.mxu2 %v13728_v63  ;;  %v13799_v13 = vld [vmem:[#allocation2 + $0xc60] sm:$0xf] }
 0xa13   :  { %7300 = vmatpush.bf16.msrb.mxu3 %v13732_v51  ;;  %7469 = vmatpush.bf16.msra.mxu0 %v13784_v37  ;;  %v15743_v63 = vld [vmem:[#allocation2 + $0xcdc] sm:$0xf0] }
 0xa14   :  { %v13800_v57 = vor.u32 %v15743_v63, %v13799_v13  ;;  %v15738_v13 = vld [vmem:[#allocation2 + $0xcb4] sm:$0xf0]  ;;  %v15722_v63 = vld [vmem:[#allocation2 + $0xc3c] sm:$0xf] }
 0xa17   :  { %v5925_v55 = vpop.f32.mrf.mxu2 }
 0xa18   :  { %v5938_v8 = vpop.f32.mrf.mxu3 }
 0xa19   :  { %v6385_v47 = vpop.f32.mrf.mxu1  ;;  %v13887_v8 = vld [vmem:[#allocation2 + $0xd38] sm:$0xf] }
 0xa1a   :  { %v18130_v20 = vadd.f32 %v6385_v47, %v17965_v58  ;;  %v6580_v53 = vpop.f32.mrf.mxu0  ;;  %v13745_v58 = vld [vmem:[#allocation2 + $0xca8] sm:$0xf0]  ;;  %v13889_v47 = vld [vmem:[#allocation2 + $0xdb8] sm:$0xf0] }
 0xa1b   :  { %v18133_v1 = vadd.f32 %v6580_v53, %v17968_v35  ;;  %v13740_v35 = vor.u32 %v15719_v9, %v13737_v27  ;;  %v13748_v37 = vor.u32 %v15720_v36, %v13745_v58  ;;  %v15777_v53 = vld [vmem:[#allocation2 + $0xdec] sm:$0xf0]  ;;  %v13884_v9 = vor.u32 %v15753_v10, %v13881_v61  ;;  %v13759_v58 = vld [vmem:[#allocation2 + $0xc38] sm:$0xf] }
 0xa1c   :  { %13958 = vmatmul.msk.bf16.vlgmr.msra.gmra.mxu1 %vm306_vm2, %v18050_v23  ;;  %13959 = vmatmul.msk.bf16.vlgmr.msra.gmra.mxu2 %vm306_vm2, %v18050_v23  ;;  %v13888_v27 = vor.u32 %v15770_v26, %v13887_v8  ;;  %v13892_v0 = vor.u32 %v15754_v31, %v13889_v47  ;;  %v15755_v8 = vld [vmem:[#allocation2 + $0xd44] sm:$0xf]  ;;  %v15772_v47 = vld [vmem:[#allocation2 + $0xdc4] sm:$0xf0] }
 0xa1d   :  { %13960 = vmatmul.msk.bf16.vlgmr.msra.gmra.mxu3 %vm306_vm2, %v18050_v23  ;;  %13973 = vmatmul.msk.bf16.vlgmr.msrb.gmra.mxu0 %vm306_vm2, %v18050_v23  ;;  %v13897_v26 = vld [vmem:[#allocation2 + $0xdc0] sm:$0xf0] }
 0xa1e   :  { %7325 = vmatpush.bf16.msra.mxu1 %v13868_v50  ;;  %7338 = vmatpush.bf16.msra.mxu2 %v13872_v12 }
 0xa1f   :  { %v6398_v51 = vpop.f32.mrf.mxu2  ;;  %7351 = vmatpush.bf16.msra.mxu3 %v13876_v38  ;;  %7520 = vmatpush.bf16.msrb.mxu0 %v13928_v44  ;;  %v15721_v38 = vld [vmem:[#allocation2 + $0xc34] sm:$0xf] }
 0xa20   :  { %v18144_v59 = vadd.f32 %v6398_v51, %v17979_v40  ;;  %v6411_v62 = vpop.f32.mrf.mxu3  ;;  %v13943_v40 = vld [vmem:[#allocation2 + $0xd70] sm:$0xf]  ;;  %v13753_v44 = vld [vmem:[#allocation2 + $0xcb0] sm:$0xf0]  ;;  %v13760_v51 = vor.u32 %v15738_v13, %v13759_v58 }
 0xa21   :  { %v18147_v48 = vadd.f32 %v6411_v62, %v17982_v32  ;;  %v6387_v3 = vpop.f32.mrf.mxu1  ;;  %v13944_v36 = vor.u32 %v15777_v53, %v13943_v40  ;;  %v15756_v40 = vld [vmem:[#allocation2 + $0xd4c] sm:$0xf] }
 0xa22   :  { %v6582_v55 = vpop.f32.mrf.mxu0  ;;  %7326 = vmatpush.bf16.msra.mxu1 %v13740_v35  ;;  %7339 = vmatpush.bf16.msra.mxu2 %v13744_v2  ;;  %v13815_v35 = vld [vmem:[#allocation2 + $0xc70] sm:$0xf] }
 0xa23   :  { %7352 = vmatpush.bf16.msra.mxu3 %v13748_v37  ;;  %7521 = vmatpush.bf16.msrb.mxu0 %v13800_v57  ;;  %v15745_v2 = vld [vmem:[#allocation2 + $0xcec] sm:$0xf0] }
 0xa24   :  { %v13816_v62 = vor.u32 %v15745_v2, %v13815_v35  ;;  %v15740_v35 = vld [vmem:[#allocation2 + $0xcc4] sm:$0xf0]  ;;  %v15724_v2 = vld [vmem:[#allocation2 + $0xc4c] sm:$0xf] }
 0xa27   :  { %v6400_v4 = vpop.f32.mrf.mxu2 }
 0xa28   :  { %v6413_v6 = vpop.f32.mrf.mxu3 }
 0xa29   :  { %v6437_v50 = vpop.f32.mrf.mxu1  ;;  %v13903_v6 = vld [vmem:[#allocation2 + $0xd48] sm:$0xf] }
 0xa2a   :  { %v18150_v32 = vadd.f32 %v6437_v50, %v17985_v11  ;;  %v6632_v12 = vpop.f32.mrf.mxu0  ;;  %v13761_v11 = vld [vmem:[#allocation2 + $0xcb8] sm:$0xf0]  ;;  %v13905_v50 = vld [vmem:[#allocation2 + $0xdc8] sm:$0xf0] }
 0xa2b   :  { %v18153_v21 = vadd.f32 %v6632_v12, %v17988_v33  ;;  %v13756_v33 = vor.u32 %v15721_v38, %v13753_v44  ;;  %v13764_v57 = vor.u32 %v15722_v63, %v13761_v11  ;;  %v15827_v12 = vld [vmem:[#allocation2 + $0xf7c] sm:$0xf0]  ;;  %v13900_v38 = vor.u32 %v15755_v8, %v13897_v26  ;;  %v13775_v11 = vld [vmem:[#allocation2 + $0xc48] sm:$0xf] }
 0xa2c   :  { %13962 = vmatmul.msk.bf16.vlgmr.msrb.gmra.mxu1 %vm306_vm2, %v18050_v23  ;;  %13963 = vmatmul.msk.bf16.vlgmr.msrb.gmra.mxu2 %vm306_vm2, %v18050_v23  ;;  %v13904_v44 = vor.u32 %v15772_v47, %v13903_v6  ;;  %v13908_v13 = vor.u32 %v15756_v40, %v13905_v50  ;;  %v15757_v6 = vld [vmem:[#allocation2 + $0xd54] sm:$0xf]  ;;  %v15774_v50 = vld [vmem:[#allocation2 + $0xdd4] sm:$0xf0] }
 0xa2d   :  { %13964 = vmatmul.msk.bf16.vlgmr.msrb.gmra.mxu3 %vm306_vm2, %v18050_v23  ;;  %13977 = vmatmul.msk.bf16.vlgmr.msra.gmra.mxu0 %vm306_vm2, %v18050_v23  ;;  %v13913_v47 = vld [vmem:[#allocation2 + $0xdd0] sm:$0xf0] }
 0xa2e   :  { %7377 = vmatpush.bf16.msrb.mxu1 %v13884_v9  ;;  %7390 = vmatpush.bf16.msrb.mxu2 %v13888_v27 }
 0xa2f   :  { %v6450_v37 = vpop.f32.mrf.mxu2  ;;  %7403 = vmatpush.bf16.msrb.mxu3 %v13892_v0  ;;  %7572 = vmatpush.bf16.msra.mxu0 %v13944_v36  ;;  %v15723_v0 = vld [vmem:[#allocation2 + $0xc44] sm:$0xf] }
 0xa30   :  { %v18164_v3 = vadd.f32 %v6450_v37, %v17999_v46  ;;  %v6463_v55 = vpop.f32.mrf.mxu3  ;;  %v14119_v46 = vld [vmem:[#allocation2 + $0xf00] sm:$0xf]  ;;  %v13769_v36 = vld [vmem:[#allocation2 + $0xcc0] sm:$0xf0]  ;;  %v13776_v37 = vor.u32 %v15740_v35, %v13775_v11 }
 0xa31   :  { %v18167_v10 = vadd.f32 %v6463_v55, %v18002_v22  ;;  %v6439_v61 = vpop.f32.mrf.mxu1  ;;  %v14120_v63 = vor.u32 %v15827_v12, %v14119_v46  ;;  %v15758_v46 = vld [vmem:[#allocation2 + $0xd5c] sm:$0xf] }
 0xa32   :  { %v6634_v4 = vpop.f32.mrf.mxu0  ;;  %7378 = vmatpush.bf16.msrb.mxu1 %v13756_v33  ;;  %7391 = vmatpush.bf16.msrb.mxu2 %v13760_v51  ;;  %v13991_v33 = vld [vmem:[#allocation2 + $0xe00] sm:$0xf] }
 0xa33   :  { %7404 = vmatpush.bf16.msrb.mxu3 %v13764_v57  ;;  %7573 = vmatpush.bf16.msra.mxu0 %v13816_v62  ;;  %v15795_v51 = vld [vmem:[#allocation2 + $0xe7c] sm:$0xf0] }
 0xa34   :  { %v13992_v55 = vor.u32 %v15795_v51, %v13991_v33  ;;  %v15742_v33 = vld [vmem:[#allocation2 + $0xcd4] sm:$0xf0]  ;;  %v15726_v51 = vld [vmem:[#allocation2 + $0xc5c] sm:$0xf] }
 0xa37   :  { %v6452_v31 = vpop.f32.mrf.mxu2 }
 0xa38   :  { %v6465_v53 = vpop.f32.mrf.mxu3 }
 0xa39   :  { %v6489_v9 = vpop.f32.mrf.mxu1  ;;  %v13919_v53 = vld [vmem:[#allocation2 + $0xd58] sm:$0xf] }
 0xa3a   :  { %v18170_v22 = vadd.f32 %v6489_v9, %v18005_v29  ;;  %v6684_v27 = vpop.f32.mrf.mxu0  ;;  %v13777_v29 = vld [vmem:[#allocation2 + $0xcc8] sm:$0xf0]  ;;  %v13921_v9 = vld [vmem:[#allocation2 + $0xdd8] sm:$0xf0] }
 0xa3b   :  { %v18173_v58 = vadd.f32 %v6684_v27, %v18008_v54  ;;  %v13772_v54 = vor.u32 %v15723_v0, %v13769_v36  ;;  %v13780_v62 = vor.u32 %v15724_v2, %v13777_v29  ;;  %v15829_v27 = vld [vmem:[#allocation2 + $0xf8c] sm:$0xf0]  ;;  %v13916_v0 = vor.u32 %v15757_v6, %v13913_v47  ;;  %v13791_v29 = vld [vmem:[#allocation2 + $0xc58] sm:$0xf] }
 0xa3c   :  { %13966 = vmatmul.msk.bf16.vlgmr.msra.gmra.mxu1 %vm306_vm2, %v18050_v23  ;;  %13967 = vmatmul.msk.bf16.vlgmr.msra.gmra.mxu2 %vm306_vm2, %v18050_v23  ;;  %v13920_v36 = vor.u32 %v15774_v50, %v13919_v53  ;;  %v13924_v35 = vor.u32 %v15758_v46, %v13921_v9  ;;  %v15759_v53 = vld [vmem:[#allocation2 + $0xd64] sm:$0xf]  ;;  %v15776_v9 = vld [vmem:[#allocation2 + $0xde4] sm:$0xf0] }
 0xa3d   :  { %13968 = vmatmul.msk.bf16.vlgmr.msra.gmra.mxu3 %vm306_vm2, %v18050_v23  ;;  %13981 = vmatmul.msk.bf16.vlgmr.msrb.gmra.mxu0 %vm306_vm2, %v18050_v23  ;;  %v13929_v50 = vld [vmem:[#allocation2 + $0xde0] sm:$0xf0] }
 0xa3e   :  { %7429 = vmatpush.bf16.msra.mxu1 %v13900_v38  ;;  %7442 = vmatpush.bf16.msra.mxu2 %v13904_v44 }
 0xa3f   :  { %v6502_v57 = vpop.f32.mrf.mxu2  ;;  %7455 = vmatpush.bf16.msra.mxu3 %v13908_v13  ;;  %8047 = vmatpush.bf16.msrb.mxu0 %v14120_v63  ;;  %v15725_v13 = vld [vmem:[#allocation2 + $0xc54] sm:$0xf] }
 0xa40   :  { %v18184_v61 = vadd.f32 %v6502_v57, %v18019_v18  ;;  %v6515_v4 = vpop.f32.mrf.mxu3  ;;  %v14135_v18 = vld [vmem:[#allocation2 + $0xf10] sm:$0xf]  ;;  %v13785_v63 = vld [vmem:[#allocation2 + $0xcd0] sm:$0xf0]  ;;  %v13792_v57 = vor.u32 %v15742_v33, %v13791_v29  ;;  %v13801_v29 = vld [vmem:[#allocation2 + $0xce0] sm:$0xf0] }
 0xa41   :  { %v18187_v8 = vadd.f32 %v6515_v4, %v18022_v52  ;;  %v6491_v26 = vpop.f32.mrf.mxu1  ;;  %v14136_v2 = vor.u32 %v15829_v27, %v14135_v18  ;;  %v15760_v18 = vld [vmem:[#allocation2 + $0xd6c] sm:$0xf] }
 0xa42   :  { %v6686_v31 = vpop.f32.mrf.mxu0  ;;  %7430 = vmatpush.bf16.msra.mxu1 %v13772_v54  ;;  %7443 = vmatpush.bf16.msra.mxu2 %v13776_v37  ;;  %v14007_v54 = vld [vmem:[#allocation2 + $0xe10] sm:$0xf] }
 0xa43   :  { %7456 = vmatpush.bf16.msra.mxu3 %v13780_v62  ;;  %8048 = vmatpush.bf16.msrb.mxu0 %v13992_v55  ;;  %v15797_v37 = vld [vmem:[#allocation2 + $0xe8c] sm:$0xf0] }
 0xa44   :  { %v14008_v4 = vor.u32 %v15797_v37, %v14007_v54  ;;  %v13807_v54 = vld [vmem:[#allocation2 + $0xc68] sm:$0xf] }
 0xa45   :  { %v15744_v37 = vld [vmem:[#allocation2 + $0xce4] sm:$0xf0] }
 0xa47   :  { %v6504_v40 = vpop.f32.mrf.mxu2 }
 0xa48   :  { %v6517_v12 = vpop.f32.mrf.mxu3 }
 0xa49   :  { %v6541_v38 = vpop.f32.mrf.mxu1  ;;  %v13935_v12 = vld [vmem:[#allocation2 + $0xd68] sm:$0xf] }
 0xa4a   :  { %v18190_v52 = vadd.f32 %v6541_v38, %v18027_v56  ;;  %v6736_v44 = vpop.f32.mrf.mxu0  ;;  %v13793_v56 = vld [vmem:[#allocation2 + $0xcd8] sm:$0xf0]  ;;  %v13937_v38 = vld [vmem:[#allocation2 + $0xde8] sm:$0xf0] }
 0xa4b   :  { %v18193_v11 = vadd.f32 %v6736_v44, %v18031_v7  ;;  %v13788_v7 = vor.u32 %v15725_v13, %v13785_v63  ;;  %v13796_v55 = vor.u32 %v15726_v51, %v13793_v56  ;;  %v15831_v44 = vld [vmem:[#allocation2 + $0xf9c] sm:$0xf0]  ;;  %v18212_v13 = vpop.permute.xlu1 %7716  ;;  %v13932_v63 = vor.u32 %v15759_v53, %v13929_v50 }
 0xa4c   :  { %13970 = vmatmul.msk.bf16.vlgmr.msrb.gmra.mxu1 %vm306_vm2, %v18050_v23  ;;  %13971 = vmatmul.msk.bf16.vlgmr.msrb.gmra.mxu2 %vm306_vm2, %v18050_v23  ;;  %v13940_v51 = vor.u32 %v15760_v18, %v13937_v38  ;;  %v13945_v18 = vld [vmem:[#allocation2 + $0xdf0] sm:$0xf0]  ;;  %v13951_v38 = vld [vmem:[#allocation2 + $0xd78] sm:$0xf] }
 0xa4d   :  { %13972 = vmatmul.msk.bf16.vlgmr.msrb.gmra.mxu3 %vm306_vm2, %v18050_v23  ;;  %13985 = vmatmul.msk.bf16.vlgmr.msra.gmra.mxu0 %vm306_vm2, %v18050_v23 }
 0xa4e   :  { %7481 = vmatpush.bf16.msrb.mxu1 %v13916_v0  ;;  %7494 = vmatpush.bf16.msrb.mxu2 %v13920_v36 }
 0xa4f   :  { %v6554_v62 = vpop.f32.mrf.mxu2  ;;  %7507 = vmatpush.bf16.msrb.mxu3 %v13924_v35  ;;  %8099 = vmatpush.bf16.msra.mxu0 %v14136_v2  ;;  %v13936_v35 = vor.u32 %v15776_v9, %v13935_v12  ;;  %v15727_v2 = vld [vmem:[#allocation2 + $0xc64] sm:$0xf]  ;;  %v15761_v9 = vld [vmem:[#allocation2 + $0xd74] sm:$0xf] }
 0xa50   :  { %v18204_v26 = vadd.f32 %v6554_v62, %v18042_v34  ;;  %v6567_v31 = vpop.f32.mrf.mxu3  ;;  %v14151_v34 = vld [vmem:[#allocation2 + $0xf20] sm:$0xf] }
 0xa51   :  { %v18207_v6 = vadd.f32 %v6567_v31, %v18045_v25  ;;  %v6543_v47 = vpop.f32.mrf.mxu1  ;;  %v14152_v56 = vor.u32 %v15831_v44, %v14151_v34  ;;  %v15799_v62 = vld [vmem:[#allocation2 + $0xe9c] sm:$0xf0]  ;;  %v15778_v34 = vld [vmem:[#allocation2 + $0xdf4] sm:$0xf0]  ;;  %v15762_v44 = vld [vmem:[#allocation2 + $0xd7c] sm:$0xf] }
 0xa52   :  { %v6738_v40 = vpop.f32.mrf.mxu0  ;;  %7482 = vmatpush.bf16.msrb.mxu1 %v13788_v7  ;;  %7495 = vmatpush.bf16.msrb.mxu2 %v13792_v57  ;;  %v15728_v7 = vld [vmem:[#allocation2 + $0xc6c] sm:$0xf]  ;;  %v14023_v57 = vld [vmem:[#allocation2 + $0xe20] sm:$0xf] }
 0xa53   :  { %7508 = vmatpush.bf16.msrb.mxu3 %v13796_v55  ;;  %8100 = vmatpush.bf16.msra.mxu0 %v14008_v4  ;;  %v13808_v55 = vor.u32 %v15744_v37, %v13807_v54  ;;  %v14024_v47 = vor.u32 %v15799_v62, %v14023_v57  ;;  %v13817_v54 = vld [vmem:[#allocation2 + $0xcf0] sm:$0xf0]  ;;  %v13823_v57 = vld [vmem:[#allocation2 + $0xc78] sm:$0xf] }
 0xa54   :  { %v15746_v62 = vld [vmem:[#allocation2 + $0xcf4] sm:$0xf0] }
 0xa57   :  { %v6556_v46 = vpop.f32.mrf.mxu2 }
 0xa58   :  { %v6569_v27 = vpop.f32.mrf.mxu3 }
 0xa59   :  { %v6593_v0 = vpop.f32.mrf.mxu1 }
 0xa5a   :  { %v18210_v25 = vadd.f32 %v6593_v0, %v18048_v60  ;;  %v7211_v36 = vpop.f32.mrf.mxu0  ;;  %v13809_v60 = vld [vmem:[#allocation2 + $0xce8] sm:$0xf0] }
 0xa5b   :  { %v18215_v33 = vadd.f32 %v7211_v36, %v18053_v41  ;;  %v13804_v41 = vor.u32 %v15727_v2, %v13801_v29  ;;  %v13812_v31 = vor.u32 %v15728_v7, %v13809_v60  ;;  %v13953_v36 = vld [vmem:[#allocation2 + $0xdf8] sm:$0xf0]  ;;  %v13948_v29 = vor.u32 %v15761_v9, %v13945_v18 }
 0xa5c   :  { %13974 = vmatmul.msk.bf16.vlgmr.msra.gmra.mxu1 %vm306_vm2, %v18050_v23  ;;  %13975 = vmatmul.msk.bf16.vlgmr.msra.gmra.mxu2 %vm306_vm2, %v18050_v23  ;;  %v13956_v7 = vor.u32 %v15762_v44, %v13953_v36  ;;  %v14121_v44 = vld [vmem:[#allocation2 + $0xf80] sm:$0xf0]  ;;  %v14127_v36 = vld [vmem:[#allocation2 + $0xf08] sm:$0xf] }
 0xa5d   :  { %13976 = vmatmul.msk.bf16.vlgmr.msra.gmra.mxu3 %vm306_vm2, %v18050_v23  ;;  %14245 = vmatmul.msk.bf16.vlgmr.msrb.gmra.mxu0 %vm306_vm2, %v18212_v13 }
 0xa5e   :  { %7533 = vmatpush.bf16.msra.mxu1 %v13932_v63  ;;  %7546 = vmatpush.bf16.msra.mxu2 %v13936_v35  ;;  %v15833_v63 = vld [vmem:[#allocation2 + $0xfac] sm:$0xf0] }
 0xa5f   :  { %v6606_v4 = vpop.f32.mrf.mxu2  ;;  %7559 = vmatpush.bf16.msra.mxu3 %v13940_v51  ;;  %8151 = vmatpush.bf16.msrb.mxu0 %v14152_v56  ;;  %v13952_v51 = vor.u32 %v15778_v34, %v13951_v38  ;;  %v15729_v56 = vld [vmem:[#allocation2 + $0xc74] sm:$0xf]  ;;  %v15811_v34 = vld [vmem:[#allocation2 + $0xf04] sm:$0xf] }
 0xa60   :  { %v18226_v40 = vadd.f32 %v6606_v4, %v18064_v15  ;;  %v6619_v53 = vpop.f32.mrf.mxu3  ;;  %v14167_v15 = vld [vmem:[#allocation2 + $0xf30] sm:$0xf] }
 0xa61   :  { %v18229_v50 = vadd.f32 %v6619_v53, %v18067_v39  ;;  %v6595_v46 = vpop.f32.mrf.mxu1  ;;  %v14168_v60 = vor.u32 %v15833_v63, %v14167_v15  ;;  %v15801_v4 = vld [vmem:[#allocation2 + $0xeac] sm:$0xf0]  ;;  %v15828_v15 = vld [vmem:[#allocation2 + $0xf84] sm:$0xf0]  ;;  %v15812_v63 = vld [vmem:[#allocation2 + $0xf0c] sm:$0xf] }
 0xa62   :  { %v7213_v12 = vpop.f32.mrf.mxu0  ;;  %7534 = vmatpush.bf16.msra.mxu1 %v13804_v41  ;;  %7547 = vmatpush.bf16.msra.mxu2 %v13808_v55  ;;  %v15730_v41 = vld [vmem:[#allocation2 + $0xc7c] sm:$0xf]  ;;  %v14039_v55 = vld [vmem:[#allocation2 + $0xe30] sm:$0xf] }
 0xa63   :  { %7560 = vmatpush.bf16.msra.mxu3 %v13812_v31  ;;  %8152 = vmatpush.bf16.msrb.mxu0 %v14024_v47  ;;  %v13824_v31 = vor.u32 %v15746_v62, %v13823_v57  ;;  %v14040_v46 = vor.u32 %v15801_v4, %v14039_v55  ;;  %v13993_v57 = vld [vmem:[#allocation2 + $0xe80] sm:$0xf0]  ;;  %v13999_v55 = vld [vmem:[#allocation2 + $0xe08] sm:$0xf] }
 0xa64   :  { %v15796_v4 = vld [vmem:[#allocation2 + $0xe84] sm:$0xf0] }
 0xa67   :  { %v6608_v27 = vpop.f32.mrf.mxu2 }
 0xa68   :  { %v6621_v0 = vpop.f32.mrf.mxu3 }
 0xa69   :  { %v6645_v35 = vpop.f32.mrf.mxu1 }
 0xa6a   :  { %v18232_v39 = vadd.f32 %v6645_v35, %v18070_v19  ;;  %v7263_v2 = vpop.f32.mrf.mxu0  ;;  %v13825_v19 = vld [vmem:[#allocation2 + $0xcf8] sm:$0xf0] }
 0xa6b   :  { %v18235_v37 = vadd.f32 %v7263_v2, %v18073_v28  ;;  %v13820_v28 = vor.u32 %v15729_v56, %v13817_v54  ;;  %v13828_v53 = vor.u32 %v15730_v41, %v13825_v19  ;;  %v14129_v2 = vld [vmem:[#allocation2 + $0xf88] sm:$0xf0]  ;;  %v14124_v54 = vor.u32 %v15811_v34, %v14121_v44 }
 0xa6c   :  { %13978 = vmatmul.msk.bf16.vlgmr.msrb.gmra.mxu1 %vm306_vm2, %v18050_v23  ;;  %13979 = vmatmul.msk.bf16.vlgmr.msrb.gmra.mxu2 %vm306_vm2, %v18050_v23  ;;  %v14132_v41 = vor.u32 %v15812_v63, %v14129_v2  ;;  %v14137_v63 = vld [vmem:[#allocation2 + $0xf90] sm:$0xf0]  ;;  %v14143_v2 = vld [vmem:[#allocation2 + $0xf18] sm:$0xf] }
 0xa6d   :  { %13980 = vmatmul.msk.bf16.vlgmr.msrb.gmra.mxu3 %vm306_vm2, %v18050_v23  ;;  %14249 = vmatmul.msk.bf16.vlgmr.msra.gmra.mxu0 %vm306_vm2, %v18212_v13 }
 0xa6e   :  { %7585 = vmatpush.bf16.msrb.mxu1 %v13948_v29  ;;  %7598 = vmatpush.bf16.msrb.mxu2 %v13952_v51  ;;  %v15835_v29 = vld [vmem:[#allocation2 + $0xfbc] sm:$0xf0] }
 0xa6f   :  { %v6658_v47 = vpop.f32.mrf.mxu2  ;;  %7611 = vmatpush.bf16.msrb.mxu3 %v13956_v7  ;;  %8203 = vmatpush.bf16.msra.mxu0 %v14168_v60  ;;  %v14128_v7 = vor.u32 %v15828_v15, %v14127_v36  ;;  %v15779_v60 = vld [vmem:[#allocation2 + $0xe04] sm:$0xf]  ;;  %v15813_v15 = vld [vmem:[#allocation2 + $0xf14] sm:$0xf] }
 0xa70   :  { %v18246_v12 = vadd.f32 %v6658_v47, %v18084_v45  ;;  %v6671_v9 = vpop.f32.mrf.mxu3  ;;  %v14183_v45 = vld [vmem:[#allocation2 + $0xf40] sm:$0xf] }
 0xa71   :  { %v18249_v18 = vadd.f32 %v6671_v9, %v18087_v5  ;;  %v6647_v27 = vpop.f32.mrf.mxu1  ;;  %v14184_v19 = vor.u32 %v15835_v29, %v14183_v45  ;;  %v15803_v47 = vld [vmem:[#allocation2 + $0xebc] sm:$0xf0]  ;;  %v15830_v45 = vld [vmem:[#allocation2 + $0xf94] sm:$0xf0]  ;;  %v15814_v29 = vld [vmem:[#allocation2 + $0xf1c] sm:$0xf] }
 0xa72   :  { %v7265_v38 = vpop.f32.mrf.mxu0  ;;  %7586 = vmatpush.bf16.msrb.mxu1 %v13820_v28  ;;  %7599 = vmatpush.bf16.msrb.mxu2 %v13824_v31  ;;  %v15780_v28 = vld [vmem:[#allocation2 + $0xe0c] sm:$0xf]  ;;  %v14055_v31 = vld [vmem:[#allocation2 + $0xe40] sm:$0xf] }
 0xa73   :  { %7612 = vmatpush.bf16.msrb.mxu3 %v13828_v53  ;;  %8204 = vmatpush.bf16.msra.mxu0 %v14040_v46  ;;  %v14000_v53 = vor.u32 %v15796_v4, %v13999_v55  ;;  %v14056_v27 = vor.u32 %v15803_v47, %v14055_v31  ;;  %v14009_v55 = vld [vmem:[#allocation2 + $0xe90] sm:$0xf0]  ;;  %v14015_v31 = vld [vmem:[#allocation2 + $0xe18] sm:$0xf] }
 0xa74   :  { %v15798_v47 = vld [vmem:[#allocation2 + $0xe94] sm:$0xf0] }
 0xa77   :  { %v6660_v0 = vpop.f32.mrf.mxu2 }
 0xa78   :  { %v6673_v35 = vpop.f32.mrf.mxu3 }
 0xa79   :  { %v6697_v51 = vpop.f32.mrf.mxu1 }
 0xa7a   :  { %v18252_v5 = vadd.f32 %v6697_v51, %v18090_v49  ;;  %v7315_v56 = vpop.f32.mrf.mxu0  ;;  %v14001_v49 = vld [vmem:[#allocation2 + $0xe88] sm:$0xf0] }
 0xa7b   :  { %v18255_v62 = vadd.f32 %v7315_v56, %v18093_v43  ;;  %v13996_v43 = vor.u32 %v15779_v60, %v13993_v57  ;;  %v14004_v9 = vor.u32 %v15780_v28, %v14001_v49  ;;  %v14145_v56 = vld [vmem:[#allocation2 + $0xf98] sm:$0xf0]  ;;  %v14140_v57 = vor.u32 %v15813_v15, %v14137_v63 }
 0xa7c   :  { %13982 = vmatmul.msk.bf16.vlgmr.msra.gmra.mxu1 %vm306_vm2, %v18050_v23  ;;  %13983 = vmatmul.msk.bf16.vlgmr.msra.gmra.mxu2 %vm306_vm2, %v18050_v23  ;;  %v14148_v28 = vor.u32 %v15814_v29, %v14145_v56  ;;  %v15832_v56 = vld [vmem:[#allocation2 + $0xfa4] sm:$0xf0] }
 0xa7d   :  { %13984 = vmatmul.msk.bf16.vlgmr.msra.gmra.mxu3 %vm306_vm2, %v18050_v23  ;;  %14253 = vmatmul.msk.bf16.vlgmr.msrb.gmra.mxu0 %vm306_vm2, %v18212_v13 }
 0xa7e   :  { %8060 = vmatpush.bf16.msra.mxu1 %v14124_v54  ;;  %8073 = vmatpush.bf16.msra.mxu2 %v14128_v7  ;;  %v15837_v54 = vld [vmem:[#allocation2 + $0xfcc] sm:$0xf0] }
 0xa7f   :  { %v6710_v46 = vpop.f32.mrf.mxu2  ;;  %8086 = vmatpush.bf16.msra.mxu3 %v14132_v41  ;;  %8255 = vmatpush.bf16.msrb.mxu0 %v14184_v19  ;;  %v14144_v41 = vor.u32 %v15830_v45, %v14143_v2  ;;  %v15781_v19 = vld [vmem:[#allocation2 + $0xe14] sm:$0xf]  ;;  %v15815_v2 = vld [vmem:[#allocation2 + $0xf24] sm:$0xf] }
 0xa80   :  { %v18266_v38 = vadd.f32 %v6710_v46, %v18104_v17  ;;  %v6723_v34 = vpop.f32.mrf.mxu3  ;;  %v14199_v17 = vld [vmem:[#allocation2 + $0xf50] sm:$0xf]  ;;  %v14153_v45 = vld [vmem:[#allocation2 + $0xfa0] sm:$0xf0] }
 0xa81   :  { %v18269_v44 = vadd.f32 %v6723_v34, %v18107_v42  ;;  %v6699_v0 = vpop.f32.mrf.mxu1  ;;  %v14200_v49 = vor.u32 %v15837_v54, %v14199_v17  ;;  %v15805_v46 = vld [vmem:[#allocation2 + $0xecc] sm:$0xf0]  ;;  %v15816_v17 = vld [vmem:[#allocation2 + $0xf2c] sm:$0xf] }
 0xa82   :  { %v7317_v36 = vpop.f32.mrf.mxu0  ;;  %8061 = vmatpush.bf16.msra.mxu1 %v13996_v43  ;;  %8074 = vmatpush.bf16.msra.mxu2 %v14000_v53  ;;  %v15782_v43 = vld [vmem:[#allocation2 + $0xe1c] sm:$0xf]  ;;  %v14071_v53 = vld [vmem:[#allocation2 + $0xe50] sm:$0xf] }
 0xa83   :  { %8087 = vmatpush.bf16.msra.mxu3 %v14004_v9  ;;  %8256 = vmatpush.bf16.msrb.mxu0 %v14056_v27  ;;  %v14016_v9 = vor.u32 %v15798_v47, %v14015_v31  ;;  %v14072_v0 = vor.u32 %v15805_v46, %v14071_v53  ;;  %v15800_v53 = vld [vmem:[#allocation2 + $0xea4] sm:$0xf0]  ;;  %v15784_v46 = vld [vmem:[#allocation2 + $0xe2c] sm:$0xf] }
 0xa87   :  { %v6712_v35 = vpop.f32.mrf.mxu2 }
 0xa88   :  { %v6725_v51 = vpop.f32.mrf.mxu3 }
 0xa89   :  { %v6749_v7 = vpop.f32.mrf.mxu1  ;;  %v14159_v51 = vld [vmem:[#allocation2 + $0xf28] sm:$0xf] }
 0xa8a   :  { %v18272_v42 = vadd.f32 %v6749_v7, %v18110_v30  ;;  %v7367_v60 = vpop.f32.mrf.mxu0  ;;  %v14017_v30 = vld [vmem:[#allocation2 + $0xe98] sm:$0xf0]  ;;  %v14161_v7 = vld [vmem:[#allocation2 + $0xfa8] sm:$0xf0] }
 0xa8b   :  { %v18275_v4 = vadd.f32 %v7367_v60, %v18113_v16  ;;  %v14012_v16 = vor.u32 %v15781_v19, %v14009_v55  ;;  %v14020_v34 = vor.u32 %v15782_v43, %v14017_v30  ;;  %v15839_v60 = vld [vmem:[#allocation2 + $0xfdc] sm:$0xf0]  ;;  %v14156_v19 = vor.u32 %v15815_v2, %v14153_v45  ;;  %v14031_v30 = vld [vmem:[#allocation2 + $0xe28] sm:$0xf] }
 0xa8c   :  { %13986 = vmatmul.msk.bf16.vlgmr.msrb.gmra.mxu1 %vm306_vm2, %v18050_v23  ;;  %13987 = vmatmul.msk.bf16.vlgmr.msrb.gmra.mxu2 %vm306_vm2, %v18050_v23  ;;  %v14160_v55 = vor.u32 %v15832_v56, %v14159_v51  ;;  %v14164_v47 = vor.u32 %v15816_v17, %v14161_v7  ;;  %v15817_v51 = vld [vmem:[#allocation2 + $0xf34] sm:$0xf]  ;;  %v15834_v7 = vld [vmem:[#allocation2 + $0xfb4] sm:$0xf0] }
 0xa8d   :  { %13988 = vmatmul.msk.bf16.vlgmr.msrb.gmra.mxu3 %vm306_vm2, %v18050_v23  ;;  %14257 = vmatmul.msk.bf16.vlgmr.msra.gmra.mxu0 %vm306_vm2, %v18212_v13  ;;  %v14169_v56 = vld [vmem:[#allocation2 + $0xfb0] sm:$0xf0] }
 0xa8e   :  { %8112 = vmatpush.bf16.msrb.mxu1 %v14140_v57  ;;  %8125 = vmatpush.bf16.msrb.mxu2 %v14144_v41 }
 0xa8f   :  { %v6762_v27 = vpop.f32.mrf.mxu2  ;;  %8138 = vmatpush.bf16.msrb.mxu3 %v14148_v28  ;;  %8307 = vmatpush.bf16.msra.mxu0 %v14200_v49  ;;  %v15783_v28 = vld [vmem:[#allocation2 + $0xe24] sm:$0xf] }
 0xa90   :  { %v18286_v36 = vadd.f32 %v6762_v27, %v18124_v14  ;;  %v6775_v15 = vpop.f32.mrf.mxu3  ;;  %v14215_v14 = vld [vmem:[#allocation2 + $0xf60] sm:$0xf]  ;;  %v14025_v49 = vld [vmem:[#allocation2 + $0xea0] sm:$0xf0]  ;;  %v14032_v27 = vor.u32 %v15800_v53, %v14031_v30 }
 0xa91   :  { %v18289_v63 = vadd.f32 %v6775_v15, %v18127_v24  ;;  %v6751_v23 = vpop.f32.mrf.mxu1  ;;  %v14216_v43 = vor.u32 %v15839_v60, %v14215_v14  ;;  %v15818_v14 = vld [vmem:[#allocation2 + $0xf3c] sm:$0xf] }
 0xa92   :  { %v7369_v35 = vpop.f32.mrf.mxu0  ;;  %8113 = vmatpush.bf16.msrb.mxu1 %v14012_v16  ;;  %8126 = vmatpush.bf16.msrb.mxu2 %v14016_v9  ;;  %v14087_v16 = vld [vmem:[#allocation2 + $0xe60] sm:$0xf] }
 0xa93   :  { %8139 = vmatpush.bf16.msrb.mxu3 %v14020_v34  ;;  %8308 = vmatpush.bf16.msra.mxu0 %v14072_v0  ;;  %v15807_v9 = vld [vmem:[#allocation2 + $0xedc] sm:$0xf0] }
 0xa94   :  { %v14088_v15 = vor.u32 %v15807_v9, %v14087_v16  ;;  %v15802_v16 = vld [vmem:[#allocation2 + $0xeb4] sm:$0xf0]  ;;  %v15786_v9 = vld [vmem:[#allocation2 + $0xe3c] sm:$0xf] }
 0xa97   :  { %v6764_v29 = vpop.f32.mrf.mxu2 }
 0xa98   :  { %v6777_v54 = vpop.f32.mrf.mxu3 }
 0xa99   :  { %v7224_v57 = vpop.f32.mrf.mxu1  ;;  %v14175_v54 = vld [vmem:[#allocation2 + $0xf38] sm:$0xf] }
 0xa9a   :  { %v18292_v24 = vadd.f32 %v7224_v57, %v18130_v20  ;;  %v7419_v41 = vpop.f32.mrf.mxu0  ;;  %v14033_v20 = vld [vmem:[#allocation2 + $0xea8] sm:$0xf0]  ;;  %v14177_v57 = vld [vmem:[#allocation2 + $0xfb8] sm:$0xf0] }
 0xa9b   :  { %v18295_v31 = vadd.f32 %v7419_v41, %v18133_v1  ;;  %v14028_v1 = vor.u32 %v15783_v28, %v14025_v49  ;;  %v14036_v0 = vor.u32 %v15784_v46, %v14033_v20  ;;  %v15841_v41 = vld [vmem:[#allocation2 + $0xfec] sm:$0xf0]  ;;  %v14172_v28 = vor.u32 %v15817_v51, %v14169_v56  ;;  %v14047_v20 = vld [vmem:[#allocation2 + $0xe38] sm:$0xf] }
 0xa9c   :  { %14246 = vmatmul.msk.bf16.vlgmr.msra.gmra.mxu1 %vm306_vm2, %v18212_v13  ;;  %14247 = vmatmul.msk.bf16.vlgmr.msra.gmra.mxu2 %vm306_vm2, %v18212_v13  ;;  %v14176_v49 = vor.u32 %v15834_v7, %v14175_v54  ;;  %v14180_v53 = vor.u32 %v15818_v14, %v14177_v57  ;;  %v15819_v7 = vld [vmem:[#allocation2 + $0xf44] sm:$0xf] }
 0xa9d   :  { %14248 = vmatmul.msk.bf16.vlgmr.msra.gmra.mxu3 %vm306_vm2, %v18212_v13  ;;  %14261 = vmatmul.msk.bf16.vlgmr.msrb.gmra.mxu0 %vm306_vm2, %v18212_v13  ;;  %v14185_v14 = vld [vmem:[#allocation2 + $0xfc0] sm:$0xf0] }
 0xa9e   :  { %8164 = vmatpush.bf16.msra.mxu1 %v14156_v19  ;;  %8177 = vmatpush.bf16.msra.mxu2 %v14160_v55 }
 0xa9f   :  { %v7237_v34 = vpop.f32.mrf.mxu2  ;;  %8190 = vmatpush.bf16.msra.mxu3 %v14164_v47  ;;  %8359 = vmatpush.bf16.msrb.mxu0 %v14216_v43  ;;  %v15785_v47 = vld [vmem:[#allocation2 + $0xe34] sm:$0xf] }
 0xaa0   :  { %v18306_v23 = vadd.f32 %v7237_v34, %v18144_v59  ;;  %v7250_v35 = vpop.f32.mrf.mxu3  ;;  %v14231_v59 = vld [vmem:[#allocation2 + $0xf70] sm:$0xf]  ;;  %v14041_v43 = vld [vmem:[#allocation2 + $0xeb0] sm:$0xf0]  ;;  %v14048_v34 = vor.u32 %v15802_v16, %v14047_v20  ;;  %v14057_v20 = vld [vmem:[#allocation2 + $0xec0] sm:$0xf0] }
 0xaa1   :  { %v18309_v2 = vadd.f32 %v7250_v35, %v18147_v48  ;;  %v7226_v45 = vpop.f32.mrf.mxu1  ;;  %v14232_v46 = vor.u32 %v15841_v41, %v14231_v59  ;;  %v15836_v59 = vld [vmem:[#allocation2 + $0xfc4] sm:$0xf0]  ;;  %v15820_v41 = vld [vmem:[#allocation2 + $0xf4c] sm:$0xf] }
 0xaa2   :  { %v7421_v29 = vpop.f32.mrf.mxu0  ;;  %8165 = vmatpush.bf16.msra.mxu1 %v14028_v1  ;;  %8178 = vmatpush.bf16.msra.mxu2 %v14032_v27  ;;  %v14103_v1 = vld [vmem:[#allocation2 + $0xe70] sm:$0xf]  ;;  %v14063_v16 = vld [vmem:[#allocation2 + $0xe48] sm:$0xf] }
 0xaa3   :  { %8191 = vmatpush.bf16.msra.mxu3 %v14036_v0  ;;  %8360 = vmatpush.bf16.msrb.mxu0 %v14088_v15  ;;  %v15809_v27 = vld [vmem:[#allocation2 + $0xeec] sm:$0xf0] }
 0xaa4   :  { %v14104_v35 = vor.u32 %v15809_v27, %v14103_v1 }
 0xaa7   :  { %v7239_v17 = vpop.f32.mrf.mxu2 }
 0xaa8   :  { %v7252_v60 = vpop.f32.mrf.mxu3 }
 0xaa9   :  { %v7276_v19 = vpop.f32.mrf.mxu1  ;;  %v14191_v60 = vld [vmem:[#allocation2 + $0xf48] sm:$0xf] }
 0xaaa   :  { %v18312_v48 = vadd.f32 %v7276_v19, %v18150_v32  ;;  %v7471_v55 = vpop.f32.mrf.mxu0  ;;  %v14049_v32 = vld [vmem:[#allocation2 + $0xeb8] sm:$0xf0]  ;;  %v14193_v19 = vld [vmem:[#allocation2 + $0xfc8] sm:$0xf0] }
 0xaab   :  { %v18315_v30 = vadd.f32 %v7471_v55, %v18153_v21  ;;  %v14044_v21 = vor.u32 %v15785_v47, %v14041_v43  ;;  %v14052_v15 = vor.u32 %v15786_v9, %v14049_v32  ;;  %v14192_v43 = vor.u32 %v15836_v59, %v14191_v60  ;;  %v15804_v9 = vld [vmem:[#allocation2 + $0xec4] sm:$0xf0]  ;;  %v14065_v32 = vld [vmem:[#allocation2 + $0xec8] sm:$0xf0]  ;;  %v14201_v60 = vld [vmem:[#allocation2 + $0xfd0] sm:$0xf0] }
 0xaac   :  { %14250 = vmatmul.msk.bf16.vlgmr.msrb.gmra.mxu1 %vm306_vm2, %v18212_v13  ;;  %14251 = vmatmul.msk.bf16.vlgmr.msrb.gmra.mxu2 %vm306_vm2, %v18212_v13 }
 0xaad   :  { %14252 = vmatmul.msk.bf16.vlgmr.msrb.gmra.mxu3 %vm306_vm2, %v18212_v13  ;;  %14265 = vmatmul.msk.bf16.vlgmr.msra.gmra.mxu0 %vm306_vm2, %v18212_v13 }
 0xaae   :  { %8216 = vmatpush.bf16.msrb.mxu1 %v14172_v28  ;;  %8229 = vmatpush.bf16.msrb.mxu2 %v14176_v49  ;;  %v15850_v28 = vld [vmem:[#allocation3 + $0x38] sm:$0xff]  ;;  %v14188_v49 = vor.u32 %v15819_v7, %v14185_v14  ;;  %v15821_v14 = vld [vmem:[#allocation2 + $0xf54] sm:$0xf] }
 0xaaf   :  { %v7289_v0 = vpop.f32.mrf.mxu2  ;;  %8242 = vmatpush.bf16.msrb.mxu3 %v14180_v53  ;;  %8411 = vmatpush.bf16.msra.mxu0 %v14232_v46  ;;  %v14196_v53 = vor.u32 %v15820_v41, %v14193_v19  ;;  %v15787_v46 = vld [vmem:[#allocation2 + $0xe44] sm:$0xf]  ;;  %v15822_v41 = vld [vmem:[#allocation2 + $0xf5c] sm:$0xf] }
 0xab0   :  { %v18326_v45 = vadd.f32 %v7289_v0, %v18164_v3  ;;  %v7302_v29 = vpop.f32.mrf.mxu3  ;;  %v14060_v1 = vor.u32 %v15787_v46, %v14057_v20  ;;  %v14209_v19 = vld [vmem:[#allocation2 + $0xfd8] sm:$0xf0]  ;;  %v15789_v20 = vld [vmem:[#allocation2 + $0xe54] sm:$0xf] }
 0xab1   :  { %v18329_v51 = vadd.f32 %v7302_v29, %v18167_v10  ;;  %v7278_v56 = vpop.f32.mrf.mxu1  ;;  %v14212_v46 = vor.u32 %v15822_v41, %v14209_v19  ;;  %v15840_v41 = vld [vmem:[#allocation2 + $0xfe4] sm:$0xf0]  ;;  %v15824_v19 = vld [vmem:[#allocation2 + $0xf6c] sm:$0xf] }
 0xab2   :  { %v7473_v17 = vpop.f32.mrf.mxu0  ;;  %8217 = vmatpush.bf16.msrb.mxu1 %v14044_v21  ;;  %8230 = vmatpush.bf16.msrb.mxu2 %v14048_v34  ;;  %v14064_v21 = vor.u32 %v15804_v9, %v14063_v16  ;;  %v14073_v16 = vld [vmem:[#allocation2 + $0xed0] sm:$0xf0]  ;;  %v14079_v9 = vld [vmem:[#allocation2 + $0xe58] sm:$0xf] }
 0xab3   :  { %8243 = vmatpush.bf16.msrb.mxu3 %v14052_v15  ;;  %8412 = vmatpush.bf16.msra.mxu0 %v14104_v35  ;;  %v15848_v17 = vld [vmem:[#allocation3 + $0x28] sm:$0xff] }
 0xab7   :  { %v7291_v54 = vpop.f32.mrf.mxu2 }
 0xab8   :  { %v7304_v57 = vpop.f32.mrf.mxu3  ;;  %v15847_v54 = vld [vmem:[#allocation3 + $0x20] sm:$0xff] }
 0xab9   :  { %v7328_v3 = vpop.f32.mrf.mxu1  ;;  %v14207_v57 = vld [vmem:[#allocation2 + $0xf58] sm:$0xf] }
 0xaba   :  { %v18332_v55 = vadd.f32 %v7328_v3, %v18170_v22  ;;  %v7523_v10 = vpop.f32.mrf.mxu0  ;;  %v15788_v22 = vld [vmem:[#allocation2 + $0xe4c] sm:$0xf] }
 0xabb   :  { %v18335_v47 = vadd.f32 %v7523_v10, %v18173_v58  ;;  %v15849_v58 = vld [vmem:[#allocation3 + $0x30] sm:$0xff]  ;;  %v14068_v34 = vor.u32 %v15788_v22, %v14065_v32  ;;  %v15790_v22 = vld [vmem:[#allocation2 + $0xe5c] sm:$0xf] }
 0xabc   :  { %14254 = vmatmul.msk.bf16.vlgmr.msra.gmra.mxu1 %vm306_vm2, %v18212_v13  ;;  %14255 = vmatmul.msk.bf16.vlgmr.msra.gmra.mxu2 %vm306_vm2, %v18212_v13  ;;  %v14081_v32 = vld [vmem:[#allocation2 + $0xed8] sm:$0xf0] }
 0xabd   :  { %14256 = vmatmul.msk.bf16.vlgmr.msra.gmra.mxu3 %vm306_vm2, %v18212_v13  ;;  %14269 = vmatmul.msk.bf16.vlgmr.msrb.gmra.mxu0 %vm306_vm2, %v18212_v13 }
 0xabe   :  { %11317 = vmatpush.bf16.msrb.mxu0 %v15850_v28  ;;  %8268 = vmatpush.bf16.msra.mxu1 %v14188_v49  ;;  %v15846_v28 = vld [vmem:[#allocation3 + $0x18] sm:$0xff]  ;;  %v14204_v49 = vor.u32 %v15821_v14, %v14201_v60  ;;  %v15843_v14 = vld [vmem:[#allocation3] sm:$0xff] }
 0xabf   :  { %v7341_v27 = vpop.f32.mrf.mxu2  ;;  %8281 = vmatpush.bf16.msra.mxu2 %v14192_v43  ;;  %8294 = vmatpush.bf16.msra.mxu3 %v14196_v53  ;;  %v15882_v60 = vld [vmem:[#allocation3 + $0x138] sm:$0xff] }
 0xac0   :  { %v18346_v0 = vadd.f32 %v7341_v27, %v18184_v61  ;;  %v7354_v15 = vpop.f32.mrf.mxu3  ;;  %v15838_v61 = vld [vmem:[#allocation2 + $0xfd4] sm:$0xf0] }
 0xac1   :  { %v18349_v35 = vadd.f32 %v7354_v15, %v18187_v8  ;;  %v7330_v29 = vpop.f32.mrf.mxu1  ;;  %v14208_v53 = vor.u32 %v15838_v61, %v14207_v57  ;;  %v15823_v57 = vld [vmem:[#allocation2 + $0xf64] sm:$0xf] }
 0xac2   :  { %v7525_v56 = vpop.f32.mrf.mxu0  ;;  %11318 = vmatpush.bf16.msrb.mxu0 %v15849_v58  ;;  %8269 = vmatpush.bf16.msra.mxu1 %v14060_v1  ;;  %v14076_v58 = vor.u32 %v15789_v20, %v14073_v16 }
 0xac3   :  { %8282 = vmatpush.bf16.msra.mxu2 %v14064_v21  ;;  %8295 = vmatpush.bf16.msra.mxu3 %v14068_v34  ;;  %v14084_v21 = vor.u32 %v15790_v22, %v14081_v32  ;;  %v14089_v22 = vld [vmem:[#allocation2 + $0xee0] sm:$0xf0]  ;;  %v14095_v32 = vld [vmem:[#allocation2 + $0xe68] sm:$0xf] }
 0xac6   :  { %11319 = vmatpush.bf16.msrb.mxu0 %v15848_v17 }
 0xac7   :  { %v7343_v7 = vpop.f32.mrf.mxu2 }
 0xac8   :  { %v7356_v59 = vpop.f32.mrf.mxu3  ;;  %v18371_v7 = vld [vmem:[#allocation14] sm:$0xff] }
 0xac9   :  { %v7380_v3 = vpop.f32.mrf.mxu1  ;;  %v14217_v59 = vld [vmem:[#allocation2 + $0xfe0] sm:$0xf0] }
 0xaca   :  { %v18352_v8 = vadd.f32 %v7380_v3, %v18190_v52  ;;  %v7575_v10 = vpop.f32.mrf.mxu0  ;;  %11320 = vmatpush.bf16.msrb.mxu0 %v15847_v54  ;;  %v15806_v52 = vld [vmem:[#allocation2 + $0xed4] sm:$0xf0]  ;;  %v15844_v54 = vld [vmem:[#allocation3 + $0x8] sm:$0xff] }
 0xacb   :  { %v18355_v43 = vadd.f32 %v7575_v10, %v18193_v11  ;;  %v15845_v11 = vld [vmem:[#allocation3 + $0x10] sm:$0xff]  ;;  %v14080_v27 = vor.u32 %v15806_v52, %v14079_v9  ;;  %v15791_v52 = vld [vmem:[#allocation2 + $0xe64] sm:$0xf] }
 0xacc   :  { %14258 = vmatmul.msk.bf16.vlgmr.msrb.gmra.mxu1 %vm306_vm2, %v18212_v13  ;;  %14259 = vmatmul.msk.bf16.vlgmr.msrb.gmra.mxu2 %vm306_vm2, %v18212_v13 }
 0xacd   :  { %14260 = vmatmul.msk.bf16.vlgmr.msrb.gmra.mxu3 %vm306_vm2, %v18212_v13  ;;  %14273 = vmatmul.msk.bf16.vlgmr.msra.gmra.mxu0 %vm306_vm2, %v18212_v13 }
 0xace   :  { %11321 = vmatpush.bf16.msrb.mxu0 %v15846_v28  ;;  %8320 = vmatpush.bf16.msrb.mxu1 %v14204_v49  ;;  %v8497_v28 = vperm.slane %v18371_v7, 0  ;;  %v15881_v49 = vld [vmem:[#allocation3 + $0x130] sm:$0xff] }
 0xacf   :  { %v7393_v1 = vpop.f32.mrf.mxu2  ;;  %8333 = vmatpush.bf16.msrb.mxu2 %v14208_v53  ;;  %8346 = vmatpush.bf16.msrb.mxu3 %v14212_v46  ;;  %v14220_v53 = vor.u32 %v15823_v57, %v14217_v59 }
 0xad0   :  { %v18366_v34 = vadd.f32 %v7393_v1, %v18204_v26  ;;  %v7406_v15 = vpop.f32.mrf.mxu3  ;;  %v14223_v26 = vld [vmem:[#allocation2 + $0xf68] sm:$0xf]  ;;  %v15792_v1 = vld [vmem:[#allocation2 + $0xe6c] sm:$0xf] }
 0xad1   :  { %v18369_v29 = vadd.f32 %v7406_v15, %v18207_v6  ;;  %v7382_v56 = vpop.f32.mrf.mxu1  ;;  %v14225_v6 = vld [vmem:[#allocation2 + $0xfe8] sm:$0xf0]  ;;  %v14224_v16 = vor.u32 %v15840_v41, %v14223_v26 }
 0xad2   :  { %v7577_v17 = vpop.f32.mrf.mxu0  ;;  %11322 = vmatpush.bf16.msrb.mxu0 %v15845_v11  ;;  %8321 = vmatpush.bf16.msrb.mxu1 %v14076_v58  ;;  %v14228_v9 = vor.u32 %v15824_v19, %v14225_v6  ;;  %v15808_v58 = vld [vmem:[#allocation2 + $0xee4] sm:$0xf0]  ;;  %v15879_v19 = vld [vmem:[#allocation3 + $0x120] sm:$0xff]  ;;  %v15878_v6 = vld [vmem:[#allocation3 + $0x118] sm:$0xff] }
 0xad3   :  { %8334 = vmatpush.bf16.msrb.mxu2 %v14080_v27  ;;  %8347 = vmatpush.bf16.msrb.mxu3 %v14084_v21  ;;  %v14097_v27 = vld [vmem:[#allocation2 + $0xee8] sm:$0xf0]  ;;  %v14092_v21 = vor.u32 %v15791_v52, %v14089_v22  ;;  %v15877_v52 = vld [vmem:[#allocation3 + $0x110] sm:$0xff] }
 0xad4   :  { %v14100_v15 = vor.u32 %v15792_v1, %v14097_v27  ;;  %v15793_v27 = vld [vmem:[#allocation2 + $0xe74] sm:$0xf] }
 0xad6   :  { %11323 = vmatpush.bf16.msrb.mxu0 %v15844_v54  ;;  %v15880_v54 = vld [vmem:[#allocation3 + $0x128] sm:$0xff] }
 0xad7   :  { %v7395_v61 = vpop.f32.mrf.mxu2 }
 0xad8   :  { %v7408_v3 = vpop.f32.mrf.mxu3 }
 0xad9   :  { %v7432_v10 = vpop.f32.mrf.mxu1  ;;  %v15825_v3 = vld [vmem:[#allocation2 + $0xf74] sm:$0xf] }
 0xada   :  { %v18375_v46 = vadd.f32 %v7432_v10, %v18210_v25  ;;  %v8050_v20 = vpop.f32.mrf.mxu0  ;;  %11324 = vmatpush.bf16.msrb.mxu0 %v15843_v14  ;;  %v14233_v10 = vld [vmem:[#allocation2 + $0xff0] sm:$0xf0] }
 0xadb   :  { %v8457_v11 = vadd.f32 %v8050_v20, %v18215_v33  ;;  %v14096_v33 = vor.u32 %v15808_v58, %v14095_v32  ;;  %v14241_v20 = vld [vmem:[#allocation2 + $0xff8] sm:$0xf0]  ;;  %v14236_v22 = vor.u32 %v15825_v3, %v14233_v10  ;;  %v15876_v3 = vld [vmem:[#allocation3 + $0x108] sm:$0xff] }
 0xadc   :  { %14262 = vmatmul.msk.bf16.vlgmr.msra.gmra.mxu1 %vm306_vm2, %v18212_v13  ;;  %14263 = vmatmul.msk.bf16.vlgmr.msra.gmra.mxu2 %vm306_vm2, %v18212_v13 }
 0xadd   :  { %v18382_v25 = vadd.f32 %v8497_v28, %v8457_v11  ;;  %14264 = vmatmul.msk.bf16.vlgmr.msra.gmra.mxu3 %vm306_vm2, %v18212_v13  ;;  %8372 = vmatpush.bf16.msra.mxu1 %v14220_v53  ;;  %v14239_v28 = vld [vmem:[#allocation2 + $0xf78] sm:$0xf]  ;;  %v15826_v53 = vld [vmem:[#allocation2 + $0xf7c] sm:$0xf] }
 0xade   :  { %11369 = vmatpush.bf16.msra.mxu0 %v15882_v60  ;;  %8385 = vmatpush.bf16.msra.mxu2 %v14224_v16  ;;  %v14244_v1 = vor.u32 %v15826_v53, %v14241_v20 }
 0xadf   :  { %8398 = vmatpush.bf16.msra.mxu3 %v14228_v9  ;;  %v8689_v56 = vand.u32 2147483647, %v18382_v25  ;;  %v7445_v17 = vpop.f32.mrf.mxu2  ;;  %v8501_v9 = vperm.slane %v18371_v7, 4  ;;  %vm8625_vm10 = vcmp.ne.f32.partialorder %v18382_v25, %v18382_v25 }
 0xae0   :  { %v18388_v14 = vadd.f32 %v7445_v17, %v18226_v40  ;;  %v7458_v60 = vpop.f32.mrf.mxu3  ;;  %v15810_v17 = vld [vmem:[#allocation2 + $0xef4] sm:$0xf0] }
 0xae1   :  { %v8721_v57 = vsub.f32 0.0, %v8689_v56  ;;  %v18391_v59 = vadd.f32 %v7458_v60, %v18229_v50  ;;  %v7434_v26 = vpop.f32.mrf.mxu1  ;;  %8373 = vmatpush.bf16.msra.mxu1 %v14092_v21  ;;  %v14105_v21 = vld [vmem:[#allocation2 + $0xef0] sm:$0xf0]  ;;  %v14113_v60 = vld [vmem:[#allocation2 + $0xef8] sm:$0xf0] }
 0xae2   :  { %11370 = vmatpush.bf16.msra.mxu0 %v15881_v49  ;;  %v8052_v61 = vpop.f32.mrf.mxu0  ;;  %8386 = vmatpush.bf16.msra.mxu2 %v14096_v33  ;;  %v15842_v49 = vld [vmem:[#allocation2 + $0xff4] sm:$0xf0] }
 0xae3   :  { %8399 = vmatpush.bf16.msra.mxu3 %v14100_v15  ;;  %v8753_v41 = vmul.f32 1.442695, %v8721_v57  ;;  %v14240_v58 = vor.u32 %v15842_v49, %v14239_v28  ;;  %v14111_v33 = vld [vmem:[#allocation2 + $0xe78] sm:$0xf]  ;;  %v14108_v61 = vor.u32 %v15793_v27, %v14105_v21 }
 0xae5   :  { %16269 = vpow2.f32 %v8753_v41 }
 0xae6   :  { %11371 = vmatpush.bf16.msra.mxu0 %v15880_v54  ;;  %v15794_v54 = vld [vmem:[#allocation2 + $0xe7c] sm:$0xf] }
 0xae7   :  { %v7447_v40 = vpop.f32.mrf.mxu2  ;;  %v14116_v41 = vor.u32 %v15794_v54, %v14113_v60  ;;  %v15858_v54 = vld [vmem:[#allocation3 + $0x78] sm:$0xff] }
 0xae8   :  { %v7460_v50 = vpop.f32.mrf.mxu3 }
 0xae9   :  { %v7484_v16 = vpop.f32.mrf.mxu1 }
 0xaea   :  { %11372 = vmatpush.bf16.msra.mxu0 %v15879_v19  ;;  %v18395_v32 = vadd.f32 %v7484_v16, %v18232_v39  ;;  %v8102_v11 = vpop.f32.mrf.mxu0 }
 0xaeb   :  { %v16270_v15 = vpop.eup %16269  ;;  %v8461_v56 = vadd.f32 %v8102_v11, %v18235_v37  ;;  %v14112_v37 = vor.u32 %v15810_v17, %v14111_v33 }
 0xaec   :  { %v8817_v57 = vadd.f32 1.0, %v16270_v15  ;;  %14266 = vmatmul.msk.bf16.vlgmr.msrb.gmra.mxu1 %vm306_vm2, %v18212_v13  ;;  %14267 = vmatmul.msk.bf16.vlgmr.msrb.gmra.mxu2 %vm306_vm2, %v18212_v13  ;;  %v8820_v39 = vmul.f32 -0.5, %v16270_v15  ;;  %v8823_v50 = vand.u32 2147483647, %v16270_v15 }
 0xaed   :  { %v18402_v26 = vadd.f32 %v8501_v9, %v8461_v56  ;;  %14268 = vmatmul.msk.bf16.vlgmr.msrb.gmra.mxu3 %vm306_vm2, %v18212_v13  ;;  %8424 = vmatpush.bf16.msrb.mxu1 %v14236_v22  ;;  %v15875_v22 = vld [vmem:[#allocation3 + $0x100] sm:$0xff] }
 0xaee   :  { %11373 = vmatpush.bf16.msra.mxu0 %v15878_v6  ;;  %16271 = vlog2.f32 %v8817_v57  ;;  %8437 = vmatpush.bf16.msrb.mxu2 %v14240_v58  ;;  %v8821_v40 = vadd.f32 1.0, %v8820_v39  ;;  %vm8824_vm9 = vcmp.lt.f32.partialorder %v8823_v50, 0.0004427343  ;;  %v15866_v39 = vld [vmem:[#allocation3 + $0xb8] sm:$0xff] }
 0xaef   :  { %8450 = vmatpush.bf16.msrb.mxu3 %v14244_v1  ;;  %v8693_v19 = vand.u32 2147483647, %v18402_v26  ;;  %v7497_v6 = vpop.f32.mrf.mxu2  ;;  %v18414_v1 = vld [vmem:[#allocation14 + $0x8] sm:$0xff]  ;;  %vm8629_vm12 = vcmp.ne.f32.partialorder %v18402_v26, %v18402_v26 }
 0xaf0   :  { %v18408_v10 = vadd.f32 %v7497_v6, %v18246_v12  ;;  %v7510_v28 = vpop.f32.mrf.mxu3  ;;  %v8822_v58 = vmul.f32 %v16270_v15, %v8821_v40  ;;  %v8593_v12 = vmax.f32 %v18382_v25, 0.0  ;;  %v8505_v17 = vperm.slane %v18414_v1, 0 }
 0xaf1   :  { %v8725_v49 = vsub.f32 0.0, %v8693_v19  ;;  %v18411_v53 = vadd.f32 %v7510_v28, %v18249_v18  ;;  %v7486_v20 = vpop.f32.mrf.mxu1  ;;  %8425 = vmatpush.bf16.msrb.mxu1 %v14108_v61  ;;  %v15874_v61 = vld [vmem:[#allocation3 + $0xf8] sm:$0xff]  ;;  %v15865_v28 = vld [vmem:[#allocation3 + $0xb0] sm:$0xff] }
 0xaf2   :  { %11374 = vmatpush.bf16.msra.mxu0 %v15877_v52  ;;  %v8104_v16 = vpop.f32.mrf.mxu0  ;;  %8438 = vmatpush.bf16.msrb.mxu2 %v14112_v37 }
 0xaf3   :  { %8451 = vmatpush.bf16.msrb.mxu3 %v14116_v41  ;;  %v8761_v9 = vmul.f32 1.442695, %v8725_v49 }
 0xaf4   :  { %v16272_v52 = vpop.eup %16271 }
 0xaf5   :  { %v8819_v11 = vmul.f32 0.6931472, %v16272_v52  ;;  %16273 = vpow2.f32 %v8761_v9 }
 0xaf6   :  { %11375 = vmatpush.bf16.msra.mxu0 %v15876_v3 }
 0xaf7   :  { %v8825_v18 = vsel %vm8824_vm9, %v8822_v58, %v8819_v11  ;;  %v7499_v27 = vpop.f32.mrf.mxu2  ;;  %v15856_v58 = vld [vmem:[#allocation3 + $0x68] sm:$0xff] }
 0xaf8   :  { %v9105_v21 = vadd.f32 %v8825_v18, %v8593_v12  ;;  %v7512_v33 = vpop.f32.mrf.mxu3 }
 0xaf9   :  { %v7536_v56 = vpop.f32.mrf.mxu1 }
 0xafa   :  { %11376 = vmatpush.bf16.msra.mxu0 %v15875_v22  ;;  %v9137_v15 = vsel %vm8625_vm10, %v18382_v25, %v9105_v21  ;;  %v18421_v60 = vadd.f32 %v7536_v56, %v18252_v5  ;;  %v8154_v57 = vpop.f32.mrf.mxu0  ;;  %v15857_v5 = vld [vmem:[#allocation3 + $0x70] sm:$0xff]  ;;  %v15864_v21 = vld [vmem:[#allocation3 + $0xa8] sm:$0xff] }
 0xafb   :  { %v16274_v37 = vpop.eup %16273  ;;  %16275 = vtanh.f32 %v9137_v15  ;;  %v8465_v41 = vadd.f32 %v8154_v57, %v18255_v62  ;;  %v15873_v62 = vld [vmem:[#allocation3 + $0xf0] sm:$0xff]  ;;  %v15872_v56 = vld [vmem:[#allocation3 + $0xe8] sm:$0xff] }
 0xafc   :  { %v8853_v19 = vadd.f32 1.0, %v16274_v37  ;;  %14270 = vmatmul.msk.bf16.vlgmr.msra.gmra.mxu1 %vm306_vm2, %v18212_v13  ;;  %14271 = vmatmul.msk.bf16.vlgmr.msra.gmra.mxu2 %vm306_vm2, %v18212_v13  ;;  %v8856_v6 = vmul.f32 -0.5, %v16274_v37  ;;  %v8859_v12 = vand.u32 2147483647, %v16274_v37 }
 0xafd   :  { %v18428_v3 = vadd.f32 %v8505_v17, %v8465_v41  ;;  %14272 = vmatmul.msk.bf16.vlgmr.msra.gmra.mxu3 %vm306_vm2, %v18212_v13  ;;  %11330 = vmatpush.bf16.msra.mxu1 %v15858_v54 }
 0xafe   :  { %16277 = vlog2.f32 %v8853_v19  ;;  %11343 = vmatpush.bf16.msra.mxu2 %v15866_v39  ;;  %11356 = vmatpush.bf16.msra.mxu3 %v15874_v61  ;;  %v8857_v9 = vadd.f32 1.0, %v8856_v6  ;;  %v8597_v39 = vmax.f32 %v18402_v26, 0.0  ;;  %vm8860_vm11 = vcmp.lt.f32.partialorder %v8859_v12, 0.0004427343  ;;  %v15863_v61 = vld [vmem:[#allocation3 + $0xa0] sm:$0xff]  ;;  %v15913_v19 = vld [vmem:[#allocation3 + $0x230] sm:$0xff] }
 0xaff   :  { %v8697_v40 = vand.u32 2147483647, %v18428_v3  ;;  %v7549_v49 = vpop.f32.mrf.mxu2  ;;  %v15871_v6 = vld [vmem:[#allocation3 + $0xe0] sm:$0xff]  ;;  %v15870_v12 = vld [vmem:[#allocation3 + $0xd8] sm:$0xff]  ;;  %vm8633_vm13 = vcmp.ne.f32.partialorder %v18428_v3, %v18428_v3 }
 0xb00   :  { %v18434_v20 = vadd.f32 %v7549_v49, %v18266_v38  ;;  %v7562_v50 = vpop.f32.mrf.mxu3  ;;  %v15914_v38 = vld [vmem:[#allocation3 + $0x238] sm:$0xff]  ;;  %v8858_v57 = vmul.f32 %v16274_v37, %v8857_v9 }
 0xb01   :  { %v16276_v16 = vpop.eup %16275  ;;  %v8729_v22 = vsub.f32 0.0, %v8697_v40  ;;  %v18437_v52 = vadd.f32 %v7562_v50, %v18269_v44  ;;  %v7538_v11 = vpop.f32.mrf.mxu1  ;;  %11331 = vmatpush.bf16.msra.mxu1 %v15857_v5  ;;  %v15855_v44 = vld [vmem:[#allocation3 + $0x60] sm:$0xff]  ;;  %v15854_v40 = vld [vmem:[#allocation3 + $0x58] sm:$0xff] }
 0xb02   :  { %v8156_v18 = vpop.f32.mrf.mxu0  ;;  %v9201_v27 = vmul.f32 %v16276_v16, %v18382_v25  ;;  %11344 = vmatpush.bf16.msra.mxu2 %v15865_v28  ;;  %11357 = vmatpush.bf16.msra.mxu3 %v15873_v62  ;;  %v8509_v62 = vperm.slane %v18414_v1, 4  ;;  %v15862_v9 = vld [vmem:[#allocation3 + $0x98] sm:$0xff] }
 0xb03   :  { %v8769_v33 = vmul.f32 1.442695, %v8729_v22 }
 0xb04   :  { %v16278_v17 = vpop.eup %16277  ;;  %v9233_v54 = vpack.c.bf16 %v9201_v27, %v9201_v27 }
 0xb05   :  { %v8855_v15 = vmul.f32 0.6931472, %v16278_v17  ;;  %16279 = vpow2.f32 %v8769_v33  ;;  %11332 = vmatpush.bf16.msra.mxu1 %v15856_v58  ;;  %v15912_v58 = vld [vmem:[#allocation3 + $0x228] sm:$0xff] }
 0xb06   :  { %11325 = vmatmul.bf16.vlgmr.msrb.gmra.mxu0 %v9233_v54  ;;  %11345 = vmatpush.bf16.msra.mxu2 %v15864_v21  ;;  %v15853_v21 = vld [vmem:[#allocation3 + $0x50] sm:$0xff] }
 0xb07   :  { %v8861_v25 = vsel %vm8860_vm11, %v8858_v57, %v8855_v15  ;;  %11421 = vmatpush.bf16.msrb.mxu0 %v15914_v38  ;;  %v7551_v41 = vpop.f32.mrf.mxu2  ;;  %11358 = vmatpush.bf16.msra.mxu3 %v15872_v56  ;;  %v15911_v38 = vld [vmem:[#allocation3 + $0x220] sm:$0xff]  ;;  %v15869_v56 = vld [vmem:[#allocation3 + $0xd0] sm:$0xff] }
 0xb08   :  { %v9109_v5 = vadd.f32 %v8861_v25, %v8597_v39  ;;  %v7564_v28 = vpop.f32.mrf.mxu3 }
 0xb09   :  { %v7588_v37 = vpop.f32.mrf.mxu1  ;;  %11333 = vmatpush.bf16.msra.mxu1 %v15855_v44 }
 0xb0a   :  { %v9141_v49 = vsel %vm8629_vm12, %v18402_v26, %v9109_v5  ;;  %v18446_v50 = vadd.f32 %v7588_v37, %v18272_v42  ;;  %v8206_v16 = vpop.f32.mrf.mxu0  ;;  %11346 = vmatpush.bf16.msra.mxu2 %v15863_v61  ;;  %v15852_v61 = vld [vmem:[#allocation3 + $0x48] sm:$0xff]  ;;  %v15910_v5 = vld [vmem:[#allocation3 + $0x218] sm:$0xff] }
 0xb0b   :  { %v16280_v22 = vpop.eup %16279  ;;  %16281 = vtanh.f32 %v9141_v49  ;;  %v8469_v11 = vadd.f32 %v8206_v16, %v18275_v4  ;;  %11422 = vmatpush.bf16.msrb.mxu0 %v15913_v19  ;;  %11359 = vmatpush.bf16.msra.mxu3 %v15871_v6  ;;  %v15861_v4 = vld [vmem:[#allocation3 + $0x90] sm:$0xff]  ;;  %v15860_v6 = vld [vmem:[#allocation3 + $0x88] sm:$0xff]  ;;  %v8601_v16 = vmax.f32 %v18428_v3, 0.0 }
 0xb0c   :  { %v8889_v18 = vadd.f32 1.0, %v16280_v22  ;;  %14274 = vmatmul.msk.bf16.vlgmr.msrb.gmra.mxu1 %vm306_vm2, %v18212_v13  ;;  %14275 = vmatmul.msk.bf16.vlgmr.msrb.gmra.mxu2 %vm306_vm2, %v18212_v13  ;;  %v8892_v42 = vmul.f32 -0.5, %v16280_v22  ;;  %v8895_v25 = vand.u32 2147483647, %v16280_v22 }
 0xb0d   :  { %v18453_v27 = vadd.f32 %v8509_v62, %v8469_v11  ;;  %14276 = vmatmul.msk.bf16.vlgmr.msrb.gmra.mxu3 %vm306_vm2, %v18212_v13  ;;  %11334 = vmatpush.bf16.msra.mxu1 %v15854_v40 }
 0xb0e   :  { %16283 = vlog2.f32 %v8889_v18  ;;  %11347 = vmatpush.bf16.msra.mxu2 %v15862_v9  ;;  %v8893_v44 = vadd.f32 1.0, %v8892_v42  ;;  %vm8896_vm2 = vcmp.lt.f32.partialorder %v8895_v25, 0.0004427343  ;;  %v15890_v9 = vld [vmem:[#allocation3 + $0x178] sm:$0xff]  ;;  %v15867_v18 = vld [vmem:[#allocation3 + $0xc0] sm:$0xff]  ;;  %v18473_v25 = vld [vmem:[#allocation14 + $0x10] sm:$0xff] }
 0xb0f   :  { %11423 = vmatpush.bf16.msrb.mxu0 %v15912_v58  ;;  %v7601_v33 = vpop.f32.mrf.mxu2  ;;  %11360 = vmatpush.bf16.msra.mxu3 %v15870_v12  ;;  %v8701_v17 = vand.u32 2147483647, %v18453_v27  ;;  %v15909_v12 = vld [vmem:[#allocation3 + $0x210] sm:$0xff]  ;;  %vm8637_vm0 = vcmp.ne.f32.partialorder %v18453_v27, %v18453_v27 }
 0xb10   :  { %v18459_v54 = vadd.f32 %v7601_v33, %v18286_v36  ;;  %v7614_v15 = vpop.f32.mrf.mxu3  ;;  %v15868_v36 = vld [vmem:[#allocation3 + $0xc8] sm:$0xff]  ;;  %v8894_v49 = vmul.f32 %v16280_v22, %v8893_v44  ;;  %v8498_v22 = vperm.slane %v18371_v7, 1  ;;  %v15898_v33 = vld [vmem:[#allocation3 + $0x1b8] sm:$0xff]  ;;  %v15889_v44 = vld [vmem:[#allocation3 + $0x170] sm:$0xff] }
 0xb11   :  { %v16282_v57 = vpop.eup %16281  ;;  %v18462_v13 = vadd.f32 %v7614_v15, %v18289_v63  ;;  %v7590_v39 = vpop.f32.mrf.mxu1  ;;  %11335 = vmatpush.bf16.msra.mxu1 %v15853_v21  ;;  %v8733_v37 = vsub.f32 0.0, %v8701_v17  ;;  %v15851_v63 = vld [vmem:[#allocation3 + $0x40] sm:$0xff] }
 0xb12   :  { %v8208_v41 = vpop.f32.mrf.mxu0  ;;  %v9205_v19 = vmul.f32 %v16282_v57, %v18402_v26  ;;  %11348 = vmatpush.bf16.msra.mxu2 %v15861_v4  ;;  %v15859_v26 = vld [vmem:[#allocation3 + $0x80] sm:$0xff]  ;;  %v15908_v39 = vld [vmem:[#allocation3 + $0x208] sm:$0xff] }
 0xb13   :  { %11424 = vmatpush.bf16.msrb.mxu0 %v15911_v38  ;;  %11361 = vmatpush.bf16.msra.mxu3 %v15869_v56  ;;  %v8777_v21 = vmul.f32 1.442695, %v8733_v37  ;;  %v15906_v38 = vld [vmem:[#allocation3 + $0x1f8] sm:$0xff]  ;;  %v8499_v41 = vperm.slane %v18371_v7, 2  ;;  %v15907_v37 = vld [vmem:[#allocation3 + $0x200] sm:$0xff] }
 0xb14   :  { %v16284_v28 = vpop.eup %16283  ;;  %v9237_v62 = vpack.c.bf16 %v9205_v19, %v9205_v19  ;;  %v15888_v19 = vld [vmem:[#allocation3 + $0x168] sm:$0xff] }
 0xb15   :  { %v8891_v40 = vmul.f32 0.6931472, %v16284_v28  ;;  %11336 = vmatpush.bf16.msra.mxu1 %v15852_v61  ;;  %v8500_v28 = vperm.slane %v18371_v7, 3 }
 0xb16   :  { %11377 = vmatmul.bf16.vlgmr.msra.gmra.mxu0 %v9237_v62  ;;  %11349 = vmatpush.bf16.msra.mxu2 %v15860_v6  ;;  %v15905_v6 = vld [vmem:[#allocation3 + $0x1f0] sm:$0xff] }
 0xb17   :  { %v8897_v11 = vsel %vm8896_vm2, %v8894_v49, %v8891_v40  ;;  %11425 = vmatpush.bf16.msrb.mxu0 %v15910_v5  ;;  %v7603_v58 = vpop.f32.mrf.mxu2  ;;  %11362 = vmatpush.bf16.msra.mxu3 %v15868_v36  ;;  %v15946_v49 = vld [vmem:[#allocation3 + $0x338] sm:$0xff] }
 0xb18   :  { %v9113_v42 = vadd.f32 %v8897_v11, %v8601_v16  ;;  %v7616_v4 = vpop.f32.mrf.mxu3 }
 0xb19   :  { %v8063_v56 = vpop.f32.mrf.mxu1  ;;  %11337 = vmatpush.bf16.msra.mxu1 %v15851_v63  ;;  %v15896_v4 = vld [vmem:[#allocation3 + $0x1a8] sm:$0xff] }
 0xb1a   :  { %v9145_v17 = vsel %vm8633_vm13, %v18428_v3, %v9113_v42  ;;  %v8458_v15 = vadd.f32 %v8063_v56, %v18292_v24  ;;  %v8258_v57 = vpop.f32.mrf.mxu0  ;;  %11350 = vmatpush.bf16.msra.mxu2 %v15859_v26  ;;  %v15897_v24 = vld [vmem:[#allocation3 + $0x1b0] sm:$0xff]  ;;  %v8513_v26 = vperm.slane %v18473_v25, 0 }
 0xb1b   :  { %16285 = vtanh.f32 %v9145_v17  ;;  %11426 = vmatpush.bf16.msrb.mxu0 %v15909_v12  ;;  %11363 = vmatpush.bf16.msra.mxu3 %v15867_v18  ;;  %v15945_v17 = vld [vmem:[#allocation3 + $0x330] sm:$0xff] }
 0xb1c   :  { %16287 = vpow2.f32 %v8777_v21  ;;  %v18471_v61 = vadd.f32 %v8498_v22, %v8458_v15  ;;  %v15887_v21 = vld [vmem:[#allocation3 + $0x160] sm:$0xff]  ;;  %v15904_v22 = vld [vmem:[#allocation3 + $0x1e8] sm:$0xff] }
 0xb1d   :  { %11382 = vmatpush.bf16.msrb.mxu1 %v15890_v9  ;;  %v8473_v9 = vadd.f32 %v8258_v57, %v18295_v31 }
 0xb1e   :  { %11395 = vmatpush.bf16.msrb.mxu2 %v15898_v33  ;;  %v8690_v5 = vand.u32 2147483647, %v18471_v61  ;;  %vm8626_vm1 = vcmp.ne.f32.partialorder %v18471_v61, %v18471_v61 }
 0xb1f   :  { %11408 = vmatpush.bf16.msrb.mxu3 %v15906_v38  ;;  %11427 = vmatpush.bf16.msrb.mxu0 %v15908_v39  ;;  %v8076_v36 = vpop.f32.mrf.mxu2  ;;  %v18491_v56 = vadd.f32 %v8513_v26, %v8473_v9  ;;  %v15895_v39 = vld [vmem:[#allocation3 + $0x1a0] sm:$0xff]  ;;  %v15894_v9 = vld [vmem:[#allocation3 + $0x198] sm:$0xff] }
 0xb20   :  { %v8459_v62 = vadd.f32 %v8076_v36, %v18306_v23  ;;  %v8089_v40 = vpop.f32.mrf.mxu3  ;;  %v8722_v16 = vsub.f32 0.0, %v8690_v5  ;;  %v15902_v26 = vld [vmem:[#allocation3 + $0x1d8] sm:$0xff] }
 0xb21   :  { %11383 = vmatpush.bf16.msrb.mxu1 %v15889_v44  ;;  %v16286_v63 = vpop.eup %16285  ;;  %v8460_v11 = vadd.f32 %v8089_v40, %v18309_v2  ;;  %v8065_v58 = vpop.f32.mrf.mxu1  ;;  %v15886_v44 = vld [vmem:[#allocation3 + $0x158] sm:$0xff]  ;;  %v8705_v36 = vand.u32 2147483647, %v18491_v56  ;;  %vm8641_vm7 = vcmp.ne.f32.partialorder %v18491_v56, %v18491_v56 }
 0xb22   :  { %11396 = vmatpush.bf16.msrb.mxu2 %v15897_v24  ;;  %v18482_v12 = vpop.eup %16287  ;;  %v18484_v18 = vadd.f32 %v8499_v41, %v8459_v62  ;;  %v8260_v42 = vpop.f32.mrf.mxu0  ;;  %v9209_v23 = vmul.f32 %v16286_v63, %v18428_v3  ;;  %v8755_v33 = vmul.f32 1.442695, %v8722_v16  ;;  %v15903_v41 = vld [vmem:[#allocation3 + $0x1e0] sm:$0xff]  ;;  %v15944_v62 = vld [vmem:[#allocation3 + $0x328] sm:$0xff]  ;;  %v15885_v16 = vld [vmem:[#allocation3 + $0x150] sm:$0xff] }
 0xb23   :  { %11409 = vmatpush.bf16.msrb.mxu3 %v15905_v6  ;;  %v18487_v38 = vadd.f32 %v8500_v28, %v8460_v11  ;;  %11428 = vmatpush.bf16.msrb.mxu0 %v15907_v37  ;;  %v8925_v2 = vadd.f32 1.0, %v18482_v12  ;;  %v8502_v37 = vperm.slane %v18371_v7, 5  ;;  %v8928_v58 = vmul.f32 -0.5, %v18482_v12 }
 0xb24   :  { %v8691_v31 = vand.u32 2147483647, %v18484_v18  ;;  %16289 = vpow2.f32 %v8755_v33  ;;  %v9241_v57 = vpack.c.bf16 %v9209_v23, %v9209_v23  ;;  %v8737_v23 = vsub.f32 0.0, %v8705_v36 }
 0xb25   :  { %11384 = vmatpush.bf16.msrb.mxu1 %v15888_v19  ;;  %v8692_v15 = vand.u32 2147483647, %v18487_v38  ;;  %16291 = vlog2.f32 %v8925_v2  ;;  %v8929_v2 = vadd.f32 1.0, %v8928_v58  ;;  %vm8627_vm5 = vcmp.ne.f32.partialorder %v18484_v18, %v18484_v18 }
 0xb26   :  { %11397 = vmatpush.bf16.msrb.mxu2 %v15896_v4  ;;  %v8723_v3 = vsub.f32 0.0, %v8691_v31  ;;  %11429 = vmatmul.bf16.vlgmr.msrb.gmra.mxu0 %v9241_v57  ;;  %v15943_v4 = vld [vmem:[#allocation3 + $0x320] sm:$0xff]  ;;  %v15884_v31 = vld [vmem:[#allocation3 + $0x148] sm:$0xff]  ;;  %vm8628_vm6 = vcmp.ne.f32.partialorder %v18487_v38, %v18487_v38 }
 0xb27   :  { %11473 = vmatpush.bf16.msra.mxu0 %v15946_v49  ;;  %11410 = vmatpush.bf16.msrb.mxu3 %v15904_v22  ;;  %v8078_v19 = vpop.f32.mrf.mxu2  ;;  %v8724_v6 = vsub.f32 0.0, %v8692_v15 }
 0xb28   :  { %v8757_v24 = vmul.f32 1.442695, %v8723_v3  ;;  %v8091_v5 = vpop.f32.mrf.mxu3  ;;  %v15942_v19 = vld [vmem:[#allocation3 + $0x318] sm:$0xff] }
 0xb29   :  { %11385 = vmatpush.bf16.msrb.mxu1 %v15887_v21  ;;  %v8115_v28 = vpop.f32.mrf.mxu1  ;;  %v8759_v40 = vmul.f32 1.442695, %v8724_v6 }
 0xb2a   :  { %11398 = vmatpush.bf16.msrb.mxu2 %v15895_v39  ;;  %v8462_v49 = vadd.f32 %v8115_v28, %v18312_v48  ;;  %v8310_v63 = vpop.f32.mrf.mxu0  ;;  %v16290_v11 = vpop.eup %16289  ;;  %16293 = vpow2.f32 %v8757_v24  ;;  %v8503_v39 = vperm.slane %v18371_v7, 6 }
 0xb2b   :  { %11474 = vmatpush.bf16.msra.mxu0 %v15945_v17  ;;  %11411 = vmatpush.bf16.msrb.mxu3 %v15903_v41  ;;  %v8826_v42 = vadd.f32 1.0, %v16290_v11  ;;  %16295 = vpow2.f32 %v8759_v40  ;;  %v16292_v48 = vpop.eup %16291  ;;  %v8829_v22 = vmul.f32 -0.5, %v16290_v11  ;;  %v8931_v17 = vand.u32 2147483647, %v18482_v12 }
 0xb2c   :  { %v18498_v21 = vadd.f32 %v8502_v37, %v8462_v49  ;;  %v8927_v6 = vmul.f32 0.6931472, %v16292_v48  ;;  %v8930_v40 = vmul.f32 %v18482_v12, %v8929_v2  ;;  %v8605_v12 = vmax.f32 %v18453_v27, 0.0  ;;  %v15892_v2 = vld [vmem:[#allocation3 + $0x188] sm:$0xff] }
 0xb2d   :  { %11386 = vmatpush.bf16.msrb.mxu1 %v15886_v44  ;;  %16297 = vlog2.f32 %v8826_v42  ;;  %v8785_v44 = vmul.f32 1.442695, %v8737_v23  ;;  %v8830_v37 = vadd.f32 1.0, %v8829_v22  ;;  %vm18509_vm14 = vcmp.lt.f32.partialorder %v8931_v17, 0.0004427343 }
 0xb2e   :  { %11399 = vmatpush.bf16.msrb.mxu2 %v15894_v9  ;;  %v8694_v3 = vand.u32 2147483647, %v18498_v21  ;;  %v8933_v23 = vsel %vm18509_vm14, %v8930_v40, %v8927_v6  ;;  %v8517_v22 = vperm.slane %v18473_v25, 4  ;;  %v8477_v17 = vadd.f32 %v8310_v63, %v18315_v30 }
 0xb2f   :  { %11475 = vmatpush.bf16.msra.mxu0 %v15944_v62  ;;  %11412 = vmatpush.bf16.msrb.mxu3 %v15902_v26  ;;  %v8128_v33 = vpop.f32.mrf.mxu2  ;;  %16299 = vpow2.f32 %v8785_v44  ;;  %v8831_v48 = vmul.f32 %v16290_v11, %v8830_v37  ;;  %v8594_v6 = vmax.f32 %v18471_v61, 0.0  ;;  %v15893_v37 = vld [vmem:[#allocation3 + $0x190] sm:$0xff]  ;;  %vm8630_vm10 = vcmp.ne.f32.partialorder %v18498_v21, %v18498_v21 }
 0xb30   :  { %v8141_v15 = vpop.f32.mrf.mxu3  ;;  %v18502_v57 = vpop.eup %16293  ;;  %v8726_v5 = vsub.f32 0.0, %v8694_v3  ;;  %v8463_v36 = vadd.f32 %v8128_v33, %v18326_v45  ;;  %v15941_v45 = vld [vmem:[#allocation3 + $0x310] sm:$0xff]  ;;  %v8504_v33 = vperm.slane %v18371_v7, 7  ;;  %v18541_v40 = vadd.f32 %v8517_v22, %v8477_v17  ;;  %v15900_v17 = vld [vmem:[#allocation3 + $0x1c8] sm:$0xff] }
 0xb31   :  { %11387 = vmatpush.bf16.msrb.mxu1 %v15885_v16  ;;  %v8117_v41 = vpop.f32.mrf.mxu1  ;;  %v18505_v24 = vpop.eup %16295  ;;  %v8832_v16 = vand.u32 2147483647, %v16290_v11  ;;  %v8835_v9 = vadd.f32 1.0, %v18502_v57  ;;  %v8464_v11 = vadd.f32 %v8141_v15, %v18329_v51  ;;  %v8838_v30 = vmul.f32 -0.5, %v18502_v57  ;;  %v15901_v51 = vld [vmem:[#allocation3 + $0x1d0] sm:$0xff] }
 0xb32   :  { %v8312_v28 = vpop.f32.mrf.mxu0  ;;  %v8844_v58 = vadd.f32 1.0, %v18505_v24  ;;  %v18515_v42 = vadd.f32 %v8503_v39, %v8463_v36  ;;  %v9117_v39 = vadd.f32 %v8933_v23, %v8605_v12  ;;  %11400 = vmatpush.bf16.msrb.mxu2 %v15893_v37 }
 0xb33   :  { %11476 = vmatpush.bf16.msra.mxu0 %v15943_v4  ;;  %v16298_v62 = vpop.eup %16297  ;;  %v8763_v4 = vmul.f32 1.442695, %v8726_v5  ;;  %vm18522_vm15 = vcmp.lt.f32.partialorder %v8832_v16, 0.0004427343  ;;  %16301 = vlog2.f32 %v8835_v9  ;;  %v18544_v9 = vadd.f32 %v8504_v33, %v8464_v11  ;;  %11413 = vmatpush.bf16.msrb.mxu3 %v15901_v51  ;;  %v15977_v51 = vld [vmem:[#allocation3 + $0x430] sm:$0xff] }
 0xb34   :  { %v8828_v26 = vmul.f32 0.6931472, %v16298_v62  ;;  %v8695_v3 = vand.u32 2147483647, %v18515_v42  ;;  %16303 = vlog2.f32 %v8844_v58  ;;  %v8847_v62 = vmul.f32 -0.5, %v18505_v24  ;;  %v15939_v58 = vld [vmem:[#allocation3 + $0x300] sm:$0xff] }
 0xb35   :  { %11388 = vmatpush.bf16.msrb.mxu1 %v15884_v31  ;;  %16305 = vpow2.f32 %v8763_v4  ;;  %v18532_v28 = vpop.eup %16299  ;;  %v9149_v16 = vsel %vm8637_vm0, %v18453_v27, %v9117_v39  ;;  %v8841_v4 = vand.u32 2147483647, %v18502_v57  ;;  %v8839_v33 = vadd.f32 1.0, %v8838_v30 }
 0xb36   :  { %v8834_v41 = vsel %vm18522_vm15, %v8831_v48, %v8828_v26  ;;  %v8727_v5 = vsub.f32 0.0, %v8695_v3  ;;  %v8506_v26 = vperm.slane %v18414_v1, 1  ;;  %v8961_v23 = vadd.f32 1.0, %v18532_v28  ;;  %v15978_v48 = vld [vmem:[#allocation3 + $0x438] sm:$0xff]  ;;  %11401 = vmatpush.bf16.msrb.mxu2 %v15892_v2 }
 0xb37   :  { %11477 = vmatpush.bf16.msra.mxu0 %v15942_v19  ;;  %v8130_v31 = vpop.f32.mrf.mxu2  ;;  %v15940_v19 = vld [vmem:[#allocation3 + $0x308] sm:$0xff]  ;;  %v9106_v15 = vadd.f32 %v8834_v41, %v8594_v6  ;;  %v8848_v39 = vadd.f32 1.0, %v8847_v62  ;;  %v8709_v41 = vand.u32 2147483647, %v18541_v40  ;;  %vm18560_vm3 = vcmp.lt.f32.partialorder %v8841_v4, 0.0004427343  ;;  %11414 = vmatpush.bf16.msrb.mxu3 %v15900_v17 }
 0xb38   :  { %v8143_v44 = vpop.f32.mrf.mxu3  ;;  %v8765_v49 = vmul.f32 1.442695, %v8727_v5  ;;  %v8507_v4 = vperm.slane %v18414_v1, 2  ;;  %v15976_v17 = vld [vmem:[#allocation3 + $0x428] sm:$0xff]  ;;  %vm8631_vm2 = vcmp.ne.f32.partialorder %v18515_v42, %v18515_v42  ;;  %vm8632_vm13 = vcmp.ne.f32.partialorder %v18544_v9, %v18544_v9 }
 0xb39   :  { %v8167_v7 = vpop.f32.mrf.mxu1  ;;  %v9138_v44 = vsel %vm8626_vm1, %v18471_v61, %v9106_v15  ;;  %v8840_v15 = vmul.f32 %v18502_v57, %v8839_v33  ;;  %v8741_v33 = vsub.f32 0.0, %v8709_v41 }
 0xb3a   :  { %v8362_v36 = vpop.f32.mrf.mxu0  ;;  %16307 = vpow2.f32 %v8765_v49  ;;  %v8466_v12 = vadd.f32 %v8167_v7, %v18332_v55  ;;  %v8850_v7 = vand.u32 2147483647, %v18505_v24 }
 0xb3b   :  { %11478 = vmatpush.bf16.msra.mxu0 %v15941_v45  ;;  %v18538_v63 = vadd.f32 %v8362_v36, %v18335_v47  ;;  %v15883_v45 = vld [vmem:[#allocation3 + $0x140] sm:$0xff]  ;;  %v16302_v47 = vpop.eup %16301  ;;  %16309 = vtanh.f32 %v9149_v16 }
 0xb3c   :  { %v16304_v22 = vpop.eup %16303  ;;  %11389 = vmatpush.bf16.msrb.mxu1 %v15883_v45  ;;  %v8837_v55 = vmul.f32 0.6931472, %v16302_v47  ;;  %16311 = vlog2.f32 %v8961_v23  ;;  %v18564_v30 = vadd.f32 %v8506_v26, %v8466_v12  ;;  %v15891_v16 = vld [vmem:[#allocation3 + $0x180] sm:$0xff]  ;;  %v8849_v47 = vmul.f32 %v18505_v24, %v8848_v39 }
 0xb3d   :  { %v18552_v3 = vpop.eup %16305  ;;  %v8846_v36 = vmul.f32 0.6931472, %v16304_v22  ;;  %16313 = vtanh.f32 %v9138_v44  ;;  %v8595_v12 = vmax.f32 %v18484_v18, 0.0  ;;  %vm18577_vm4 = vcmp.lt.f32.partialorder %v8850_v7, 0.0004427343  ;;  %11402 = vmatpush.bf16.msrb.mxu2 %v15891_v16 }
 0xb3e   :  { %v8862_v62 = vadd.f32 1.0, %v18552_v3  ;;  %v8698_v23 = vand.u32 2147483647, %v18564_v30  ;;  %v8843_v57 = vsel %vm18560_vm3, %v8840_v15, %v8837_v55  ;;  %v8609_v39 = vmax.f32 %v18491_v56, 0.0 }
 0xb3f   :  { %11479 = vmatpush.bf16.msra.mxu0 %v15940_v19  ;;  %v8180_v31 = vpop.f32.mrf.mxu2  ;;  %v8696_v19 = vand.u32 2147483647, %v18544_v9  ;;  %v8852_v24 = vsel %vm18577_vm4, %v8849_v47, %v8846_v36  ;;  %v8964_v55 = vmul.f32 -0.5, %v18532_v28  ;;  %v8596_v7 = vmax.f32 %v18487_v38, 0.0 }
 0xb40   :  { %v18556_v11 = vpop.f32.mrf.mxu3  ;;  %v18568_v45 = vpop.eup %16307  ;;  %v8467_v26 = vadd.f32 %v8180_v31, %v18346_v0  ;;  %v8730_v0 = vsub.f32 0.0, %v8698_v23  ;;  %v18584_v31 = vld [vmem:[#allocation14 + $0x18] sm:$0xff]  ;;  %16315 = vlog2.f32 %v8862_v62  ;;  %v9107_v5 = vadd.f32 %v8843_v57, %v8595_v12 }
 0xb41   :  { %v8169_v6 = vpop.f32.mrf.mxu1  ;;  %v8728_v49 = vsub.f32 0.0, %v8696_v19  ;;  %v8871_v2 = vadd.f32 1.0, %v18568_v45  ;;  %v16310_v44 = vpop.eup %16309  ;;  %v8967_v62 = vand.u32 2147483647, %v18532_v28  ;;  %v8793_v47 = vmul.f32 1.442695, %v8741_v33 }
 0xb42   :  { %v8364_v37 = vpop.f32.mrf.mxu0  ;;  %v16312_v6 = vpop.eup %16311  ;;  %v8771_v41 = vmul.f32 1.442695, %v8730_v0  ;;  %v18589_v36 = vadd.f32 %v8507_v4, %v8467_v26  ;;  %v15975_v26 = vld [vmem:[#allocation3 + $0x420] sm:$0xff]  ;;  %v8965_v4 = vadd.f32 1.0, %v8964_v55  ;;  %v8468_v57 = vadd.f32 %v18556_v11, %v18349_v35  ;;  %v15922_v55 = vld [vmem:[#allocation3 + $0x278] sm:$0xff] }
 0xb43   :  { %11480 = vmatpush.bf16.msra.mxu0 %v15939_v58  ;;  %v15899_v58 = vld [vmem:[#allocation3 + $0x1c0] sm:$0xff]  ;;  %v8767_v22 = vmul.f32 1.442695, %v8728_v49  ;;  %v16314_v15 = vpop.eup %16313  ;;  %v8521_v49 = vperm.slane %v18584_v31, 0  ;;  %v8963_v0 = vmul.f32 0.6931472, %v16312_v6  ;;  %vm8634_vm1 = vcmp.ne.f32.partialorder %v18564_v30, %v18564_v30 }
 0xb44   :  { %11415 = vmatpush.bf16.msrb.mxu3 %v15899_v58  ;;  %v8865_v58 = vmul.f32 -0.5, %v18552_v3  ;;  %v8699_v12 = vand.u32 2147483647, %v18589_v36  ;;  %v9202_v33 = vmul.f32 %v16314_v15, %v18471_v61  ;;  %v8874_v35 = vmul.f32 -0.5, %v18568_v45 }
 0xb45   :  { %16317 = vpow2.f32 %v8767_v22  ;;  %v9139_v22 = vsel %vm8627_vm5, %v18484_v18, %v9107_v5  ;;  %v8868_v61 = vand.u32 2147483647, %v18552_v3  ;;  %vm18631_vm8 = vcmp.lt.f32.partialorder %v8967_v62, 0.0004427343  ;;  %v15973_v62 = vld [vmem:[#allocation3 + $0x410] sm:$0xff] }
 0xb46   :  { %16319 = vlog2.f32 %v8871_v2  ;;  %v16316_v2 = vpop.eup %16315  ;;  %v8731_v11 = vsub.f32 0.0, %v8699_v12  ;;  %vm8635_vm3 = vcmp.ne.f32.partialorder %v18589_v36, %v18589_v36 }
 0xb47   :  { %11525 = vmatpush.bf16.msrb.mxu0 %v15978_v48  ;;  %v8182_v19 = vpop.f32.mrf.mxu2  ;;  %v8508_v48 = vperm.slane %v18414_v1, 3  ;;  %16321 = vpow2.f32 %v8771_v41  ;;  %v9234_v41 = vpack.c.bf16 %v9202_v33, %v9202_v33  ;;  %vm18642_vm9 = vcmp.lt.f32.partialorder %v8868_v61, 0.0004427343 }
 0xb48   :  { %v8195_v37 = vpop.f32.mrf.mxu3  ;;  %v8866_v19 = vadd.f32 1.0, %v8865_v58  ;;  %16323 = vpow2.f32 %v8793_v47  ;;  %v8773_v58 = vmul.f32 1.442695, %v8731_v11  ;;  %v8877_v11 = vand.u32 2147483647, %v18568_v45 }
 0xb49   :  { %v18596_v16 = vpop.f32.mrf.mxu1  ;;  %16325 = vtanh.f32 %v9139_v22  ;;  %v18621_v6 = vadd.f32 %v8508_v48, %v8468_v57  ;;  %11338 = vmatmul.bf16.vlgmr.msra.gmra.mxu1 %v9234_v41  ;;  %v8875_v48 = vadd.f32 1.0, %v8874_v35  ;;  %v15921_v22 = vld [vmem:[#allocation3 + $0x270] sm:$0xff] }
 0xb4a   :  { %v18600_v23 = vpop.f32.mrf.mxu0  ;;  %11434 = vmatpush.bf16.msra.mxu1 %v15922_v55  ;;  %vm18660_vm11 = vcmp.lt.f32.partialorder %v8877_v11, 0.0004427343 }
 0xb4b   :  { %11526 = vmatpush.bf16.msrb.mxu0 %v15977_v51  ;;  %v9108_v51 = vadd.f32 %v8852_v24, %v8596_v7  ;;  %v9213_v24 = vmul.f32 %v16310_v44, %v18453_v27  ;;  %v18617_v7 = vpop.eup %16317  ;;  %v15974_v27 = vld [vmem:[#allocation3 + $0x418] sm:$0xff]  ;;  %v8876_v61 = vmul.f32 %v18568_v45, %v8875_v48  ;;  %v18667_v45 = vadd.f32 %v18600_v23, %v18355_v43 }
 0xb4c   :  { %v8880_v44 = vadd.f32 1.0, %v18617_v7  ;;  %v16320_v15 = vpop.eup %16319  ;;  %v8883_v12 = vmul.f32 -0.5, %v18617_v7  ;;  %vm8636_vm5 = vcmp.ne.f32.partialorder %v18621_v6, %v18621_v6 }
 0xb4d   :  { %v9245_v5 = vpack.c.bf16 %v9213_v24, %v9213_v24  ;;  %v18635_v33 = vpop.eup %16321  ;;  %v8873_v55 = vmul.f32 0.6931472, %v16320_v15 }
 0xb4e   :  { %v18647_v41 = vpop.eup %16323  ;;  %v8898_v15 = vadd.f32 1.0, %v18635_v33  ;;  %11435 = vmatpush.bf16.msra.mxu1 %v15921_v22  ;;  %v8599_v22 = vmax.f32 %v18515_v42, 0.0 }
 0xb4f   :  { %11527 = vmatpush.bf16.msrb.mxu0 %v15976_v17  ;;  %v9140_v17 = vsel %vm8628_vm6, %v18487_v38, %v9108_v51  ;;  %v18623_v37 = vpop.f32.mrf.mxu2  ;;  %v8864_v51 = vmul.f32 0.6931472, %v16316_v2  ;;  %v8598_v2 = vmax.f32 %v18498_v21, 0.0  ;;  %vm8645_vm6 = vcmp.ne.f32.partialorder %v18541_v40, %v18541_v40 }
 0xb50   :  { %16327 = vtanh.f32 %v9140_v17  ;;  %11481 = vmatmul.bf16.vlgmr.msra.gmra.mxu0 %v9245_v5  ;;  %v18626_v47 = vpop.f32.mrf.mxu3  ;;  %v8867_v17 = vmul.f32 %v18552_v3, %v8866_v19  ;;  %v8700_v5 = vand.u32 2147483647, %v18621_v6  ;;  %v8884_v19 = vadd.f32 1.0, %v8883_v12 }
 0xb51   :  { %16329 = vlog2.f32 %v8880_v44  ;;  %v8221_v24 = vpop.f32.mrf.mxu1  ;;  %v8886_v44 = vand.u32 2147483647, %v18617_v7 }
 0xb52   :  { %16331 = vpow2.f32 %v8773_v58  ;;  %v8870_v3 = vsel %vm18642_vm9, %v8867_v17, %v8864_v51  ;;  %v8732_v58 = vsub.f32 0.0, %v8700_v5  ;;  %v8879_v17 = vsel %vm18660_vm11, %v8876_v61, %v8873_v55  ;;  %v15919_v5 = vld [vmem:[#allocation3 + $0x260] sm:$0xff]  ;;  %v16010_v51 = vld [vmem:[#allocation3 + $0x538] sm:$0xff] }
 0xb53   :  { %11528 = vmatpush.bf16.msrb.mxu0 %v15975_v26  ;;  %v8966_v26 = vmul.f32 %v18532_v28, %v8965_v4  ;;  %v8416_v28 = vpop.f32.mrf.mxu0  ;;  %v9110_v48 = vadd.f32 %v8870_v3, %v8598_v2  ;;  %vm18678_vm12 = vcmp.lt.f32.partialorder %v8886_v44, 0.0004427343  ;;  %16333 = vlog2.f32 %v8898_v15  ;;  %v15930_v44 = vld [vmem:[#allocation3 + $0x2b8] sm:$0xff] }
 0xb54   :  { %v9111_v61 = vadd.f32 %v8879_v17, %v8599_v22 }
 0xb55   :  { %v8969_v4 = vsel %vm18631_vm8, %v8966_v26, %v8963_v0  ;;  %v16326_v0 = vpop.eup %16325  ;;  %v15920_v26 = vld [vmem:[#allocation3 + $0x268] sm:$0xff] }
 0xb56   :  { %v16328_v57 = vpop.eup %16327  ;;  %v9121_v24 = vadd.f32 %v8969_v4, %v8609_v39  ;;  %v8775_v39 = vmul.f32 1.442695, %v8732_v58  ;;  %v9203_v43 = vmul.f32 %v16326_v0, %v18484_v18  ;;  %11436 = vmatpush.bf16.msra.mxu1 %v15920_v26  ;;  %v8600_v18 = vmax.f32 %v18544_v9, 0.0 }
 0xb57   :  { %11529 = vmatpush.bf16.msrb.mxu0 %v15974_v27  ;;  %v8470_v27 = vadd.f32 %v18596_v16, %v18352_v8  ;;  %v8510_v8 = vperm.slane %v18414_v1, 5  ;;  %v15972_v16 = vld [vmem:[#allocation3 + $0x408] sm:$0xff]  ;;  %v16330_v12 = vpop.eup %16329  ;;  %v8234_v11 = vpop.f32.mrf.mxu2  ;;  %v8885_v1 = vmul.f32 %v18617_v7, %v8884_v19  ;;  %v9204_v55 = vmul.f32 %v16328_v57, %v18487_v38 }
 0xb58   :  { %v18672_v28 = vpop.eup %16331  ;;  %v8882_v4 = vmul.f32 0.6931472, %v16330_v12  ;;  %v8247_v23 = vpop.f32.mrf.mxu3  ;;  %v9153_v7 = vsel %vm8641_vm7, %v18491_v56, %v9121_v24  ;;  %16335 = vpow2.f32 %v8775_v39  ;;  %v9142_v38 = vsel %vm8630_vm10, %v18498_v21, %v9110_v48  ;;  %v15938_v24 = vld [vmem:[#allocation3 + $0x2f8] sm:$0xff]  ;;  %v15929_v39 = vld [vmem:[#allocation3 + $0x2b0] sm:$0xff] }
 0xb59   :  { %v18675_v35 = vadd.f32 %v8510_v8, %v8470_v27  ;;  %v8907_v2 = vadd.f32 1.0, %v18672_v28  ;;  %v18684_v3 = vpop.f32.mrf.mxu1  ;;  %v15971_v27 = vld [vmem:[#allocation3 + $0x400] sm:$0xff]  ;;  %v8997_v0 = vadd.f32 1.0, %v18647_v41  ;;  %v18701_v58 = vadd.f32 %v8521_v49, %v18538_v63  ;;  %v15918_v48 = vld [vmem:[#allocation3 + $0x258] sm:$0xff]  ;;  %v16334_v22 = vpop.eup %16333 }
 0xb5a   :  { %v8888_v19 = vsel %vm18678_vm12, %v8885_v1, %v8882_v4  ;;  %v9235_v57 = vpack.c.bf16 %v9203_v43, %v9203_v43  ;;  %v9000_v8 = vmul.f32 -0.5, %v18647_v41  ;;  %v9236_v12 = vpack.c.bf16 %v9204_v55, %v9204_v55  ;;  %11437 = vmatpush.bf16.msra.mxu1 %v15919_v5  ;;  %v16461_v23 = vld [vmem:[#allocation14 + $0x8] sm:$0xff] }
 0xb5b   :  { %11530 = vmatpush.bf16.msrb.mxu0 %v15973_v62  ;;  %16337 = vlog2.f32 %v8907_v2  ;;  %v9112_v15 = vadd.f32 %v8888_v19, %v8600_v18  ;;  %v8702_v26 = vand.u32 2147483647, %v18675_v35  ;;  %v8910_v63 = vmul.f32 -0.5, %v18672_v28  ;;  %v15937_v2 = vld [vmem:[#allocation3 + $0x2f0] sm:$0xff] }
 0xb5c   :  { %16339 = vtanh.f32 %v9153_v7  ;;  %11351 = vmatmul.bf16.vlgmr.msra.gmra.mxu2 %v9235_v57  ;;  %v9143_v17 = vsel %vm8631_vm2, %v18515_v42, %v9111_v61  ;;  %11364 = vmatmul.bf16.vlgmr.msra.gmra.mxu3 %v9236_v12  ;;  %v8713_v1 = vand.u32 2147483647, %v18701_v58  ;;  %v8471_v43 = vadd.f32 %v18623_v37, %v18366_v34  ;;  %v15928_v57 = vld [vmem:[#allocation3 + $0x2a8] sm:$0xff] }
 0xb5d   :  { %16341 = vtanh.f32 %v9142_v38  ;;  %v8734_v49 = vsub.f32 0.0, %v8702_v26  ;;  %11447 = vmatpush.bf16.msra.mxu2 %v15930_v44  ;;  %v9144_v4 = vsel %vm8632_vm13, %v18544_v9, %v9112_v15  ;;  %11460 = vmatpush.bf16.msra.mxu3 %v15938_v24  ;;  %v8511_v62 = vperm.slane %v16461_v23, 6  ;;  %v15936_v12 = vld [vmem:[#allocation3 + $0x2e8] sm:$0xff] }
 0xb5e   :  { %16343 = vlog2.f32 %v8997_v0  ;;  %v18712_v11 = vpop.eup %16335  ;;  %v9001_v5 = vadd.f32 1.0, %v9000_v8  ;;  %11438 = vmatpush.bf16.msra.mxu1 %v15918_v48  ;;  %v9003_v0 = vand.u32 2147483647, %v18647_v41  ;;  %v8904_v61 = vand.u32 2147483647, %v18635_v33 }
 0xb5f   :  { %11531 = vmatpush.bf16.msrb.mxu0 %v15972_v16  ;;  %v8901_v16 = vmul.f32 -0.5, %v18635_v33  ;;  %v8916_v18 = vadd.f32 1.0, %v18712_v11  ;;  %v8779_v19 = vmul.f32 1.442695, %v8734_v49  ;;  %16345 = vtanh.f32 %v9143_v17  ;;  %v15916_v17 = vld [vmem:[#allocation3 + $0x248] sm:$0xff] }
 0xb60   :  { %v8911_v44 = vadd.f32 1.0, %v8910_v63  ;;  %16347 = vtanh.f32 %v9144_v4  ;;  %v8900_v37 = vmul.f32 0.6931472, %v16334_v22  ;;  %v8913_v15 = vand.u32 2147483647, %v18672_v28 }
 0xb61   :  { %v16338_v55 = vpop.eup %16337  ;;  %v8902_v7 = vadd.f32 1.0, %v8901_v16  ;;  %v8273_v38 = vpop.f32.mrf.mxu1  ;;  %v18724_v26 = vadd.f32 %v8511_v62, %v8471_v43  ;;  %11448 = vmatpush.bf16.msra.mxu2 %v15929_v39  ;;  %16349 = vlog2.f32 %v8916_v18  ;;  %v8919_v8 = vmul.f32 -0.5, %v18712_v11  ;;  %11461 = vmatpush.bf16.msra.mxu3 %v15937_v2  ;;  %v15927_v2 = vld [vmem:[#allocation3 + $0x2a0] sm:$0xff] }
 0xb62   :  { %v18721_v34 = vpop.eup %16339  ;;  %v8472_v16 = vadd.f32 %v18626_v47, %v18369_v29  ;;  %v18730_v63 = vmul.f32 %v18647_v41, %v9001_v5  ;;  %v8745_v22 = vsub.f32 0.0, %v8713_v1  ;;  %16351 = vpow2.f32 %v8779_v19  ;;  %v15935_v18 = vld [vmem:[#allocation3 + $0x2e0] sm:$0xff] }
 0xb63   :  { %11532 = vmatpush.bf16.msrb.mxu0 %v15971_v27  ;;  %v15917_v27 = vld [vmem:[#allocation3 + $0x250] sm:$0xff]  ;;  %v16342_v24 = vpop.eup %16341  ;;  %v8903_v49 = vmul.f32 %v18635_v33, %v8902_v7  ;;  %vm18733_vm14 = vcmp.lt.f32.partialorder %v9003_v0, 0.0004427343  ;;  %vm18737_vm15 = vcmp.lt.f32.partialorder %v8904_v61, 0.0004427343  ;;  %v8912_v29 = vmul.f32 %v18672_v28, %v8911_v44 }
 0xb64   :  { %v16344_v48 = vpop.eup %16343  ;;  %11439 = vmatpush.bf16.msra.mxu1 %v15917_v27  ;;  %v8703_v47 = vand.u32 2147483647, %v18724_v26  ;;  %v8512_v41 = vperm.slane %v16461_v23, 7  ;;  %v8602_v43 = vmax.f32 %v18564_v30, 0.0  ;;  %vm18746_vm0 = vcmp.lt.f32.partialorder %v8913_v15, 0.0004427343 }
 0xb65   :  { %v8906_v33 = vsel %vm18737_vm15, %v8903_v49, %v8900_v37  ;;  %11449 = vmatpush.bf16.msra.mxu2 %v15928_v57  ;;  %v9206_v62 = vmul.f32 %v16342_v24, %v18498_v21  ;;  %v8920_v5 = vadd.f32 1.0, %v8919_v8  ;;  %11462 = vmatpush.bf16.msra.mxu3 %v15936_v12  ;;  %v8999_v27 = vmul.f32 0.6931472, %v16344_v48  ;;  %v15926_v48 = vld [vmem:[#allocation3 + $0x298] sm:$0xff]  ;;  %v8284_v49 = vpop.f32.mrf.mxu2 }
 0xb66   :  { %v8735_v7 = vsub.f32 0.0, %v8703_v47  ;;  %v18753_v23 = vadd.f32 %v8512_v41, %v8472_v16  ;;  %v8603_v38 = vmax.f32 %v18589_v36, 0.0  ;;  %v8922_v0 = vand.u32 2147483647, %v18712_v11 }
 0xb67   :  { %11577 = vmatpush.bf16.msra.mxu0 %v16010_v51  ;;  %v8909_v51 = vmul.f32 0.6931472, %v16338_v55  ;;  %v16346_v55 = vpop.eup %16345  ;;  %v9238_v61 = vpack.c.bf16 %v9206_v62, %v9206_v62  ;;  %v8801_v44 = vmul.f32 1.442695, %v8745_v22  ;;  %v8474_v15 = vadd.f32 %v18684_v3, %v18375_v46  ;;  %v15934_v3 = vld [vmem:[#allocation3 + $0x2d8] sm:$0xff] }
 0xb68   :  { %v16348_v19 = vpop.eup %16347  ;;  %11440 = vmatpush.bf16.msra.mxu1 %v15916_v17  ;;  %v8781_v37 = vmul.f32 1.442695, %v8735_v7  ;;  %v8514_v57 = vperm.slane %v18473_v25, 1  ;;  %v8704_v12 = vand.u32 2147483647, %v18753_v23  ;;  %v8921_v17 = vmul.f32 %v18712_v11, %v8920_v5  ;;  %v16009_v11 = vld [vmem:[#allocation3 + $0x530] sm:$0xff] }
 0xb69   :  { %v8915_v28 = vsel %vm18746_vm0, %v8912_v29, %v8909_v51  ;;  %v16350_v21 = vpop.eup %16349  ;;  %v9114_v51 = vadd.f32 %v8906_v33, %v8602_v43  ;;  %11390 = vmatmul.bf16.vlgmr.msrb.gmra.mxu1 %v9238_v61  ;;  %11450 = vmatpush.bf16.msra.mxu2 %v15927_v2  ;;  %v9207_v46 = vmul.f32 %v16346_v55, %v18515_v42  ;;  %vm18770_vm4 = vcmp.lt.f32.partialorder %v8922_v0, 0.0004427343  ;;  %v8297_v43 = vpop.f32.mrf.mxu3  ;;  %v15915_v33 = vld [vmem:[#allocation3 + $0x240] sm:$0xff]  ;;  %v15925_v55 = vld [vmem:[#allocation3 + $0x290] sm:$0xff] }
 0xb6a   :  { %v18760_v24 = vpop.eup %16351  ;;  %v9115_v8 = vadd.f32 %v8915_v28, %v8603_v38  ;;  %v8918_v16 = vmul.f32 0.6931472, %v16350_v21  ;;  %16353 = vpow2.f32 %v8781_v37  ;;  %11463 = vmatpush.bf16.msra.mxu3 %v15935_v18  ;;  %v9208_v29 = vmul.f32 %v16348_v19, %v18544_v9  ;;  %v15954_v28 = vld [vmem:[#allocation3 + $0x378] sm:$0xff] }
 0xb6b   :  { %v8934_v22 = vadd.f32 1.0, %v18760_v24  ;;  %v18777_v41 = vadd.f32 %v8514_v57, %v8474_v15  ;;  %v9217_v42 = vmul.f32 %v18721_v34, %v18491_v56  ;;  %v9005_v1 = vsel %vm18733_vm14, %v18730_v63, %v8999_v27  ;;  %11578 = vmatpush.bf16.msra.mxu0 %v16009_v11  ;;  %v15933_v63 = vld [vmem:[#allocation3 + $0x2d0] sm:$0xff]  ;;  %v16008_v27 = vld [vmem:[#allocation3 + $0x528] sm:$0xff]  ;;  %v16007_v11 = vld [vmem:[#allocation3 + $0x520] sm:$0xff] }
 0xb6c   :  { %v8924_v47 = vsel %vm18770_vm4, %v8921_v17, %v8918_v16  ;;  %v9146_v62 = vsel %vm8634_vm1, %v18564_v30, %v9114_v51  ;;  %v8604_v9 = vmax.f32 %v18621_v6, 0.0  ;;  %v8736_v2 = vsub.f32 0.0, %v8704_v12  ;;  %11441 = vmatpush.bf16.msra.mxu1 %v15915_v33  ;;  %v15924_v57 = vld [vmem:[#allocation3 + $0x288] sm:$0xff]  ;;  %v15953_v51 = vld [vmem:[#allocation3 + $0x370] sm:$0xff] }
 0xb6d   :  { %16355 = vlog2.f32 %v8934_v22  ;;  %11451 = vmatpush.bf16.msra.mxu2 %v15926_v48  ;;  %v8613_v5 = vmax.f32 %v18541_v40, 0.0  ;;  %v9147_v56 = vsel %vm8635_vm3, %v18589_v36, %v9115_v8  ;;  %v9239_v34 = vpack.c.bf16 %v9207_v46, %v9207_v46  ;;  %v8286_v8 = vpop.f32.mrf.mxu2  ;;  %v15932_v17 = vld [vmem:[#allocation3 + $0x2c8] sm:$0xff] }
 0xb6e   :  { %16357 = vpow2.f32 %v8801_v44  ;;  %11464 = vmatpush.bf16.msra.mxu3 %v15934_v3  ;;  %v9116_v39 = vadd.f32 %v8924_v47, %v8604_v9  ;;  %v8937_v7 = vmul.f32 -0.5, %v18760_v24  ;;  %v8783_v18 = vmul.f32 1.442695, %v8736_v2  ;;  %v15952_v47 = vld [vmem:[#allocation3 + $0x368] sm:$0xff]  ;;  %v15962_v9 = vld [vmem:[#allocation3 + $0x3b8] sm:$0xff]  ;;  %v18814_v2 = vpop.f32.mrf.mxu1 }
 0xb6f   :  { %v9240_v19 = vpack.c.bf16 %v9208_v29, %v9208_v29  ;;  %v9125_v0 = vadd.f32 %v9005_v1, %v8613_v5  ;;  %16359 = vtanh.f32 %v9146_v62  ;;  %v8706_v61 = vand.u32 2147483647, %v18777_v41  ;;  %11403 = vmatmul.bf16.vlgmr.msrb.gmra.mxu2 %v9239_v34  ;;  %11579 = vmatpush.bf16.msra.mxu0 %v16008_v27  ;;  %v15931_v62 = vld [vmem:[#allocation3 + $0x2c0] sm:$0xff]  ;;  %v15970_v5 = vld [vmem:[#allocation3 + $0x3f8] sm:$0xff] }
 0xb70   :  { %11486 = vmatpush.bf16.msrb.mxu1 %v15954_v28  ;;  %v18792_v38 = vpop.eup %16353  ;;  %v9249_v21 = vpack.c.bf16 %v9217_v42, %v9217_v42  ;;  %16361 = vpow2.f32 %v8783_v18  ;;  %v8475_v37 = vadd.f32 %v8284_v49, %v18388_v14  ;;  %v8515_v15 = vperm.slane %v18473_v25, 2 }
 0xb71   :  { %v8943_v44 = vadd.f32 1.0, %v18792_v38  ;;  %11416 = vmatmul.bf16.vlgmr.msrb.gmra.mxu3 %v9240_v19  ;;  %11452 = vmatpush.bf16.msra.mxu2 %v15925_v55  ;;  %16363 = vtanh.f32 %v9147_v56  ;;  %v8476_v12 = vadd.f32 %v8297_v43, %v18391_v59  ;;  %v8516_v48 = vperm.slane %v18473_v25, 3  ;;  %v8299_v4 = vpop.f32.mrf.mxu3  ;;  %v15923_v25 = vld [vmem:[#allocation3 + $0x280] sm:$0xff]  ;;  %v16006_v56 = vld [vmem:[#allocation3 + $0x518] sm:$0xff] }
 0xb72   :  { %11533 = vmatmul.bf16.vlgmr.msrb.gmra.mxu0 %v9249_v21  ;;  %11465 = vmatpush.bf16.msra.mxu3 %v15933_v63  ;;  %v9148_v14 = vsel %vm8636_vm5, %v18621_v6, %v9116_v39  ;;  %v8938_v49 = vadd.f32 1.0, %v8937_v7  ;;  %v8940_v46 = vand.u32 2147483647, %v18760_v24  ;;  %v8738_v3 = vsub.f32 0.0, %v8706_v61  ;;  %v15950_v4 = vld [vmem:[#allocation3 + $0x358] sm:$0xff] }
 0xb73   :  { %v16356_v16 = vpop.eup %16355  ;;  %16365 = vlog2.f32 %v8943_v44  ;;  %v18808_v29 = vadd.f32 %v8515_v15, %v8475_v37  ;;  %v9157_v43 = vsel %vm8645_vm6, %v18541_v40, %v9125_v0  ;;  %v8946_v33 = vmul.f32 -0.5, %v18792_v38  ;;  %11580 = vmatpush.bf16.msra.mxu0 %v16007_v11  ;;  %v15951_v0 = vld [vmem:[#allocation3 + $0x360] sm:$0xff]  ;;  %v15961_v15 = vld [vmem:[#allocation3 + $0x3b0] sm:$0xff] }
 0xb74   :  { %11487 = vmatpush.bf16.msrb.mxu1 %v15953_v51  ;;  %v18803_v22 = vpop.eup %16357  ;;  %v8936_v59 = vmul.f32 0.6931472, %v16356_v16  ;;  %16367 = vtanh.f32 %v9148_v14  ;;  %v18812_v1 = vadd.f32 %v8516_v48, %v8476_v12  ;;  %v8939_v28 = vmul.f32 %v18760_v24, %v8938_v49  ;;  %v15969_v16 = vld [vmem:[#allocation3 + $0x3f0] sm:$0xff] }
 0xb75   :  { %11453 = vmatpush.bf16.msra.mxu2 %v15924_v57  ;;  %v16360_v42 = vpop.eup %16359  ;;  %vm18819_vm7 = vcmp.lt.f32.partialorder %v8940_v46, 0.0004427343  ;;  %v8787_v7 = vmul.f32 1.442695, %v8738_v3  ;;  %16369 = vtanh.f32 %v9157_v43  ;;  %v8606_v19 = vmax.f32 %v18675_v35, 0.0  ;;  %v16005_v46 = vld [vmem:[#allocation3 + $0x510] sm:$0xff] }
 0xb76   :  { %11466 = vmatpush.bf16.msra.mxu3 %v15932_v17  ;;  %v18816_v55 = vpop.eup %16361  ;;  %v8942_v27 = vsel %vm18819_vm7, %v8939_v28, %v8936_v59  ;;  %v8707_v24 = vand.u32 2147483647, %v18808_v29  ;;  %v8947_v61 = vadd.f32 1.0, %v8946_v33  ;;  %v8708_v44 = vand.u32 2147483647, %v18812_v1 }
 0xb77   :  { %v16364_v34 = vpop.eup %16363  ;;  %v8952_v39 = vadd.f32 1.0, %v18816_v55  ;;  %v8955_v21 = vmul.f32 -0.5, %v18816_v55  ;;  %v9210_v37 = vmul.f32 %v16360_v42, %v18564_v30  ;;  %v9033_v57 = vadd.f32 1.0, %v18803_v22  ;;  %11581 = vmatpush.bf16.msra.mxu0 %v16006_v56  ;;  %v18835_v30 = vpop.f32.mrf.mxu2  ;;  %v15968_v56 = vld [vmem:[#allocation3 + $0x3e8] sm:$0xff] }
 0xb78   :  { %11488 = vmatpush.bf16.msrb.mxu1 %v15952_v47  ;;  %v8949_v51 = vand.u32 2147483647, %v18792_v38  ;;  %v9211_v8 = vmul.f32 %v16364_v34, %v18589_v36  ;;  %v9118_v48 = vadd.f32 %v8942_v27, %v8606_v19  ;;  %v8525_v17 = vperm.slane %v18584_v31, 4  ;;  %v15960_v31 = vld [vmem:[#allocation3 + $0x3a8] sm:$0xff]  ;;  %v8325_v47 = vpop.f32.mrf.mxu1 }
 0xb79   :  { %v16366_v18 = vpop.eup %16365  ;;  %11454 = vmatpush.bf16.msra.mxu2 %v15923_v25  ;;  %16371 = vlog2.f32 %v8952_v39  ;;  %v18837_v49 = vpop.f32.mrf.mxu3  ;;  %vm8638_vm8 = vcmp.ne.f32.partialorder %v18675_v35, %v18675_v35  ;;  %v8739_v3 = vsub.f32 0.0, %v8707_v24  ;;  %v8948_v36 = vmul.f32 %v18792_v38, %v8947_v61  ;;  %v16004_v34 = vld [vmem:[#allocation3 + $0x508] sm:$0xff]  ;;  %v15959_v61 = vld [vmem:[#allocation3 + $0x3a0] sm:$0xff] }
 0xb7a   :  { %11467 = vmatpush.bf16.msra.mxu3 %v15931_v62  ;;  %v16368_v12 = vpop.eup %16367  ;;  %v8945_v14 = vmul.f32 0.6931472, %v16366_v18  ;;  %16373 = vpow2.f32 %v8787_v7  ;;  %v8956_v59 = vadd.f32 1.0, %v8955_v21  ;;  %v8740_v25 = vsub.f32 0.0, %v8708_v44  ;;  %v15949_v18 = vld [vmem:[#allocation3 + $0x350] sm:$0xff] }
 0xb7b   :  { %v9242_v11 = vpack.c.bf16 %v9210_v37, %v9210_v37  ;;  %v16370_v42 = vpop.eup %16369  ;;  %vm18842_vm9 = vcmp.lt.f32.partialorder %v8949_v51, 0.0004427343  ;;  %v8958_v33 = vand.u32 2147483647, %v18816_v55  ;;  %v9243_v62 = vpack.c.bf16 %v9211_v8, %v9211_v8  ;;  %11582 = vmatpush.bf16.msra.mxu0 %v16005_v46  ;;  %v16003_v8 = vld [vmem:[#allocation3 + $0x500] sm:$0xff] }
 0xb7c   :  { %11489 = vmatpush.bf16.msrb.mxu1 %v15951_v0  ;;  %16375 = vlog2.f32 %v9033_v57  ;;  %v9150_v38 = vsel %vm8638_vm8, %v18675_v35, %v9118_v48  ;;  %v18853_v28 = vadd.f32 %v8525_v17, %v18667_v45  ;;  %v8789_v39 = vmul.f32 1.442695, %v8739_v3  ;;  %v15967_v57 = vld [vmem:[#allocation3 + $0x3e0] sm:$0xff]  ;;  %v16042_v48 = vld [vmem:[#allocation3 + $0x638] sm:$0xff]  ;;  %v15948_v17 = vld [vmem:[#allocation3 + $0x348] sm:$0xff] }
 0xb7d   :  { %11499 = vmatpush.bf16.msrb.mxu2 %v15962_v9  ;;  %v9212_v9 = vmul.f32 %v16368_v12, %v18621_v6  ;;  %11442 = vmatmul.bf16.vlgmr.msra.gmra.mxu1 %v9242_v11  ;;  %v8607_v6 = vmax.f32 %v18724_v26, 0.0  ;;  %v9036_v45 = vmul.f32 -0.5, %v18803_v22  ;;  %v8957_v24 = vmul.f32 %v18816_v55, %v8956_v59 }
 0xb7e   :  { %11512 = vmatpush.bf16.msrb.mxu3 %v15970_v5  ;;  %v8951_v5 = vsel %vm18842_vm9, %v8948_v36, %v8945_v14  ;;  %v8791_v0 = vmul.f32 1.442695, %v8740_v25  ;;  %16377 = vtanh.f32 %v9150_v38  ;;  %vm18862_vm10 = vcmp.lt.f32.partialorder %v8958_v33, 0.0004427343 }
 0xb7f   :  { %v16372_v63 = vpop.eup %16371  ;;  %11455 = vmatmul.bf16.vlgmr.msra.gmra.mxu2 %v9243_v62  ;;  %v9244_v7 = vpack.c.bf16 %v9212_v9, %v9212_v9  ;;  %v9119_v21 = vadd.f32 %v8951_v5, %v8607_v6  ;;  %v8717_v37 = vand.u32 2147483647, %v18853_v28  ;;  %11583 = vmatpush.bf16.msra.mxu0 %v16004_v34  ;;  %v8338_v51 = vpop.f32.mrf.mxu2  ;;  %16379 = vpow2.f32 %v8789_v39  ;;  %v16041_v34 = vld [vmem:[#allocation3 + $0x630] sm:$0xff]  ;;  %v15984_v6 = vld [vmem:[#allocation3 + $0x468] sm:$0xff] }
 0xb80   :  { %11490 = vmatpush.bf16.msrb.mxu1 %v15950_v4  ;;  %v18858_v19 = vpop.eup %16373  ;;  %v8954_v27 = vmul.f32 0.6931472, %v16372_v63  ;;  %v9221_v14 = vmul.f32 %v16370_v42, %v18541_v40  ;;  %v9037_v3 = vadd.f32 1.0, %v9036_v45  ;;  %vm8639_vm11 = vcmp.ne.f32.partialorder %v18724_v26, %v18724_v26  ;;  %v15958_v4 = vld [vmem:[#allocation3 + $0x398] sm:$0xff]  ;;  %v18874_v36 = vpop.f32.mrf.mxu1 }
 0xb81   :  { %11500 = vmatpush.bf16.msrb.mxu2 %v15961_v15  ;;  %11468 = vmatmul.bf16.vlgmr.msra.gmra.mxu3 %v9244_v7  ;;  %v8351_v55 = vpop.f32.mrf.mxu3  ;;  %v8970_v12 = vadd.f32 1.0, %v18858_v19  ;;  %16381 = vpow2.f32 %v8791_v0  ;;  %v9151_v59 = vsel %vm8639_vm11, %v18724_v26, %v9119_v21  ;;  %v8478_v11 = vadd.f32 %v18814_v2, %v18395_v32  ;;  %v15966_v42 = vld [vmem:[#allocation3 + $0x3d8] sm:$0xff]  ;;  %v15957_v32 = vld [vmem:[#allocation3 + $0x390] sm:$0xff] }
 0xb82   :  { %11513 = vmatpush.bf16.msrb.mxu3 %v15969_v16  ;;  %v8960_v15 = vsel %vm18862_vm10, %v8957_v24, %v8954_v27  ;;  %v8608_v16 = vmax.f32 %v18753_v23, 0.0  ;;  %v16376_v46 = vpop.eup %16375  ;;  %v9039_v47 = vand.u32 2147483647, %v18803_v22  ;;  %v8749_v62 = vsub.f32 0.0, %v8717_v37  ;;  %v15965_v7 = vld [vmem:[#allocation3 + $0x3d0] sm:$0xff]  ;;  %v15986_v0 = vld [vmem:[#allocation3 + $0x478] sm:$0xff] }
 0xb83   :  { %11584 = vmatpush.bf16.msra.mxu0 %v16003_v8  ;;  %v9035_v33 = vmul.f32 0.6931472, %v16376_v46  ;;  %16383 = vlog2.f32 %v8970_v12  ;;  %v9253_v9 = vpack.c.bf16 %v9221_v14, %v9221_v14  ;;  %vm8640_vm12 = vcmp.ne.f32.partialorder %v18753_v23, %v18753_v23  ;;  %v15985_v14 = vld [vmem:[#allocation3 + $0x470] sm:$0xff] }
 0xb84   :  { %11491 = vmatpush.bf16.msrb.mxu1 %v15949_v18  ;;  %v9120_v25 = vadd.f32 %v8960_v15, %v8608_v16  ;;  %v16378_v43 = vpop.eup %16377  ;;  %16385 = vtanh.f32 %v9151_v59  ;;  %v9038_v38 = vmul.f32 %v18803_v22, %v9037_v3  ;;  %vm18893_vm2 = vcmp.lt.f32.partialorder %v9039_v47, 0.0004427343  ;;  %v15947_v18 = vld [vmem:[#allocation3 + $0x340] sm:$0xff]  ;;  %v16040_v16 = vld [vmem:[#allocation3 + $0x628] sm:$0xff]  ;;  %v18918_v59 = vpop.f32.mrf.mxu0 }
 0xb85   :  { %11501 = vmatpush.bf16.msrb.mxu2 %v15960_v31  ;;  %v18879_v31 = vld [vmem:[#allocation14 + $0x10] sm:$0xff]  ;;  %v18885_v2 = vpop.eup %16379  ;;  %v8973_v39 = vmul.f32 -0.5, %v18858_v19  ;;  %v9214_v45 = vmul.f32 %v16378_v43, %v18675_v35  ;;  %v8809_v27 = vmul.f32 1.442695, %v8749_v62  ;;  %v8479_v24 = vadd.f32 %v18835_v30, %v18408_v10  ;;  %v16039_v62 = vld [vmem:[#allocation3 + $0x620] sm:$0xff] }
 0xb86   :  { %11514 = vmatpush.bf16.msrb.mxu3 %v15968_v56  ;;  %v8518_v40 = vperm.slane %v18879_v31, 5  ;;  %v9152_v5 = vsel %vm8640_vm12, %v18753_v23, %v9120_v25  ;;  %11585 = vmatmul.bf16.vlgmr.msra.gmra.mxu0 %v9253_v9  ;;  %v9041_v22 = vsel %vm18893_vm2, %v9038_v38, %v9035_v33  ;;  %v8519_v21 = vperm.slane %v18879_v31, 6  ;;  %v15956_v35 = vld [vmem:[#allocation3 + $0x388] sm:$0xff]  ;;  %v15963_v33 = vld [vmem:[#allocation3 + $0x3c0] sm:$0xff]  ;;  %v16002_v38 = vld [vmem:[#allocation3 + $0x4f8] sm:$0xff] }
 0xb87   :  { %11629 = vmatpush.bf16.msrb.mxu0 %v16042_v48  ;;  %v18891_v63 = vpop.eup %16381  ;;  %16387 = vtanh.f32 %v9152_v5  ;;  %v8480_v44 = vadd.f32 %v18837_v49, %v18411_v53  ;;  %v8520_v10 = vperm.slane %v18879_v31, 7  ;;  %v18910_v30 = vpop.f32.mrf.mxu2  ;;  %v9246_v8 = vpack.c.bf16 %v9214_v45, %v9214_v45  ;;  %v15964_v48 = vld [vmem:[#allocation3 + $0x3c8] sm:$0xff]  ;;  %v15955_v31 = vld [vmem:[#allocation3 + $0x380] sm:$0xff] }
 0xb88   :  { %11492 = vmatpush.bf16.msrb.mxu1 %v15948_v17  ;;  %v18889_v56 = vadd.f32 %v8518_v40, %v8478_v11  ;;  %v8377_v37 = vpop.f32.mrf.mxu1  ;;  %v8617_v53 = vmax.f32 %v18701_v58, 0.0  ;;  %v8974_v49 = vadd.f32 1.0, %v8973_v39  ;;  %16389 = vpow2.f32 %v8809_v27  ;;  %v15994_v40 = vld [vmem:[#allocation3 + $0x4b8] sm:$0xff] }
 0xb89   :  { %11502 = vmatpush.bf16.msrb.mxu2 %v15959_v61  ;;  %v8979_v61 = vadd.f32 1.0, %v18885_v2  ;;  %v16384_v15 = vpop.eup %16383  ;;  %v18912_v55 = vpop.f32.mrf.mxu3  ;;  %v8976_v17 = vand.u32 2147483647, %v18858_v19  ;;  %v18920_v11 = vadd.f32 %v8520_v10, %v8480_v44  ;;  %vm8649_vm13 = vcmp.ne.f32.partialorder %v18701_v58, %v18701_v58  ;;  %v16038_v44 = vld [vmem:[#allocation3 + $0x618] sm:$0xff] }
 0xb8a   :  { %11515 = vmatpush.bf16.msrb.mxu3 %v15967_v57  ;;  %v8988_v57 = vadd.f32 1.0, %v18891_v63  ;;  %v8710_v51 = vand.u32 2147483647, %v18889_v56  ;;  %v16386_v12 = vpop.eup %16385  ;;  %v9129_v46 = vadd.f32 %v9041_v22, %v8617_v53  ;;  %v8972_v3 = vmul.f32 0.6931472, %v16384_v15 }
 0xb8b   :  { %11630 = vmatpush.bf16.msrb.mxu0 %v16041_v34  ;;  %16391 = vlog2.f32 %v8979_v61  ;;  %v9215_v47 = vmul.f32 %v16386_v12, %v18724_v26  ;;  %v8975_v43 = vmul.f32 %v18858_v19, %v8974_v49  ;;  %vm18926_vm14 = vcmp.lt.f32.partialorder %v8976_v17, 0.0004427343  ;;  %v16001_v12 = vld [vmem:[#allocation3 + $0x4f0] sm:$0xff] }
 0xb8c   :  { %11493 = vmatpush.bf16.msrb.mxu1 %v15947_v18  ;;  %16393 = vlog2.f32 %v8988_v57  ;;  %v8742_v25 = vsub.f32 0.0, %v8710_v51  ;;  %v9161_v5 = vsel %vm8649_vm13, %v18701_v58, %v9129_v46  ;;  %v8991_v19 = vmul.f32 -0.5, %v18891_v63  ;;  %v15983_v51 = vld [vmem:[#allocation3 + $0x460] sm:$0xff]  ;;  %v11328_v53 = vpop.f32.mrf.mxu0  ;;  %v16037_v46 = vld [vmem:[#allocation3 + $0x610] sm:$0xff] }
 0xb8d   :  { %11503 = vmatpush.bf16.msrb.mxu2 %v15958_v4  ;;  %v18916_v4 = vadd.f32 %v8519_v21, %v8479_v24  ;;  %v8978_v26 = vsel %vm18926_vm14, %v8975_v43, %v8972_v3  ;;  %v8712_v18 = vand.u32 2147483647, %v18920_v11  ;;  %v9247_v27 = vpack.c.bf16 %v9215_v47, %v9215_v47  ;;  %v15982_v47 = vld [vmem:[#allocation3 + $0x458] sm:$0xff] }
 0xb8e   :  { %11516 = vmatpush.bf16.msrb.mxu3 %v15966_v42  ;;  %v16388_v42 = vpop.eup %16387  ;;  %v8610_v21 = vmax.f32 %v18777_v41, 0.0  ;;  %16395 = vtanh.f32 %v9161_v5  ;;  %v8985_v15 = vand.u32 2147483647, %v18885_v2  ;;  %vm8642_vm15 = vcmp.ne.f32.partialorder %v18777_v41, %v18777_v41 }
 0xb8f   :  { %11494 = vmatmul.bf16.vlgmr.msrb.gmra.mxu1 %v9246_v8  ;;  %11631 = vmatpush.bf16.msrb.mxu0 %v16040_v16  ;;  %v8711_v34 = vand.u32 2147483647, %v18916_v4  ;;  %v18936_v39 = vpop.eup %16389  ;;  %v8390_v45 = vpop.f32.mrf.mxu2  ;;  %v9216_v24 = vmul.f32 %v16388_v42, %v18753_v23  ;;  %v8992_v8 = vadd.f32 1.0, %v8991_v19  ;;  %v8994_v23 = vand.u32 2147483647, %v18891_v63  ;;  %v15991_v19 = vld [vmem:[#allocation3 + $0x4a0] sm:$0xff] }
 0xb90   :  { %11538 = vmatpush.bf16.msra.mxu1 %v15986_v0  ;;  %v15993_v0 = vld [vmem:[#allocation3 + $0x4b0] sm:$0xff]  ;;  %v8427_v57 = vpop.f32.mrf.mxu1  ;;  %v9122_v10 = vadd.f32 %v8978_v26, %v8610_v21  ;;  %v9069_v3 = vadd.f32 1.0, %v18936_v39  ;;  %vm18951_vm0 = vcmp.lt.f32.partialorder %v8985_v15, 0.0004427343  ;;  %v15999_v21 = vld [vmem:[#allocation3 + $0x4e0] sm:$0xff]  ;;  %v15990_v15 = vld [vmem:[#allocation3 + $0x498] sm:$0xff]  ;;  %vm8643_vm3 = vcmp.ne.f32.partialorder %v18808_v29, %v18808_v29 }
 0xb91   :  { %11504 = vmatpush.bf16.msrb.mxu2 %v15957_v32  ;;  %v8982_v32 = vmul.f32 -0.5, %v18885_v2  ;;  %v8403_v22 = vpop.f32.mrf.mxu3  ;;  %v16392_v61 = vpop.eup %16391  ;;  %v8743_v16 = vsub.f32 0.0, %v8711_v34  ;;  %v9248_v17 = vpack.c.bf16 %v9216_v24, %v9216_v24  ;;  %vm18958_vm1 = vcmp.lt.f32.partialorder %v8994_v23, 0.0004427343  ;;  %v16036_v34 = vld [vmem:[#allocation3 + $0x608] sm:$0xff] }
 0xb92   :  { %11517 = vmatpush.bf16.msrb.mxu3 %v15965_v7  ;;  %v8795_v7 = vmul.f32 1.442695, %v8742_v25  ;;  %v8981_v49 = vmul.f32 0.6931472, %v16392_v61  ;;  %v9154_v42 = vsel %vm8642_vm15, %v18777_v41, %v9122_v10  ;;  %v15981_v22 = vld [vmem:[#allocation3 + $0x450] sm:$0xff]  ;;  %v8482_v24 = vadd.f32 %v18874_v36, %v18421_v60  ;;  %v16074_v10 = vld [vmem:[#allocation3 + $0x738] sm:$0xff] }
 0xb93   :  { %11632 = vmatpush.bf16.msrb.mxu0 %v16039_v62  ;;  %v8983_v37 = vadd.f32 1.0, %v8982_v32  ;;  %v8797_v62 = vmul.f32 1.442695, %v8743_v16  ;;  %vm8644_vm4 = vcmp.ne.f32.partialorder %v18812_v1, %v18812_v1  ;;  %vm8653_vm6 = vcmp.ne.f32.partialorder %v18853_v28, %v18853_v28 }
 0xb94   :  { %11539 = vmatpush.bf16.msra.mxu1 %v15985_v14  ;;  %16397 = vpow2.f32 %v8795_v7  ;;  %v15992_v14 = vld [vmem:[#allocation3 + $0x4a8] sm:$0xff]  ;;  %vm8646_vm8 = vcmp.ne.f32.partialorder %v18889_v56, %v18889_v56  ;;  %vm8647_vm11 = vcmp.ne.f32.partialorder %v18916_v4, %v18916_v4  ;;  %vm8648_vm12 = vcmp.ne.f32.partialorder %v18920_v11, %v18920_v11 }
 0xb95   :  { %11505 = vmatpush.bf16.msrb.mxu2 %v15956_v35  ;;  %v16394_v35 = vpop.eup %16393  ;;  %16399 = vlog2.f32 %v9069_v3 }
 0xb96   :  { %11518 = vmatpush.bf16.msrb.mxu3 %v15964_v48  ;;  %v8744_v48 = vsub.f32 0.0, %v8712_v18  ;;  %v8990_v25 = vmul.f32 0.6931472, %v16394_v35  ;;  %v16396_v9 = vpop.eup %16395  ;;  %16401 = vtanh.f32 %v9154_v42  ;;  %v8612_v18 = vmax.f32 %v18812_v1, 0.0 }
 0xb97   :  { %11633 = vmatpush.bf16.msrb.mxu0 %v16038_v44  ;;  %v8440_v5 = vpop.f32.mrf.mxu2  ;;  %16403 = vpow2.f32 %v8797_v62  ;;  %v18973_v44 = vpop.f32.mrf.mxu0  ;;  %v9072_v35 = vmul.f32 -0.5, %v18936_v39 }
 0xb98   :  { %11540 = vmatpush.bf16.msra.mxu1 %v15984_v6  ;;  %v8429_v45 = vpop.f32.mrf.mxu1  ;;  %v18979_v36 = vadd.f32 %v8440_v5, %v18459_v54  ;;  %v16073_v5 = vld [vmem:[#allocation3 + $0x730] sm:$0xff] }
 0xb99   :  { %11506 = vmatpush.bf16.msrb.mxu2 %v15955_v31  ;;  %v18945_v31 = vadd.f32 %v8427_v57, %v18446_v50  ;;  %v16000_v50 = vld [vmem:[#allocation3 + $0x4e8] sm:$0xff]  ;;  %v8453_v26 = vpop.f32.mrf.mxu3  ;;  %v16035_v57 = vld [vmem:[#allocation3 + $0x600] sm:$0xff]  ;;  %v9073_v54 = vadd.f32 1.0, %v9072_v35 }
 0xb9a   :  { %11519 = vmatpush.bf16.msrb.mxu3 %v15963_v33  ;;  %v8993_v33 = vmul.f32 %v18891_v63, %v8992_v8  ;;  %v8611_v63 = vmax.f32 %v18808_v29, 0.0  ;;  %v18965_v7 = vpop.eup %16397  ;;  %v15980_v8 = vld [vmem:[#allocation3 + $0x448] sm:$0xff] }
 0xb9b   :  { %11634 = vmatpush.bf16.msrb.mxu0 %v16037_v46  ;;  %v9006_v60 = vadd.f32 1.0, %v18965_v7  ;;  %v16400_v23 = vpop.eup %16399  ;;  %v9009_v62 = vmul.f32 -0.5, %v18965_v7 }
 0xb9c   :  { %11507 = vmatmul.bf16.vlgmr.msrb.gmra.mxu2 %v9247_v27  ;;  %11541 = vmatpush.bf16.msra.mxu1 %v15983_v51  ;;  %v8996_v6 = vsel %vm18958_vm1, %v8993_v33, %v8990_v25  ;;  %v9225_v51 = vmul.f32 %v16396_v9, %v18701_v58  ;;  %v15998_v58 = vld [vmem:[#allocation3 + $0x4d8] sm:$0xff]  ;;  %v16402_v53 = vpop.eup %16401  ;;  %v9074_v33 = vmul.f32 %v18936_v39, %v9073_v54 }
 0xb9d   :  { %11551 = vmatpush.bf16.msra.mxu2 %v15994_v40  ;;  %v8984_v40 = vmul.f32 %v18885_v2, %v8983_v37  ;;  %11520 = vmatmul.bf16.vlgmr.msrb.gmra.mxu3 %v9248_v17  ;;  %v9124_v37 = vadd.f32 %v8996_v6, %v8612_v18  ;;  %v18992_v3 = vpop.eup %16403 }
 0xb9e   :  { %11564 = vmatpush.bf16.msra.mxu3 %v16002_v38  ;;  %v8799_v38 = vmul.f32 1.442695, %v8744_v48  ;;  %v18990_v48 = vadd.f32 %v8453_v26, %v18462_v13  ;;  %v9257_v46 = vpack.c.bf16 %v9225_v51, %v9225_v51  ;;  %v8483_v13 = vadd.f32 %v18910_v30, %v18434_v20  ;;  %v15997_v30 = vld [vmem:[#allocation3 + $0x4d0] sm:$0xff]  ;;  %v15979_v26 = vld [vmem:[#allocation3 + $0x440] sm:$0xff] }
 0xb9f   :  { %v8987_v32 = vsel %vm18951_vm0, %v8984_v40, %v8981_v49  ;;  %11635 = vmatpush.bf16.msrb.mxu0 %v16036_v34  ;;  %v9156_v49 = vsel %vm8644_vm4, %v18812_v1, %v9124_v37  ;;  %v8442_v17 = vpop.f32.mrf.mxu2  ;;  %v9075_v40 = vand.u32 2147483647, %v18936_v39  ;;  %v11380_v43 = vpop.f32.mrf.mxu0  ;;  %v16018_v34 = vld [vmem:[#allocation3 + $0x578] sm:$0xff] }
 0xba0   :  { %11542 = vmatpush.bf16.msra.mxu1 %v15982_v47  ;;  %v9123_v27 = vadd.f32 %v8987_v32, %v8611_v63  ;;  %16405 = vpow2.f32 %v8799_v38  ;;  %v9071_v47 = vmul.f32 0.6931472, %v16400_v23  ;;  %v15989_v32 = vld [vmem:[#allocation3 + $0x490] sm:$0xff]  ;;  %v8484_v38 = vadd.f32 %v18912_v55, %v18437_v52  ;;  %v15988_v63 = vld [vmem:[#allocation3 + $0x488] sm:$0xff]  ;;  %v15995_v23 = vld [vmem:[#allocation3 + $0x4c0] sm:$0xff] }
 0xba1   :  { %11552 = vmatpush.bf16.msra.mxu2 %v15993_v0  ;;  %v18970_v0 = vld [vmem:[#allocation14 + $0x18] sm:$0xff]  ;;  %16407 = vlog2.f32 %v9006_v60  ;;  %vm19009_vm5 = vcmp.lt.f32.partialorder %v9075_v40, 0.0004427343  ;;  %v15996_v52 = vld [vmem:[#allocation3 + $0x4c8] sm:$0xff]  ;;  %v15987_v60 = vld [vmem:[#allocation3 + $0x480] sm:$0xff] }
 0xba2   :  { %11565 = vmatpush.bf16.msra.mxu3 %v16001_v12  ;;  %v8522_v61 = vperm.slane %v18970_v0, 1  ;;  %v9155_v16 = vsel %vm8643_vm3, %v18808_v29, %v9123_v27  ;;  %v8523_v42 = vperm.slane %v18970_v0, 2  ;;  %v8524_v20 = vperm.slane %v18970_v0, 3 }
 0xba3   :  { %11636 = vmatpush.bf16.msrb.mxu0 %v16035_v57  ;;  %16409 = vtanh.f32 %v9155_v16  ;;  %v9077_v18 = vsel %vm19009_vm5, %v9074_v33, %v9071_v47 }
 0xba4   :  { %11543 = vmatpush.bf16.msra.mxu1 %v15981_v22  ;;  %v18986_v12 = vadd.f32 %v8522_v61, %v8482_v24  ;;  %16411 = vtanh.f32 %v9156_v49  ;;  %v19015_v45 = vadd.f32 %v8523_v42, %v8483_v13  ;;  %v8621_v22 = vmax.f32 %v18853_v28, 0.0  ;;  %v16072_v24 = vld [vmem:[#allocation3 + $0x728] sm:$0xff] }
 0xba5   :  { %11553 = vmatpush.bf16.msra.mxu2 %v15992_v14  ;;  %v8455_v14 = vpop.f32.mrf.mxu3  ;;  %v19019_v35 = vadd.f32 %v8524_v20, %v8484_v38 }
 0xba6   :  { %11566 = vmatpush.bf16.msra.mxu3 %v16000_v50  ;;  %v18994_v25 = vpop.eup %16405  ;;  %11637 = vmatmul.bf16.vlgmr.msrb.gmra.mxu0 %v9257_v46  ;;  %v9015_v50 = vadd.f32 1.0, %v18992_v3  ;;  %v8714_v9 = vand.u32 2147483647, %v18986_v12  ;;  %v9133_v57 = vadd.f32 %v9077_v18, %v8621_v22  ;;  %v16034_v14 = vld [vmem:[#allocation3 + $0x5f8] sm:$0xff]  ;;  %v16071_v46 = vld [vmem:[#allocation3 + $0x720] sm:$0xff]  ;;  %v16024_v22 = vld [vmem:[#allocation3 + $0x5a8] sm:$0xff]  ;;  %vm8650_vm13 = vcmp.ne.f32.partialorder %v18986_v12, %v18986_v12 }
 0xba7   :  { %11681 = vmatpush.bf16.msra.mxu0 %v16074_v10  ;;  %v9024_v2 = vadd.f32 1.0, %v18994_v25  ;;  %v16408_v6 = vpop.eup %16407  ;;  %v9018_v10 = vmul.f32 -0.5, %v18992_v3  ;;  %v19023_v16 = vpop.f32.mrf.mxu0  ;;  %v9027_v49 = vmul.f32 -0.5, %v18994_v25  ;;  %v8716_v13 = vand.u32 2147483647, %v19019_v35 }
 0xba8   :  { %11544 = vmatpush.bf16.msra.mxu1 %v15980_v8  ;;  %16413 = vlog2.f32 %v9015_v50  ;;  %v8746_v27 = vsub.f32 0.0, %v8714_v9  ;;  %v9008_v51 = vmul.f32 0.6931472, %v16408_v6  ;;  %v8715_v8 = vand.u32 2147483647, %v19015_v45 }
 0xba9   :  { %11554 = vmatpush.bf16.msra.mxu2 %v15991_v19  ;;  %v9218_v19 = vmul.f32 %v16402_v53, %v18777_v41  ;;  %v16410_v55 = vpop.eup %16409  ;;  %v9010_v41 = vadd.f32 1.0, %v9009_v62  ;;  %16415 = vlog2.f32 %v9024_v2  ;;  %v9165_v42 = vsel %vm8653_vm6, %v18853_v28, %v9133_v57  ;;  %v16014_v57 = vld [vmem:[#allocation3 + $0x558] sm:$0xff] }
 0xbaa   :  { %11567 = vmatpush.bf16.msra.mxu3 %v15999_v21  ;;  %v16412_v61 = vpop.eup %16411  ;;  %v9012_v21 = vand.u32 2147483647, %v18965_v7  ;;  %v9219_v53 = vmul.f32 %v16410_v55, %v18808_v29  ;;  %v8803_v17 = vmul.f32 1.442695, %v8746_v27  ;;  %v16016_v29 = vld [vmem:[#allocation3 + $0x568] sm:$0xff]  ;;  %v9019_v62 = vadd.f32 1.0, %v9018_v10 }
 0xbab   :  { %11682 = vmatpush.bf16.msra.mxu0 %v16073_v5  ;;  %v9250_v37 = vpack.c.bf16 %v9218_v19, %v9218_v19  ;;  %v9011_v54 = vmul.f32 %v18965_v7, %v9010_v41  ;;  %v9220_v40 = vmul.f32 %v16412_v61, %v18812_v1  ;;  %v8614_v1 = vmax.f32 %v18889_v56, 0.0  ;;  %v16070_v5 = vld [vmem:[#allocation3 + $0x718] sm:$0xff]  ;;  %v16069_v61 = vld [vmem:[#allocation3 + $0x710] sm:$0xff] }
 0xbac   :  { %11545 = vmatpush.bf16.msra.mxu1 %v15979_v26  ;;  %vm19031_vm7 = vcmp.lt.f32.partialorder %v9012_v21, 0.0004427343  ;;  %v8747_v50 = vsub.f32 0.0, %v8715_v8  ;;  %v9251_v9 = vpack.c.bf16 %v9219_v53, %v9219_v53  ;;  %v9021_v2 = vand.u32 2147483647, %v18992_v3  ;;  %v16023_v8 = vld [vmem:[#allocation3 + $0x5a0] sm:$0xff] }
 0xbad   :  { %11555 = vmatpush.bf16.msra.mxu2 %v15990_v15  ;;  %v16017_v15 = vld [vmem:[#allocation3 + $0x570] sm:$0xff]  ;;  %v9014_v43 = vsel %vm19031_vm7, %v9011_v54, %v9008_v51  ;;  %v9028_v38 = vadd.f32 1.0, %v9027_v49  ;;  %16417 = vpow2.f32 %v8803_v17  ;;  %v9252_v20 = vpack.c.bf16 %v9220_v40, %v9220_v40  ;;  %v16068_v53 = vld [vmem:[#allocation3 + $0x708] sm:$0xff]  ;;  %v16022_v40 = vld [vmem:[#allocation3 + $0x598] sm:$0xff] }
 0xbae   :  { %11568 = vmatpush.bf16.msra.mxu3 %v15998_v58  ;;  %v16026_v58 = vld [vmem:[#allocation3 + $0x5b8] sm:$0xff]  ;;  %v16414_v7 = vpop.eup %16413  ;;  %v9126_v26 = vadd.f32 %v9014_v43, %v8614_v1  ;;  %v9030_v39 = vand.u32 2147483647, %v18994_v25  ;;  %v9020_v18 = vmul.f32 %v18992_v3, %v9019_v62  ;;  %16419 = vtanh.f32 %v9165_v42 }
 0xbaf   :  { %11546 = vmatmul.bf16.vlgmr.msra.gmra.mxu1 %v9250_v37  ;;  %11683 = vmatpush.bf16.msra.mxu0 %v16072_v24  ;;  %v16416_v33 = vpop.eup %16415  ;;  %v9017_v19 = vmul.f32 0.6931472, %v16414_v7  ;;  %v11432_v55 = vpop.f32.mrf.mxu0  ;;  %vm19045_vm9 = vcmp.lt.f32.partialorder %v9021_v2, 0.0004427343  ;;  %v9029_v27 = vmul.f32 %v18994_v25, %v9028_v38  ;;  %v16032_v24 = vld [vmem:[#allocation3 + $0x5e8] sm:$0xff]  ;;  %v8615_v25 = vmax.f32 %v18916_v4, 0.0 }
 0xbb0   :  { %11590 = vmatpush.bf16.msrb.mxu1 %v16018_v34  ;;  %v8748_v34 = vsub.f32 0.0, %v8716_v13  ;;  %v9026_v6 = vmul.f32 0.6931472, %v16416_v33  ;;  %v9158_v3 = vsel %vm8646_vm8, %v18889_v56, %v9126_v26  ;;  %vm19053_vm10 = vcmp.lt.f32.partialorder %v9030_v39, 0.0004427343  ;;  %v16030_v13 = vld [vmem:[#allocation3 + $0x5d8] sm:$0xff] }
 0xbb1   :  { %11556 = vmatpush.bf16.msra.mxu2 %v15989_v32  ;;  %v16025_v32 = vld [vmem:[#allocation3 + $0x5b0] sm:$0xff]  ;;  %v9023_v21 = vsel %vm19045_vm9, %v9020_v18, %v9017_v19  ;;  %v8616_v10 = vmax.f32 %v18920_v11, 0.0  ;;  %v8526_v17 = vperm.slane %v18970_v0, 5  ;;  %v16012_v33 = vld [vmem:[#allocation3 + $0x548] sm:$0xff]  ;;  %v8528_v19 = vperm.slane %v18970_v0, 7  ;;  %v16050_v39 = vld [vmem:[#allocation3 + $0x678] sm:$0xff] }
 0xbb2   :  { %11569 = vmatpush.bf16.msra.mxu3 %v15997_v30  ;;  %v16033_v30 = vld [vmem:[#allocation3 + $0x5f0] sm:$0xff]  ;;  %v16020_v18 = vld [vmem:[#allocation3 + $0x588] sm:$0xff]  ;;  %vm8651_vm0 = vcmp.ne.f32.partialorder %v19015_v45, %v19015_v45  ;;  %vm8652_vm1 = vcmp.ne.f32.partialorder %v19019_v35, %v19019_v35 }
 0xbb3   :  { %11684 = vmatpush.bf16.msra.mxu0 %v16071_v46  ;;  %v19057_v51 = vpop.eup %16417  ;;  %v19074_v43 = vadd.f32 %v8526_v17, %v18945_v31  ;;  %v16029_v38 = vld [vmem:[#allocation3 + $0x5d0] sm:$0xff] }
 0xbb4   :  { %11591 = vmatpush.bf16.msrb.mxu1 %v16017_v15  ;;  %v8807_v15 = vmul.f32 1.442695, %v8748_v34  ;;  %v9042_v49 = vadd.f32 1.0, %v19057_v51  ;;  %v16420_v46 = vpop.eup %16419  ;;  %v9045_v2 = vmul.f32 -0.5, %v19057_v51  ;;  %v9048_v55 = vand.u32 2147483647, %v19057_v51 }
 0xbb5   :  { %11557 = vmatpush.bf16.msra.mxu2 %v15988_v63  ;;  %v16015_v63 = vld [vmem:[#allocation3 + $0x560] sm:$0xff]  ;;  %v9229_v1 = vmul.f32 %v16420_v46, %v18853_v28  ;;  %v8618_v46 = vmax.f32 %v18986_v12, 0.0  ;;  %vm8654_vm5 = vcmp.ne.f32.partialorder %v19074_v43, %v19074_v43 }
 0xbb6   :  { %11570 = vmatpush.bf16.msra.mxu3 %v15996_v52  ;;  %v8805_v52 = vmul.f32 1.442695, %v8747_v50  ;;  %vm19101_vm2 = vcmp.lt.f32.partialorder %v9048_v55, 0.0004427343  ;;  %v8619_v55 = vmax.f32 %v19015_v45, 0.0 }
 0xbb7   :  { %11685 = vmatpush.bf16.msra.mxu0 %v16070_v5  ;;  %v9261_v28 = vpack.c.bf16 %v9229_v1, %v9229_v1  ;;  %v16011_v5 = vld [vmem:[#allocation3 + $0x540] sm:$0xff] }
 0xbb8   :  { %11592 = vmatpush.bf16.msrb.mxu1 %v16016_v29  ;;  %16421 = vpow2.f32 %v8805_v52  ;;  %v16067_v29 = vld [vmem:[#allocation3 + $0x700] sm:$0xff]  ;;  %v9046_v52 = vadd.f32 1.0, %v9045_v2  ;;  %v16065_v2 = vld [vmem:[#allocation3 + $0x6f0] sm:$0xff] }
 0xbb9   :  { %11558 = vmatpush.bf16.msra.mxu2 %v15987_v60  ;;  %v9032_v60 = vsel %vm19053_vm10, %v9029_v27, %v9026_v6  ;;  %16423 = vtanh.f32 %v9158_v3 }
 0xbba   :  { %11571 = vmatpush.bf16.msra.mxu3 %v15995_v23  ;;  %v9127_v23 = vadd.f32 %v9023_v21, %v8615_v25  ;;  %v9128_v54 = vadd.f32 %v9032_v60, %v8616_v10  ;;  %16425 = vpow2.f32 %v8807_v15  ;;  %v19096_v21 = vadd.f32 %v8528_v19, %v18990_v48  ;;  %v16049_v15 = vld [vmem:[#allocation3 + $0x670] sm:$0xff]  ;;  %v16058_v10 = vld [vmem:[#allocation3 + $0x6b8] sm:$0xff] }
 0xbbb   :  { %11686 = vmatpush.bf16.msra.mxu0 %v16069_v61  ;;  %16427 = vlog2.f32 %v9042_v49  ;;  %v9047_v25 = vmul.f32 %v19057_v51, %v9046_v52 }
 0xbbc   :  { %11559 = vmatmul.bf16.vlgmr.msra.gmra.mxu2 %v9251_v9  ;;  %11593 = vmatpush.bf16.msrb.mxu1 %v16015_v63  ;;  %v9159_v47 = vsel %vm8647_vm11, %v18916_v4, %v9127_v23  ;;  %v9160_v42 = vsel %vm8648_vm12, %v18920_v11, %v9128_v54  ;;  %v16268_v9 = vld [vmem:[#allocation16] ss:$0 sm:$0xff]  ;;  %v8720_v17 = vand.u32 2147483647, %v19096_v21  ;;  %vm8656_vm8 = vcmp.ne.f32.partialorder %v19096_v21, %v19096_v21 }
 0xbbd   :  { %11603 = vmatpush.bf16.msrb.mxu2 %v16026_v58  ;;  %11572 = vmatmul.bf16.vlgmr.msra.gmra.mxu3 %v9252_v20  ;;  %v16031_v58 = vld [vmem:[#allocation3 + $0x5e0] sm:$0xff]  ;;  %16429 = vtanh.f32 %v9159_v47  ;;  %v8718_v20 = vand.u32 2147483647, %v19074_v43  ;;  %v11327_v6 = vadd.f32 %v16268_v9, %v18918_v59 }
 0xbbe   :  { %11616 = vmatpush.bf16.msrb.mxu3 %v16034_v14  ;;  %v16013_v14 = vld [vmem:[#allocation3 + $0x550] sm:$0xff]  ;;  %v19070_v7 = vpop.eup %16421  ;;  %16431 = vtanh.f32 %v9160_v42 }
 0xbbf   :  { %11687 = vmatpush.bf16.msra.mxu0 %v16068_v53  ;;  %v16424_v62 = vpop.eup %16423  ;;  %v9051_v31 = vadd.f32 1.0, %v19070_v7  ;;  %v9054_v60 = vmul.f32 -0.5, %v19070_v7  ;;  %v16066_v53 = vld [vmem:[#allocation3 + $0x6f8] sm:$0xff] }
 0xbc0   :  { %11594 = vmatpush.bf16.msrb.mxu1 %v16014_v57  ;;  %v19077_v50 = vpop.eup %16425  ;;  %v9222_v34 = vmul.f32 %v16424_v62, %v18889_v56  ;;  %v16019_v57 = vld [vmem:[#allocation3 + $0x580] sm:$0xff] }
 0xbc1   :  { %11604 = vmatpush.bf16.msrb.mxu2 %v16025_v32  ;;  %v16021_v32 = vld [vmem:[#allocation3 + $0x590] sm:$0xff]  ;;  %v9060_v26 = vadd.f32 1.0, %v19077_v50  ;;  %v16428_v63 = vpop.eup %16427  ;;  %16433 = vlog2.f32 %v9051_v31  ;;  %v9063_v48 = vmul.f32 -0.5, %v19077_v50  ;;  %v9055_v47 = vadd.f32 1.0, %v9054_v60 }
 0xbc2   :  { %11617 = vmatpush.bf16.msrb.mxu3 %v16033_v30  ;;  %v8527_v30 = vperm.slane %v18970_v0, 6  ;;  %v8750_v0 = vsub.f32 0.0, %v8718_v20  ;;  %v9044_v3 = vmul.f32 0.6931472, %v16428_v63  ;;  %v9254_v37 = vpack.c.bf16 %v9222_v34, %v9222_v34 }
 0xbc3   :  { %11688 = vmatpush.bf16.msra.mxu0 %v16067_v29  ;;  %16435 = vlog2.f32 %v9060_v26  ;;  %v9064_v62 = vadd.f32 1.0, %v9063_v48  ;;  %v9066_v31 = vand.u32 2147483647, %v19077_v50  ;;  %v8752_v20 = vsub.f32 0.0, %v8720_v17  ;;  %v16056_v26 = vld [vmem:[#allocation3 + $0x6a8] sm:$0xff]  ;;  %v16061_v17 = vld [vmem:[#allocation3 + $0x6d0] sm:$0xff] }
 0xbc4   :  { %11595 = vmatpush.bf16.msrb.mxu1 %v16013_v14  ;;  %v19091_v61 = vadd.f32 %v8527_v30, %v18979_v36  ;;  %v16027_v36 = vld [vmem:[#allocation3 + $0x5c0] sm:$0xff]  ;;  %v9050_v51 = vsel %vm19101_vm2, %v9047_v25, %v9044_v3  ;;  %v8811_v49 = vmul.f32 1.442695, %v8750_v0  ;;  %v16048_v14 = vld [vmem:[#allocation3 + $0x668] sm:$0xff]  ;;  %v16054_v25 = vld [vmem:[#allocation3 + $0x698] sm:$0xff] }
 0xbc5   :  { %11605 = vmatpush.bf16.msrb.mxu2 %v16024_v22  ;;  %v16028_v22 = vld [vmem:[#allocation3 + $0x5c8] sm:$0xff]  ;;  %v9130_v1 = vadd.f32 %v9050_v51, %v8618_v46  ;;  %v16047_v30 = vld [vmem:[#allocation3 + $0x660] sm:$0xff]  ;;  %v9065_v34 = vmul.f32 %v19077_v50, %v9064_v62  ;;  %vm9067_vm15 = vcmp.lt.f32.partialorder %v9066_v31, 0.0004427343  ;;  %v8815_v52 = vmul.f32 1.442695, %v8752_v20 }
 0xbc6   :  { %11618 = vmatpush.bf16.msrb.mxu3 %v16032_v24  ;;  %11689 = vmatmul.bf16.vlgmr.msra.gmra.mxu0 %v9261_v28  ;;  %v11339_v27 = vpop.f32.mrf.mxu1  ;;  %v16430_v24 = vpop.eup %16429  ;;  %16437 = vpow2.f32 %v8811_v49  ;;  %v16055_v50 = vld [vmem:[#allocation3 + $0x6a0] sm:$0xff]  ;;  %v16053_v49 = vld [vmem:[#allocation3 + $0x690] sm:$0xff]  ;;  %v16060_v62 = vld [vmem:[#allocation3 + $0x6c8] sm:$0xff]  ;;  %vm8655_vm7 = vcmp.ne.f32.partialorder %v19091_v61, %v19091_v61 }
 0xbc7   :  { %v19093_v56 = vadd.f32 %v11339_v27, %v11327_v6  ;;  %v16432_v59 = vpop.eup %16431  ;;  %v9162_v19 = vsel %vm8650_vm13, %v18986_v12, %v9130_v1  ;;  %v16064_v6 = vld [vmem:[#allocation3 + $0x6e8] sm:$0xff]  ;;  %v16081_v31 = vld [vmem:[#allocation3 + $0x770] sm:$0xff] }
 0xbc8   :  { %11596 = vmatpush.bf16.msrb.mxu1 %v16012_v33  ;;  %v9224_v54 = vmul.f32 %v16432_v59, %v18920_v11  ;;  %v16057_v11 = vld [vmem:[#allocation3 + $0x6b0] sm:$0xff]  ;;  %16439 = vtanh.f32 %v9162_v19  ;;  %v16063_v59 = vld [vmem:[#allocation3 + $0x6e0] sm:$0xff] }
 0xbc9   :  { %11606 = vmatpush.bf16.msrb.mxu2 %v16023_v8  ;;  %v9223_v8 = vmul.f32 %v16430_v24, %v18916_v4  ;;  %v16434_v4 = vpop.eup %16433  ;;  %v8620_v24 = vmax.f32 %v19019_v35, 0.0 }
 0xbca   :  { %11619 = vmatpush.bf16.msrb.mxu3 %v16031_v58  ;;  %v8719_v58 = vand.u32 2147483647, %v19091_v61 }
 0xbcb   :  { %v9255_v29 = vpack.c.bf16 %v9223_v8, %v9223_v8  ;;  %v16062_v8 = vld [vmem:[#allocation3 + $0x6d8] sm:$0xff] }
 0xbcc   :  { %11597 = vmatpush.bf16.msrb.mxu1 %v16011_v5  ;;  %v8751_v9 = vsub.f32 0.0, %v8719_v58  ;;  %v9056_v5 = vmul.f32 %v19070_v7, %v9055_v47  ;;  %v16044_v58 = vld [vmem:[#allocation3 + $0x648] sm:$0xff] }
 0xbcd   :  { %11607 = vmatpush.bf16.msrb.mxu2 %v16022_v40  ;;  %v19088_v41 = vpop.f32.mrf.mxu0  ;;  %v16436_v40 = vpop.eup %16435 }
 0xbce   :  { %11620 = vmatpush.bf16.msrb.mxu3 %v16030_v13  ;;  %v9057_v13 = vand.u32 2147483647, %v19070_v7  ;;  %v11341_v33 = vpop.f32.mrf.mxu1  ;;  %v9062_v28 = vmul.f32 0.6931472, %v16436_v40  ;;  %v8813_v63 = vmul.f32 1.442695, %v8751_v9  ;;  %v19126_v27 = vpop.eup %16437 }
 0xbcf   :  { %11598 = vmatmul.bf16.vlgmr.msrb.gmra.mxu1 %v9254_v37  ;;  %v16046_v7 = vld [vmem:[#allocation3 + $0x658] sm:$0xff]  ;;  %v16045_v37 = vld [vmem:[#allocation3 + $0x650] sm:$0xff]  ;;  %v16440_v23 = vpop.eup %16439  ;;  %v9081_v46 = vmul.f32 -0.5, %v19126_v27  ;;  %v16052_v33 = vld [vmem:[#allocation3 + $0x688] sm:$0xff]  ;;  %v9084_v20 = vand.u32 2147483647, %v19126_v27 }
 0xbd0   :  { %11642 = vmatpush.bf16.msra.mxu1 %v16050_v39  ;;  %vm19118_vm14 = vcmp.lt.f32.partialorder %v9057_v13, 0.0004427343  ;;  %16441 = vpow2.f32 %v8813_v63  ;;  %v16082_v13 = vld [vmem:[#allocation3 + $0x778] sm:$0xff] }
 0xbd1   :  { %11608 = vmatpush.bf16.msrb.mxu2 %v16021_v32  ;;  %v9256_v32 = vpack.c.bf16 %v9224_v54, %v9224_v54  ;;  %16443 = vpow2.f32 %v8815_v52  ;;  %v16080_v52 = vld [vmem:[#allocation3 + $0x768] sm:$0xff]  ;;  %vm19152_vm3 = vcmp.lt.f32.partialorder %v9084_v20, 0.0004427343 }
 0xbd2   :  { %11621 = vmatpush.bf16.msrb.mxu3 %v16029_v38  ;;  %v9053_v38 = vmul.f32 0.6931472, %v16434_v4  ;;  %v16043_v4 = vld [vmem:[#allocation3 + $0x640] sm:$0xff] }
 0xbd4   :  { %11643 = vmatpush.bf16.msra.mxu1 %v16049_v15  ;;  %v9078_v15 = vadd.f32 1.0, %v19126_v27 }
 0xbd5   :  { %11609 = vmatpush.bf16.msrb.mxu2 %v16020_v18  ;;  %v11484_v42 = vpop.f32.mrf.mxu0  ;;  %v9059_v18 = vsel %vm19118_vm14, %v9056_v5, %v9053_v38  ;;  %v16059_v5 = vld [vmem:[#allocation3 + $0x6c0] sm:$0xff] }
 0xbd6   :  { %11622 = vmatpush.bf16.msrb.mxu3 %v16028_v22  ;;  %v9068_v22 = vsel %vm9067_vm15, %v9065_v34, %v9062_v28  ;;  %v9131_v0 = vadd.f32 %v9059_v18, %v8619_v55  ;;  %16445 = vlog2.f32 %v9078_v15  ;;  %v16098_v34 = vld [vmem:[#allocation3 + $0x7f8] sm:$0xff]  ;;  %v16097_v15 = vld [vmem:[#allocation3 + $0x7f0] sm:$0xff] }
 0xbd7   :  { %v9132_v3 = vadd.f32 %v9068_v22, %v8620_v24 }
 0xbd8   :  { %11644 = vmatpush.bf16.msra.mxu1 %v16048_v14  ;;  %v9163_v60 = vsel %vm8651_vm0, %v19015_v45, %v9131_v0  ;;  %v8622_v0 = vmax.f32 %v19074_v43, 0.0 }
 0xbd9   :  { %11610 = vmatpush.bf16.msrb.mxu2 %v16019_v57  ;;  %v9164_v48 = vsel %vm8652_vm1, %v19019_v35, %v9132_v3  ;;  %16447 = vtanh.f32 %v9163_v60  ;;  %v16079_v60 = vld [vmem:[#allocation3 + $0x760] sm:$0xff] }
 0xbda   :  { %11623 = vmatpush.bf16.msrb.mxu3 %v16027_v36  ;;  %16449 = vtanh.f32 %v9164_v48 }
 0xbdc   :  { %11611 = vmatmul.bf16.vlgmr.msrb.gmra.mxu2 %v9255_v29  ;;  %11645 = vmatpush.bf16.msra.mxu1 %v16047_v30  ;;  %v9226_v29 = vmul.f32 %v16440_v23, %v18986_v12  ;;  %v16051_v12 = vld [vmem:[#allocation3 + $0x680] sm:$0xff] }
 0xbdd   :  { %11655 = vmatpush.bf16.msra.mxu2 %v16058_v10  ;;  %11624 = vmatmul.bf16.vlgmr.msrb.gmra.mxu3 %v9256_v32 }
 0xbde   :  { %11668 = vmatpush.bf16.msra.mxu3 %v16066_v53  ;;  %v19137_v53 = vpop.eup %16441  ;;  %v9258_v38 = vpack.c.bf16 %v9226_v29, %v9226_v29  ;;  %v8624_v29 = vmax.f32 %v19096_v21, 0.0 }
 0xbdf   :  { %v11352_v57 = vpop.f32.mrf.mxu2  ;;  %v11365_v10 = vpop.f32.mrf.mxu3  ;;  %v9087_v14 = vadd.f32 1.0, %v19137_v53  ;;  %v9090_v28 = vmul.f32 -0.5, %v19137_v53 }
 0xbe0   :  { %11646 = vmatpush.bf16.msra.mxu1 %v16046_v7  ;;  %v11353_v36 = vadd.f32 %v11352_v57, %v19093_v56  ;;  %v19139_v51 = vpop.eup %16443 }
 0xbe1   :  { %11656 = vmatpush.bf16.msra.mxu2 %v16057_v11  ;;  %v9096_v40 = vadd.f32 1.0, %v19139_v51  ;;  %v16446_v1 = vpop.eup %16445  ;;  %16451 = vlog2.f32 %v9087_v14  ;;  %v9099_v39 = vmul.f32 -0.5, %v19139_v51 }
 0xbe2   :  { %11669 = vmatpush.bf16.msra.mxu3 %v16065_v2  ;;  %v11366_v54 = vadd.f32 %v11365_v10, %v11353_v36  ;;  %v16448_v9 = vpop.eup %16447  ;;  %v9082_v2 = vadd.f32 1.0, %v9081_v46  ;;  %v9080_v30 = vmul.f32 0.6931472, %v16446_v1  ;;  %v16078_v46 = vld [vmem:[#allocation3 + $0x758] sm:$0xff]  ;;  %v16095_v1 = vld [vmem:[#allocation3 + $0x7e0] sm:$0xff] }
 0xbe3   :  { %v16450_v32 = vpop.eup %16449  ;;  %16453 = vlog2.f32 %v9096_v40  ;;  %v9227_v19 = vmul.f32 %v16448_v9, %v19015_v45  ;;  %v9100_v3 = vadd.f32 1.0, %v9099_v39 }
 0xbe4   :  { %11647 = vmatpush.bf16.msra.mxu1 %v16045_v37  ;;  %v11379_v56 = vadd.f32 %v18973_v44, %v11366_v54  ;;  %v9228_v63 = vmul.f32 %v16450_v32, %v19019_v35  ;;  %v16088_v54 = vld [vmem:[#allocation3 + $0x7a8] sm:$0xff] }
 0xbe5   :  { %11657 = vmatpush.bf16.msra.mxu2 %v16056_v26  ;;  %v16090_v26 = vld [vmem:[#allocation3 + $0x7b8] sm:$0xff]  ;;  %v9259_v35 = vpack.c.bf16 %v9227_v19, %v9227_v19  ;;  %v16075_v19 = vld [vmem:[#allocation3 + $0x740] sm:$0xff] }
 0xbe6   :  { %11670 = vmatpush.bf16.msra.mxu3 %v16064_v6  ;;  %v11391_v47 = vpop.f32.mrf.mxu1  ;;  %v9083_v6 = vmul.f32 %v19126_v27, %v9082_v2  ;;  %v16089_v27 = vld [vmem:[#allocation3 + $0x7b0] sm:$0xff]  ;;  %v9260_v37 = vpack.c.bf16 %v9228_v63, %v9228_v63  ;;  %v16086_v2 = vld [vmem:[#allocation3 + $0x798] sm:$0xff]  ;;  %v16084_v63 = vld [vmem:[#allocation3 + $0x788] sm:$0xff] }
 0xbe7   :  { %v11392_v11 = vadd.f32 %v11391_v47, %v11379_v56  ;;  %v11354_v42 = vpop.f32.mrf.mxu2  ;;  %v11367_v44 = vpop.f32.mrf.mxu3  ;;  %v9101_v56 = vmul.f32 %v19139_v51, %v9100_v3  ;;  %v8623_v47 = vmax.f32 %v19091_v61, 0.0 }
 0xbe8   :  { %11648 = vmatpush.bf16.msra.mxu1 %v16044_v58  ;;  %v16452_v7 = vpop.eup %16451  ;;  %v9086_v45 = vsel %vm19152_vm3, %v9083_v6, %v9080_v30  ;;  %v16087_v42 = vld [vmem:[#allocation3 + $0x7a0] sm:$0xff]  ;;  %v16076_v30 = vld [vmem:[#allocation3 + $0x748] sm:$0xff] }
 0xbe9   :  { %11658 = vmatpush.bf16.msra.mxu2 %v16055_v50  ;;  %v16454_v24 = vpop.eup %16453  ;;  %v9091_v50 = vadd.f32 1.0, %v9090_v28  ;;  %v9089_v57 = vmul.f32 0.6931472, %v16452_v7  ;;  %v9134_v36 = vadd.f32 %v9086_v45, %v8622_v0  ;;  %v16091_v0 = vld [vmem:[#allocation3 + $0x7c0] sm:$0xff] }
 0xbea   :  { %11671 = vmatpush.bf16.msra.mxu3 %v16063_v59  ;;  %v9093_v59 = vand.u32 2147483647, %v19137_v53  ;;  %v9098_v10 = vmul.f32 0.6931472, %v16454_v24 }
 0xbeb   :  { %v9092_v23 = vmul.f32 %v19137_v53, %v9091_v50  ;;  %v9166_v40 = vsel %vm8654_vm5, %v19074_v43, %v9134_v36 }
 0xbec   :  { %11649 = vmatpush.bf16.msra.mxu1 %v16043_v4  ;;  %vm19164_vm4 = vcmp.lt.f32.partialorder %v9093_v59, 0.0004427343  ;;  %16455 = vtanh.f32 %v9166_v40 }
 0xbed   :  { %11659 = vmatpush.bf16.msra.mxu2 %v16054_v25  ;;  %v9102_v25 = vand.u32 2147483647, %v19139_v51  ;;  %v9095_v14 = vsel %vm19164_vm4, %v9092_v23, %v9089_v57 }
 0xbee   :  { %11672 = vmatpush.bf16.msra.mxu3 %v16062_v8  ;;  %v11393_v18 = vpop.f32.mrf.mxu1 }
 0xbef   :  { %11650 = vmatmul.bf16.vlgmr.msra.gmra.mxu1 %v9258_v38  ;;  %v19156_v22 = vpop.f32.mrf.mxu0  ;;  %vm19173_vm6 = vcmp.lt.f32.partialorder %v9102_v25, 0.0004427343 }
 0xbf0   :  { %11694 = vmatpush.bf16.msrb.mxu1 %v16082_v13  ;;  %v9104_v51 = vsel %vm19173_vm6, %v9101_v56, %v9098_v10 }
 0xbf1   :  { %11660 = vmatpush.bf16.msra.mxu2 %v16053_v49  ;;  %v9136_v44 = vadd.f32 %v9104_v51, %v8624_v29 }
 0xbf2   :  { %11673 = vmatpush.bf16.msra.mxu3 %v16061_v17  ;;  %v11404_v8 = vpop.f32.mrf.mxu2  ;;  %v16096_v17 = vld [vmem:[#allocation3 + $0x7e8] sm:$0xff]  ;;  %v16456_v28 = vpop.eup %16455 }
 0xbf3   :  { %v11405_v48 = vadd.f32 %v11404_v8, %v11392_v11  ;;  %v9168_v20 = vsel %vm8656_vm8, %v19096_v21, %v9136_v44  ;;  %v9230_v39 = vmul.f32 %v16456_v28, %v19074_v43 }
 0xbf4   :  { %11695 = vmatpush.bf16.msrb.mxu1 %v16081_v31  ;;  %v11417_v58 = vpop.f32.mrf.mxu3  ;;  %v16094_v31 = vld [vmem:[#allocation3 + $0x7d8] sm:$0xff] }
 0xbf5   :  { %11661 = vmatpush.bf16.msra.mxu2 %v16052_v33  ;;  %v11418_v4 = vadd.f32 %v11417_v58, %v11405_v48  ;;  %v9135_v33 = vadd.f32 %v9095_v14, %v8623_v47  ;;  %v9262_v50 = vpack.c.bf16 %v9230_v39, %v9230_v39 }
 0xbf6   :  { %11674 = vmatpush.bf16.msra.mxu3 %v16060_v62  ;;  %v16077_v62 = vld [vmem:[#allocation3 + $0x750] sm:$0xff] }
 0xbf7   :  { %v11536_v13 = vpop.f32.mrf.mxu0  ;;  %v11431_v11 = vadd.f32 %v19023_v16, %v11418_v4  ;;  %v9167_v38 = vsel %vm8655_vm7, %v19091_v61, %v9135_v33 }
 0xbf8   :  { %11696 = vmatpush.bf16.msrb.mxu1 %v16080_v52  ;;  %16457 = vtanh.f32 %v9167_v38  ;;  %v16092_v52 = vld [vmem:[#allocation3 + $0x7c8] sm:$0xff] }
 0xbf9   :  { %11662 = vmatpush.bf16.msra.mxu2 %v16051_v12  ;;  %16459 = vtanh.f32 %v9168_v20 }
 0xbfa   :  { %11675 = vmatpush.bf16.msra.mxu3 %v16059_v5  ;;  %v11406_v9 = vpop.f32.mrf.mxu2  ;;  %v11443_v16 = vpop.f32.mrf.mxu1  ;;  %v16085_v5 = vld [vmem:[#allocation3 + $0x790] sm:$0xff] }
 0xbfb   :  { %v11444_v12 = vadd.f32 %v11443_v16, %v11431_v11 }
 0xbfc   :  { %11663 = vmatmul.bf16.vlgmr.msra.gmra.mxu2 %v9259_v35  ;;  %11697 = vmatpush.bf16.msrb.mxu1 %v16079_v60  ;;  %v11419_v32 = vpop.f32.mrf.mxu3 }
 0xbfd   :  { %11707 = vmatpush.bf16.msrb.mxu2 %v16090_v26  ;;  %11676 = vmatmul.bf16.vlgmr.msra.gmra.mxu3 %v9260_v37  ;;  %v16093_v26 = vld [vmem:[#allocation3 + $0x7d0] sm:$0xff] }
 0xbfe   :  { %11720 = vmatpush.bf16.msrb.mxu3 %v16098_v34  ;;  %v16458_v7 = vpop.eup %16457 }
 0xbff   :  { %v16460_v24 = vpop.eup %16459  ;;  %v9231_v43 = vmul.f32 %v16458_v7, %v19091_v61 }
 0xc00   :  { %11698 = vmatpush.bf16.msrb.mxu1 %v16078_v46  ;;  %v9232_v3 = vmul.f32 %v16460_v24, %v19096_v21 }
 0xc01   :  { %11708 = vmatpush.bf16.msrb.mxu2 %v16089_v27  ;;  %v16083_v27 = vld [vmem:[#allocation3 + $0x780] sm:$0xff] }
 0xc02   :  { %11721 = vmatpush.bf16.msrb.mxu3 %v16097_v15  ;;  %v11456_v34 = vpop.f32.mrf.mxu2  ;;  %v11445_v6 = vpop.f32.mrf.mxu1  ;;  %v9263_v15 = vpack.c.bf16 %v9231_v43, %v9231_v43  ;;  %v9264_v25 = vpack.c.bf16 %v9232_v3, %v9232_v3 }
 0xc03   :  { %v11457_v18 = vadd.f32 %v11456_v34, %v11444_v12  ;;  %v11586_v35 = vpop.f32.mrf.mxu0 }
 0xc04   :  { %11699 = vmatpush.bf16.msrb.mxu1 %v16077_v62  ;;  %v11469_v55 = vpop.f32.mrf.mxu3 }
 0xc05   :  { %11709 = vmatpush.bf16.msrb.mxu2 %v16088_v54  ;;  %v11470_v45 = vadd.f32 %v11469_v55, %v11457_v18 }
 0xc06   :  { %11722 = vmatpush.bf16.msrb.mxu3 %v16096_v17 }
 0xc07   :  { %v11483_v59 = vadd.f32 %v19088_v41, %v11470_v45 }
 0xc08   :  { %11700 = vmatpush.bf16.msrb.mxu1 %v16076_v30 }
 0xc09   :  { %11710 = vmatpush.bf16.msrb.mxu2 %v16087_v42 }
 0xc0a   :  { %11723 = vmatpush.bf16.msrb.mxu3 %v16095_v1  ;;  %v11458_v37 = vpop.f32.mrf.mxu2 }
 0xc0b   :  { %v11588_v10 = vpop.f32.mrf.mxu0 }
 0xc0c   :  { %11701 = vmatpush.bf16.msrb.mxu1 %v16075_v19  ;;  %v11471_v57 = vpop.f32.mrf.mxu3  ;;  %v11495_v60 = vpop.f32.mrf.mxu1 }
 0xc0d   :  { %11711 = vmatpush.bf16.msrb.mxu2 %v16086_v2  ;;  %v11496_v36 = vadd.f32 %v11495_v60, %v11483_v59 }
 0xc0e   :  { %11724 = vmatpush.bf16.msrb.mxu3 %v16094_v31 }
 0xc0f   :  { %11702 = vmatmul.bf16.vlgmr.msrb.gmra.mxu1 %v9262_v50 }
 0xc11   :  { %11712 = vmatpush.bf16.msrb.mxu2 %v16085_v5 }
 0xc12   :  { %11725 = vmatpush.bf16.msrb.mxu3 %v16093_v26 }
 0xc14   :  { %v11497_v8 = vpop.f32.mrf.mxu1 }
 0xc15   :  { %11713 = vmatpush.bf16.msrb.mxu2 %v16084_v63 }
 0xc16   :  { %11726 = vmatpush.bf16.msrb.mxu3 %v16092_v52 }
 0xc19   :  { %11714 = vmatpush.bf16.msrb.mxu2 %v16083_v27 }
 0xc1a   :  { %11727 = vmatpush.bf16.msrb.mxu3 %v16091_v0 }
 0xc1c   :  { %11715 = vmatmul.bf16.vlgmr.msrb.gmra.mxu2 %v9263_v15 }
 0xc1d   :  { %11728 = vmatmul.bf16.vlgmr.msrb.gmra.mxu3 %v9264_v25 }
 0xc1f   :  { %v11508_v23 = vpop.f32.mrf.mxu2 }
 0xc20   :  { %v11509_v48 = vadd.f32 %v11508_v23, %v11496_v36  ;;  %v11521_v58 = vpop.f32.mrf.mxu3 }
 0xc22   :  { %v11522_v61 = vadd.f32 %v11521_v58, %v11509_v48 }
 0xc23   :  { %v11638_v21 = vpop.f32.mrf.mxu0 }
 0xc24   :  { %v11535_v41 = vadd.f32 %v19156_v22, %v11522_v61 }
 0xc27   :  { %v11510_v54 = vpop.f32.mrf.mxu2 }
 0xc28   :  { %v11523_v49 = vpop.f32.mrf.mxu3 }
 0xc2b   :  { %v11640_v56 = vpop.f32.mrf.mxu0 }
 0xc2c   :  { %v11547_v17 = vpop.f32.mrf.mxu1 }
 0xc2d   :  { %v11548_v14 = vadd.f32 %v11547_v17, %v11535_v41 }
 0xc34   :  { %v11549_v53 = vpop.f32.mrf.mxu1 }
 0xc3f   :  { %v11560_v4 = vpop.f32.mrf.mxu2 }
 0xc40   :  { %v11561_v46 = vadd.f32 %v11560_v4, %v11548_v14  ;;  %v11573_v40 = vpop.f32.mrf.mxu3 }
 0xc42   :  { %v11574_v47 = vadd.f32 %v11573_v40, %v11561_v46 }
 0xc43   :  { %v11690_v11 = vpop.f32.mrf.mxu0 }
 0xc44   :  { %v11587_v51 = vadd.f32 %v11586_v35, %v11574_v47 }
 0xc47   :  { %v11562_v13 = vpop.f32.mrf.mxu2 }
 0xc48   :  { %v11575_v29 = vpop.f32.mrf.mxu3 }
 0xc4b   :  { %v11692_v33 = vpop.f32.mrf.mxu0 }
 0xc4c   :  { %v11599_v42 = vpop.f32.mrf.mxu1 }
 0xc4d   :  { %v11600_v44 = vadd.f32 %v11599_v42, %v11587_v51 }
 0xc54   :  { %v11601_v1 = vpop.f32.mrf.mxu1 }
 0xc5f   :  { %v11612_v22 = vpop.f32.mrf.mxu2 }
 0xc60   :  { %v11613_v62 = vadd.f32 %v11612_v22, %v11600_v44  ;;  %v11625_v9 = vpop.f32.mrf.mxu3 }
 0xc62   :  { %v11626_v32 = vadd.f32 %v11625_v9, %v11613_v62 }
 0xc64   :  { %v11639_v2 = vadd.f32 %v11638_v21, %v11626_v32 }
 0xc67   :  { %v11614_v38 = vpop.f32.mrf.mxu2 }
 0xc68   :  { %v11627_v16 = vpop.f32.mrf.mxu3 }
 0xc6c   :  { %v11651_v31 = vpop.f32.mrf.mxu1 }
 0xc6d   :  { %v11652_v12 = vadd.f32 %v11651_v31, %v11639_v2 }
 0xc74   :  { %v11653_v20 = vpop.f32.mrf.mxu1 }
 0xc7f   :  { %v11664_v30 = vpop.f32.mrf.mxu2 }
 0xc80   :  { %v11665_v28 = vadd.f32 %v11664_v30, %v11652_v12  ;;  %v11677_v5 = vpop.f32.mrf.mxu3 }
 0xc82   :  { %v11678_v26 = vadd.f32 %v11677_v5, %v11665_v28 }
 0xc84   :  { %v11691_v19 = vadd.f32 %v11690_v11, %v11678_v26 }
 0xc87   :  { %v11666_v39 = vpop.f32.mrf.mxu2 }
 0xc88   :  { %v11679_v34 = vpop.f32.mrf.mxu3 }
 0xc8c   :  { %v11703_v63 = vpop.f32.mrf.mxu1 }
 0xc8d   :  { %v11704_v18 = vadd.f32 %v11703_v63, %v11691_v19 }
 0xc94   :  { %v11705_v6 = vpop.f32.mrf.mxu1 }
 0xc9f   :  { %v11716_v52 = vpop.f32.mrf.mxu2 }
 0xca0   :  { %v11717_v7 = vadd.f32 %v11716_v52, %v11704_v18  ;;  %v11729_v55 = vpop.f32.mrf.mxu3 }
 0xca2   :  { %v11730_v24 = vadd.f32 %v11729_v55, %v11717_v7 }
 0xca4   :  { %11733 = vst [vmem:[#allocation17] sm:$0xff] %v11730_v24 }
 0xca5   :  { %11744 = dma.vmem_to_hbm [thread:$0]  %s11740_s10, 128, %s11742_s13, [#allocation7]  }
 0xca7   :  { %v11718_v45 = vpop.f32.mrf.mxu2 }
 0xca8   :  { %v11731_v50 = vpop.f32.mrf.mxu3 }
 0xca9   :  { %16716 = dma.done.wait [#allocation7], 128  }
 0xcaa   :  { %16717 = vsyncadd [#allocation7], 4294967168 }
 0xcab   :  { %11749 = vsyncpa [#allocation6], 1 }
 0xcac   :  { %11750 = vsyncpa [#allocation9], 1 }
 0xcad   :  { %11751 = vsyncpa [#allocation12], 1 }
 0xcae   :  { %11752 = vsyncpa [#allocation15], 1 }
 0xcaf   :  { %11753 = vsyncpa [#allocation7], 1 }
 0xcb0   :  { %11754 = vsyncmov [#allocation4] }
 0xcb3   :  { %s11755_s14 = vpop.sfrf %11754 }
 0xcb4   :  { %p15301_p0 = scmp.ne.s32.totalorder %s11755_s14, 0 }
 0xcb6   :  { %11759 = shalt.err (%p15301_p0)  }
 0xcb7   :  { %11761 = vsyncmov [#allocation4 + $0x1] }
 0xcba   :  { %s11762_s11 = vpop.sfrf %11761 }
 0xcbb   :  { %p15302_p1 = scmp.ne.s32.totalorder %s11762_s11, 0 }
 0xcbd   :  { %11766 = shalt.err (%p15302_p1)  }

</bundles_post_ra>
